<compile_context>
chip_gen: v6e
topology: v6e:2x2x1
jax: 0.10.0
libtpu: 0.0.40
codegen_flags: <defaults>
</compile_context>

<pallas_src>
import jax
import jax.numpy as jnp
from jax.experimental import pallas as pl
from jax.experimental.pallas import tpu as pltpu

IN_FEATURES = 2048
OUT_FEATURES = 2
OUT_PAD = 128  # lane-dense padded output width (multiple of 128)


def _linear_kernel(x_ref, w_ref, b_ref, o_ref):
    # x_ref: (tile_m, 2048), w_ref: (2048, 128), b_ref: (1, 128),
    # o_ref: (tile_m, 128)
    acc = jnp.dot(
        x_ref[...],
        w_ref[...],
        preferred_element_type=jnp.float32,
        precision=jax.lax.Precision.HIGHEST,
    )
    o_ref[...] = (acc + b_ref[...]).astype(o_ref.dtype)


def prepare_ins_d_res_params(weight, bias, dtype=jnp.float32):
    """One-time parameter prep (hoisted out of the per-call path).

    weight: (2, 2048) PyTorch nn.Linear layout
    bias:   (2,)
    returns (w_t, b_pad): (2048, 128) and (1, 128), lane-padded so the kernel
    output is lane-dense (full unmasked stores).
    """
    w_t = jnp.zeros((IN_FEATURES, OUT_PAD), dtype=dtype)
    w_t = w_t.at[:, :OUT_FEATURES].set(weight.T.astype(dtype))
    b = jnp.zeros((1, OUT_PAD), dtype=jnp.float32)
    b = b.at[:, :OUT_FEATURES].set(bias.astype(jnp.float32))
    return w_t, b


def _round_up(v, m):
    return ((v + m - 1) // m) * m


def ins_d_res_forward(x, w_t, b, *, tm=1024):
    """Forward of Ins_D_res with pre-prepared (padded) parameters.

    x:   (N, 2048)  f32 (bf16 also accepted — halves the dominant HBM read)
    w_t: (2048, 128) padded weight from prepare_ins_d_res_params
    b:   (1, 128)    padded bias   from prepare_ins_d_res_params
    returns (N, 2)
    """
    n, k = x.shape
    assert k == IN_FEATURES

    # Minimum sublane multiple for the block's second-to-last dim by dtype.
    sub = {4: 8, 2: 16, 1: 32}[jnp.dtype(x.dtype).itemsize]

    if n <= 256:
        tile_m = max(sub, _round_up(n, sub))          # single small block
    elif n <= tm:
        # Split so the grid has >= 2 parallel steps (both v7x TensorCores).
        tile_m = _round_up(pl.cdiv(n, 2), sub)
    else:
        tile_m = tm                                   # large batch: stream tm-row tiles
    grid = (pl.cdiv(n, tile_m),)                      # ragged last block is masked by Pallas

    itemsize = jnp.dtype(x.dtype).itemsize
    cost = pl.CostEstimate(
        flops=2 * n * IN_FEATURES * OUT_PAD,          # MXU work actually issued
        transcendentals=0,
        bytes_accessed=(n * IN_FEATURES * itemsize            # x read (un-padded)
                        + IN_FEATURES * OUT_PAD * jnp.dtype(w_t.dtype).itemsize
                        + n * OUT_PAD * itemsize),             # out write
    )

    out = pl.pallas_call(
        _linear_kernel,
        out_shape=jax.ShapeDtypeStruct((n, OUT_PAD), x.dtype),
        grid_spec=pltpu.PrefetchScalarGridSpec(
            num_scalar_prefetch=0,
            grid=grid,
            in_specs=[
                pl.BlockSpec((tile_m, IN_FEATURES), lambda i: (i, 0)),
                pl.BlockSpec((IN_FEATURES, OUT_PAD), lambda i: (0, 0)),
                pl.BlockSpec((1, OUT_PAD), lambda i: (0, 0)),
            ],
            out_specs=pl.BlockSpec((tile_m, OUT_PAD), lambda i: (i, 0)),
        ),
        compiler_params=pltpu.CompilerParams(
            dimension_semantics=("parallel",),
            vmem_limit_bytes=40 * 1024 * 1024,
        ),
        cost_estimate=cost,
    )(x, w_t, b)

    # Only the lane padding needs slicing now (no row padding was added).
    return out[:, :OUT_FEATURES]


if __name__ == "__main__":
    key = jax.random.PRNGKey(0)
    kx, kw, kb = jax.random.split(key, 3)

    # Deterministic parameter init (mimics nn.Linear's uniform fan-in init).
    bound = 1.0 / (IN_FEATURES ** 0.5)
    weight = jax.random.uniform(
        kw, (OUT_FEATURES, IN_FEATURES), dtype=jnp.float32,
        minval=-bound, maxval=bound)
    bias = jax.random.uniform(
        kb, (OUT_FEATURES,), dtype=jnp.float32, minval=-bound, maxval=bound)

    # Parameter prep is hoisted: done once, reused for every forward call.
    w_t, b_pad = prepare_ins_d_res_params(weight, bias)
    w_t, b_pad = jax.block_until_ready((w_t, b_pad))

    # Exercise all tiling paths:
    #   n=37   -> tiny single masked block (ragged, no jnp.pad)
    #   n=700  -> moderate batch split into a 2-step parallel grid
    #   n=1300 -> > tm: multi-step grid with masked ragged tail block
    for n in (37, 700, 1300):
        x = jax.random.normal(
            jax.random.fold_in(kx, n), (n, IN_FEATURES), dtype=jnp.float32)

        out = ins_d_res_forward(x, w_t, b_pad)
        out = jax.block_until_ready(out)

        ref = jnp.dot(x, weight.T,
                      precision=jax.lax.Precision.HIGHEST) + bias
        assert out.shape == (n, OUT_FEATURES)
        assert jnp.allclose(out, ref, atol=1e-4, rtol=1e-4), f"mismatch n={n}"

    print("KERNEL_OK")
</pallas_src>

<mosaic_0001>
module attributes {stable_mosaic.version = 11 : i64} {
  func.func @_linear_kernel(%arg0: i32, %arg1: memref<40x2048xf32, #tpu.memory_space<vmem>>, %arg2: memref<2048x128xf32, #tpu.memory_space<vmem>>, %arg3: memref<1x128xf32, #tpu.memory_space<vmem>>, %arg4: memref<40x128xf32, #tpu.memory_space<vmem>>) attributes {dimension_semantics = [#tpu.dimension_semantics<parallel>], iteration_bounds = array<i64: 1>, scalar_prefetch = 0 : i64, scratch_operands = 0 : i64, tpu.core_type = #tpu.core_type<tc>, window_params = [{transform_indices = @transform_0, window_bounds = array<i64: 40, 2048>}, {pipeline_mode = #tpu.pipeline_mode<synchronous>, transform_indices = @transform_1, window_bounds = array<i64: 2048, 128>}, {pipeline_mode = #tpu.pipeline_mode<synchronous>, transform_indices = @transform_2, window_bounds = array<i64: 1, 128>}, {transform_indices = @transform_3, window_bounds = array<i64: 40, 128>}]} {
    %c0 = arith.constant 0 : index
    %c0_0 = arith.constant 0 : index
    %0 = vector.load %arg1[%c0, %c0_0] : memref<40x2048xf32, #tpu.memory_space<vmem>>, vector<40x2048xf32>
    %c0_1 = arith.constant 0 : index
    %c0_2 = arith.constant 0 : index
    %1 = vector.load %arg2[%c0_1, %c0_2] : memref<2048x128xf32, #tpu.memory_space<vmem>>, vector<2048x128xf32>
    %cst = arith.constant dense<0.000000e+00> : vector<40x128xf32>
    %2 = tpu.matmul %0, %1, %cst {dimension_numbers = #tpu.dot_dimension_numbers<[1], [0], [0], [1], [0, 0, 1, 1], [], []>, precision = #tpu.contract_precision<fp32>} : vector<40x2048xf32>, vector<2048x128xf32>, vector<40x128xf32> -> vector<40x128xf32>
    %c0_3 = arith.constant 0 : index
    %c0_4 = arith.constant 0 : index
    %3 = vector.load %arg3[%c0_3, %c0_4] : memref<1x128xf32, #tpu.memory_space<vmem>>, vector<1x128xf32>
    %4 = vector.broadcast %3 : vector<1x128xf32> to vector<40x128xf32>
    %5 = arith.addf %2, %4 : vector<40x128xf32>
    %c0_5 = arith.constant 0 : index
    %c0_6 = arith.constant 0 : index
    %6 = vector.load %arg4[%c0_5, %c0_6] : memref<40x128xf32, #tpu.memory_space<vmem>>, vector<40x128xf32>
    tpu.vector_store %arg4[%c0_5, %c0_6], %5 {strides = array<i32>} : memref<40x128xf32, #tpu.memory_space<vmem>>, vector<40x128xf32>,
    return
  }
  func.func @transform_0(%arg0: i32) -> (i32, i32) {
    %c0_i32 = arith.constant 0 : i32
    %c0_i32_0 = arith.constant 0 : i32
    return %arg0, %c0_i32 : i32, i32
  }
  func.func @transform_1(%arg0: i32) -> (i32, i32) {
    %c0_i32 = arith.constant 0 : i32
    %c0_i32_0 = arith.constant 0 : i32
    %c0_i32_1 = arith.constant 0 : i32
    return %c0_i32, %c0_i32_0 : i32, i32
  }
  func.func @transform_2(%arg0: i32) -> (i32, i32) {
    %c0_i32 = arith.constant 0 : i32
    %c0_i32_0 = arith.constant 0 : i32
    %c0_i32_1 = arith.constant 0 : i32
    return %c0_i32, %c0_i32_0 : i32, i32
  }
  func.func @transform_3(%arg0: i32) -> (i32, i32) {
    %c0_i32 = arith.constant 0 : i32
    %c0_i32_0 = arith.constant 0 : i32
    return %arg0, %c0_i32 : i32, i32
  }
}

</mosaic_0001>

<bundles_post_ra>
// kernel: tpu_custom_call.1
= control target key start
LH: loop header
LB: loop body
LE: loop exit
PB: predicated region body
PF: predicated region fallthrough
CT: control target
= control target key end

     0   :  { %8 = vsyncpa [#allocation3], 0  ;;  %s18003_s0 = inlined_call_operand.hbm [shape: f32[37,2048], index: 0, kind: input, shape index: {}]   ;;  %s18004_s1 = inlined_call_operand.hbm [shape: f32[2048,128], index: 1, kind: input, shape index: {}]   ;;  %s18005_s2 = inlined_call_operand.vmem [shape: f32[1,128], index: 2, kind: input, shape index: {}]   ;;  %s18006_s3 = inlined_call_operand.hbm [shape: f32[37,128], index: 3, kind: output, shape index: {}]  }
   0x1   :  { %9 = vsyncpa [#allocation6], 0 }
   0x2   :  { %10 = vsyncpa [#allocation4], 0  ;;  %s11426_s12 = smov [#allocation2]  }
   0x3   :  { %s16_s13 = sshll.u32 %s11426_s12, 4  ;;  %s17_s13 = int_to_ptr.vmem [resolvable:$true] %s16_s13 }
   0x4   :  { %s11368_s14 = scalar_lea.vmem %s17_s13, 10240  ;;  %p11373_p1 = scmp.lt.s32.totalorder %s17_s13, %s17_s13 }
   0x5   :  { %p11369_p0 = scmp.ne.s32.totalorder %s17_s13, %s11368_s14  ;;  %p11374_p2 = scmp.lt.s32.totalorder %s11368_s14, %s11368_s14 }
   0x7   :  { %p11375_p3 = por %p11374_p2, %p11373_p1 }
   0x9   :  { %p11376_p4 = pnand %p11375_p3, %p11369_p0 }
   0xb   :  { %11379 = shalt.err (!%p11376_p4)
}
   0xc   :  { %s11427_s15 = smov 2048   ;;  %s11428_s16 = smov 128  }
   0xd   :  { %22 = dma.hbm_to_vmem [thread:$0]  %s18003_s0, 10240, %s17_s13, [#allocation3], %s11427_s15, %s11427_s15, %s11428_s16  }
   0xe   :  { %s11429_s19 = smov [#allocation5]  }
   0xf   :  { %s28_s20 = sshll.u32 %s11429_s19, 4  ;;  %s29_s20 = int_to_ptr.vmem [resolvable:$true] %s28_s20 }
  0x10   :  { %s11388_s21 = scalar_lea.vmem %s29_s20, 32768  ;;  %p11393_p6 = scmp.lt.s32.totalorder %s29_s20, %s29_s20 }
  0x11   :  { %p11389_p5 = scmp.ne.s32.totalorder %s29_s20, %s11388_s21  ;;  %p11394_p7 = scmp.lt.s32.totalorder %s11388_s21, %s11388_s21 }
  0x13   :  { %p11395_p8 = por %p11394_p7, %p11393_p6 }
  0x15   :  { %p11396_p9 = pnand %p11395_p8, %p11389_p5 }
  0x17   :  { %11399 = shalt.err (!%p11396_p9)
}
  0x18   :  { %s11430_s22 = smov 8  }
  0x19   :  { %34 = dma.hbm_to_vmem [thread:$0]  %s18004_s1, 32768, %s29_s20, [#allocation6], %s11428_s16, %s11428_s16, %s11430_s22  }
  0x1a   :  { %11420 = dma.done.wait [#allocation3], 10240  }
  0x1b   :  { %11421 = vsyncadd [#allocation3], 4294957056 }
  0x1c   :  { %11422 = dma.done.wait [#allocation6], 32768  }
  0x1d   :  { %11423 = vsyncadd [#allocation6], 4294934528  ;;  %v154_v0 = vld [vmem:[#allocation5 + $0xf8] sm:$0xff]  ;;  %v153_v2 = vld [vmem:[#allocation5 + $0xf0] sm:$0xff] }
  0x1e   :  { %v138_v1 = vld [vmem:[#allocation5 + $0x78] sm:$0xff]  ;;  %v11462_v3 = vand.u32 4294901760, %v154_v0  ;;  %v11466_v5 = vand.u32 4294901760, %v153_v2  ;;  %v137_v6 = vld [vmem:[#allocation5 + $0x70] sm:$0xff]  ;;  %v152_v7 = vld [vmem:[#allocation5 + $0xe8] sm:$0xff] }
  0x1f   :  { %v11464_v4 = vand.u32 4294901760, %v138_v1  ;;  %v136_v8 = vld [vmem:[#allocation5 + $0x68] sm:$0xff]  ;;  %v11468_v9 = vand.u32 4294901760, %v137_v6  ;;  %v11470_v10 = vand.u32 4294901760, %v152_v7  ;;  %v151_v12 = vld [vmem:[#allocation5 + $0xe0] sm:$0xff]  ;;  %v150_v14 = vld [vmem:[#allocation5 + $0xd8] sm:$0xff] }
  0x20   :  { %v11472_v11 = vand.u32 4294901760, %v136_v8  ;;  %v135_v13 = vld [vmem:[#allocation5 + $0x60] sm:$0xff]  ;;  %9098 = vmatprep.subr.mxu0 %v11462_v3  ;;  %v11475_v15 = vand.u32 4294901760, %v151_v12  ;;  %v11479_v17 = vand.u32 4294901760, %v150_v14  ;;  %v11482_v18 = vsub.f32 %v154_v0, %v11462_v3  ;;  %v11484_v19 = vld [vmem:[#allocation5 + $0x58] sm:$0xff]  ;;  %v11486_v20 = vld [vmem:[#allocation5 + $0xd0] sm:$0xff] }
  0x21   :  { %19033 = vst [vmem:[#allocation11_spill] sm:$0xff] %v11464_v4  ;;  %19034 = vst [vmem:[#allocation12_spill] sm:$0xff] %v11468_v9  ;;  %v11477_v16 = vand.u32 4294901760, %v135_v13  ;;  %v11488_v21 = vld [vmem:[#allocation5 + $0x50] sm:$0xff]  ;;  %9099 = vmatpush3.msra.mxu0 %v11464_v4  ;;  %v11492_v22 = vand.u32 4294901760, %v11484_v19  ;;  %v11495_v23 = vsub.f32 %v138_v1, %v11464_v4  ;;  %v11498_v24 = vand.u32 4294901760, %v11486_v20 }
  0x22   :  { %19036 = vst [vmem:[#allocation14_spill] sm:$0xff] %v11482_v18  ;;  %v11501_v25 = vsub.f32 %v153_v2, %v11466_v5  ;;  %v11503_v26 = vld [vmem:[#allocation5 + $0xc8] sm:$0xff]  ;;  %v11507_v28 = vld [vmem:[#allocation5 + $0xc0] sm:$0xff]  ;;  %9100 = vmatprep.subr.mxu0 %v11466_v5  ;;  %v18020_v29 = vand.u32 4294901760, %v11482_v18  ;;  %v11512_v30 = vand.u32 4294901760, %v11488_v21  ;;  %v11515_v31 = vsub.f32 %v137_v6, %v11468_v9  ;;  %v11553_v46 = vld [vmem:[#allocation5 + $0xb8] sm:$0xff] }
  0x23   :  { %19035 = vst [vmem:[#allocation13_spill] sm:$0xff] %v11477_v16  ;;  %19037 = vst [vmem:[#allocation15_spill] sm:$0xff] %v11492_v22  ;;  %v11505_v27 = vld [vmem:[#allocation5 + $0x48] sm:$0xff]  ;;  %v11518_v32 = vand.u32 4294901760, %v11503_v26  ;;  %9101 = vmatpush3.msra.mxu0 %v11468_v9  ;;  %v18018_v33 = vand.u32 4294901760, %v11495_v23  ;;  %v11524_v35 = vsub.f32 %v152_v7, %v11470_v10  ;;  %v11529_v37 = vld [vmem:[#allocation5 + $0x40] sm:$0xff]  ;;  %v11537_v40 = vsub.f32 %v136_v8, %v11472_v11 }
  0x24   :  { %19038 = vst [vmem:[#allocation16_spill] sm:$0xff] %v11498_v24  ;;  %19039 = vst [vmem:[#allocation17_spill] sm:$0xff] %v11512_v30  ;;  %v18017_v34 = vand.u32 4294901760, %v11501_v25  ;;  %v11527_v36 = vand.u32 4294901760, %v11505_v27  ;;  %9102 = vmatprep.subr.mxu0 %v11470_v10  ;;  %v674_v38 = vsub.f32 %v11482_v18, %v18020_v29  ;;  %v18015_v39 = vand.u32 4294901760, %v11515_v31  ;;  %v11563_v51 = vld [vmem:[#allocation5 + $0x38] sm:$0xff] }
  0x25   :  { %19040 = vst [vmem:[#allocation18_spill] sm:$0xff] %v11518_v32  ;;  %v11540_v41 = vand.u32 4294901760, %v11507_v28  ;;  %9103 = vmatpush3.msra.mxu0 %v11472_v11  ;;  %v562_v42 = vsub.f32 %v11495_v23, %v18018_v33  ;;  %v18013_v44 = vand.u32 4294901760, %v11524_v35  ;;  %v11551_v45 = vsub.f32 %v151_v12, %v11475_v15  ;;  %v11570_v56 = vld [vmem:[#allocation5 + $0xb0] sm:$0xff]  ;;  %v11594_v2 = vld [vmem:[#allocation5 + $0xa8] sm:$0xff] }
  0x26   :  { %19041 = vst [vmem:[#allocation19_spill] sm:$0xff] %v11527_v36  ;;  %v681_v43 = vsub.f32 %v11501_v25, %v18017_v34  ;;  %9104 = vmatprep.subr.mxu0 %v11475_v15  ;;  %v675_v47 = vand.u32 4294901760, %v674_v38  ;;  %v569_v48 = vsub.f32 %v11515_v31, %v18015_v39  ;;  %v18012_v49 = vand.u32 4294901760, %v11537_v40  ;;  %v11582_v61 = vld [vmem:[#allocation5 + $0x30] sm:$0xff] }
  0x27   :  { %19042 = vst [vmem:[#allocation20_spill] sm:$0xff] %v11540_v41  ;;  %v11561_v50 = vand.u32 4294901760, %v11529_v37  ;;  %9105 = vmatpush3.msra.mxu0 %v11477_v16  ;;  %v563_v52 = vand.u32 4294901760, %v562_v42  ;;  %v688_v54 = vsub.f32 %v11524_v35, %v18013_v44  ;;  %v18010_v55 = vand.u32 4294901760, %v11551_v45  ;;  %v11685_v39 = vld [vmem:[#allocation5 + $0x90] sm:$0xff] }
  0x28   :  { %v682_v53 = vand.u32 4294901760, %v681_v43  ;;  %9106 = vmatprep.subr.mxu0 %v11479_v17  ;;  %9145 = vmatprep.subr.mxu1 %v675_v47  ;;  %v570_v57 = vand.u32 4294901760, %v569_v48  ;;  %v576_v58 = vsub.f32 %v11537_v40, %v18012_v49  ;;  %v11577_v59 = vsub.f32 %v135_v13, %v11477_v16  ;;  %v11605_v13 = vld [vmem:[#allocation5 + $0x28] sm:$0xff]  ;;  %v11672_v49 = vld [vmem:[#allocation5 + $0x18] sm:$0xff]  ;;  %v11695_v34 = vld [vmem:[#allocation5 + $0x10] sm:$0xff] }
  0x29   :  { %19043 = vst [vmem:[#allocation21_spill] sm:$0xff] %v11561_v50  ;;  %v11580_v60 = vand.u32 4294901760, %v11553_v46  ;;  %9107 = vmatpush3.msra.mxu0 %v11492_v22  ;;  %9146 = vmatpush3.msra.mxu1 %v563_v52  ;;  %v689_v62 = vand.u32 4294901760, %v688_v54  ;;  %v695_v63 = vsub.f32 %v11551_v45, %v18010_v55  ;;  %v11589_v0 = vsub.f32 %v150_v14, %v11479_v17 }
  0x2a   :  { %v11592_v1 = vand.u32 4294901760, %v11563_v51  ;;  %9108 = vmatprep.subr.mxu0 %v11498_v24  ;;  %9147 = vmatprep.subr.mxu1 %v682_v53  ;;  %v577_v6 = vand.u32 4294901760, %v576_v58  ;;  %v18008_v7 = vand.u32 4294901760, %v11577_v59  ;;  %v11600_v8 = vsub.f32 %v11484_v19, %v11492_v22 }
  0x2b   :  { %19044 = vst [vmem:[#allocation22_spill] sm:$0xff] %v11580_v60  ;;  %v11603_v12 = vand.u32 4294901760, %v11570_v56  ;;  %9109 = vmatpush3.msra.mxu0 %v11512_v30  ;;  %9148 = vmatpush3.msra.mxu1 %v570_v57  ;;  %v696_v14 = vand.u32 4294901760, %v695_v63  ;;  %v18007_v38 = vand.u32 4294901760, %v11589_v0  ;;  %v11611_v42 = vsub.f32 %v11486_v20, %v11498_v24  ;;  %v11628_v20 = vld [vmem:[#allocation5 + $0xa0] sm:$0xff] }
  0x2c   :  { %19045 = vst [vmem:[#allocation23_spill] sm:$0xff] %v11592_v1  ;;  %v11614_v43 = vand.u32 4294901760, %v11582_v61  ;;  %9110 = vmatprep.subr.mxu0 %v11518_v32  ;;  %9149 = vmatprep.subr.mxu1 %v689_v62  ;;  %v583_v19 = vsub.f32 %v11577_v59, %v18008_v7  ;;  %v18009_v47 = vand.u32 4294901760, %v11600_v8  ;;  %v11623_v48 = vsub.f32 %v11488_v21, %v11512_v30 }
  0x2d   :  { %19046 = vst [vmem:[#allocation24_spill] sm:$0xff] %v11603_v12  ;;  %19047 = vst [vmem:[#allocation25_spill] sm:$0xff] %v11611_v42  ;;  %v11626_v52 = vand.u32 4294901760, %v11594_v2  ;;  %9111 = vmatpush3.msra.mxu0 %v11527_v36  ;;  %9150 = vmatpush3.msra.mxu1 %v577_v6  ;;  %v702_v53 = vsub.f32 %v11589_v0, %v18007_v38  ;;  %v18011_v54 = vand.u32 4294901760, %v11611_v42  ;;  %v11640_v21 = vand.u32 4294901760, %v11605_v13  ;;  %v11651_v38 = vld [vmem:[#allocation5 + $0x20] sm:$0xff] }
  0x2e   :  { %19048 = vst [vmem:[#allocation26_spill] sm:$0xff] %v11614_v43  ;;  %v11637_v57 = vsub.f32 %v11503_v26, %v11518_v32  ;;  %9112 = vmatprep.subr.mxu0 %v11540_v41  ;;  %9151 = vmatprep.subr.mxu1 %v696_v14  ;;  %v584_v58 = vand.u32 4294901760, %v583_v19  ;;  %v590_v62 = vsub.f32 %v11600_v8, %v18009_v47  ;;  %v18014_v63 = vand.u32 4294901760, %v11623_v48  ;;  %v11661_v47 = vld [vmem:[#allocation5 + $0x98] sm:$0xff] }
  0x2f   :  { %19049 = vst [vmem:[#allocation27_spill] sm:$0xff] %v11626_v52  ;;  %19051 = vst [vmem:[#allocation29_spill] sm:$0xff] %v11640_v21  ;;  %v11649_v6 = vsub.f32 %v11505_v27, %v11527_v36  ;;  %9113 = vmatpush3.msra.mxu0 %v11561_v50  ;;  %v703_v26 = vand.u32 4294901760, %v702_v53  ;;  %v709_v14 = vsub.f32 %v11611_v42, %v18011_v54  ;;  %v11659_v7 = vand.u32 4294901760, %v11628_v20  ;;  %v44_v36 = vld [vmem:[#allocation2 + $0x8] sm:$0xff] }
  0x30   :  { %19050 = vst [vmem:[#allocation28_spill] sm:$0xff] %v11637_v57  ;;  %v18016_v19 = vand.u32 4294901760, %v11637_v57  ;;  %9152 = vmatpush3.msra.mxu1 %v584_v58  ;;  %9114 = vmatprep.subr.mxu0 %v11580_v60  ;;  %v591_v27 = vand.u32 4294901760, %v590_v62  ;;  %v597_v55 = vsub.f32 %v11623_v48, %v18014_v63  ;;  %v11670_v54 = vsub.f32 %v11507_v28, %v11540_v41 }
  0x31   :  { %19052 = vst [vmem:[#allocation30_spill] sm:$0xff] %v11659_v7  ;;  %v18019_v53 = vand.u32 4294901760, %v11649_v6  ;;  %9153 = vmatprep.subr.mxu1 %v703_v26  ;;  %9115 = vmatpush3.msra.mxu0 %v11592_v1  ;;  %v710_v44 = vand.u32 4294901760, %v709_v14  ;;  %v11679_v62 = vand.u32 4294901760, %v11651_v38  ;;  %v11683_v63 = vsub.f32 %v11529_v37, %v11561_v50 }
  0x32   :  { %19053 = vst [vmem:[#allocation31_spill] sm:$0xff] %v11670_v54  ;;  %v716_v58 = vsub.f32 %v11637_v57, %v18016_v19  ;;  %9154 = vmatpush3.msra.mxu1 %v591_v27  ;;  %9116 = vmatprep.subr.mxu0 %v11603_v12  ;;  %v598_v28 = vand.u32 4294901760, %v597_v55  ;;  %v18023_v14 = vand.u32 4294901760, %v11670_v54  ;;  %v11693_v19 = vand.u32 4294901760, %v11661_v47 }
  0x33   :  { %v604_v26 = vsub.f32 %v11649_v6, %v18019_v53  ;;  %9155 = vmatprep.subr.mxu1 %v710_v44  ;;  %9117 = vmatpush3.msra.mxu0 %v11614_v43  ;;  %v18026_v27 = vand.u32 4294901760, %v11683_v63  ;;  %v11701_v55 = vsub.f32 %v11553_v46, %v11580_v60  ;;  %v11704_v33 = vand.u32 4294901760, %v11672_v49  ;;  %v11706_v53 = vld [vmem:[#allocation5 + $0x88] sm:$0xff] }
  0x34   :  { %19054 = vst [vmem:[#allocation32_spill] sm:$0xff] %v11693_v19  ;;  %v717_v37 = vand.u32 4294901760, %v716_v58  ;;  %9156 = vmatpush3.msra.mxu1 %v598_v28  ;;  %9118 = vmatprep.subr.mxu0 %v11626_v52  ;;  %v723_v44 = vsub.f32 %v11670_v54, %v18023_v14  ;;  %v11714_v58 = vsub.f32 %v11563_v51, %v11592_v1  ;;  %v11717_v46 = vand.u32 4294901760, %v11685_v39  ;;  %v11731_v51 = vld [vmem:[#allocation5 + $0x8] sm:$0xff] }
  0x35   :  { %19055 = vst [vmem:[#allocation33_spill] sm:$0xff] %v11704_v33  ;;  %v605_v29 = vand.u32 4294901760, %v604_v26  ;;  %9119 = vmatpush3.msra.mxu0 %v11640_v21  ;;  %v611_v28 = vsub.f32 %v11683_v63, %v18026_v27  ;;  %v11726_v60 = vsub.f32 %v11570_v56, %v11603_v12  ;;  %v11729_v14 = vand.u32 4294901760, %v11695_v34  ;;  %v11742_v56 = vld [vmem:[#allocation5 + $0x80] sm:$0xff] }
  0x36   :  { %19056 = vst [vmem:[#allocation34_spill] sm:$0xff] %v11717_v46  ;;  %9157 = vmatprep.subr.mxu1 %v717_v37  ;;  %9120 = vmatprep.subr.mxu0 %v11659_v7  ;;  %v724_v37 = vand.u32 4294901760, %v723_v44  ;;  %v11737_v27 = vsub.f32 %v11582_v61, %v11614_v43  ;;  %v11740_v26 = vand.u32 4294901760, %v11706_v53  ;;  %v19061_v50 = vand.u32 4294901760, %v11701_v55  ;;  %v11765_v44 = vld [vmem:[#allocation5] sm:$0xff] }
  0x37   :  { %19057 = vst [vmem:[#allocation35_spill] sm:$0xff] %v11726_v60  ;;  %19058 = vst [vmem:[#allocation36_spill] sm:$0xff] %v11729_v14  ;;  %9158 = vmatpush3.msra.mxu1 %v605_v29  ;;  %9121 = vmatpush3.msra.mxu0 %v11679_v62  ;;  %v612_v12 = vand.u32 4294901760, %v611_v28  ;;  %v11751_v1 = vsub.f32 %v11594_v2, %v11626_v52  ;;  %v19063_v61 = vand.u32 4294901760, %v11714_v58  ;;  %v11759_v28 = vand.u32 4294901760, %v11731_v51 }
  0x38   :  { %19059 = vst [vmem:[#allocation37_spill] sm:$0xff] %v11737_v27  ;;  %19060 = vst [vmem:[#allocation38_spill] sm:$0xff] %v11740_v26  ;;  %v730_v29 = vsub.f32 %v11701_v55, %v19061_v50  ;;  %9159 = vmatprep.subr.mxu1 %v724_v37  ;;  %9122 = vmatprep.subr.mxu0 %v11693_v19  ;;  %v11763_v50 = vsub.f32 %v11605_v13, %v11640_v21  ;;  %v19064_v37 = vand.u32 4294901760, %v11726_v60 }
  0x39   :  { %19062 = vst [vmem:[#allocation39_spill] sm:$0xff] %v11751_v1  ;;  %v618_v43 = vsub.f32 %v11714_v58, %v19063_v61  ;;  %9160 = vmatpush3.msra.mxu1 %v612_v12  ;;  %9123 = vmatpush3.msra.mxu0 %v11704_v33  ;;  %v11773_v41 = vand.u32 4294901760, %v11742_v56  ;;  %v19066_v13 = vand.u32 4294901760, %v11737_v27  ;;  %v11782_v21 = vsub.f32 %v11628_v20, %v11659_v7 }
  0x3a   :  { %v731_v2 = vand.u32 4294901760, %v730_v29  ;;  %v737_v52 = vsub.f32 %v11726_v60, %v19064_v37  ;;  %9124 = vmatprep.subr.mxu0 %v11717_v46  ;;  %v43_v37 = vld [vmem:[#allocation2] sm:$0xff]  ;;  %v19067_v30 = vand.u32 4294901760, %v11751_v1  ;;  %v11789_v24 = vand.u32 4294901760, %v11765_v44 }
  0x3b   :  { %19065 = vst [vmem:[#allocation40_spill] sm:$0xff] %v11773_v41  ;;  %v619_v32 = vand.u32 4294901760, %v618_v43  ;;  %v625_v12 = vsub.f32 %v11737_v27, %v19066_v13  ;;  %9125 = vmatpush3.msra.mxu0 %v11729_v14  ;;  %v11793_v13 = vsub.f32 %v11651_v38, %v11679_v62  ;;  %v19069_v20 = vand.u32 4294901760, %v11763_v50 }
  0x3c   :  { %9161 = vmatprep.subr.mxu1 %v731_v2  ;;  %v738_v61 = vand.u32 4294901760, %v737_v52  ;;  %v744_v43 = vsub.f32 %v11751_v1, %v19067_v30  ;;  %19068 = vst [vmem:[#allocation41_spill] sm:$0xff] %v11789_v24  ;;  %9126 = vmatprep.subr.mxu0 %v11740_v26  ;;  %v18051_v2 = vand.u32 4294901760, %v11782_v21  ;;  %v11800_v7 = vand.u32 4294901760, %v44_v36 }
  0x3d   :  { %9162 = vmatpush3.msra.mxu1 %v619_v32  ;;  %v626_v29 = vand.u32 4294901760, %v625_v12  ;;  %v632_v52 = vsub.f32 %v11763_v50, %v19069_v20  ;;  %9127 = vmatpush3.msra.mxu0 %v11759_v28  ;;  %v18052_v1 = vand.u32 4294901760, %v11793_v13  ;;  %v11806_v32 = vsub.f32 %v11661_v47, %v11693_v19 }
  0x3e   :  { %19070 = vst [vmem:[#allocation42_spill] sm:$0xff] %v11800_v7  ;;  %9163 = vmatprep.subr.mxu1 %v738_v61  ;;  %v745_v30 = vand.u32 4294901760, %v744_v43  ;;  %v11808_v38 = vand.u32 4294901760, %v43_v37  ;;  %9128 = vmatprep.subr.mxu0 %v11773_v41  ;;  %v751_v20 = vsub.f32 %v11782_v21, %v18051_v2  ;;  %v11815_v61 = vsub.f32 %v44_v36, %v11800_v7 }
  0x3f   :  { %9164 = vmatpush3.msra.mxu1 %v626_v29  ;;  %v633_v12 = vand.u32 4294901760, %v632_v52  ;;  %v11819_v43 = vsub.f32 %v11672_v49, %v11704_v33  ;;  %9129 = vmatpush3.msra.mxu0 %v11789_v24  ;;  %v639_v47 = vsub.f32 %v11793_v13, %v18052_v1  ;;  %v11831_v36 = vsub.f32 %v11685_v39, %v11717_v46 }
  0x40   :  { %19071 = vst [vmem:[#allocation43_spill] sm:$0xff] %v11808_v38  ;;  %9165 = vmatprep.subr.mxu1 %v745_v30  ;;  %v11827_v52 = vsub.f32 %v43_v37, %v11808_v38  ;;  %v752_v2 = vand.u32 4294901760, %v751_v20  ;;  %v18057_v49 = vand.u32 4294901760, %v11815_v61  ;;  %9192 = vmatprep.subr.mxu0 %v11482_v18  ;;  %v11838_v1 = vsub.f32 %v11695_v34, %v11729_v14  ;;  %v76_v18 = vld [vmem:[#allocation2 + $0x108] sm:$0xff] }
  0x41   :  { %9166 = vmatpush3.msra.mxu1 %v633_v12  ;;  %v18060_v30 = vand.u32 4294901760, %v11819_v43  ;;  %v640_v29 = vand.u32 4294901760, %v639_v47  ;;  %v19072_v37 = vand.u32 4294901760, %v11806_v32  ;;  %783 = vmatprep.mubr.f32.mxu1 %v11800_v7  ;;  %v19074_v7 = vand.u32 4294901760, %v11831_v36 }
  0x42   :  { %9167 = vmatprep.subr.mxu1 %v752_v2  ;;  %v485_v20 = vsub.f32 %v11815_v61, %v18057_v49  ;;  %v19073_v12 = vand.u32 4294901760, %v11827_v52  ;;  %v11865_v14 = vsub.f32 %v11731_v51, %v11759_v28  ;;  %v11874_v51 = vsub.f32 %v11742_v56, %v11773_v41 }
  0x43   :  { %v758_v33 = vsub.f32 %v11806_v32, %v19072_v37  ;;  %v646_v34 = vsub.f32 %v11819_v43, %v18060_v30  ;;  %v11855_v37 = vsub.f32 %v11706_v53, %v11740_v26  ;;  %9168 = vmatpush3.msra.mxu1 %v640_v29  ;;  %v765_v49 = vsub.f32 %v11831_v36, %v19074_v7  ;;  %v60_v30 = vld [vmem:[#allocation2 + $0x88] sm:$0xff]  ;;  %v59_v26 = vld [vmem:[#allocation2 + $0x80] sm:$0xff] }
  0x44   :  { %v491_v2 = vsub.f32 %v11827_v52, %v19073_v12  ;;  %v486_v47 = vand.u32 4294901760, %v485_v20  ;;  %v19075_v53 = vand.u32 4294901760, %v11838_v1  ;;  %v18069_v7 = vand.u32 4294901760, %v11865_v14 }
  0x45   :  { %v759_v39 = vand.u32 4294901760, %v758_v33  ;;  %v647_v46 = vand.u32 4294901760, %v646_v34  ;;  %v18068_v33 = vand.u32 4294901760, %v11855_v37  ;;  %v766_v19 = vand.u32 4294901760, %v765_v49  ;;  %v75_v49 = vld [vmem:[#allocation2 + $0x100] sm:$0xff] }
  0x46   :  { %v653_v29 = vsub.f32 %v11838_v1, %v19075_v53  ;;  %v492_v12 = vand.u32 4294901760, %v491_v2  ;;  %487 = vmatprep.mubr.f32.mxu0 %v486_v47  ;;  %v11881_v53 = vsub.f32 %v11765_v44, %v11789_v24  ;;  %v660_v56 = vsub.f32 %v11865_v14, %v18069_v7 }
  0x47   :  { %9169 = vmatprep.subr.mxu1 %v759_v39  ;;  %v772_v34 = vsub.f32 %v11855_v37, %v18068_v33  ;;  %v11883_v39 = vand.u32 4294901760, %v60_v30  ;;  %v11889_v47 = vand.u32 4294901760, %v59_v26  ;;  %v11891_v2 = vand.u32 4294901760, %v76_v18 }
  0x48   :  { %9170 = vmatpush3.msra.mxu1 %v647_v46  ;;  %v654_v20 = vand.u32 4294901760, %v653_v29  ;;  %19076 = vst [vmem:[#allocation44_spill] sm:$0xff] %v11881_v53  ;;  %493 = vmatmul.mubr.f32.vlgmr.msra.gmra.mxu0 %v492_v12  ;;  %v18072_v46 = vand.u32 4294901760, %v11874_v51  ;;  %v18075_v29 = vand.u32 4294901760, %v11881_v53  ;;  %v11905_v24 = vand.u32 4294901760, %v75_v49 }
  0x49   :  { %19077 = vst [vmem:[#allocation45_spill] sm:$0xff] %v11883_v39  ;;  %9171 = vmatprep.subr.mxu1 %v766_v19  ;;  %19078 = vst [vmem:[#allocation46_spill] sm:$0xff] %v11889_v47  ;;  %9193 = vmatpush3.msra.mxu0 %v11495_v23  ;;  %v773_v44 = vand.u32 4294901760, %v772_v34  ;;  %v11896_v33 = vsub.f32 %v60_v30, %v11883_v39  ;;  %v661_v19 = vand.u32 4294901760, %v660_v56  ;;  %v92_v34 = vld [vmem:[#allocation2 + $0x188] sm:$0xff] }
  0x4a   :  { %19079 = vst [vmem:[#allocation47_spill] sm:$0xff] %v11891_v2  ;;  %9172 = vmatpush3.msra.mxu1 %v654_v20  ;;  %9194 = vmatprep.subr.mxu0 %v11501_v25  ;;  %v779_v12 = vsub.f32 %v11874_v51, %v18072_v46  ;;  %v11903_v7 = vsub.f32 %v59_v26, %v11889_v47  ;;  %19080 = vst [vmem:[#allocation48_spill] sm:$0xff] %v11905_v24  ;;  %v11922_v20 = vand.u32 4294901760, %v92_v34 }
  0x4b   :  { %9195 = vmatpush3.msra.mxu0 %v11515_v31  ;;  %9173 = vmatprep.subr.mxu1 %v773_v44  ;;  %v667_v30 = vsub.f32 %v11881_v53, %v18075_v29  ;;  %v11914_v46 = vsub.f32 %v76_v18, %v11891_v2  ;;  %v91_v44 = vld [vmem:[#allocation2 + $0x180] sm:$0xff]  ;;  %v11920_v29 = vsub.f32 %v75_v49, %v11905_v24  ;;  %v19082_v18 = vand.u32 4294901760, %v11896_v33 }
  0x4c   :  { %9196 = vmatprep.subr.mxu0 %v11524_v35  ;;  %9174 = vmatpush3.msra.mxu1 %v661_v19  ;;  %v780_v56 = vand.u32 4294901760, %v779_v12  ;;  %v18078_v41 = vand.u32 4294901760, %v11903_v7  ;;  %19081 = vst [vmem:[#allocation49_spill] sm:$0xff] %v11922_v20 }
  0x4d   :  { %9197 = vmatpush3.msra.mxu0 %v11537_v40  ;;  %v668_v26 = vand.u32 4294901760, %v667_v30  ;;  %v500_v19 = vsub.f32 %v11896_v33, %v19082_v18  ;;  %v11931_v30 = vand.u32 4294901760, %v91_v44  ;;  %v11942_v18 = vsub.f32 %v92_v34, %v11922_v20 }
  0x4e   :  { %9175 = vmatprep.subr.mxu1 %v780_v56  ;;  %9198 = vmatprep.subr.mxu0 %v11551_v45  ;;  %v506_v49 = vsub.f32 %v11903_v7, %v18078_v41  ;;  %v108_v56 = vld [vmem:[#allocation2 + $0x208] sm:$0xff]  ;;  %v19084_v41 = vand.u32 4294901760, %v11914_v46 }
  0x4f   :  { %9176 = vmatpush3.msra.mxu1 %v668_v26  ;;  %9199 = vmatpush3.msra.mxu0 %v11577_v59  ;;  %19083 = vst [vmem:[#allocation50_spill] sm:$0xff] %v11931_v30  ;;  %v501_v12 = vand.u32 4294901760, %v500_v19  ;;  %v11954_v26 = vand.u32 4294901760, %v108_v56  ;;  %v19085_v19 = vand.u32 4294901760, %v11920_v29 }
  0x50   :  { %785 = vmatmul.mubr.f32.vlgmr.msra.gmra.mxu1 %v11808_v38  ;;  %9200 = vmatprep.subr.mxu0 %v11589_v0  ;;  %v107_v38 = vld [vmem:[#allocation2 + $0x200] sm:$0xff]  ;;  %v507_v34 = vand.u32 4294901760, %v506_v49 }
  0x51   :  { %9239 = vmatprep.subr.mxu1 %v11462_v3  ;;  %9201 = vmatpush3.msra.mxu0 %v11600_v8 }
  0x52   :  { %9240 = vmatpush3.msra.mxu1 %v11464_v4  ;;  %9202 = vmatprep.subr.mxu0 %v11611_v42  ;;  %v515_v4 = vsub.f32 %v11914_v46, %v19084_v41  ;;  %v11952_v42 = vsub.f32 %v91_v44, %v11931_v30  ;;  %v18085_v41 = vand.u32 4294901760, %v11942_v18 }
  0x53   :  { %9241 = vmatprep.subr.mxu1 %v11466_v5  ;;  %9203 = vmatpush3.msra.mxu0 %v11623_v48 }
  0x54   :  { %9242 = vmatpush3.msra.mxu1 %v11468_v9  ;;  %9204 = vmatprep.subr.mxu0 %v11637_v57  ;;  %v521_v57 = vsub.f32 %v11920_v29, %v19085_v19  ;;  %v11964_v9 = vand.u32 4294901760, %v107_v38  ;;  %v516_v44 = vand.u32 4294901760, %v515_v4  ;;  %v18088_v49 = vand.u32 4294901760, %v11952_v42  ;;  %v19086_v4 = vld [vmem:[#allocation16_spill] sm:$0xff] }
  0x55   :  { %9243 = vmatprep.subr.mxu1 %v11470_v10  ;;  %9205 = vmatpush3.msra.mxu0 %v11649_v6 }
  0x56   :  { %9244 = vmatpush3.msra.mxu1 %v11472_v11  ;;  %9206 = vmatprep.subr.mxu0 %v11670_v54  ;;  %v11971_v54 = vsub.f32 %v108_v56, %v11954_v26  ;;  %v522_v19 = vand.u32 4294901760, %v521_v57  ;;  %v536_v56 = vsub.f32 %v11952_v42, %v18088_v49 }
  0x57   :  { %9245 = vmatprep.subr.mxu1 %v11475_v15  ;;  %502 = vmatprep.mubr.f32.mxu0 %v501_v12  ;;  %v530_v12 = vsub.f32 %v11942_v18, %v18085_v41 }
  0x58   :  { %9207 = vmatpush3.msra.mxu0 %v11683_v63  ;;  %9246 = vmatpush3.msra.mxu1 %v11477_v16  ;;  %v11980_v16 = vsub.f32 %v107_v38, %v11964_v9  ;;  %v18090_v57 = vand.u32 4294901760, %v11971_v54  ;;  %v19088_v38 = vld [vmem:[#allocation39_spill] sm:$0xff]  ;;  %v537_v49 = vand.u32 4294901760, %v536_v56 }
  0x59   :  { %508 = vmatmul.mubr.f32.gmra.mxu0 %v507_v34  ;;  %9208 = vmatprep.subr.mxu0 %v11701_v55  ;;  %v19087_v34 = vld [vmem:[#allocation17_spill] sm:$0xff]  ;;  %v531_v41 = vand.u32 4294901760, %v530_v12 }
  0x5a   :  { %9247 = vmatprep.subr.mxu1 %v11479_v17  ;;  %9209 = vmatpush3.msra.mxu0 %v11714_v58 }
  0x5b   :  { %9248 = vmatpush3.msra.mxu1 %v11492_v22  ;;  %9210 = vmatprep.subr.mxu0 %v11726_v60  ;;  %v18093_v22 = vand.u32 4294901760, %v11980_v16  ;;  %v19089_v60 = vld [vmem:[#allocation18_spill] sm:$0xff] }
  0x5c   :  { %9249 = vmatprep.subr.mxu1 %v19086_v4  ;;  %517 = vmatprep.mubr.f32.mxu0 %v516_v44  ;;  %v19090_v44 = vld [vmem:[#allocation19_spill] sm:$0xff] }
  0x5d   :  { %9211 = vmatpush3.msra.mxu0 %v11737_v27  ;;  %9250 = vmatpush3.msra.mxu1 %v19087_v34  ;;  %v545_v27 = vsub.f32 %v11971_v54, %v18090_v57  ;;  %v551_v12 = vsub.f32 %v11980_v16, %v18093_v22  ;;  %v19093_v57 = vld [vmem:[#allocation22_spill] sm:$0xff]  ;;  %v19095_v22 = vld [vmem:[#allocation24_spill] sm:$0xff] }
  0x5e   :  { %523 = vmatmul.mubr.f32.gmra.mxu0 %v522_v19  ;;  %9212 = vmatprep.subr.mxu0 %v19088_v38  ;;  %v19091_v19 = vld [vmem:[#allocation20_spill] sm:$0xff] }
  0x5f   :  { %9251 = vmatprep.subr.mxu1 %v19089_v60  ;;  %9213 = vmatpush3.msra.mxu0 %v11763_v50  ;;  %v546_v56 = vand.u32 4294901760, %v545_v27  ;;  %v19097_v27 = vld [vmem:[#allocation27_spill] sm:$0xff] }
  0x60   :  { %9252 = vmatpush3.msra.mxu1 %v19090_v44  ;;  %790 = vmatprep.mubr.f32.mxu1 %v11883_v39  ;;  %v19092_v44 = vld [vmem:[#allocation21_spill] sm:$0xff]  ;;  %v19094_v39 = vld [vmem:[#allocation23_spill] sm:$0xff] }
  0x61   :  { %9214 = vmatprep.subr.mxu0 %v11782_v21  ;;  %9253 = vmatprep.subr.mxu1 %v19091_v19 }
  0x62   :  { %532 = vmatprep.mubr.f32.mxu0 %v531_v41  ;;  %792 = vmatmul.mubr.f32.gmra.mxu1 %v11889_v47  ;;  %v552_v41 = vand.u32 4294901760, %v551_v12  ;;  %v19099_v12 = vld [vmem:[#allocation30_spill] sm:$0xff]  ;;  %v19104_v47 = vand.u32 4294901760, %v11495_v23 }
  0x63   :  { %9215 = vmatpush3.msra.mxu0 %v11793_v13  ;;  %9254 = vmatpush3.msra.mxu1 %v19092_v44  ;;  %v19109_v23 = vld [vmem:[#allocation38_spill] sm:$0xff] }
  0x64   :  { %538 = vmatmul.mubr.f32.gmra.mxu0 %v537_v49  ;;  %9216 = vmatprep.subr.mxu0 %v11806_v32  ;;  %v19096_v49 = vld [vmem:[#allocation26_spill] sm:$0xff] }
  0x65   :  { %9255 = vmatprep.subr.mxu1 %v19093_v57  ;;  %9217 = vmatpush3.msra.mxu0 %v11819_v43 }
  0x66   :  { %9256 = vmatpush3.msra.mxu1 %v19094_v39  ;;  %797 = vmatprep.mubr.f32.mxu1 %v11891_v2  ;;  %v19098_v2 = vld [vmem:[#allocation29_spill] sm:$0xff] }
  0x67   :  { %9218 = vmatprep.subr.mxu0 %v11831_v36  ;;  %9257 = vmatprep.subr.mxu1 %v19095_v22 }
  0x68   :  { %547 = vmatprep.mubr.f32.mxu0 %v546_v56  ;;  %799 = vmatmul.mubr.f32.gmra.mxu1 %v11905_v24  ;;  %v19100_v56 = vld [vmem:[#allocation32_spill] sm:$0xff] }
  0x69   :  { %9219 = vmatpush3.msra.mxu0 %v11838_v1  ;;  %9258 = vmatpush3.msra.mxu1 %v19096_v49 }
  0x6a   :  { %553 = vmatmul.mubr.f32.gmra.mxu0 %v552_v41  ;;  %9220 = vmatprep.subr.mxu0 %v11855_v37  ;;  %v19101_v41 = vld [vmem:[#allocation14_spill] sm:$0xff] }
  0x6b   :  { %9259 = vmatprep.subr.mxu1 %v19097_v27  ;;  %9221 = vmatpush3.msra.mxu0 %v11865_v14  ;;  %v19102_v24 = vand.u32 4294901760, %v19101_v41  ;;  %v19113_v41 = vand.u32 4294901760, %v11551_v45  ;;  %v19119_v45 = vand.u32 4294901760, %v11600_v8  ;;  %v19127_v8 = vld [vmem:[#allocation28_spill] sm:$0xff] }
  0x6c   :  { %9260 = vmatpush3.msra.mxu1 %v19098_v2  ;;  %804 = vmatprep.mubr.f32.mxu1 %v11922_v20  ;;  %v19103_v20 = vld [vmem:[#allocation33_spill] sm:$0xff] }
  0x6d   :  { %9222 = vmatprep.subr.mxu0 %v11874_v51  ;;  %9261 = vmatprep.subr.mxu1 %v19099_v12 }
  0x6e   :  { %806 = vmatmul.mubr.f32.gmra.mxu1 %v11931_v30  ;;  %9223 = vmatpush3.msra.mxu0 %v11881_v53  ;;  %v19105_v30 = vld [vmem:[#allocation34_spill] sm:$0xff]  ;;  %v19106_v53 = vand.u32 4294901760, %v11501_v25  ;;  %v19111_v25 = vand.u32 4294901760, %v11537_v40  ;;  %v19118_v40 = vand.u32 4294901760, %v11589_v0  ;;  %v19124_v0 = vand.u32 4294901760, %v11623_v48 }
  0x6f   :  { %948 = vmatprep.mubr.f32.mxu0 %v11815_v61  ;;  %9262 = vmatpush3.msra.mxu1 %v11679_v62 }
  0x70   :  { %951 = vmatmul.mubr.f32.vlgmr.msra.gmra.mxu0 %v11827_v52  ;;  %9263 = vmatprep.subr.mxu1 %v19100_v56  ;;  %v19107_v56 = vld [vmem:[#allocation36_spill] sm:$0xff] }
  0x71   :  { %9286 = vmatprep.subr.mxu0 %v19102_v24  ;;  %9264 = vmatpush3.msra.mxu1 %v19103_v20  ;;  %v19108_v24 = vand.u32 4294901760, %v11515_v31  ;;  %v19114_v31 = vld [vmem:[#allocation41_spill] sm:$0xff] }
  0x72   :  { %9287 = vmatpush3.msra.mxu0 %v19104_v47  ;;  %811 = vmatprep.mubr.f32.mxu1 %v11954_v26  ;;  %v19110_v47 = vand.u32 4294901760, %v11524_v35  ;;  %v19116_v35 = vand.u32 4294901760, %v11577_v59  ;;  %v19123_v59 = vand.u32 4294901760, %v11896_v33 }
  0x73   :  { %9265 = vmatprep.subr.mxu1 %v19105_v30  ;;  %9288 = vmatprep.subr.mxu0 %v19106_v53  ;;  %v19112_v53 = vld [vmem:[#allocation40_spill] sm:$0xff] }
  0x74   :  { %813 = vmatmul.mubr.f32.gmra.mxu1 %v11964_v9  ;;  %957 = vmatprep.mubr.f32.mxu0 %v11896_v33  ;;  %v19130_v33 = vld [vmem:[#allocation31_spill] sm:$0xff] }
  0x75   :  { %9266 = vmatpush3.msra.mxu1 %v19107_v56  ;;  %9289 = vmatpush3.msra.mxu0 %v19108_v24  ;;  %v19115_v24 = vand.u32 4294901760, %v11815_v61  ;;  %v19121_v61 = vld [vmem:[#allocation25_spill] sm:$0xff]  ;;  %v19131_v48 = vand.u32 4294901760, %v19130_v33 }
  0x76   :  { %960 = vmatmul.mubr.f32.gmra.mxu0 %v11903_v7  ;;  %9267 = vmatprep.subr.mxu1 %v19109_v23  ;;  %v166_v33 = vld [vmem:[#allocation5 + $0x158] sm:$0xff] }
  0x77   :  { %9290 = vmatprep.subr.mxu0 %v19110_v47  ;;  %9268 = vmatpush3.msra.mxu1 %v11759_v28  ;;  %v19117_v47 = vand.u32 4294901760, %v11827_v52  ;;  %v19125_v52 = vld [vmem:[#allocation12_spill] sm:$0xff] }
  0x78   :  { %9291 = vmatpush3.msra.mxu0 %v19111_v25  ;;  %9269 = vmatprep.subr.mxu1 %v19112_v53  ;;  %v19120_v25 = vld [vmem:[#allocation11_spill] sm:$0xff] }
  0x79   :  { %9292 = vmatprep.subr.mxu0 %v19113_v41  ;;  %966 = vmatprep.mubr.f32.mxu0 %v11914_v46  ;;  %v19122_v41 = vand.u32 4294901760, %v19121_v61  ;;  %v19148_v61 = vand.u32 4294901760, %v11782_v21  ;;  %v19151_v21 = vand.u32 4294901760, %v11980_v16 }
  0x7a   :  { %9270 = vmatpush3.msra.mxu1 %v19114_v31  ;;  %1091 = vmatprep.mubr.f32.mxu1 %v19115_v24  ;;  %v19128_v24 = vand.u32 4294901760, %v19127_v8 }
  0x7b   :  { %9293 = vmatpush3.msra.mxu0 %v19116_v35  ;;  %1095 = vmatmul.mubr.f32.vlgmr.msra.gmra.mxu1 %v19117_v47  ;;  %v19133_v35 = vand.u32 4294901760, %v11683_v63  ;;  %v19134_v47 = vld [vmem:[#allocation13_spill] sm:$0xff] }
  0x7c   :  { %969 = vmatmul.mubr.f32.gmra.mxu0 %v11920_v29  ;;  %9294 = vmatprep.subr.mxu0 %v19118_v40  ;;  %v19141_v40 = vand.u32 4294901760, %v11942_v18 }
  0x7d   :  { %9333 = vmatprep.subr.mxu1 %v11462_v3  ;;  %9295 = vmatpush3.msra.mxu0 %v19119_v45  ;;  %v19126_v3 = vand.u32 4294901760, %v11903_v7  ;;  %v19132_v7 = vand.u32 4294901760, %v11914_v46  ;;  %v19139_v46 = vld [vmem:[#allocation35_spill] sm:$0xff] }
  0x7e   :  { %9334 = vmatpush3.msra.mxu1 %v19120_v25  ;;  %9296 = vmatprep.subr.mxu0 %v19122_v41  ;;  %v19140_v63 = vand.u32 4294901760, %v19139_v46  ;;  %v170_v25 = vld [vmem:[#allocation5 + $0x178] sm:$0xff]  ;;  %v169_v41 = vld [vmem:[#allocation5 + $0x170] sm:$0xff] }
  0x7f   :  { %9335 = vmatprep.subr.mxu1 %v11466_v5  ;;  %975 = vmatprep.mubr.f32.mxu0 %v11942_v18  ;;  %v19129_v5 = vand.u32 4294901760, %v11649_v6  ;;  %v19138_v6 = vld [vmem:[#allocation15_spill] sm:$0xff] }
  0x80   :  { %1102 = vmatprep.mubr.f32.mxu1 %v19123_v59  ;;  %9297 = vmatpush3.msra.mxu0 %v19124_v0  ;;  %v19147_v18 = vld [vmem:[#allocation19_spill] sm:$0xff]  ;;  %v185_v59 = vld [vmem:[#allocation5 + $0x1f0] sm:$0xff]  ;;  %v19152_v0 = vand.u32 4294901760, %v11806_v32 }
  0x81   :  { %9336 = vmatpush3.msra.mxu1 %v19125_v52  ;;  %978 = vmatmul.mubr.f32.gmra.mxu0 %v11952_v42  ;;  %v19154_v52 = vand.u32 4294901760, %v11819_v43  ;;  %v19158_v43 = vand.u32 4294901760, %v11838_v1  ;;  %v182_v1 = vld [vmem:[#allocation5 + $0x1d8] sm:$0xff] }
  0x82   :  { %1106 = vmatmul.mubr.f32.gmra.mxu1 %v19126_v3  ;;  %9298 = vmatprep.subr.mxu0 %v19128_v24  ;;  %v12143_v3 = vand.u32 4294901760, %v185_v59  ;;  %v183_v24 = vld [vmem:[#allocation5 + $0x1e0] sm:$0xff] }
  0x83   :  { %9337 = vmatprep.subr.mxu1 %v11470_v10  ;;  %9299 = vmatpush3.msra.mxu0 %v19129_v5  ;;  %v19135_v10 = vand.u32 4294901760, %v11920_v29  ;;  %v19142_v29 = vld [vmem:[#allocation37_spill] sm:$0xff]  ;;  %v19161_v5 = vand.u32 4294901760, %v11865_v14 }
  0x84   :  { %9338 = vmatpush3.msra.mxu1 %v11472_v11  ;;  %9300 = vmatprep.subr.mxu0 %v19131_v48  ;;  %v19136_v11 = vand.u32 4294901760, %v11701_v55  ;;  %v19143_v45 = vand.u32 4294901760, %v19142_v29  ;;  %v19145_v55 = vand.u32 4294901760, %v19088_v38  ;;  %v12129_v38 = vand.u32 4294901760, %v170_v25  ;;  %19155 = vst [vmem:[#allocation17_spill] sm:$0xff] %v12143_v3 }
  0x85   :  { %9339 = vmatprep.subr.mxu1 %v11475_v15  ;;  %984 = vmatprep.mubr.f32.mxu0 %v11971_v54  ;;  %v19137_v15 = vand.u32 4294901760, %v11714_v58  ;;  %v186_v58 = vld [vmem:[#allocation5 + $0x1f8] sm:$0xff]  ;;  %v12173_v48 = vsub.f32 %v185_v59, %v12143_v3 }
  0x86   :  { %1113 = vmatprep.mubr.f32.mxu1 %v19132_v7  ;;  %9301 = vmatpush3.msra.mxu0 %v19133_v35  ;;  %v165_v7 = vld [vmem:[#allocation5 + $0x150] sm:$0xff] }
  0x87   :  { %9340 = vmatpush3.msra.mxu1 %v19134_v47  ;;  %987 = vmatmul.mubr.f32.gmra.mxu0 %v11980_v16  ;;  %v12149_v16 = vsub.f32 %v170_v25, %v12129_v38  ;;  %v19164_v35 = vld [vmem:[#allocation44_spill] sm:$0xff]  ;;  %v18109_v29 = vand.u32 4294901760, %v12173_v48 }
  0x88   :  { %1117 = vmatmul.mubr.f32.gmra.mxu1 %v19135_v10  ;;  %9302 = vmatprep.subr.mxu0 %v19136_v11  ;;  %v19165_v47 = vand.u32 4294901760, %v19164_v35  ;;  %v12186_v10 = vand.u32 4294901760, %v183_v24  ;;  %v12193_v11 = vand.u32 4294901760, %v182_v1 }
  0x89   :  { %9341 = vmatprep.subr.mxu1 %v11479_v17  ;;  %9303 = vmatpush3.msra.mxu0 %v19137_v15  ;;  %v19144_v17 = vand.u32 4294901760, %v11952_v42  ;;  %v19149_v42 = vand.u32 4294901760, %v11971_v54  ;;  %v184_v54 = vld [vmem:[#allocation5 + $0x1e8] sm:$0xff]  ;;  %v18110_v14 = vand.u32 4294901760, %v12149_v16  ;;  %v12195_v15 = vand.u32 4294901760, %v166_v33 }
  0x8a   :  { %9342 = vmatpush3.msra.mxu1 %v19138_v6  ;;  %9304 = vmatprep.subr.mxu0 %v19140_v63  ;;  %19166 = vst [vmem:[#allocation21_spill] sm:$0xff] %v12186_v10  ;;  %19168 = vst [vmem:[#allocation22_spill] sm:$0xff] %v12193_v11  ;;  %v181_v6 = vld [vmem:[#allocation5 + $0x1d0] sm:$0xff] }
  0x8b   :  { %9343 = vmatprep.subr.mxu1 %v19086_v4  ;;  %1124 = vmatprep.mubr.f32.mxu1 %v19141_v40  ;;  %v19146_v4 = vand.u32 4294901760, %v11763_v50  ;;  %v168_v50 = vld [vmem:[#allocation5 + $0x168] sm:$0xff]  ;;  %19169 = vst [vmem:[#allocation23_spill] sm:$0xff] %v12195_v15  ;;  %v19171_v63 = vld [vmem:[#allocation32_spill] sm:$0xff] }
  0x8c   :  { %9305 = vmatpush3.msra.mxu0 %v19143_v45  ;;  %9344 = vmatpush3.msra.mxu1 %v19087_v34  ;;  %v12127_v34 = vand.u32 4294901760, %v186_v58  ;;  %v12151_v32 = vand.u32 4294901760, %v168_v50  ;;  %v12204_v45 = vand.u32 4294901760, %v165_v7 }
  0x8d   :  { %1128 = vmatmul.mubr.f32.gmra.mxu1 %v19144_v17  ;;  %9306 = vmatprep.subr.mxu0 %v19145_v55  ;;  %v164_v17 = vld [vmem:[#allocation5 + $0x148] sm:$0xff]  ;;  %v12216_v55 = vsub.f32 %v12149_v16, %v18110_v14 }
  0x8e   :  { %9345 = vmatprep.subr.mxu1 %v19089_v60  ;;  %9307 = vmatpush3.msra.mxu0 %v19146_v4  ;;  %v19150_v60 = vand.u32 4294901760, %v11793_v13  ;;  %v19156_v13 = vand.u32 4294901760, %v11831_v36  ;;  %19157 = vst [vmem:[#allocation39_spill] sm:$0xff] %v12151_v32  ;;  %v12154_v8 = vsub.f32 %v186_v58, %v12127_v34  ;;  %v19160_v36 = vand.u32 4294901760, %v11855_v37  ;;  %19172 = vst [vmem:[#allocation24_spill] sm:$0xff] %v12204_v45  ;;  %v180_v58 = vld [vmem:[#allocation5 + $0x1c8] sm:$0xff] }
  0x8f   :  { %9346 = vmatpush3.msra.mxu1 %v19147_v18  ;;  %9308 = vmatprep.subr.mxu0 %v19148_v61  ;;  %v19163_v37 = vand.u32 4294901760, %v11874_v51  ;;  %v19167_v51 = vld [vmem:[#allocation42_spill] sm:$0xff]  ;;  %v12221_v4 = vand.u32 4294901760, %v181_v6  ;;  %v12225_v18 = vsub.f32 %v183_v24, %v12186_v10  ;;  %v178_v24 = vld [vmem:[#allocation5 + $0x1b8] sm:$0xff] }
  0x90   :  { %9347 = vmatprep.subr.mxu1 %v19091_v19  ;;  %1135 = vmatprep.mubr.f32.mxu1 %v19149_v42  ;;  %v12138_v19 = vand.u32 4294901760, %v169_v41  ;;  %v163_v61 = vld [vmem:[#allocation5 + $0x140] sm:$0xff]  ;;  %v12230_v42 = vsub.f32 %v166_v33, %v12195_v15  ;;  %v162_v33 = vld [vmem:[#allocation5 + $0x138] sm:$0xff] }
  0x91   :  { %9309 = vmatpush3.msra.mxu0 %v19150_v60  ;;  %9348 = vmatpush3.msra.mxu1 %v19092_v44  ;;  %v167_v44 = vld [vmem:[#allocation5 + $0x160] sm:$0xff]  ;;  %19173 = vst [vmem:[#allocation26_spill] sm:$0xff] %v12221_v4 }
  0x92   :  { %1139 = vmatmul.mubr.f32.gmra.mxu1 %v19151_v21  ;;  %9310 = vmatprep.subr.mxu0 %v19152_v0  ;;  %19153 = vst [vmem:[#allocation16_spill] sm:$0xff] %v12138_v19  ;;  %v179_v60 = vld [vmem:[#allocation5 + $0x1c0] sm:$0xff]  ;;  %v12247_v21 = vsub.f32 %v12173_v48, %v18109_v29  ;;  %v12250_v0 = vsub.f32 %v165_v7, %v12204_v45  ;;  %v19189_v29 = vld [vmem:[#allocation48_spill] sm:$0xff] }
  0x93   :  { %9349 = vmatprep.subr.mxu1 %v19093_v57  ;;  %9311 = vmatpush3.msra.mxu0 %v19154_v52  ;;  %v12159_v57 = vand.u32 4294901760, %v184_v54 }
  0x94   :  { %9350 = vmatpush3.msra.mxu1 %v19094_v39  ;;  %9312 = vmatprep.subr.mxu0 %v19156_v13  ;;  %v12165_v39 = vsub.f32 %v169_v41, %v12138_v19  ;;  %v19174_v41 = vld [vmem:[#allocation45_spill] sm:$0xff]  ;;  %19176 = vst [vmem:[#allocation29_spill] sm:$0xff] %v12250_v0  ;;  %v19178_v13 = vld [vmem:[#allocation46_spill] sm:$0xff] }
  0x95   :  { %9351 = vmatprep.subr.mxu1 %v19095_v22  ;;  %9313 = vmatpush3.msra.mxu0 %v19158_v43  ;;  %19159 = vst [vmem:[#allocation18_spill] sm:$0xff] %v12159_v57  ;;  %v12170_v22 = vand.u32 4294901760, %v167_v44 }
  0x96   :  { %9352 = vmatpush3.msra.mxu1 %v19096_v49  ;;  %9314 = vmatprep.subr.mxu0 %v19160_v36  ;;  %v12179_v49 = vsub.f32 %v168_v50, %v12151_v32  ;;  %v18108_v46 = vand.u32 4294901760, %v12165_v39  ;;  %v12240_v50 = vsub.f32 %v182_v1, %v12193_v11  ;;  %v12264_v36 = vand.u32 4294901760, %v163_v61 }
  0x97   :  { %9353 = vmatprep.subr.mxu1 %v19097_v27  ;;  %9315 = vmatpush3.msra.mxu0 %v19161_v5  ;;  %19162 = vst [vmem:[#allocation20_spill] sm:$0xff] %v12170_v22  ;;  %v18112_v27 = vand.u32 4294901760, %v12154_v8  ;;  %v12201_v40 = vsub.f32 %v167_v44, %v12170_v22  ;;  %v1649_v44 = vand.u32 4294901760, %v12216_v55  ;;  %v12273_v5 = vand.u32 4294901760, %v179_v60 }
  0x98   :  { %9354 = vmatpush3.msra.mxu1 %v19098_v2  ;;  %9316 = vmatprep.subr.mxu0 %v19163_v37  ;;  %v12189_v2 = vsub.f32 %v184_v54, %v12159_v57  ;;  %v18105_v25 = vand.u32 4294901760, %v12179_v49  ;;  %v12235_v59 = vsub.f32 %v12165_v39, %v18108_v46  ;;  %v12252_v54 = vand.u32 4294901760, %v180_v58  ;;  %19179 = vst [vmem:[#allocation14_spill] sm:$0xff] %v12264_v36  ;;  %v160_v46 = vld [vmem:[#allocation5 + $0x128] sm:$0xff] }
  0x99   :  { %9355 = vmatprep.subr.mxu1 %v19099_v12  ;;  %9317 = vmatpush3.msra.mxu0 %v19165_v47  ;;  %v19170_v12 = vld [vmem:[#allocation43_spill] sm:$0xff]  ;;  %v18107_v52 = vand.u32 4294901760, %v12201_v40  ;;  %19180 = vst [vmem:[#allocation33_spill] sm:$0xff] %v12273_v5  ;;  %v18111_v1 = vand.u32 4294901760, %v12225_v18  ;;  %v12277_v37 = vsub.f32 %v181_v6, %v12221_v4  ;;  %v18113_v35 = vand.u32 4294901760, %v12240_v50 }
  0x9a   :  { %1305 = vmatprep.mubr.f32.mxu0 %v19167_v51  ;;  %9356 = vmatpush3.msra.mxu1 %v11679_v62  ;;  %v12211_v62 = vsub.f32 %v12154_v8, %v18112_v27  ;;  %19177 = vst [vmem:[#allocation30_spill] sm:$0xff] %v12252_v54  ;;  %v12262_v43 = vsub.f32 %v12179_v49, %v18105_v25  ;;  %v1656_v7 = vand.u32 4294901760, %v12235_v59  ;;  %v18116_v47 = vand.u32 4294901760, %v12230_v42  ;;  %v159_v27 = vld [vmem:[#allocation5 + $0x120] sm:$0xff] }
  0x9b   :  { %1307 = vmatmul.mubr.f32.vlgmr.msra.gmra.mxu0 %v19170_v12  ;;  %9357 = vmatprep.subr.mxu1 %v19171_v63  ;;  %19181 = vst [vmem:[#allocation34_spill] sm:$0xff] %v12277_v37  ;;  %v161_v63 = vld [vmem:[#allocation5 + $0x130] sm:$0xff]  ;;  %v1768_v6 = vand.u32 4294901760, %v12247_v21  ;;  %v12295_v55 = vand.u32 4294901760, %v178_v24  ;;  %v12298_v59 = vsub.f32 %v180_v58, %v12252_v54  ;;  %v12306_v21 = vand.u32 4294901760, %v162_v33 }
  0x9c   :  { %9380 = vmatprep.subr.mxu0 %v12127_v34  ;;  %9358 = vmatpush3.msra.mxu1 %v19103_v20  ;;  %v18106_v20 = vand.u32 4294901760, %v12189_v2  ;;  %v12325_v14 = vsub.f32 %v12240_v50, %v18113_v35  ;;  %v46_v35 = vld [vmem:[#allocation2 + $0x18] sm:$0xff] }
  0x9d   :  { %9381 = vmatpush3.msra.mxu0 %v12129_v38  ;;  %9359 = vmatprep.subr.mxu1 %v19105_v30  ;;  %v12237_v30 = vand.u32 4294901760, %v164_v17  ;;  %19184 = vst [vmem:[#allocation38_spill] sm:$0xff] %v12295_v55  ;;  %19185 = vst [vmem:[#allocation40_spill] sm:$0xff] %v12298_v59 }
  0x9e   :  { %9382 = vmatprep.subr.mxu0 %v12143_v3  ;;  %1312 = vmatprep.mubr.f32.mxu0 %v19174_v41  ;;  %19187 = vst [vmem:[#allocation11_spill] sm:$0xff] %v12306_v21 }
  0x9f   :  { %19175 = vst [vmem:[#allocation27_spill] sm:$0xff] %v12237_v30  ;;  %9360 = vmatpush3.msra.mxu1 %v19107_v56  ;;  %9383 = vmatpush3.msra.mxu0 %v12138_v19  ;;  %v1761_v56 = vand.u32 4294901760, %v12211_v62  ;;  %v19183_v62 = vld [vmem:[#allocation47_spill] sm:$0xff] }
  0xa0   :  { %1314 = vmatmul.mubr.f32.gmra.mxu0 %v19178_v13  ;;  %9361 = vmatprep.subr.mxu1 %v19109_v23  ;;  %v12271_v23 = vsub.f32 %v12189_v2, %v18106_v20  ;;  %v12304_v20 = vsub.f32 %v163_v61, %v12264_v36  ;;  %v12318_v61 = vand.u32 4294901760, %v161_v63 }
  0xa1   :  { %9384 = vmatprep.subr.mxu0 %v12159_v57  ;;  %9362 = vmatpush3.msra.mxu1 %v11759_v28  ;;  %v12283_v28 = vsub.f32 %v164_v17, %v12237_v30  ;;  %v177_v17 = vld [vmem:[#allocation5 + $0x1b0] sm:$0xff] }
  0xa2   :  { %9385 = vmatpush3.msra.mxu0 %v12151_v32  ;;  %9363 = vmatprep.subr.mxu1 %v19112_v53  ;;  %v12293_v53 = vsub.f32 %v12201_v40, %v18107_v52  ;;  %19186 = vst [vmem:[#allocation41_spill] sm:$0xff] %v12304_v20  ;;  %v1775_v58 = vand.u32 4294901760, %v12271_v23  ;;  %19188 = vst [vmem:[#allocation25_spill] sm:$0xff] %v12318_v61  ;;  %v12332_v23 = vand.u32 4294901760, %v177_v17  ;;  %v12340_v52 = vand.u32 4294901760, %v160_v46  ;;  %v157_v57 = vld [vmem:[#allocation5 + $0x110] sm:$0xff] }
  0xa3   :  { %19182 = vst [vmem:[#allocation36_spill] sm:$0xff] %v12283_v28  ;;  %9386 = vmatprep.subr.mxu0 %v12186_v10  ;;  %1319 = vmatprep.mubr.f32.mxu0 %v19183_v62  ;;  %v158_v10 = vld [vmem:[#allocation5 + $0x118] sm:$0xff] }
  0xa4   :  { %9364 = vmatpush3.msra.mxu1 %v19114_v31  ;;  %1437 = vmatprep.mubr.f32.mxu1 %v19167_v51  ;;  %v12315_v31 = vsub.f32 %v12225_v18, %v18111_v1  ;;  %19190 = vst [vmem:[#allocation12_spill] sm:$0xff] %v12332_v23  ;;  %v12335_v1 = vsub.f32 %v179_v60, %v12273_v5  ;;  %v176_v51 = vld [vmem:[#allocation5 + $0x1a8] sm:$0xff]  ;;  %19192 = vst [vmem:[#allocation31_spill] sm:$0xff] %v12340_v52 }
  0xa5   :  { %9387 = vmatpush3.msra.mxu0 %v12170_v22  ;;  %1439 = vmatmul.mubr.f32.vlgmr.msra.gmra.mxu1 %v19170_v12  ;;  %v12330_v12 = vsub.f32 %v12230_v42, %v18116_v47  ;;  %v12347_v60 = vsub.f32 %v162_v33, %v12306_v21  ;;  %v19196_v22 = vld [vmem:[#allocation49_spill] sm:$0xff]  ;;  %v12372_v25 = vand.u32 4294901760, %v176_v51  ;;  %v12403_v19 = vsub.f32 %v177_v17, %v12332_v23 }
  0xa6   :  { %1321 = vmatmul.mubr.f32.gmra.mxu0 %v19189_v29  ;;  %9388 = vmatprep.subr.mxu0 %v12193_v11  ;;  %19191 = vst [vmem:[#allocation28_spill] sm:$0xff] %v12335_v1  ;;  %v12343_v11 = vsub.f32 %v178_v24, %v12295_v55  ;;  %v19197_v24 = vand.u32 4294901760, %v12277_v37  ;;  %v19208_v17 = vand.u32 4294901760, %v12335_v1 }
  0xa7   :  { %9427 = vmatprep.subr.mxu1 %v1761_v56  ;;  %9389 = vmatpush3.msra.mxu0 %v12195_v15  ;;  %19194 = vst [vmem:[#allocation15_spill] sm:$0xff] %v12347_v60  ;;  %v19195_v56 = vand.u32 4294901760, %v12250_v0  ;;  %v175_v15 = vld [vmem:[#allocation5 + $0x1a0] sm:$0xff]  ;;  %19200 = vst [vmem:[#allocation19_spill] sm:$0xff] %v12372_v25 }
  0xa8   :  { %19193 = vst [vmem:[#allocation13_spill] sm:$0xff] %v12343_v11  ;;  %9428 = vmatpush3.msra.mxu1 %v1649_v44  ;;  %9390 = vmatprep.subr.mxu0 %v12221_v4  ;;  %v1782_v44 = vand.u32 4294901760, %v12315_v31  ;;  %v12361_v33 = vsub.f32 %v12277_v37, %v19197_v24  ;;  %v12364_v4 = vsub.f32 %v161_v63, %v12318_v61  ;;  %v19201_v24 = vld [vmem:[#allocation50_spill] sm:$0xff]  ;;  %v19202_v63 = vand.u32 4294901760, %v12298_v59  ;;  %v61_v37 = vld [vmem:[#allocation2 + $0x90] sm:$0xff] }
  0xa9   :  { %v12352_v47 = vsub.f32 %v12250_v0, %v19195_v56  ;;  %9429 = vmatprep.subr.mxu1 %v1768_v6  ;;  %1326 = vmatprep.mubr.f32.mxu0 %v19196_v22  ;;  %v12366_v56 = vand.u32 4294901760, %v159_v27  ;;  %v1789_v6 = vand.u32 4294901760, %v12325_v14  ;;  %v12386_v14 = vld [vmem:[#allocation5 + $0x198] sm:$0xff]  ;;  %v19204_v31 = vand.u32 4294901760, %v12283_v28 }
  0xaa   :  { %19198 = vst [vmem:[#allocation35_spill] sm:$0xff] %v12364_v4  ;;  %1444 = vmatprep.mubr.f32.mxu1 %v19174_v41  ;;  %9391 = vmatpush3.msra.mxu0 %v12204_v45  ;;  %v12379_v32 = vsub.f32 %v12298_v59, %v19202_v63  ;;  %v12382_v41 = vsub.f32 %v160_v46, %v12340_v52  ;;  %v12384_v45 = vand.u32 4294901760, %v175_v15  ;;  %v19205_v46 = vand.u32 4294901760, %v12304_v20 }
  0xab   :  { %19199 = vst [vmem:[#allocation37_spill] sm:$0xff] %v12366_v56  ;;  %9430 = vmatpush3.msra.mxu1 %v1656_v7  ;;  %1328 = vmatmul.mubr.f32.gmra.mxu0 %v19201_v24  ;;  %v12395_v63 = vsub.f32 %v12283_v28, %v19204_v31  ;;  %v12408_v7 = vsub.f32 %v159_v27, %v12366_v56  ;;  %v12413_v28 = vld [vmem:[#allocation5 + $0x190] sm:$0xff]  ;;  %v12426_v27 = vand.u32 4294901760, %v157_v57 }
  0xac   :  { %19203 = vst [vmem:[#allocation44_spill] sm:$0xff] %v12384_v45  ;;  %1446 = vmatmul.mubr.f32.gmra.mxu1 %v19178_v13  ;;  %9392 = vmatprep.subr.mxu0 %v12252_v54  ;;  %v12400_v59 = vsub.f32 %v12304_v20, %v19205_v46  ;;  %v1796_v13 = vand.u32 4294901760, %v12361_v33  ;;  %v12410_v54 = vand.u32 4294901760, %v158_v10  ;;  %v19207_v46 = vand.u32 4294901760, %v12262_v43  ;;  %v45_v31 = vld [vmem:[#allocation2 + $0x10] sm:$0xff] }
  0xad   :  { %9431 = vmatprep.subr.mxu1 %v1775_v58  ;;  %9393 = vmatpush3.msra.mxu0 %v12237_v30  ;;  %v12421_v58 = vsub.f32 %v12335_v1, %v19208_v17  ;;  %v12424_v33 = vand.u32 4294901760, %v12386_v14  ;;  %19210 = vst [vmem:[#allocation32_spill] sm:$0xff] %v12426_v27  ;;  %v1803_v43 = vand.u32 4294901760, %v12379_v32  ;;  %v12436_v17 = vld [vmem:[#allocation5 + $0x188] sm:$0xff]  ;;  %v12439_v20 = vsub.f32 %v176_v51, %v12372_v25 }
  0xae   :  { %19206 = vst [vmem:[#allocation42_spill] sm:$0xff] %v12410_v54  ;;  %9432 = vmatpush3.msra.mxu1 %v19207_v46  ;;  %9394 = vmatprep.subr.mxu0 %v12273_v5  ;;  %v19211_v46 = vand.u32 4294901760, %v12343_v11  ;;  %v12441_v1 = vand.u32 4294901760, %v46_v35  ;;  %v12448_v30 = vand.u32 4294901760, %v12413_v28  ;;  %v12455_v51 = vsub.f32 %v158_v10, %v12410_v54 }
  0xaf   :  { %19209 = vst [vmem:[#allocation43_spill] sm:$0xff] %v12424_v33  ;;  %9433 = vmatprep.subr.mxu1 %v1782_v44  ;;  %1333 = vmatprep.mubr.f32.mxu0 %v11954_v26  ;;  %v1691_v44 = vand.u32 4294901760, %v12395_v63  ;;  %v156_v63 = vld [vmem:[#allocation5 + $0x108] sm:$0xff]  ;;  %v12463_v32 = vsub.f32 %v175_v15, %v12384_v45  ;;  %v12465_v0 = vand.u32 4294901760, %v45_v31  ;;  %v12471_v10 = vsub.f32 %v157_v57, %v12426_v27  ;;  %v171_v57 = vld [vmem:[#allocation5 + $0x180] sm:$0xff] }
  0xb0   :  { %v12434_v5 = vsub.f32 %v12343_v11, %v19211_v46  ;;  %19212 = vst [vmem:[#allocation45_spill] sm:$0xff] %v12441_v1  ;;  %1451 = vmatprep.mubr.f32.mxu1 %v19183_v62  ;;  %9395 = vmatpush3.msra.mxu0 %v12264_v36  ;;  %v19213_v11 = vand.u32 4294901760, %v12293_v53  ;;  %v19214_v62 = vand.u32 4294901760, %v12347_v60  ;;  %v62_v46 = vld [vmem:[#allocation2 + $0x98] sm:$0xff]  ;;  %v19217_v53 = vand.u32 4294901760, %v12364_v4 }
  0xb1   :  { %1335 = vmatmul.mubr.f32.gmra.mxu0 %v11964_v9  ;;  %19215 = vst [vmem:[#allocation46_spill] sm:$0xff] %v12463_v32  ;;  %19216 = vst [vmem:[#allocation47_spill] sm:$0xff] %v12465_v0  ;;  %1453 = vmatmul.mubr.f32.gmra.mxu1 %v19189_v29  ;;  %v12479_v15 = vand.u32 4294901760, %v12436_v17  ;;  %v12486_v3 = vsub.f32 %v46_v35, %v12441_v1 }
  0xb2   :  { %9434 = vmatpush3.msra.mxu1 %v19213_v11  ;;  %v12460_v36 = vsub.f32 %v12347_v60, %v19214_v62  ;;  %9396 = vmatprep.subr.mxu0 %v12295_v55  ;;  %v1810_v11 = vand.u32 4294901760, %v12421_v58  ;;  %v12476_v62 = vsub.f32 %v12364_v4, %v19217_v53  ;;  %v155_v60 = vld [vmem:[#allocation5 + $0x100] sm:$0xff]  ;;  %v1817_v29 = vand.u32 4294901760, %v12434_v5 }
  0xb3   :  { %19218 = vst [vmem:[#allocation48_spill] sm:$0xff] %v12479_v15  ;;  %9435 = vmatprep.subr.mxu1 %v1789_v6  ;;  %9397 = vmatpush3.msra.mxu0 %v12306_v21  ;;  %v19219_v53 = vand.u32 4294901760, %v12330_v12  ;;  %v19220_v6 = vand.u32 4294901760, %v12403_v19  ;;  %v12496_v5 = vand.u32 4294901760, %v156_v63  ;;  %v12500_v58 = vsub.f32 %v12386_v14, %v12424_v33 }
  0xb4   :  { %9398 = vmatprep.subr.mxu0 %v12332_v23  ;;  %v12502_v55 = vand.u32 4294901760, %v62_v46  ;;  %1458 = vmatprep.mubr.f32.mxu1 %v19196_v22  ;;  %v1705_v35 = vand.u32 4294901760, %v12460_v36  ;;  %v19224_v23 = vand.u32 4294901760, %v12352_v47  ;;  %v1712_v14 = vand.u32 4294901760, %v12476_v62  ;;  %v78_v36 = vld [vmem:[#allocation2 + $0x118] sm:$0xff] }
  0xb5   :  { %9436 = vmatpush3.msra.mxu1 %v19219_v53  ;;  %v12494_v21 = vsub.f32 %v12403_v19, %v19220_v6  ;;  %19221 = vst [vmem:[#allocation49_spill] sm:$0xff] %v12496_v5  ;;  %v12507_v53 = vand.u32 4294901760, %v155_v60  ;;  %v12510_v6 = vsub.f32 %v45_v31, %v12465_v0  ;;  %9399 = vmatpush3.msra.mxu0 %v12318_v61  ;;  %v12516_v4 = vand.u32 4294901760, %v171_v57 }
  0xb6   :  { %19222 = vst [vmem:[#allocation50_spill] sm:$0xff] %v12502_v55  ;;  %9437 = vmatprep.subr.mxu1 %v1796_v13  ;;  %v12519_v13 = vand.u32 4294901760, %v61_v37  ;;  %1460 = vmatmul.mubr.f32.gmra.mxu1 %v19201_v24  ;;  %v19227_v31 = vand.u32 4294901760, %v12439_v20  ;;  %v19228_v47 = vand.u32 4294901760, %v12382_v41  ;;  %v12534_v22 = vsub.f32 %v12413_v28, %v12448_v30 }
  0xb7   :  { %19223 = vst [vmem:[#allocation51_spill] sm:$0xff] %v12507_v53  ;;  %9438 = vmatpush3.msra.mxu1 %v19224_v23  ;;  %19225 = vst [vmem:[#allocation52_spill] sm:$0xff] %v12516_v4  ;;  %9400 = vmatprep.subr.mxu0 %v12372_v25  ;;  %v1824_v24 = vand.u32 4294901760, %v12494_v21  ;;  %v12539_v25 = vsub.f32 %v156_v63, %v12496_v5  ;;  %v12543_v61 = vsub.f32 %v62_v46, %v12502_v55  ;;  %v77_v63 = vld [vmem:[#allocation2 + $0x110] sm:$0xff] }
  0xb8   :  { %19226 = vst [vmem:[#allocation53_spill] sm:$0xff] %v12519_v13  ;;  %v1830_v12 = vsub.f32 %v12439_v20, %v19227_v31  ;;  %v12529_v23 = vsub.f32 %v12382_v41, %v19228_v47  ;;  %9439 = vmatprep.subr.mxu1 %v1803_v43  ;;  %9401 = vmatpush3.msra.mxu0 %v12340_v52  ;;  %v19230_v47 = vand.u32 4294901760, %v12463_v32  ;;  %v12553_v62 = vand.u32 4294901760, %v78_v36 }
  0xb9   :  { %19229 = vst [vmem:[#allocation54_spill] sm:$0xff] %v12539_v25  ;;  %9440 = vmatpush3.msra.mxu1 %v1691_v44  ;;  %9402 = vmatprep.subr.mxu0 %v12384_v45  ;;  %v12550_v43 = vsub.f32 %v155_v60, %v12507_v53  ;;  %v19233_v46 = vand.u32 4294901760, %v12408_v7  ;;  %v12561_v45 = vsub.f32 %v61_v37, %v12519_v13  ;;  %v19235_v21 = vand.u32 4294901760, %v12486_v3 }
  0xba   :  { %v1837_v28 = vsub.f32 %v12463_v32, %v19230_v47  ;;  %19232 = vst [vmem:[#allocation56_spill] sm:$0xff] %v12553_v62  ;;  %9441 = vmatprep.subr.mxu1 %v1810_v11  ;;  %1465 = vmatprep.mubr.f32.mxu1 %v11954_v26  ;;  %v12565_v60 = vsub.f32 %v12436_v17, %v12479_v15  ;;  %v19234_v47 = vand.u32 4294901760, %v12400_v59  ;;  %v1831_v11 = vand.u32 4294901760, %v1830_v12 }
  0xbb   :  { %19231 = vst [vmem:[#allocation55_spill] sm:$0xff] %v12550_v43  ;;  %v1725_v44 = vsub.f32 %v12408_v7, %v19233_v46  ;;  %9403 = vmatpush3.msra.mxu0 %v12366_v56  ;;  %v1719_v26 = vand.u32 4294901760, %v12529_v23  ;;  %v1571_v46 = vsub.f32 %v12486_v3, %v19235_v21  ;;  %1467 = vmatmul.mubr.f32.gmra.mxu1 %v11964_v9  ;;  %v19236_v37 = vand.u32 4294901760, %v12500_v58  ;;  %v93_v56 = vld [vmem:[#allocation2 + $0x190] sm:$0xff] }
  0xbc   :  { %9442 = vmatpush3.msra.mxu1 %v19234_v47  ;;  %9404 = vmatprep.subr.mxu0 %v12424_v33  ;;  %v12582_v12 = vsub.f32 %v171_v57, %v12516_v4  ;;  %v12584_v23 = vand.u32 4294901760, %v77_v63  ;;  %v94_v47 = vld [vmem:[#allocation2 + $0x198] sm:$0xff]  ;;  %v1838_v21 = vand.u32 4294901760, %v1837_v28  ;;  %v19238_v9 = vand.u32 4294901760, %v12510_v6 }
  0xbd   :  { %v1844_v17 = vsub.f32 %v12500_v58, %v19236_v37  ;;  %9443 = vmatprep.subr.mxu1 %v1817_v29  ;;  %9405 = vmatpush3.msra.mxu0 %v12410_v54  ;;  %v12592_v37 = vsub.f32 %v78_v36, %v12553_v62  ;;  %v1726_v57 = vand.u32 4294901760, %v1725_v44  ;;  %v19239_v59 = vand.u32 4294901760, %v12455_v51 }
  0xbe   :  { %19237 = vst [vmem:[#allocation57_spill] sm:$0xff] %v12584_v23  ;;  %v1577_v31 = vsub.f32 %v12510_v6, %v19238_v9  ;;  %9444 = vmatpush3.msra.mxu1 %v1705_v35  ;;  %9406 = vmatprep.subr.mxu0 %v12448_v30  ;;  %v1572_v9 = vand.u32 4294901760, %v1571_v46  ;;  %v19240_v36 = vand.u32 4294901760, %v12534_v22  ;;  %v12605_v44 = vand.u32 4294901760, %v94_v47 }
  0xbf   :  { %v1732_v29 = vsub.f32 %v12455_v51, %v19239_v59  ;;  %9445 = vmatprep.subr.mxu1 %v1824_v24  ;;  %9407 = vmatpush3.msra.mxu0 %v12426_v27  ;;  %v1845_v59 = vand.u32 4294901760, %v1844_v17  ;;  %v19242_v54 = vand.u32 4294901760, %v12543_v61  ;;  %v12613_v46 = vsub.f32 %v77_v63, %v12584_v23  ;;  %v110_v27 = vld [vmem:[#allocation2 + $0x218] sm:$0xff] }
  0xc0   :  { %v1851_v35 = vsub.f32 %v12534_v22, %v19240_v36  ;;  %19241 = vst [vmem:[#allocation58_spill] sm:$0xff] %v12605_v44  ;;  %9446 = vmatpush3.msra.mxu1 %v1712_v14  ;;  %9408 = vmatprep.subr.mxu0 %v12479_v15  ;;  %v1578_v36 = vand.u32 4294901760, %v1577_v31  ;;  %v19243_v33 = vand.u32 4294901760, %v12471_v10  ;;  %v12620_v17 = vand.u32 4294901760, %v93_v56 }
  0xc1   :  { %v1586_v28 = vsub.f32 %v12543_v61, %v19242_v54  ;;  %9447 = vmatprep.subr.mxu1 %v1831_v11  ;;  %9409 = vmatpush3.msra.mxu0 %v12496_v5  ;;  %v1733_v54 = vand.u32 4294901760, %v1732_v29  ;;  %v19245_v24 = vand.u32 4294901760, %v12561_v45  ;;  %v19246_v11 = vand.u32 4294901760, %v12565_v60 }
  0xc2   :  { %v1739_v14 = vsub.f32 %v12471_v10, %v19243_v33  ;;  %19244 = vst [vmem:[#allocation59_spill] sm:$0xff] %v12620_v17  ;;  %9448 = vmatpush3.msra.mxu1 %v1719_v26  ;;  %9410 = vmatprep.subr.mxu0 %v12516_v4  ;;  %v1852_v33 = vand.u32 4294901760, %v1851_v35  ;;  %v19247_v26 = vand.u32 4294901760, %v12539_v25  ;;  %v12635_v29 = vsub.f32 %v94_v47, %v12605_v44 }
  0xc3   :  { %v1592_v63 = vsub.f32 %v12561_v45, %v19245_v24  ;;  %v1858_v31 = vsub.f32 %v12565_v60, %v19246_v11  ;;  %9449 = vmatprep.subr.mxu1 %v1838_v21  ;;  %9411 = vmatpush3.msra.mxu0 %v12507_v53  ;;  %v1587_v24 = vand.u32 4294901760, %v1586_v28  ;;  %v19248_v4 = vand.u32 4294901760, %v12582_v12  ;;  %v109_v21 = vld [vmem:[#allocation2 + $0x210] sm:$0xff] }
  0xc4   :  { %v1746_v15 = vsub.f32 %v12539_v25, %v19247_v26  ;;  %1573 = vmatprep.mubr.f32.mxu0 %v1572_v9  ;;  %9450 = vmatpush3.msra.mxu1 %v1726_v57  ;;  %v18193_v5 = vand.u32 4294901760, %v12613_v46  ;;  %v1740_v35 = vand.u32 4294901760, %v1739_v14  ;;  %v19249_v53 = vand.u32 4294901760, %v12592_v37 }
  0xc5   :  { %v1865_v11 = vsub.f32 %v12582_v12, %v19248_v4  ;;  %1579 = vmatmul.mubr.f32.vlgmr.msra.gmra.mxu0 %v1578_v36  ;;  %9451 = vmatprep.subr.mxu1 %v1845_v59  ;;  %v12645_v47 = vsub.f32 %v93_v56, %v12620_v17  ;;  %v12647_v9 = vand.u32 4294901760, %v110_v27  ;;  %v1593_v57 = vand.u32 4294901760, %v1592_v63 }
  0xc6   :  { %v1601_v26 = vsub.f32 %v12592_v37, %v19249_v53  ;;  %9474 = vmatprep.subr.mxu0 %v12154_v8  ;;  %9452 = vmatpush3.msra.mxu1 %v1733_v54  ;;  %v1859_v4 = vand.u32 4294901760, %v1858_v31  ;;  %v19251_v28 = vand.u32 4294901760, %v12550_v43  ;;  %v1747_v59 = vand.u32 4294901760, %v1746_v15 }
  0xc7   :  { %19250 = vst [vmem:[#allocation60_spill] sm:$0xff] %v12647_v9  ;;  %9475 = vmatpush3.msra.mxu0 %v12149_v16  ;;  %9453 = vmatprep.subr.mxu1 %v1852_v33  ;;  %v18192_v53 = vand.u32 4294901760, %v12635_v29  ;;  %v12655_v14 = vand.u32 4294901760, %v109_v21  ;;  %v1866_v56 = vand.u32 4294901760, %v1865_v11  ;;  %v1607_v54 = vsub.f32 %v12613_v46, %v18193_v5  ;;  %v19266_v5 = vld [vmem:[#allocation22_spill] sm:$0xff] }
  0xc8   :  { %v1753_v36 = vsub.f32 %v12550_v43, %v19251_v28  ;;  %9476 = vmatprep.subr.mxu0 %v12173_v48  ;;  %1588 = vmatprep.mubr.f32.mxu0 %v1587_v24  ;;  %v1602_v63 = vand.u32 4294901760, %v1601_v26  ;;  %v18191_v31 = vand.u32 4294901760, %v12645_v47  ;;  %v12664_v15 = vsub.f32 %v110_v27, %v12647_v9 }
  0xc9   :  { %19252 = vst [vmem:[#allocation61_spill] sm:$0xff] %v12655_v14  ;;  %9454 = vmatpush3.msra.mxu1 %v1740_v35  ;;  %9477 = vmatpush3.msra.mxu0 %v12165_v39  ;;  %v1616_v24 = vsub.f32 %v12635_v29, %v18192_v53  ;;  %v12671_v11 = vsub.f32 %v109_v21, %v12655_v14  ;;  %v1608_v35 = vand.u32 4294901760, %v1607_v54  ;;  %v19255_v54 = vld [vmem:[#allocation29_spill] sm:$0xff] }
  0xca   :  { %1594 = vmatmul.mubr.f32.gmra.mxu0 %v1593_v57  ;;  %9455 = vmatprep.subr.mxu1 %v1859_v4  ;;  %v1754_v33 = vand.u32 4294901760, %v1753_v36  ;;  %v1622_v27 = vsub.f32 %v12645_v47, %v18191_v31  ;;  %v18189_v26 = vand.u32 4294901760, %v12664_v15  ;;  %v19253_v36 = vld [vmem:[#allocation34_spill] sm:$0xff]  ;;  %v19262_v31 = vld [vmem:[#allocation21_spill] sm:$0xff] }
  0xcb   :  { %9478 = vmatprep.subr.mxu0 %v12189_v2  ;;  %9456 = vmatpush3.msra.mxu1 %v1747_v59  ;;  %v1617_v21 = vand.u32 4294901760, %v1616_v24  ;;  %v18190_v57 = vand.u32 4294901760, %v12671_v11  ;;  %v19254_v59 = vld [vmem:[#allocation17_spill] sm:$0xff]  ;;  %v19257_v24 = vld [vmem:[#allocation40_spill] sm:$0xff] }
  0xcc   :  { %9479 = vmatpush3.msra.mxu0 %v12179_v49  ;;  %9457 = vmatprep.subr.mxu1 %v1866_v56  ;;  %v1623_v4 = vand.u32 4294901760, %v1622_v27  ;;  %v1631_v28 = vsub.f32 %v12664_v15, %v18189_v26  ;;  %v19259_v27 = vld [vmem:[#allocation36_spill] sm:$0xff]  ;;  %v19260_v26 = vld [vmem:[#allocation39_spill] sm:$0xff]  ;;  %v19265_v53 = vld [vmem:[#allocation13_spill] sm:$0xff] }
  0xcd   :  { %9480 = vmatprep.subr.mxu0 %v12225_v18  ;;  %1603 = vmatprep.mubr.f32.mxu0 %v1602_v63  ;;  %v1637_v56 = vsub.f32 %v12671_v11, %v18190_v57  ;;  %v19256_v63 = vld [vmem:[#allocation16_spill] sm:$0xff] }
  0xce   :  { %9458 = vmatpush3.msra.mxu1 %v1754_v33  ;;  %1869 = vmatprep.mubr.f32.mxu1 %v12441_v1  ;;  %v1632_v33 = vand.u32 4294901760, %v1631_v28  ;;  %v19261_v57 = vld [vmem:[#allocation28_spill] sm:$0xff]  ;;  %v19277_v1 = vld [vmem:[#allocation11_spill] sm:$0xff] }
  0xcf   :  { %9481 = vmatpush3.msra.mxu0 %v12201_v40  ;;  %1871 = vmatmul.mubr.f32.vlgmr.msra.gmra.mxu1 %v12465_v0  ;;  %v19264_v28 = vld [vmem:[#allocation20_spill] sm:$0xff]  ;;  %v19274_v0 = vld [vmem:[#allocation33_spill] sm:$0xff] }
  0xd0   :  { %1609 = vmatmul.mubr.f32.gmra.mxu0 %v1608_v35  ;;  %9482 = vmatprep.subr.mxu0 %v12240_v50  ;;  %v19258_v35 = vld [vmem:[#allocation18_spill] sm:$0xff] }
  0xd1   :  { %9521 = vmatprep.subr.mxu1 %v12127_v34  ;;  %9483 = vmatpush3.msra.mxu0 %v12230_v42 }
  0xd2   :  { %9522 = vmatpush3.msra.mxu1 %v12129_v38  ;;  %9484 = vmatprep.subr.mxu0 %v19253_v36 }
  0xd3   :  { %9523 = vmatprep.subr.mxu1 %v19254_v59  ;;  %1618 = vmatprep.mubr.f32.mxu0 %v1617_v21  ;;  %v1638_v21 = vand.u32 4294901760, %v1637_v56  ;;  %v19267_v56 = vld [vmem:[#allocation15_spill] sm:$0xff] }
  0xd4   :  { %1876 = vmatprep.mubr.f32.mxu1 %v12502_v55  ;;  %9485 = vmatpush3.msra.mxu0 %v19255_v54  ;;  %v19271_v55 = vld [vmem:[#allocation24_spill] sm:$0xff] }
  0xd5   :  { %9524 = vmatpush3.msra.mxu1 %v19256_v63  ;;  %1624 = vmatmul.mubr.f32.gmra.mxu0 %v1623_v4  ;;  %v19263_v4 = vld [vmem:[#allocation41_spill] sm:$0xff] }
  0xd6   :  { %1878 = vmatmul.mubr.f32.gmra.mxu1 %v12519_v13  ;;  %9486 = vmatprep.subr.mxu0 %v19257_v24  ;;  %v19268_v13 = vld [vmem:[#allocation23_spill] sm:$0xff] }
  0xd7   :  { %9525 = vmatprep.subr.mxu1 %v19258_v35  ;;  %9487 = vmatpush3.msra.mxu0 %v19259_v27 }
  0xd8   :  { %9526 = vmatpush3.msra.mxu1 %v19260_v26  ;;  %9488 = vmatprep.subr.mxu0 %v19261_v57 }
  0xd9   :  { %9527 = vmatprep.subr.mxu1 %v19262_v31  ;;  %1633 = vmatprep.mubr.f32.mxu0 %v1632_v33  ;;  %v19269_v33 = vld [vmem:[#allocation26_spill] sm:$0xff] }
  0xda   :  { %1883 = vmatprep.mubr.f32.mxu1 %v12553_v62  ;;  %9489 = vmatpush3.msra.mxu0 %v19263_v4  ;;  %v19270_v62 = vld [vmem:[#allocation35_spill] sm:$0xff] }
  0xdb   :  { %9528 = vmatpush3.msra.mxu1 %v19264_v28  ;;  %1639 = vmatmul.mubr.f32.gmra.mxu0 %v1638_v21  ;;  %v19272_v21 = vld [vmem:[#allocation30_spill] sm:$0xff] }
  0xdc   :  { %1885 = vmatmul.mubr.f32.gmra.mxu1 %v12584_v23  ;;  %9490 = vmatprep.subr.mxu0 %v19265_v53  ;;  %v19273_v23 = vld [vmem:[#allocation27_spill] sm:$0xff] }
  0xdd   :  { %9529 = vmatprep.subr.mxu1 %v19266_v5  ;;  %9491 = vmatpush3.msra.mxu0 %v19267_v56 }
  0xde   :  { %9530 = vmatpush3.msra.mxu1 %v19268_v13  ;;  %9492 = vmatprep.subr.mxu0 %v12403_v19 }
  0xdf   :  { %9531 = vmatprep.subr.mxu1 %v19269_v33  ;;  %1890 = vmatprep.mubr.f32.mxu1 %v12605_v44  ;;  %v19275_v44 = vld [vmem:[#allocation14_spill] sm:$0xff] }
  0xe0   :  { %9493 = vmatpush3.msra.mxu0 %v19270_v62  ;;  %9532 = vmatpush3.msra.mxu1 %v19271_v55 }
  0xe1   :  { %1892 = vmatmul.mubr.f32.gmra.mxu1 %v12620_v17  ;;  %9494 = vmatprep.subr.mxu0 %v12439_v20  ;;  %v19276_v17 = vld [vmem:[#allocation38_spill] sm:$0xff] }
  0xe2   :  { %9533 = vmatprep.subr.mxu1 %v19272_v21  ;;  %9495 = vmatpush3.msra.mxu0 %v12382_v41 }
  0xe3   :  { %9534 = vmatpush3.msra.mxu1 %v19273_v23  ;;  %9496 = vmatprep.subr.mxu0 %v12463_v32  ;;  %v19278_v32 = vld [vmem:[#allocation12_spill] sm:$0xff] }
  0xe4   :  { %9535 = vmatprep.subr.mxu1 %v19274_v0  ;;  %1897 = vmatprep.mubr.f32.mxu1 %v12647_v9  ;;  %v19279_v9 = vld [vmem:[#allocation25_spill] sm:$0xff] }
  0xe5   :  { %9497 = vmatpush3.msra.mxu0 %v12408_v7  ;;  %9536 = vmatpush3.msra.mxu1 %v19275_v44  ;;  %v19280_v44 = vld [vmem:[#allocation19_spill] sm:$0xff] }
  0xe6   :  { %1899 = vmatmul.mubr.f32.gmra.mxu1 %v12655_v14  ;;  %9498 = vmatprep.subr.mxu0 %v12500_v58  ;;  %v19281_v14 = vld [vmem:[#allocation44_spill] sm:$0xff] }
  0xe7   :  { %9537 = vmatprep.subr.mxu1 %v19276_v17  ;;  %9499 = vmatpush3.msra.mxu0 %v12455_v51 }
  0xe8   :  { %9538 = vmatpush3.msra.mxu1 %v19277_v1  ;;  %9500 = vmatprep.subr.mxu0 %v12534_v22 }
  0xe9   :  { %9539 = vmatprep.subr.mxu1 %v19278_v32  ;;  %9501 = vmatpush3.msra.mxu0 %v12471_v10  ;;  %v19282_v32 = vld [vmem:[#allocation37_spill] sm:$0xff] }
  0xea   :  { %9540 = vmatpush3.msra.mxu1 %v19279_v9  ;;  %9502 = vmatprep.subr.mxu0 %v12565_v60  ;;  %v19283_v9 = vld [vmem:[#allocation43_spill] sm:$0xff] }
  0xeb   :  { %9541 = vmatprep.subr.mxu1 %v19280_v44  ;;  %9503 = vmatpush3.msra.mxu0 %v12539_v25  ;;  %v19284_v44 = vand.u32 4294901760, %v12154_v8  ;;  %v19285_v25 = vld [vmem:[#allocation42_spill] sm:$0xff]  ;;  %v19290_v8 = vld [vmem:[#allocation48_spill] sm:$0xff] }
  0xec   :  { %9542 = vmatpush3.msra.mxu1 %v12340_v52  ;;  %9504 = vmatprep.subr.mxu0 %v12582_v12  ;;  %v19286_v52 = vand.u32 4294901760, %v12149_v16  ;;  %v19292_v16 = vld [vmem:[#allocation49_spill] sm:$0xff] }
  0xed   :  { %9543 = vmatprep.subr.mxu1 %v19281_v14  ;;  %9505 = vmatpush3.msra.mxu0 %v12550_v43  ;;  %v19287_v43 = vand.u32 4294901760, %v12173_v48  ;;  %v19289_v14 = vand.u32 4294901760, %v12165_v39  ;;  %v19294_v48 = vld [vmem:[#allocation52_spill] sm:$0xff]  ;;  %v19296_v39 = vld [vmem:[#allocation51_spill] sm:$0xff] }
  0xee   :  { %2034 = vmatprep.mubr.f32.mxu0 %v12486_v3  ;;  %9544 = vmatpush3.msra.mxu1 %v19282_v32  ;;  %v19288_v32 = vld [vmem:[#allocation32_spill] sm:$0xff] }
  0xef   :  { %2037 = vmatmul.mubr.f32.vlgmr.msra.gmra.mxu0 %v12510_v6  ;;  %9545 = vmatprep.subr.mxu1 %v19283_v9 }
  0xf0   :  { %9568 = vmatprep.subr.mxu0 %v19284_v44  ;;  %9546 = vmatpush3.msra.mxu1 %v19285_v25  ;;  %v19291_v44 = vand.u32 4294901760, %v12189_v2  ;;  %v19298_v2 = vand.u32 4294901760, %v12201_v40  ;;  %v19303_v40 = vand.u32 4294901760, %v12543_v61 }
  0xf1   :  { %9569 = vmatpush3.msra.mxu0 %v19286_v52  ;;  %9547 = vmatprep.subr.mxu1 %v12448_v30  ;;  %v19293_v52 = vand.u32 4294901760, %v12179_v49  ;;  %v19300_v49 = vand.u32 4294901760, %v12240_v50  ;;  %v19304_v50 = vand.u32 4294901760, %v19255_v54  ;;  %v19314_v54 = vand.u32 4294901760, %v12403_v19  ;;  %v200_v19 = vld [vmem:[#allocation5 + $0x268] sm:$0xff] }
  0xf2   :  { %9570 = vmatprep.subr.mxu0 %v19287_v43  ;;  %2043 = vmatprep.mubr.f32.mxu0 %v12543_v61  ;;  %v19295_v43 = vand.u32 4294901760, %v12225_v18  ;;  %v19301_v18 = vand.u32 4294901760, %v12230_v42  ;;  %v19307_v42 = vand.u32 4294901760, %v19259_v27  ;;  %v19308_v61 = vand.u32 4294901760, %v19261_v57 }
  0xf3   :  { %9548 = vmatpush3.msra.mxu1 %v19288_v32  ;;  %9571 = vmatpush3.msra.mxu0 %v19289_v14  ;;  %v19297_v14 = vand.u32 4294901760, %v12486_v3  ;;  %v19302_v3 = vand.u32 4294901760, %v19253_v36  ;;  %v218_v36 = vld [vmem:[#allocation5 + $0x2f8] sm:$0xff]  ;;  %v19312_v57 = vand.u32 4294901760, %v19265_v53  ;;  %v19318_v53 = vand.u32 4294901760, %v19270_v62 }
  0xf4   :  { %2046 = vmatmul.mubr.f32.gmra.mxu0 %v12561_v45  ;;  %9549 = vmatprep.subr.mxu1 %v19290_v8  ;;  %v19324_v62 = vand.u32 4294901760, %v12382_v41 }
  0xf5   :  { %9572 = vmatprep.subr.mxu0 %v19291_v44  ;;  %9550 = vmatpush3.msra.mxu1 %v19292_v16  ;;  %v19299_v44 = vand.u32 4294901760, %v12510_v6  ;;  %v19310_v6 = vand.u32 4294901760, %v19263_v4 }
  0xf6   :  { %9573 = vmatpush3.msra.mxu0 %v19293_v52  ;;  %9551 = vmatprep.subr.mxu1 %v19294_v48 }
  0xf7   :  { %9574 = vmatprep.subr.mxu0 %v19295_v43  ;;  %2052 = vmatprep.mubr.f32.mxu0 %v12592_v37 }
  0xf8   :  { %9552 = vmatpush3.msra.mxu1 %v19296_v39  ;;  %2177 = vmatprep.mubr.f32.mxu1 %v19297_v14  ;;  %v12855_v14 = vand.u32 4294901760, %v200_v19 }
  0xf9   :  { %9575 = vmatpush3.msra.mxu0 %v19298_v2  ;;  %2181 = vmatmul.mubr.f32.vlgmr.msra.gmra.mxu1 %v19299_v44  ;;  %v199_v44 = vld [vmem:[#allocation5 + $0x260] sm:$0xff] }
  0xfa   :  { %2055 = vmatmul.mubr.f32.gmra.mxu0 %v12613_v46  ;;  %9576 = vmatprep.subr.mxu0 %v19300_v49  ;;  %19328 = vst [vmem:[#allocation36_spill] sm:$0xff] %v12855_v14  ;;  %v214_v49 = vld [vmem:[#allocation5 + $0x2d8] sm:$0xff] }
  0xfb   :  { %9615 = vmatprep.subr.mxu1 %v12127_v34  ;;  %9577 = vmatpush3.msra.mxu0 %v19301_v18  ;;  %v19305_v34 = vand.u32 4294901760, %v12561_v45  ;;  %v19309_v45 = vand.u32 4294901760, %v12592_v37  ;;  %v19313_v37 = vand.u32 4294901760, %v19267_v56  ;;  %v19321_v56 = vand.u32 4294901760, %v12439_v20  ;;  %v19326_v20 = vld [vmem:[#allocation46_spill] sm:$0xff] }
  0xfc   :  { %9616 = vmatpush3.msra.mxu1 %v12129_v38  ;;  %9578 = vmatprep.subr.mxu0 %v19302_v3  ;;  %v19306_v38 = vand.u32 4294901760, %v19257_v24  ;;  %v19332_v3 = vand.u32 4294901760, %v12408_v7 }
  0xfd   :  { %9617 = vmatprep.subr.mxu1 %v19254_v59  ;;  %2061 = vmatprep.mubr.f32.mxu0 %v12635_v29  ;;  %v202_v59 = vld [vmem:[#allocation5 + $0x278] sm:$0xff] }
  0xfe   :  { %2188 = vmatprep.mubr.f32.mxu1 %v19303_v40  ;;  %9579 = vmatpush3.msra.mxu0 %v19304_v50  ;;  %v12825_v24 = vand.u32 4294901760, %v202_v59  ;;  %v19333_v40 = vld [vmem:[#allocation14_spill] sm:$0xff]  ;;  %v19336_v50 = vand.u32 4294901760, %v12671_v11 }
  0xff   :  { %9618 = vmatpush3.msra.mxu1 %v19256_v63  ;;  %2064 = vmatmul.mubr.f32.gmra.mxu0 %v12645_v47  ;;  %v12823_v63 = vand.u32 4294901760, %v218_v36 }
 0x100   :  { %2192 = vmatmul.mubr.f32.gmra.mxu1 %v19305_v34  ;;  %9580 = vmatprep.subr.mxu0 %v19306_v38  ;;  %19316 = vst [vmem:[#allocation17_spill] sm:$0xff] %v12825_v24  ;;  %v19337_v34 = vand.u32 4294901760, %v12500_v58 }
 0x101   :  { %9619 = vmatprep.subr.mxu1 %v19258_v35  ;;  %9581 = vmatpush3.msra.mxu0 %v19307_v42  ;;  %19315 = vst [vmem:[#allocation34_spill] sm:$0xff] %v12823_v63  ;;  %v216_v35 = vld [vmem:[#allocation5 + $0x2e8] sm:$0xff]  ;;  %v12850_v43 = vsub.f32 %v218_v36, %v12823_v63  ;;  %v198_v42 = vld [vmem:[#allocation5 + $0x258] sm:$0xff]  ;;  %v12891_v36 = vand.u32 4294901760, %v199_v44 }
 0x102   :  { %9620 = vmatpush3.msra.mxu1 %v19260_v26  ;;  %9582 = vmatprep.subr.mxu0 %v19308_v61  ;;  %v19311_v26 = vand.u32 4294901760, %v12613_v46  ;;  %v201_v46 = vld [vmem:[#allocation5 + $0x270] sm:$0xff] }
 0x103   :  { %9621 = vmatprep.subr.mxu1 %v19262_v31  ;;  %2070 = vmatprep.mubr.f32.mxu0 %v12664_v15  ;;  %v217_v31 = vld [vmem:[#allocation5 + $0x2f0] sm:$0xff]  ;;  %v12839_v52 = vand.u32 4294901760, %v201_v46  ;;  %v18223_v38 = vand.u32 4294901760, %v12850_v43  ;;  %19340 = vst [vmem:[#allocation13_spill] sm:$0xff] %v12891_v36 }
 0x104   :  { %2199 = vmatprep.mubr.f32.mxu1 %v19309_v45  ;;  %9583 = vmatpush3.msra.mxu0 %v19310_v6  ;;  %v19338_v45 = vand.u32 4294901760, %v12455_v51  ;;  %v12889_v6 = vsub.f32 %v200_v19, %v12855_v14  ;;  %v212_v19 = vld [vmem:[#allocation5 + $0x2c8] sm:$0xff] }
 0x105   :  { %9622 = vmatpush3.msra.mxu1 %v19264_v28  ;;  %2073 = vmatmul.mubr.f32.gmra.mxu0 %v12671_v11  ;;  %v19320_v28 = vand.u32 4294901760, %v12645_v47  ;;  %19322 = vst [vmem:[#allocation16_spill] sm:$0xff] %v12839_v52  ;;  %v19327_v47 = vand.u32 4294901760, %v19326_v20  ;;  %v12893_v11 = vand.u32 4294901760, %v214_v49  ;;  %v211_v20 = vld [vmem:[#allocation5 + $0x2c0] sm:$0xff] }
 0x106   :  { %2203 = vmatmul.mubr.f32.gmra.mxu1 %v19311_v26  ;;  %9584 = vmatprep.subr.mxu0 %v19312_v57  ;;  %19339 = vst [vmem:[#allocation20_spill] sm:$0xff] %v12889_v6  ;;  %v19344_v57 = vld [vmem:[#allocation12_spill] sm:$0xff] }
 0x107   :  { %9623 = vmatprep.subr.mxu1 %v19266_v5  ;;  %9585 = vmatpush3.msra.mxu0 %v19313_v37  ;;  %v19317_v5 = vand.u32 4294901760, %v12635_v29  ;;  %v215_v29 = vld [vmem:[#allocation5 + $0x2e0] sm:$0xff]  ;;  %19341 = vst [vmem:[#allocation22_spill] sm:$0xff] %v12893_v11  ;;  %v19345_v37 = vand.u32 4294901760, %v12471_v10 }
 0x108   :  { %9624 = vmatpush3.msra.mxu1 %v19268_v13  ;;  %9586 = vmatprep.subr.mxu0 %v19314_v54  ;;  %v9130_v27 = vpop.f32.mrf.mxu0  ;;  %v12833_v13 = vand.u32 4294901760, %v217_v31  ;;  %v12860_v41 = vand.u32 4294901760, %v215_v29  ;;  %v213_v54 = vld [vmem:[#allocation5 + $0x2d0] sm:$0xff] }
 0x109   :  { %9625 = vmatprep.subr.mxu1 %v19269_v33  ;;  %2210 = vmatprep.mubr.f32.mxu1 %v19317_v5  ;;  %v12841_v33 = vand.u32 4294901760, %v216_v35  ;;  %v19348_v5 = vand.u32 4294901760, %v12565_v60  ;;  %v196_v60 = vld [vmem:[#allocation5 + $0x248] sm:$0xff] }
 0x10a   :  { %9587 = vmatpush3.msra.mxu0 %v19318_v53  ;;  %9626 = vmatpush3.msra.mxu1 %v19271_v55  ;;  %19319 = vst [vmem:[#allocation29_spill] sm:$0xff] %v12833_v13  ;;  %v9131_v4 = vpop.f32.mrf.mxu0  ;;  %v12847_v55 = vsub.f32 %v202_v59, %v12825_v24  ;;  %19330 = vst [vmem:[#allocation39_spill] sm:$0xff] %v12860_v41  ;;  %v12863_v18 = vsub.f32 %v217_v31, %v12833_v13  ;;  %v19342_v59 = vand.u32 4294901760, %v12534_v22 }
 0x10b   :  { %2214 = vmatmul.mubr.f32.gmra.mxu1 %v19320_v28  ;;  %9588 = vmatprep.subr.mxu0 %v19321_v56  ;;  %19323 = vst [vmem:[#allocation40_spill] sm:$0xff] %v12841_v33  ;;  %v9132_v2 = vadd.f32 %v9131_v4, %v9130_v27  ;;  %v12906_v31 = vand.u32 4294901760, %v198_v42  ;;  %v19347_v27 = vld [vmem:[#allocation25_spill] sm:$0xff]  ;;  %v12916_v53 = vsub.f32 %v12850_v43, %v18223_v38  ;;  %v19349_v4 = vld [vmem:[#allocation19_spill] sm:$0xff]  ;;  %v19350_v28 = vld [vmem:[#allocation54_spill] sm:$0xff] }
 0x10c   :  { %9627 = vmatprep.subr.mxu1 %v19272_v21  ;;  %9589 = vmatpush3.msra.mxu0 %v19324_v62  ;;  %19325 = vst [vmem:[#allocation18_spill] sm:$0xff] %v12847_v55  ;;  %v19329_v21 = vand.u32 4294901760, %v12664_v15  ;;  %19331 = vst [vmem:[#allocation28_spill] sm:$0xff] %v12863_v18  ;;  %v12877_v15 = vsub.f32 %v216_v35, %v12841_v33  ;;  %v18222_v7 = vand.u32 4294901760, %v12847_v55  ;;  %v18221_v26 = vand.u32 4294901760, %v12863_v18 }
 0x10d   :  { %9628 = vmatpush3.msra.mxu1 %v19273_v23  ;;  %9590 = vmatprep.subr.mxu0 %v19327_v47  ;;  %v12868_v23 = vld [vmem:[%s18005_s2] ss:$0 sm:$0xff]  ;;  %19346 = vst [vmem:[#allocation23_spill] sm:$0xff] %v12906_v31  ;;  %v19351_v56 = vand.u32 4294901760, %v19350_v28  ;;  %v18218_v62 = vand.u32 4294901760, %v12889_v6  ;;  %v19368_v28 = vld [vmem:[#allocation47_spill] sm:$0xff] }
 0x10e   :  { %9629 = vmatprep.subr.mxu1 %v19274_v0  ;;  %2221 = vmatprep.mubr.f32.mxu1 %v19329_v21  ;;  %v12874_v0 = vsub.f32 %v201_v46, %v12839_v52  ;;  %19335 = vst [vmem:[#allocation41_spill] sm:$0xff] %v12877_v15  ;;  %v495_v58 = vadd.f32 %v9132_v2, %v12868_v23  ;;  %v197_v46 = vld [vmem:[#allocation5 + $0x250] sm:$0xff]  ;;  %v18219_v22 = vand.u32 4294901760, %v12877_v15  ;;  %v195_v47 = vld [vmem:[#allocation5 + $0x240] sm:$0xff]  ;;  %s11431_s2 = smov [#allocation7]  }
 0x10f   :  { %9591 = vmatpush3.msra.mxu0 %v19332_v3  ;;  %9630 = vmatpush3.msra.mxu1 %v19333_v40  ;;  %v12921_v10 = vsub.f32 %v12847_v55, %v18222_v7  ;;  %v12931_v2 = vsub.f32 %v214_v49, %v12893_v11  ;;  %v19354_v3 = vld [vmem:[#allocation31_spill] sm:$0xff]  ;;  %v19355_v40 = vand.u32 4294901760, %v12582_v12  ;;  %v19358_v49 = vld [vmem:[#allocation44_spill] sm:$0xff]  ;;  %s9084_s25 = sshll.u32 %s11431_s2, 4  ;;  %s9085_s25 = int_to_ptr.vmem [resolvable:$true] %s9084_s25 }
 0x110   :  { %19334 = vst [vmem:[#allocation21_spill] sm:$0xff] %v12874_v0  ;;  %2225 = vmatmul.mubr.f32.gmra.mxu1 %v19336_v50  ;;  %9592 = vmatprep.subr.mxu0 %v19337_v34  ;;  %v9177_v61 = vpop.f32.mrf.mxu1  ;;  %v12938_v50 = vand.u32 4294901760, %v213_v54  ;;  %v12945_v34 = vand.u32 4294901760, %v197_v46  ;;  %v209_v7 = vld [vmem:[#allocation5 + $0x2b0] sm:$0xff]  ;;  %s11400_s26 = scalar_lea.vmem %s9085_s25, 640  ;;  %p11405_p11 = scmp.lt.s32.totalorder %s9085_s25, %s9085_s25 }
 0x111   :  { %9631 = vmatprep.subr.mxu1 %v19276_v17  ;;  %9593 = vmatpush3.msra.mxu0 %v19338_v45  ;;  %v12901_v17 = vsub.f32 %v215_v29, %v12860_v41  ;;  %v12927_v29 = vsub.f32 %v199_v44, %v12891_v36  ;;  %19353 = vst [vmem:[#allocation35_spill] sm:$0xff] %v12931_v2  ;;  %v19359_v45 = vld [vmem:[#allocation55_spill] sm:$0xff]  ;;  %p11401_p10 = scmp.ne.s32.totalorder %s9085_s25, %s11400_s26  ;;  %p11406_p12 = scmp.lt.s32.totalorder %s11400_s26, %s11400_s26 }
 0x112   :  { %9632 = vmatpush3.msra.mxu1 %v19277_v1  ;;  %9594 = vmatprep.subr.mxu0 %v19342_v59  ;;  %v9178_v51 = vpop.f32.mrf.mxu1  ;;  %v18220_v1 = vand.u32 4294901760, %v12874_v0  ;;  %19356 = vst [vmem:[#allocation24_spill] sm:$0xff] %v12938_v50  ;;  %v12943_v44 = vsub.f32 %v12863_v18, %v18221_v26  ;;  %19357 = vst [vmem:[#allocation30_spill] sm:$0xff] %v12945_v34  ;;  %v12952_v59 = vsub.f32 %v198_v42, %v12906_v31  ;;  %v193_v26 = vld [vmem:[#allocation5 + $0x230] sm:$0xff] }
 0x113   :  { %19343 = vst [vmem:[#allocation15_spill] sm:$0xff] %v12901_v17  ;;  %9633 = vmatprep.subr.mxu1 %v19344_v57  ;;  %9595 = vmatpush3.msra.mxu0 %v19345_v37  ;;  %v9179_v35 = vadd.f32 %v9178_v51, %v9177_v61  ;;  %19352 = vst [vmem:[#allocation26_spill] sm:$0xff] %v12927_v29  ;;  %v18224_v61 = vand.u32 4294901760, %v12901_v17  ;;  %v12959_v51 = vand.u32 4294901760, %v212_v19  ;;  %v19363_v37 = vld [vmem:[#allocation45_spill] sm:$0xff]  ;;  %v12969_v42 = vand.u32 4294901760, %v196_v60  ;;  %p11407_p13 = por %p11406_p12, %p11405_p11 }
 0x114   :  { %9634 = vmatpush3.msra.mxu1 %v19347_v27  ;;  %9596 = vmatprep.subr.mxu0 %v19348_v5  ;;  %19361 = vst [vmem:[#allocation27_spill] sm:$0xff] %v12952_v59  ;;  %v12957_v12 = vsub.f32 %v12874_v0, %v18220_v1  ;;  %v12964_v57 = vsub.f32 %v12877_v15, %v18219_v22  ;;  %v12971_v5 = vand.u32 4294901760, %v211_v20  ;;  %v194_v22 = vld [vmem:[#allocation5 + $0x238] sm:$0xff] }
 0x115   :  { %9635 = vmatprep.subr.mxu1 %v19349_v4  ;;  %9597 = vmatpush3.msra.mxu0 %v19351_v56  ;;  %v12933_v21 = vadd.f32 %v9179_v35, %v495_v58  ;;  %v19360_v58 = vand.u32 4294901760, %v19359_v45  ;;  %19362 = vst [vmem:[#allocation33_spill] sm:$0xff] %v12959_v51  ;;  %v19364_v35 = vld [vmem:[#allocation37_spill] sm:$0xff]  ;;  %19365 = vst [vmem:[#allocation38_spill] sm:$0xff] %v12969_v42  ;;  %v12973_v4 = vand.u32 4294901760, %v195_v47  ;;  %v18230_v45 = vand.u32 4294901760, %v12931_v2  ;;  %p11408_p0 = pnand %p11407_p13, %p11401_p10 }
 0x116   :  { %9636 = vmatpush3.msra.mxu1 %v19354_v3  ;;  %9598 = vmatprep.subr.mxu0 %v19355_v40  ;;  %19366 = vst [vmem:[#allocation11_spill] sm:$0xff] %v12971_v5  ;;  %v12981_v3 = vsub.f32 %v12889_v6, %v18218_v62  ;;  %v18225_v40 = vand.u32 4294901760, %v12927_v29  ;;  %v12994_v62 = vsub.f32 %v12901_v17, %v18224_v61  ;;  %v13033_v27 = vand.u32 4294901760, %v194_v22  ;;  %v47_v6 = vld [vmem:[#allocation2 + $0x20] sm:$0xff] }
 0x117   :  { %9637 = vmatprep.subr.mxu1 %v19358_v49  ;;  %9599 = vmatpush3.msra.mxu0 %v19360_v58  ;;  %19367 = vst [vmem:[#allocation43_spill] sm:$0xff] %v12973_v4  ;;  %v210_v49 = vld [vmem:[#allocation5 + $0x2b8] sm:$0xff]  ;;  %v12997_v1 = vsub.f32 %v213_v54, %v12938_v50  ;;  %v13005_v38 = vsub.f32 %v212_v19, %v12959_v51 }
 0x118   :  { %2391 = vmatprep.mubr.f32.mxu0 %v19363_v37  ;;  %9638 = vmatpush3.msra.mxu1 %v19364_v35  ;;  %v19372_v35 = vld [vmem:[#allocation50_spill] sm:$0xff]  ;;  %v13010_v54 = vsub.f32 %v196_v60, %v12969_v42  ;;  %v13018_v56 = vsub.f32 %v211_v20, %v12971_v5  ;;  %v13026_v60 = vsub.f32 %v12927_v29, %v18225_v40  ;;  %v19378_v20 = vld [vmem:[#allocation53_spill] sm:$0xff] }
 0x119   :  { %2393 = vmatmul.mubr.f32.vlgmr.msra.gmra.mxu0 %v19368_v28  ;;  %9639 = vmatprep.subr.mxu1 %v19283_v9  ;;  %v9133_v58 = vpop.f32.mrf.mxu0  ;;  %v12989_v9 = vsub.f32 %v197_v46, %v12945_v34  ;;  %19370 = vst [vmem:[#allocation32_spill] sm:$0xff] %v12997_v1  ;;  %19371 = vst [vmem:[#allocation48_spill] sm:$0xff] %v13005_v38  ;;  %v13038_v46 = vand.u32 4294901760, %v209_v7 }
 0x11a   :  { %9662 = vmatprep.subr.mxu0 %v12823_v63  ;;  %9640 = vmatpush3.msra.mxu1 %v19285_v25  ;;  %19373 = vst [vmem:[#allocation49_spill] sm:$0xff] %v13010_v54  ;;  %v13015_v25 = vand.u32 4294901760, %v210_v49  ;;  %19376 = vst [vmem:[#allocation46_spill] sm:$0xff] %v13018_v56  ;;  %v192_v63 = vld [vmem:[#allocation5 + $0x228] sm:$0xff] }
 0x11b   :  { %19369 = vst [vmem:[#allocation42_spill] sm:$0xff] %v12989_v9  ;;  %9663 = vmatpush3.msra.mxu0 %v12825_v24  ;;  %9641 = vmatprep.subr.mxu1 %v12448_v30  ;;  %v9134_v61 = vpop.f32.mrf.mxu0  ;;  %v13013_v30 = vsub.f32 %v195_v47, %v12973_v4  ;;  %v13031_v47 = vsub.f32 %v12931_v2, %v18230_v45  ;;  %19377 = vst [vmem:[#allocation14_spill] sm:$0xff] %v13033_v27  ;;  %v19379_v45 = vand.u32 4294901760, %v12952_v59 }
 0x11c   :  { %9664 = vmatprep.subr.mxu0 %v12833_v13  ;;  %2398 = vmatprep.mubr.f32.mxu0 %v19372_v35  ;;  %19375 = vst [vmem:[#allocation51_spill] sm:$0xff] %v13015_v25  ;;  %v9135_v2 = vadd.f32 %v9134_v61, %v9133_v58  ;;  %v19385_v19 = vand.u32 4294901760, %v12989_v9  ;;  %v13081_v58 = vand.u32 4294901760, %v192_v63 }
 0x11d   :  { %19374 = vst [vmem:[#allocation52_spill] sm:$0xff] %v13013_v30  ;;  %9642 = vmatpush3.msra.mxu1 %v19288_v32  ;;  %9665 = vmatpush3.msra.mxu0 %v12839_v52  ;;  %v208_v52 = vld [vmem:[#allocation5 + $0x2a8] sm:$0xff]  ;;  %v13047_v24 = vsub.f32 %v12952_v59, %v19379_v45  ;;  %v19382_v59 = vld [vmem:[#allocation56_spill] sm:$0xff] }
 0x11e   :  { %2400 = vmatmul.mubr.f32.gmra.mxu0 %v19378_v20  ;;  %9643 = vmatprep.subr.mxu1 %v19290_v8  ;;  %v9136_v13 = vpop.f32.mrf.mxu0  ;;  %v13049_v8 = vand.u32 4294901760, %v193_v26  ;;  %v13067_v40 = vand.u32 4294901760, %v208_v52  ;;  %v13079_v61 = vsub.f32 %v12989_v9, %v19385_v19 }
 0x11f   :  { %9666 = vmatprep.subr.mxu0 %v12841_v33  ;;  %9644 = vmatpush3.msra.mxu1 %v19292_v16  ;;  %v13058_v33 = vsub.f32 %v210_v49, %v13015_v25  ;;  %v19384_v49 = vand.u32 4294901760, %v12997_v1 }
 0x120   :  { %19380 = vst [vmem:[#allocation12_spill] sm:$0xff] %v13049_v8  ;;  %9667 = vmatpush3.msra.mxu0 %v12855_v14  ;;  %9645 = vmatprep.subr.mxu1 %v19294_v48  ;;  %v9137_v45 = vpop.f32.mrf.mxu0  ;;  %v13065_v48 = vsub.f32 %v194_v22, %v13033_v27  ;;  %v13084_v22 = vsub.f32 %v209_v7, %v13038_v46  ;;  %v19389_v7 = vld [vmem:[#allocation57_spill] sm:$0xff] }
 0x121   :  { %19381 = vst [vmem:[#allocation25_spill] sm:$0xff] %v13058_v33  ;;  %9668 = vmatprep.subr.mxu0 %v12860_v41  ;;  %2405 = vmatprep.mubr.f32.mxu0 %v19382_v59  ;;  %v13074_v16 = vsub.f32 %v12997_v1, %v19384_v49  ;;  %v19388_v49 = vand.u32 4294901760, %v13005_v38  ;;  %v207_v41 = vld [vmem:[#allocation5 + $0x2a0] sm:$0xff]  ;;  %v510_v14 = vadd.f32 %v9135_v2, %v12868_v23  ;;  %v19401_v2 = vand.u32 4294901760, %v13058_v33 }
 0x122   :  { %19383 = vst [vmem:[#allocation19_spill] sm:$0xff] %v13065_v48  ;;  %9646 = vmatpush3.msra.mxu1 %v19296_v39  ;;  %2523 = vmatprep.mubr.f32.mxu1 %v19363_v37  ;;  %19386 = vst [vmem:[#allocation54_spill] sm:$0xff] %v13084_v22  ;;  %v9180_v32 = vpop.f32.mrf.mxu1  ;;  %v13090_v37 = vsub.f32 %v193_v26, %v13049_v8  ;;  %v19391_v26 = vand.u32 4294901760, %v13018_v56 }
 0x123   :  { %9669 = vmatpush3.msra.mxu0 %v12891_v36  ;;  %2525 = vmatmul.mubr.f32.vlgmr.msra.gmra.mxu1 %v19368_v28  ;;  %v13095_v19 = vsub.f32 %v13005_v38, %v19388_v49  ;;  %v19390_v36 = vand.u32 4294901760, %v13010_v54  ;;  %v19392_v49 = vand.u32 4294901760, %v13013_v30 }
 0x124   :  { %19387 = vst [vmem:[#allocation31_spill] sm:$0xff] %v13090_v37  ;;  %2407 = vmatmul.mubr.f32.gmra.mxu0 %v19389_v7  ;;  %9670 = vmatprep.subr.mxu0 %v12893_v11  ;;  %v13108_v39 = vsub.f32 %v13018_v56, %v19391_v26  ;;  %v9139_v9 = vpop.f32.mrf.mxu0  ;;  %v9181_v1 = vpop.f32.mrf.mxu1  ;;  %v19393_v11 = vand.u32 4294901760, %v12916_v53  ;;  %v13121_v26 = vsub.f32 %v208_v52, %v13067_v40  ;;  %v19398_v52 = vand.u32 4294901760, %v12943_v44 }
 0x125   :  { %v13103_v28 = vsub.f32 %v13010_v54, %v19390_v36  ;;  %v13113_v38 = vsub.f32 %v13013_v30, %v19392_v49  ;;  %9671 = vmatpush3.msra.mxu0 %v12906_v31  ;;  %v191_v36 = vld [vmem:[#allocation5 + $0x220] sm:$0xff]  ;;  %v9138_v56 = vadd.f32 %v9137_v45, %v9136_v13  ;;  %v9182_v29 = vadd.f32 %v9181_v1, %v9180_v32  ;;  %v48_v45 = vld [vmem:[#allocation2 + $0x28] sm:$0xff]  ;;  %v13156_v31 = vld [vmem:[#allocation5 + $0x298] sm:$0xff] }
 0x126   :  { %9709 = vmatprep.subr.mxu1 %v19393_v11  ;;  %19394 = vst [vmem:[#allocation44_spill] sm:$0xff] %v13121_v26  ;;  %v19395_v49 = vand.u32 4294901760, %v12921_v10  ;;  %9672 = vmatprep.subr.mxu0 %v12938_v50  ;;  %v13128_v53 = vsub.f32 %v192_v63, %v13081_v58  ;;  %v13130_v11 = vand.u32 4294901760, %v207_v41  ;;  %v9140_v54 = vpop.f32.mrf.mxu0  ;;  %v19399_v13 = vld [vmem:[#allocation58_spill] sm:$0xff]  ;;  %v13150_v1 = vsub.f32 %v13058_v33, %v19401_v2  ;;  %v190_v10 = vld [vmem:[#allocation5 + $0x218] sm:$0xff] }
 0x127   :  { %2412 = vmatprep.mubr.f32.mxu0 %v19399_v13  ;;  %2530 = vmatprep.mubr.f32.mxu1 %v19372_v35  ;;  %v19404_v44 = vand.u32 4294901760, %v13065_v48  ;;  %v525_v50 = vadd.f32 %v9138_v56, %v12868_v23  ;;  %v19410_v30 = vand.u32 4294901760, %v13090_v37  ;;  %v9141_v33 = vadd.f32 %v9140_v54, %v9139_v9  ;;  %v19415_v54 = vld [vmem:[#allocation60_spill] sm:$0xff] }
 0x128   :  { %9710 = vmatpush3.msra.mxu1 %v19395_v49  ;;  %19396 = vst [vmem:[#allocation55_spill] sm:$0xff] %v13128_v53  ;;  %19397 = vst [vmem:[#allocation45_spill] sm:$0xff] %v13130_v11  ;;  %v13139_v49 = vadd.f32 %v9182_v29, %v510_v14  ;;  %9673 = vmatpush3.msra.mxu0 %v12945_v34  ;;  %v9183_v32 = vpop.f32.mrf.mxu1  ;;  %v19402_v14 = vand.u32 4294901760, %v12957_v12  ;;  %v19403_v29 = vld [vmem:[#allocation59_spill] sm:$0xff]  ;;  %v189_v34 = vld [vmem:[#allocation5 + $0x210] sm:$0xff]  ;;  %v19414_v9 = vand.u32 4294901760, %v12994_v62 }
 0x129   :  { %9711 = vmatprep.subr.mxu1 %v19398_v52  ;;  %v13145_v52 = vand.u32 4294901760, %v191_v36  ;;  %2414 = vmatmul.mubr.f32.gmra.mxu0 %v19403_v29  ;;  %v13161_v63 = vsub.f32 %v13065_v48, %v19404_v44  ;;  %v13167_v12 = vld [vmem:[#allocation5 + $0x290] sm:$0xff]  ;;  %v13176_v44 = vsub.f32 %v207_v41, %v13130_v11  ;;  %v13178_v48 = vand.u32 4294901760, %v48_v45 }
 0x12a   :  { %9712 = vmatpush3.msra.mxu1 %v19402_v14  ;;  %9674 = vmatprep.subr.mxu0 %v12959_v51  ;;  %v19405_v14 = vand.u32 4294901760, %v13084_v22  ;;  %v9142_v2 = vpop.f32.mrf.mxu0  ;;  %v9184_v56 = vpop.f32.mrf.mxu1  ;;  %v13183_v51 = vand.u32 4294901760, %v190_v10  ;;  %v19411_v41 = vand.u32 4294901760, %v12981_v3  ;;  %v19425_v62 = vand.u32 4294901760, %v13047_v24 }
 0x12b   :  { %19400 = vst [vmem:[#allocation37_spill] sm:$0xff] %v13145_v52  ;;  %2532 = vmatmul.mubr.f32.gmra.mxu1 %v19378_v20  ;;  %19406 = vst [vmem:[#allocation47_spill] sm:$0xff] %v13176_v44  ;;  %v19408_v20 = vand.u32 4294901760, %v12964_v57  ;;  %9675 = vmatpush3.msra.mxu0 %v12969_v42  ;;  %v13194_v17 = vsub.f32 %v191_v36, %v13145_v52  ;;  %v13197_v57 = vand.u32 4294901760, %v13156_v31  ;;  %v13200_v42 = vand.u32 4294901760, %v189_v34  ;;  %v13209_v36 = vld [vmem:[#allocation5 + $0x288] sm:$0xff] }
 0x12c   :  { %v13172_v35 = vsub.f32 %v13084_v22, %v19405_v14  ;;  %19407 = vst [vmem:[#allocation50_spill] sm:$0xff] %v13178_v48  ;;  %19409 = vst [vmem:[#allocation53_spill] sm:$0xff] %v13183_v51  ;;  %v13188_v14 = vsub.f32 %v13090_v37, %v19410_v30  ;;  %v9185_v22 = vadd.f32 %v9184_v56, %v9183_v32  ;;  %9676 = vmatprep.subr.mxu0 %v12971_v5  ;;  %v9143_v30 = vpop.f32.mrf.mxu0 }
 0x12d   :  { %9713 = vmatprep.subr.mxu1 %v19408_v20  ;;  %19412 = vst [vmem:[#allocation56_spill] sm:$0xff] %v13197_v57  ;;  %19413 = vst [vmem:[#allocation57_spill] sm:$0xff] %v13200_v42  ;;  %2419 = vmatprep.mubr.f32.mxu0 %v19415_v54  ;;  %v13207_v32 = vand.u32 4294901760, %v13167_v12  ;;  %v19417_v56 = vand.u32 4294901760, %v13121_v26  ;;  %v188_v20 = vld [vmem:[#allocation5 + $0x208] sm:$0xff]  ;;  %v13228_v15 = vsub.f32 %v48_v45, %v13178_v48  ;;  %v19424_v48 = vand.u32 4294901760, %v13031_v47 }
 0x12e   :  { %9714 = vmatpush3.msra.mxu1 %v19411_v41  ;;  %v13216_v5 = vadd.f32 %v9185_v22, %v525_v50  ;;  %2537 = vmatprep.mubr.f32.mxu1 %v19382_v59  ;;  %v19419_v50 = vand.u32 4294901760, %v13026_v60  ;;  %v19420_v22 = vld [vmem:[#allocation61_spill] sm:$0xff]  ;;  %v13234_v59 = vsub.f32 %v190_v10, %v13183_v51  ;;  %v13243_v45 = vsub.f32 %v189_v34, %v13200_v42  ;;  %v187_v10 = vld [vmem:[#allocation5 + $0x200] sm:$0xff] }
 0x12f   :  { %9715 = vmatprep.subr.mxu1 %v19414_v9  ;;  %19416 = vst [vmem:[#allocation58_spill] sm:$0xff] %v13207_v32  ;;  %v13214_v41 = vsub.f32 %v13121_v26, %v19417_v56  ;;  %9677 = vmatpush3.msra.mxu0 %v12973_v4  ;;  %v19418_v9 = vand.u32 4294901760, %v13128_v53  ;;  %v9186_v56 = vpop.f32.mrf.mxu1  ;;  %v13237_v4 = vand.u32 4294901760, %v47_v6  ;;  %v13246_v60 = vand.u32 4294901760, %v13209_v36 }
 0x130   :  { %9716 = vmatpush3.msra.mxu1 %v19419_v50  ;;  %2421 = vmatmul.mubr.f32.gmra.mxu0 %v19420_v22  ;;  %v13248_v50 = vand.u32 4294901760, %v188_v20  ;;  %v9224_v37 = vpop.f32.mrf.mxu0  ;;  %v13259_v34 = vsub.f32 %v13156_v31, %v13197_v57  ;;  %v9144_v0 = vadd.f32 %v9143_v30, %v9142_v2  ;;  %v19428_v2 = vand.u32 4294901760, %v13074_v16 }
 0x131   :  { %v13224_v3 = vsub.f32 %v13128_v53, %v19418_v9  ;;  %19421 = vst [vmem:[#allocation59_spill] sm:$0xff] %v13237_v4  ;;  %v64_v9 = vld [vmem:[#allocation2 + $0xa8] sm:$0xff]  ;;  %v540_v53 = vadd.f32 %v9141_v33, %v12868_v23  ;;  %2539 = vmatmul.mubr.f32.gmra.mxu1 %v19389_v7  ;;  %9678 = vmatprep.subr.mxu0 %v13015_v25  ;;  %19422 = vst [vmem:[#allocation60_spill] sm:$0xff] %v13246_v60  ;;  %v9187_v26 = vpop.f32.mrf.mxu1  ;;  %v13255_v7 = vld [vmem:[#allocation5 + $0x280] sm:$0xff]  ;;  %v13276_v24 = vand.u32 4294901760, %v187_v10 }
 0x132   :  { %19423 = vst [vmem:[#allocation61_spill] sm:$0xff] %v13248_v50  ;;  %9717 = vmatprep.subr.mxu1 %v19424_v48  ;;  %9679 = vmatpush3.msra.mxu0 %v13033_v27  ;;  %v63_v25 = vld [vmem:[#allocation2 + $0xa0] sm:$0xff]  ;;  %v9188_v18 = vadd.f32 %v9187_v26, %v9186_v56  ;;  %v19426_v48 = vand.u32 4294901760, %v13176_v44  ;;  %v18307_v27 = vand.u32 4294901760, %v13228_v15  ;;  %v13271_v55 = vand.u32 4294901760, %v64_v9  ;;  %v9225_v31 = vpop.f32.mrf.mxu0 }
 0x133   :  { %9718 = vmatpush3.msra.mxu1 %v19425_v62  ;;  %9680 = vmatprep.subr.mxu0 %v13038_v46  ;;  %19429 = vst [vmem:[#allocation63_spill] sm:$0xff] %v13276_v24  ;;  %v13279_v26 = vsub.f32 %v47_v6, %v13237_v4  ;;  %v9226_v62 = vadd.f32 %v9225_v31, %v9224_v37  ;;  %v19430_v56 = vand.u32 4294901760, %v13079_v61  ;;  %v18308_v16 = vand.u32 4294901760, %v13234_v59  ;;  %v80_v6 = vld [vmem:[#allocation2 + $0x128] sm:$0xff] }
 0x134   :  { %v13268_v33 = vsub.f32 %v13176_v44, %v19426_v48  ;;  %19427 = vst [vmem:[#allocation62_spill] sm:$0xff] %v13271_v55  ;;  %9719 = vmatprep.subr.mxu1 %v19428_v2  ;;  %2544 = vmatprep.mubr.f32.mxu1 %v19399_v13  ;;  %v13281_v30 = vadd.f32 %v9188_v18, %v540_v53  ;;  %v13287_v48 = vand.u32 4294901760, %v13255_v7  ;;  %v13294_v2 = vand.u32 4294901760, %v63_v25  ;;  %v9189_v18 = vpop.f32.mrf.mxu1 }
 0x135   :  { %9681 = vmatpush3.msra.mxu0 %v13049_v8  ;;  %9720 = vmatpush3.msra.mxu1 %v19430_v56  ;;  %v13292_v13 = vsub.f32 %v13167_v12, %v13207_v32  ;;  %v13299_v61 = vsub.f32 %v188_v20, %v13248_v50  ;;  %v555_v53 = vadd.f32 %v9144_v0, %v12868_v23  ;;  %v19433_v12 = vand.u32 4294901760, %v13095_v19  ;;  %v79_v56 = vld [vmem:[#allocation2 + $0x120] sm:$0xff] }
 0x136   :  { %19431 = vst [vmem:[#allocation64_spill] sm:$0xff] %v13287_v48  ;;  %19432 = vst [vmem:[#allocation65_spill] sm:$0xff] %v13294_v2  ;;  %2546 = vmatmul.mubr.f32.gmra.mxu1 %v19403_v29  ;;  %9682 = vmatprep.subr.mxu0 %v13067_v40  ;;  %v13304_v31 = vadd.f32 %v9226_v62, %v12933_v21  ;;  %v13313_v29 = vsub.f32 %v13228_v15, %v18307_v27  ;;  %v19434_v20 = vand.u32 4294901760, %v13194_v17  ;;  %v9227_v0 = vpop.f32.mrf.mxu0  ;;  %v9190_v21 = vpop.f32.mrf.mxu1 }
 0x137   :  { %9721 = vmatprep.subr.mxu1 %v19433_v12  ;;  %9683 = vmatpush3.msra.mxu0 %v13081_v58  ;;  %v13321_v23 = vsub.f32 %v64_v9, %v13271_v55  ;;  %v19435_v19 = vand.u32 4294901760, %v13103_v28  ;;  %v13327_v62 = vsub.f32 %v187_v10, %v13276_v24  ;;  %v18309_v12 = vand.u32 4294901760, %v13279_v26 }
 0x138   :  { %v13318_v47 = vsub.f32 %v13194_v17, %v19434_v20  ;;  %9684 = vmatprep.subr.mxu0 %v13130_v11  ;;  %v13330_v27 = vand.u32 4294901760, %v80_v6  ;;  %v9191_v20 = vadd.f32 %v9190_v21, %v9189_v18  ;;  %v19438_v37 = vand.u32 4294901760, %v13108_v39  ;;  %2551 = vmatprep.mubr.f32.mxu1 %v19415_v54  ;;  %v9228_v18 = vpop.f32.mrf.mxu0 }
 0x139   :  { %9722 = vmatpush3.msra.mxu1 %v19435_v19  ;;  %19436 = vst [vmem:[#allocation66_spill] sm:$0xff] %v13327_v62  ;;  %v13338_v28 = vsub.f32 %v13234_v59, %v18308_v16  ;;  %v13342_v10 = vsub.f32 %v63_v25, %v13294_v2  ;;  %v13346_v19 = vsub.f32 %v13209_v36, %v13246_v60  ;;  %v19440_v39 = vand.u32 4294901760, %v13113_v38 }
 0x13a   :  { %19437 = vst [vmem:[#allocation67_spill] sm:$0xff] %v13330_v27  ;;  %9723 = vmatprep.subr.mxu1 %v19438_v37  ;;  %9685 = vmatpush3.msra.mxu0 %v13145_v52  ;;  %v19441_v54 = vand.u32 4294901760, %v13259_v34  ;;  %v13357_v16 = vadd.f32 %v9191_v20, %v555_v53  ;;  %v9229_v25 = vadd.f32 %v9228_v18, %v9227_v0  ;;  %v2812_v36 = vand.u32 4294901760, %v13318_v47 }
 0x13b   :  { %19439 = vst [vmem:[#allocation68_spill] sm:$0xff] %v13346_v19  ;;  %9724 = vmatpush3.msra.mxu1 %v19440_v39  ;;  %9686 = vmatprep.subr.mxu0 %v13197_v57  ;;  %v13365_v38 = vsub.f32 %v13255_v7, %v13287_v48  ;;  %v13367_v39 = vand.u32 4294901760, %v79_v56  ;;  %v19443_v21 = vand.u32 4294901760, %v13150_v1  ;;  %v2663_v47 = vsub.f32 %v13279_v26, %v18309_v12  ;;  %v9271_v0 = vpop.f32.mrf.mxu1  ;;  %v95_v12 = vld [vmem:[#allocation2 + $0x1a0] sm:$0xff] }
 0x13c   :  { %v13354_v37 = vsub.f32 %v13259_v34, %v19441_v54  ;;  %2553 = vmatmul.mubr.f32.gmra.mxu1 %v19420_v22  ;;  %v96_v54 = vld [vmem:[#allocation2 + $0x1a8] sm:$0xff]  ;;  %9687 = vmatpush3.msra.mxu0 %v13183_v51  ;;  %v2658_v22 = vand.u32 4294901760, %v13313_v29  ;;  %v13377_v53 = vsub.f32 %v80_v6, %v13330_v27  ;;  %v13380_v7 = vadd.f32 %v9229_v25, %v13139_v49  ;;  %v9230_v9 = vpop.f32.mrf.mxu0 }
 0x13d   :  { %19442 = vst [vmem:[#allocation69_spill] sm:$0xff] %v13367_v39  ;;  %9725 = vmatprep.subr.mxu1 %v19443_v21  ;;  %v19445_v20 = vand.u32 4294901760, %v13161_v63  ;;  %9688 = vmatprep.subr.mxu0 %v13207_v32  ;;  %v2819_v1 = vand.u32 4294901760, %v13338_v28  ;;  %v19446_v29 = vand.u32 4294901760, %v13292_v13  ;;  %v19447_v49 = vand.u32 4294901760, %v13172_v35  ;;  %v9272_v21 = vpop.f32.mrf.mxu1 }
 0x13e   :  { %19444 = vst [vmem:[#allocation70_spill] sm:$0xff] %v13377_v53  ;;  %9689 = vmatpush3.msra.mxu0 %v13200_v42  ;;  %v2931_v63 = vand.u32 4294901760, %v13354_v37  ;;  %v19448_v25 = vand.u32 4294901760, %v13243_v45  ;;  %v19450_v6 = vand.u32 4294901760, %v13188_v14  ;;  %v19451_v35 = vand.u32 4294901760, %v13321_v23  ;;  %2659 = vmatprep.mubr.f32.mxu0 %v2658_v22 }
 0x13f   :  { %9726 = vmatpush3.msra.mxu1 %v19445_v20  ;;  %v2937_v18 = vsub.f32 %v13292_v13, %v19446_v29  ;;  %v13401_v29 = vand.u32 4294901760, %v96_v54  ;;  %9690 = vmatprep.subr.mxu0 %v13246_v60  ;;  %v18318_v37 = vand.u32 4294901760, %v13365_v38  ;;  %v13411_v42 = vsub.f32 %v79_v56, %v13367_v39 }
 0x140   :  { %9727 = vmatprep.subr.mxu1 %v19447_v49  ;;  %v13398_v28 = vsub.f32 %v13243_v45, %v19448_v25  ;;  %v2672_v49 = vsub.f32 %v13321_v23, %v19451_v35  ;;  %v9231_v25 = vpop.f32.mrf.mxu0  ;;  %v9273_v32 = vadd.f32 %v9272_v21, %v9271_v0  ;;  %v19452_v20 = vand.u32 4294901760, %v13214_v41  ;;  %9691 = vmatpush3.msra.mxu0 %v13248_v50  ;;  %v19466_v50 = vld [vmem:[#allocation28_spill] sm:$0xff] }
 0x141   :  { %19449 = vst [vmem:[#allocation71_spill] sm:$0xff] %v13401_v29  ;;  %9728 = vmatpush3.msra.mxu1 %v19450_v6  ;;  %v2664_v14 = vand.u32 4294901760, %v2663_v47  ;;  %v13417_v60 = vand.u32 4294901760, %v95_v12  ;;  %v9232_v51 = vadd.f32 %v9231_v25, %v9230_v9  ;;  %v19454_v35 = vand.u32 4294901760, %v13224_v3  ;;  %9692 = vmatprep.subr.mxu0 %v13287_v48 }
 0x142   :  { %9729 = vmatprep.subr.mxu1 %v19452_v20  ;;  %v19455_v56 = vand.u32 4294901760, %v13342_v10  ;;  %v19456_v41 = vand.u32 4294901760, %v13346_v19  ;;  %v112_v20 = vld [vmem:[#allocation2 + $0x228] sm:$0xff]  ;;  %v13430_v6 = vadd.f32 %v9273_v32, %v13304_v31  ;;  %v19457_v9 = vand.u32 4294901760, %v13268_v33  ;;  %9693 = vmatpush3.msra.mxu0 %v13276_v24  ;;  %v9233_v47 = vpop.f32.mrf.mxu0  ;;  %v19464_v24 = vld [vmem:[#allocation18_spill] sm:$0xff] }
 0x143   :  { %19453 = vst [vmem:[#allocation72_spill] sm:$0xff] %v13417_v60  ;;  %9730 = vmatpush3.msra.mxu1 %v19454_v35  ;;  %v2938_v3 = vand.u32 4294901760, %v2937_v18  ;;  %v19458_v25 = vand.u32 4294901760, %v13299_v61  ;;  %v2673_v32 = vand.u32 4294901760, %v2672_v49  ;;  %v2951_v33 = vsub.f32 %v13365_v38, %v18318_v37  ;;  %v111_v18 = vld [vmem:[#allocation2 + $0x220] sm:$0xff]  ;;  %2665 = vmatmul.mubr.f32.vlgmr.msra.gmra.mxu0 %v2664_v14 }
 0x144   :  { %v2678_v0 = vsub.f32 %v13342_v10, %v19455_v56  ;;  %v2944_v21 = vsub.f32 %v13346_v19, %v19456_v41  ;;  %9731 = vmatprep.subr.mxu1 %v19457_v9  ;;  %v13439_v56 = vsub.f32 %v96_v54, %v13401_v29  ;;  %v13442_v41 = vadd.f32 %v9232_v51, %v13216_v5  ;;  %v9274_v9 = vpop.f32.mrf.mxu1  ;;  %v9234_v22 = vpop.f32.mrf.mxu0 }
 0x145   :  { %v2832_v35 = vsub.f32 %v13299_v61, %v19458_v25  ;;  %9732 = vmatpush3.msra.mxu1 %v2812_v36  ;;  %v2826_v54 = vand.u32 4294901760, %v13398_v28  ;;  %v19460_v25 = vand.u32 4294901760, %v13377_v53  ;;  %v13453_v5 = vsub.f32 %v95_v12, %v13417_v60  ;;  %9756 = vmatprep.subr.mxu0 %v12850_v43 }
 0x146   :  { %19459 = vst [vmem:[#allocation73_spill] sm:$0xff] %v13439_v56  ;;  %9733 = vmatprep.subr.mxu1 %v2931_v63  ;;  %v13455_v36 = vand.u32 4294901760, %v112_v20  ;;  %v2679_v49 = vand.u32 4294901760, %v2678_v0  ;;  %v2945_v37 = vand.u32 4294901760, %v2944_v21  ;;  %v19463_v14 = vand.u32 4294901760, %v13327_v62  ;;  %v9275_v31 = vpop.f32.mrf.mxu1  ;;  %9757 = vmatpush3.msra.mxu0 %v19464_v24 }
 0x147   :  { %v2687_v51 = vsub.f32 %v13377_v53, %v19460_v25  ;;  %19461 = vst [vmem:[#allocation74_spill] sm:$0xff] %v13453_v5  ;;  %9734 = vmatpush3.msra.mxu1 %v2819_v1  ;;  %v9235_v28 = vadd.f32 %v9234_v22, %v9233_v47  ;;  %v2833_v25 = vand.u32 4294901760, %v2832_v35  ;;  %v18327_v12 = vand.u32 4294901760, %v13439_v56  ;;  %9758 = vmatprep.subr.mxu0 %v19466_v50  ;;  %v19468_v22 = vld [vmem:[#allocation21_spill] sm:$0xff] }
 0x148   :  { %19462 = vst [vmem:[#allocation75_spill] sm:$0xff] %v13455_v36  ;;  %v2839_v63 = vsub.f32 %v13327_v62, %v19463_v14  ;;  %9735 = vmatprep.subr.mxu1 %v2938_v3  ;;  %v13463_v53 = vand.u32 4294901760, %v111_v18  ;;  %v9276_v48 = vadd.f32 %v9275_v31, %v9274_v9  ;;  %2674 = vmatprep.mubr.f32.mxu0 %v2673_v32  ;;  %v2952_v1 = vand.u32 4294901760, %v2951_v33  ;;  %v9236_v32 = vpop.f32.mrf.mxu0  ;;  %v9277_v9 = vpop.f32.mrf.mxu1 }
 0x149   :  { %v19467_v0 = vand.u32 4294901760, %v13411_v42  ;;  %v980_v47 = vadd.f32 %v9235_v28, %v13281_v30  ;;  %9736 = vmatpush3.msra.mxu1 %v2826_v54  ;;  %9759 = vmatpush3.msra.mxu0 %v19468_v22  ;;  %v2688_v3 = vand.u32 4294901760, %v2687_v51  ;;  %v18330_v35 = vand.u32 4294901760, %v13453_v5  ;;  %v19472_v51 = vld [vmem:[#allocation20_spill] sm:$0xff] }
 0x14a   :  { %19465 = vst [vmem:[#allocation18_spill] sm:$0xff] %v13463_v53  ;;  %v13473_v14 = vsub.f32 %v112_v20, %v13455_v36  ;;  %v13476_v31 = vadd.f32 %v9276_v48, %v13380_v7  ;;  %2680 = vmatmul.mubr.f32.gmra.mxu0 %v2679_v49  ;;  %9737 = vmatprep.subr.mxu1 %v2945_v37  ;;  %v2840_v33 = vand.u32 4294901760, %v2839_v63  ;;  %v9237_v20 = vpop.f32.mrf.mxu0  ;;  %v9278_v49 = vpop.f32.mrf.mxu1  ;;  %v19473_v37 = vld [vmem:[#allocation15_spill] sm:$0xff] }
 0x14b   :  { %v2693_v21 = vsub.f32 %v13411_v42, %v19467_v0  ;;  %v19470_v0 = vld [vmem:[#allocation41_spill] sm:$0xff]  ;;  %9738 = vmatpush3.msra.mxu1 %v2833_v25  ;;  %v2702_v30 = vsub.f32 %v13439_v56, %v18327_v12  ;;  %v13483_v54 = vsub.f32 %v111_v18, %v13463_v53  ;;  %v9238_v7 = vadd.f32 %v9237_v20, %v9236_v32  ;;  %v19474_v18 = vld [vmem:[#allocation50_spill] sm:$0xff]  ;;  %v19476_v20 = vld [vmem:[#allocation35_spill] sm:$0xff] }
 0x14c   :  { %19469 = vst [vmem:[#allocation28_spill] sm:$0xff] %v13473_v14  ;;  %9760 = vmatprep.subr.mxu0 %v19470_v0  ;;  %9739 = vmatprep.subr.mxu1 %v2952_v1  ;;  %v2708_v63 = vsub.f32 %v13453_v5, %v18330_v35  ;;  %v18333_v28 = vand.u32 4294901760, %v13473_v14  ;;  %v9279_v25 = vadd.f32 %v9278_v49, %v9277_v9  ;;  %v19475_v56 = vld [vmem:[#allocation26_spill] sm:$0xff]  ;;  %v19480_v35 = vld [vmem:[#allocation32_spill] sm:$0xff]  ;;  %v19486_v5 = vld [vmem:[#allocation49_spill] sm:$0xff] }
 0x14d   :  { %19471 = vst [vmem:[#allocation21_spill] sm:$0xff] %v13483_v54  ;;  %9761 = vmatpush3.msra.mxu0 %v19472_v51  ;;  %v2694_v48 = vand.u32 4294901760, %v2693_v21  ;;  %2689 = vmatprep.mubr.f32.mxu0 %v2688_v3  ;;  %v989_v12 = vadd.f32 %v9238_v7, %v13357_v16  ;;  %v2703_v1 = vand.u32 4294901760, %v2702_v30  ;;  %v18338_v21 = vand.u32 4294901760, %v13483_v54  ;;  %v9280_v32 = vpop.f32.mrf.mxu1  ;;  %v19477_v9 = vld [vmem:[#allocation34_spill] sm:$0xff]  ;;  %v19479_v30 = vld [vmem:[#allocation17_spill] sm:$0xff] }
 0x14e   :  { %9762 = vmatprep.subr.mxu0 %v19473_v37  ;;  %9740 = vmatpush3.msra.mxu1 %v2840_v33  ;;  %v13497_v3 = vadd.f32 %v9279_v25, %v13442_v41  ;;  %v19478_v33 = vld [vmem:[#allocation27_spill] sm:$0xff]  ;;  %v2709_v49 = vand.u32 4294901760, %v2708_v63  ;;  %v2717_v16 = vsub.f32 %v13473_v14, %v18333_v28  ;;  %v19481_v25 = vld [vmem:[#allocation29_spill] sm:$0xff]  ;;  %v19482_v63 = vld [vmem:[#allocation42_spill] sm:$0xff] }
 0x14f   :  { %2955 = vmatprep.mubr.f32.mxu1 %v19474_v18  ;;  %9763 = vmatpush3.msra.mxu0 %v19475_v56  ;;  %v9281_v7 = vpop.f32.mrf.mxu1  ;;  %v19483_v18 = vld [vmem:[#allocation16_spill] sm:$0xff] }
 0x150   :  { %2957 = vmatmul.mubr.f32.vlgmr.msra.gmra.mxu1 %v13237_v4  ;;  %2695 = vmatmul.mubr.f32.gmra.mxu0 %v2694_v48  ;;  %v9282_v41 = vadd.f32 %v9281_v7, %v9280_v32  ;;  %v2723_v48 = vsub.f32 %v13483_v54, %v18338_v21  ;;  %v2718_v14 = vand.u32 4294901760, %v2717_v16  ;;  %v19484_v32 = vld [vmem:[#allocation48_spill] sm:$0xff] }
 0x151   :  { %9764 = vmatprep.subr.mxu0 %v19476_v20  ;;  %9803 = vmatprep.subr.mxu1 %v19477_v9  ;;  %v19485_v7 = vld [vmem:[#allocation40_spill] sm:$0xff] }
 0x152   :  { %9765 = vmatpush3.msra.mxu0 %v19478_v33  ;;  %9804 = vmatpush3.msra.mxu1 %v19479_v30  ;;  %v13513_v4 = vadd.f32 %v9282_v41, %v980_v47  ;;  %v9283_v28 = vpop.f32.mrf.mxu1  ;;  %v2724_v21 = vand.u32 4294901760, %v2723_v48  ;;  %v19487_v54 = vld [vmem:[#allocation36_spill] sm:$0xff]  ;;  %v19488_v47 = vld [vmem:[#allocation46_spill] sm:$0xff]  ;;  %v19489_v41 = vld [vmem:[#allocation39_spill] sm:$0xff] }
 0x153   :  { %9766 = vmatprep.subr.mxu0 %v19480_v35  ;;  %9805 = vmatprep.subr.mxu1 %v19481_v25  ;;  %v19490_v16 = vld [vmem:[#allocation52_spill] sm:$0xff]  ;;  %v19492_v48 = vld [vmem:[#allocation25_spill] sm:$0xff] }
 0x154   :  { %2704 = vmatprep.mubr.f32.mxu0 %v2703_v1  ;;  %2962 = vmatprep.mubr.f32.mxu1 %v13271_v55  ;;  %v9284_v1 = vpop.f32.mrf.mxu1 }
 0x155   :  { %9767 = vmatpush3.msra.mxu0 %v19482_v63  ;;  %9806 = vmatpush3.msra.mxu1 %v19483_v18  ;;  %v9285_v55 = vadd.f32 %v9284_v1, %v9283_v28  ;;  %v19493_v28 = vld [vmem:[#allocation22_spill] sm:$0xff]  ;;  %v19494_v1 = vld [vmem:[#allocation19_spill] sm:$0xff] }
 0x156   :  { %2710 = vmatmul.mubr.f32.gmra.mxu0 %v2709_v49  ;;  %2964 = vmatmul.mubr.f32.gmra.mxu1 %v13294_v2  ;;  %v19491_v2 = vld [vmem:[#allocation13_spill] sm:$0xff] }
 0x157   :  { %9768 = vmatprep.subr.mxu0 %v19484_v32  ;;  %9807 = vmatprep.subr.mxu1 %v19485_v7  ;;  %v13523_v49 = vadd.f32 %v9285_v55, %v989_v12  ;;  %v19496_v55 = vld [vmem:[#allocation54_spill] sm:$0xff]  ;;  %v19497_v12 = vld [vmem:[#allocation24_spill] sm:$0xff] }
 0x158   :  { %9769 = vmatpush3.msra.mxu0 %v19486_v5  ;;  %9808 = vmatpush3.msra.mxu1 %v19487_v54 }
 0x159   :  { %9770 = vmatprep.subr.mxu0 %v19488_v47  ;;  %9809 = vmatprep.subr.mxu1 %v19489_v41  ;;  %v19495_v41 = vld [vmem:[#allocation23_spill] sm:$0xff] }
 0x15a   :  { %2719 = vmatprep.mubr.f32.mxu0 %v2718_v14  ;;  %2969 = vmatprep.mubr.f32.mxu1 %v13330_v27  ;;  %v19498_v27 = vld [vmem:[#allocation31_spill] sm:$0xff] }
 0x15b   :  { %9771 = vmatpush3.msra.mxu0 %v19490_v16  ;;  %9810 = vmatpush3.msra.mxu1 %v19491_v2  ;;  %v9318_v47 = vpop.f32.mrf.mxu0 }
 0x15c   :  { %2725 = vmatmul.mubr.f32.gmra.mxu0 %v2724_v21  ;;  %2971 = vmatmul.mubr.f32.gmra.mxu1 %v13367_v39  ;;  %v19499_v21 = vld [vmem:[#allocation30_spill] sm:$0xff] }
 0x15d   :  { %9772 = vmatprep.subr.mxu0 %v19492_v48  ;;  %9811 = vmatprep.subr.mxu1 %v19493_v28  ;;  %v9319_v14 = vpop.f32.mrf.mxu0  ;;  %v19500_v28 = vld [vmem:[#allocation44_spill] sm:$0xff]  ;;  %v19502_v48 = vld [vmem:[#allocation55_spill] sm:$0xff] }
 0x15e   :  { %9773 = vmatpush3.msra.mxu0 %v19494_v1  ;;  %9812 = vmatpush3.msra.mxu1 %v19495_v41  ;;  %v9320_v39 = vadd.f32 %v9319_v14, %v9318_v47  ;;  %v19501_v1 = vld [vmem:[#allocation33_spill] sm:$0xff]  ;;  %v19505_v14 = vld [vmem:[#allocation43_spill] sm:$0xff] }
 0x15f   :  { %9774 = vmatprep.subr.mxu0 %v19496_v55  ;;  %9813 = vmatprep.subr.mxu1 %v19497_v12  ;;  %v19503_v12 = vld [vmem:[#allocation38_spill] sm:$0xff] }
 0x160   :  { %2976 = vmatprep.mubr.f32.mxu1 %v13401_v29  ;;  %9775 = vmatpush3.msra.mxu0 %v19498_v27  ;;  %v1309_v55 = vadd.f32 %v9320_v39, %v13430_v6  ;;  %v9321_v41 = vpop.f32.mrf.mxu0  ;;  %v19504_v29 = vld [vmem:[#allocation11_spill] sm:$0xff] }
 0x161   :  { %9814 = vmatpush3.msra.mxu1 %v19499_v21  ;;  %9776 = vmatprep.subr.mxu0 %v19500_v28  ;;  %v19506_v39 = vld [vmem:[#allocation51_spill] sm:$0xff] }
 0x162   :  { %2978 = vmatmul.mubr.f32.gmra.mxu1 %v13417_v60  ;;  %9815 = vmatprep.subr.mxu1 %v19501_v1  ;;  %v9322_v47 = vpop.f32.mrf.mxu0 }
 0x163   :  { %9777 = vmatpush3.msra.mxu0 %v19502_v48  ;;  %9816 = vmatpush3.msra.mxu1 %v19503_v12  ;;  %v9323_v60 = vadd.f32 %v9322_v47, %v9321_v41 }
 0x164   :  { %9778 = vmatprep.subr.mxu0 %v13176_v44  ;;  %9817 = vmatprep.subr.mxu1 %v19504_v29  ;;  %v19507_v29 = vld [vmem:[#allocation14_spill] sm:$0xff] }
 0x165   :  { %2983 = vmatprep.mubr.f32.mxu1 %v13455_v36  ;;  %9779 = vmatpush3.msra.mxu0 %v13194_v17  ;;  %v1316_v6 = vadd.f32 %v9323_v60, %v13476_v31  ;;  %v9365_v44 = vpop.f32.mrf.mxu1 }
 0x166   :  { %9818 = vmatpush3.msra.mxu1 %v19505_v14  ;;  %9780 = vmatprep.subr.mxu0 %v13259_v34  ;;  %v9324_v36 = vpop.f32.mrf.mxu0 }
 0x167   :  { %2985 = vmatmul.mubr.f32.gmra.mxu1 %v13463_v53  ;;  %9819 = vmatprep.subr.mxu1 %v19506_v39  ;;  %v9366_v41 = vpop.f32.mrf.mxu1 }
 0x168   :  { %9781 = vmatpush3.msra.mxu0 %v13234_v59  ;;  %9820 = vmatpush3.msra.mxu1 %v19507_v29  ;;  %v9325_v47 = vpop.f32.mrf.mxu0  ;;  %v9367_v53 = vadd.f32 %v9366_v41, %v9365_v44 }
 0x169   :  { %9782 = vmatprep.subr.mxu0 %v13292_v13  ;;  %9821 = vmatprep.subr.mxu1 %v13038_v46  ;;  %v9326_v60 = vadd.f32 %v9325_v47, %v9324_v36 }
 0x16a   :  { %9783 = vmatpush3.msra.mxu0 %v13243_v45  ;;  %9822 = vmatpush3.msra.mxu1 %v13049_v8  ;;  %v13564_v31 = vadd.f32 %v9367_v53, %v1309_v55  ;;  %v19508_v53 = vand.u32 4294901760, %v12850_v43  ;;  %v19509_v55 = vld [vmem:[#allocation53_spill] sm:$0xff]  ;;  %v19514_v43 = vand.u32 4294901760, %v19468_v22 }
 0x16b   :  { %9784 = vmatprep.subr.mxu0 %v13346_v19  ;;  %9823 = vmatprep.subr.mxu1 %v13067_v40  ;;  %v1323_v8 = vadd.f32 %v9326_v60, %v13497_v3  ;;  %v9327_v19 = vpop.f32.mrf.mxu0  ;;  %v19510_v3 = vand.u32 4294901760, %v19464_v24  ;;  %v19511_v60 = vld [vmem:[#allocation58_spill] sm:$0xff]  ;;  %v19515_v24 = vld [vmem:[#allocation60_spill] sm:$0xff] }
 0x16c   :  { %9785 = vmatpush3.msra.mxu0 %v13299_v61  ;;  %9824 = vmatpush3.msra.mxu1 %v13081_v58  ;;  %v9368_v44 = vpop.f32.mrf.mxu1 }
 0x16d   :  { %9786 = vmatprep.subr.mxu0 %v13365_v38  ;;  %9825 = vmatprep.subr.mxu1 %v13130_v11  ;;  %v9328_v36 = vpop.f32.mrf.mxu0  ;;  %v19513_v11 = vld [vmem:[#allocation57_spill] sm:$0xff] }
 0x16e   :  { %9787 = vmatpush3.msra.mxu0 %v13327_v62  ;;  %3120 = vmatprep.mubr.f32.mxu0 %v13228_v15  ;;  %v9329_v41 = vadd.f32 %v9328_v36, %v9327_v19  ;;  %v9369_v47 = vpop.f32.mrf.mxu1 }
 0x16f   :  { %9826 = vmatpush3.msra.mxu1 %v13145_v52  ;;  %3123 = vmatmul.mubr.f32.vlgmr.msra.gmra.mxu0 %v13279_v26  ;;  %v9370_v62 = vadd.f32 %v9369_v47, %v9368_v44  ;;  %v19512_v52 = vand.u32 4294901760, %v19466_v50  ;;  %v19516_v50 = vand.u32 4294901760, %v19470_v0  ;;  %v19521_v47 = vld [vmem:[#allocation70_spill] sm:$0xff]  ;;  %v19523_v0 = vand.u32 4294901760, %v13228_v15 }
 0x170   :  { %9827 = vmatprep.subr.mxu1 %v13197_v57  ;;  %9850 = vmatprep.subr.mxu0 %v19508_v53  ;;  %v1330_v57 = vadd.f32 %v9329_v41, %v13513_v4  ;;  %v19518_v4 = vand.u32 4294901760, %v19472_v51  ;;  %v19519_v41 = vld [vmem:[#allocation64_spill] sm:$0xff]  ;;  %v19524_v51 = vand.u32 4294901760, %v19475_v56  ;;  %v19527_v15 = vand.u32 4294901760, %v19478_v33 }
 0x171   :  { %9828 = vmatpush3.msra.mxu1 %v19509_v55  ;;  %9851 = vmatpush3.msra.mxu0 %v19510_v3  ;;  %v13586_v19 = vadd.f32 %v9370_v62, %v1316_v6  ;;  %v9330_v36 = vpop.f32.mrf.mxu0  ;;  %v9371_v44 = vpop.f32.mrf.mxu1  ;;  %v19520_v6 = vand.u32 4294901760, %v19473_v37  ;;  %v19528_v56 = vand.u32 4294901760, %v19480_v35  ;;  %v19533_v35 = vand.u32 4294901760, %v13342_v10 }
 0x172   :  { %9829 = vmatprep.subr.mxu1 %v19511_v60  ;;  %9852 = vmatprep.subr.mxu0 %v19512_v52  ;;  %v19517_v52 = vld [vmem:[#allocation61_spill] sm:$0xff] }
 0x173   :  { %3129 = vmatprep.mubr.f32.mxu0 %v13321_v23  ;;  %9830 = vmatpush3.msra.mxu1 %v19513_v11  ;;  %v9331_v53 = vpop.f32.mrf.mxu0  ;;  %v9372_v62 = vpop.f32.mrf.mxu1 }
 0x174   :  { %9853 = vmatpush3.msra.mxu0 %v19514_v43  ;;  %9831 = vmatprep.subr.mxu1 %v19515_v24  ;;  %v9332_v22 = vadd.f32 %v9331_v53, %v9330_v36  ;;  %v9373_v3 = vadd.f32 %v9372_v62, %v9371_v44  ;;  %v19522_v43 = vld [vmem:[#allocation63_spill] sm:$0xff]  ;;  %v19526_v44 = vand.u32 4294901760, %v19476_v20  ;;  %v19530_v53 = vand.u32 4294901760, %v13321_v23 }
 0x175   :  { %3132 = vmatmul.mubr.f32.gmra.mxu0 %v13342_v10  ;;  %9854 = vmatprep.subr.mxu0 %v19516_v50  ;;  %v19531_v20 = vand.u32 4294901760, %v19482_v63  ;;  %v19535_v23 = vand.u32 4294901760, %v19486_v5  ;;  %v250_v10 = vld [vmem:[#allocation5 + $0x3f8] sm:$0xff] }
 0x176   :  { %9832 = vmatpush3.msra.mxu1 %v19517_v52  ;;  %9855 = vmatpush3.msra.mxu0 %v19518_v4  ;;  %v1337_v50 = vadd.f32 %v9332_v22, %v13523_v49  ;;  %v19525_v4 = vand.u32 4294901760, %v13279_v26  ;;  %v13607_v36 = vadd.f32 %v9373_v3, %v1323_v8  ;;  %v9374_v37 = vpop.f32.mrf.mxu1  ;;  %v19529_v8 = vld [vmem:[#allocation73_spill] sm:$0xff] }
 0x177   :  { %9833 = vmatprep.subr.mxu1 %v19519_v41  ;;  %9856 = vmatprep.subr.mxu0 %v19520_v6  ;;  %v19539_v6 = vld [vmem:[#allocation28_spill] sm:$0xff]  ;;  %v19542_v5 = vld [vmem:[#allocation21_spill] sm:$0xff] }
 0x178   :  { %3138 = vmatprep.mubr.f32.mxu0 %v19521_v47  ;;  %9834 = vmatpush3.msra.mxu1 %v19522_v43  ;;  %v9375_v49 = vpop.f32.mrf.mxu1 }
 0x179   :  { %3263 = vmatprep.mubr.f32.mxu1 %v19523_v0  ;;  %9857 = vmatpush3.msra.mxu0 %v19524_v51  ;;  %v9376_v26 = vadd.f32 %v9375_v49, %v9374_v37  ;;  %v19543_v0 = vand.u32 4294901760, %v13411_v42  ;;  %v19544_v51 = vld [vmem:[#allocation25_spill] sm:$0xff]  ;;  %v13652_v37 = vand.u32 4294901760, %v250_v10  ;;  %v19550_v49 = vld [vmem:[#allocation23_spill] sm:$0xff] }
 0x17a   :  { %3267 = vmatmul.mubr.f32.vlgmr.msra.gmra.mxu1 %v19525_v4  ;;  %3141 = vmatmul.mubr.f32.gmra.mxu0 %v13411_v42  ;;  %v19545_v4 = vand.u32 4294901760, %v19544_v51  ;;  %v233_v42 = vld [vmem:[#allocation5 + $0x370] sm:$0xff] }
 0x17b   :  { %9858 = vmatprep.subr.mxu0 %v19526_v44  ;;  %9897 = vmatprep.subr.mxu1 %v19477_v9  ;;  %v13624_v9 = vadd.f32 %v9376_v26, %v1330_v57  ;;  %v9377_v33 = vpop.f32.mrf.mxu1  ;;  %v19536_v57 = vld [vmem:[#allocation46_spill] sm:$0xff]  ;;  %19546 = vst [vmem:[#allocation41_spill] sm:$0xff] %v13652_v37 }
 0x17c   :  { %9859 = vmatpush3.msra.mxu0 %v19527_v15  ;;  %9898 = vmatpush3.msra.mxu1 %v19479_v30  ;;  %v19532_v30 = vld [vmem:[#allocation74_spill] sm:$0xff]  ;;  %v19537_v62 = vand.u32 4294901760, %v19536_v57 }
 0x17d   :  { %9860 = vmatprep.subr.mxu0 %v19528_v56  ;;  %9899 = vmatprep.subr.mxu1 %v19481_v25  ;;  %v19534_v25 = vand.u32 4294901760, %v19484_v32  ;;  %v9378_v22 = vpop.f32.mrf.mxu1  ;;  %v19540_v32 = vand.u32 4294901760, %v19521_v47  ;;  %v19547_v44 = vld [vmem:[#allocation22_spill] sm:$0xff]  ;;  %v19548_v47 = vld [vmem:[#allocation19_spill] sm:$0xff]  ;;  %v19558_v57 = vand.u32 4294901760, %v19532_v30 }
 0x17e   :  { %3147 = vmatprep.mubr.f32.mxu0 %v19529_v8  ;;  %3274 = vmatprep.mubr.f32.mxu1 %v19530_v53  ;;  %v9379_v63 = vadd.f32 %v9378_v22, %v9377_v33  ;;  %v19549_v15 = vand.u32 4294901760, %v19548_v47  ;;  %v19554_v53 = vld [vmem:[#allocation24_spill] sm:$0xff]  ;;  %v248_v22 = vld [vmem:[#allocation5 + $0x3e8] sm:$0xff]  ;;  %v231_v47 = vld [vmem:[#allocation5 + $0x360] sm:$0xff] }
 0x17f   :  { %9861 = vmatpush3.msra.mxu0 %v19531_v20  ;;  %9900 = vmatpush3.msra.mxu1 %v19483_v18  ;;  %v19538_v18 = vld [vmem:[#allocation39_spill] sm:$0xff]  ;;  %v19555_v20 = vand.u32 4294901760, %v19529_v8  ;;  %v13677_v8 = vand.u32 4294901760, %v233_v42 }
 0x180   :  { %3150 = vmatmul.mubr.f32.gmra.mxu0 %v19532_v30  ;;  %3278 = vmatmul.mubr.f32.gmra.mxu1 %v19533_v35  ;;  %v13640_v3 = vadd.f32 %v9379_v63, %v1337_v50  ;;  %v249_v50 = vld [vmem:[#allocation5 + $0x3f0] sm:$0xff]  ;;  %v19562_v30 = vld [vmem:[#allocation47_spill] sm:$0xff] }
 0x181   :  { %9862 = vmatprep.subr.mxu0 %v19534_v25  ;;  %9901 = vmatprep.subr.mxu1 %v19485_v7  ;;  %v19541_v7 = vand.u32 4294901760, %v19490_v16  ;;  %v13665_v33 = vand.u32 4294901760, %v249_v50  ;;  %v19557_v25 = vand.u32 4294901760, %v19498_v27  ;;  %19560 = vst [vmem:[#allocation26_spill] sm:$0xff] %v13677_v8  ;;  %v19561_v27 = vand.u32 4294901760, %v19502_v48 }
 0x182   :  { %9863 = vmatpush3.msra.mxu0 %v19535_v23  ;;  %9902 = vmatpush3.msra.mxu1 %v19487_v54  ;;  %v234_v54 = vld [vmem:[#allocation5 + $0x378] sm:$0xff]  ;;  %v13671_v23 = vsub.f32 %v250_v10, %v13652_v37  ;;  %v247_v10 = vld [vmem:[#allocation5 + $0x3e0] sm:$0xff]  ;;  %v19566_v48 = vand.u32 4294901760, %v19539_v6 }
 0x183   :  { %9864 = vmatprep.subr.mxu0 %v19537_v62  ;;  %9903 = vmatprep.subr.mxu1 %v19538_v18  ;;  %v13660_v26 = vand.u32 4294901760, %v234_v54  ;;  %19556 = vst [vmem:[#allocation15_spill] sm:$0xff] %v13665_v33  ;;  %v19559_v62 = vand.u32 4294901760, %v19500_v28  ;;  %v232_v18 = vld [vmem:[#allocation5 + $0x368] sm:$0xff]  ;;  %v19563_v28 = vand.u32 4294901760, %v19562_v30  ;;  %v13692_v51 = vsub.f32 %v249_v50, %v13665_v33 }
 0x184   :  { %3156 = vmatprep.mubr.f32.mxu0 %v19539_v6  ;;  %3285 = vmatprep.mubr.f32.mxu1 %v19540_v32  ;;  %v13706_v50 = vand.u32 4294901760, %v247_v10  ;;  %v19570_v6 = vand.u32 4294901760, %v19542_v5 }
 0x185   :  { %9865 = vmatpush3.msra.mxu0 %v19541_v7  ;;  %9904 = vmatpush3.msra.mxu1 %v19491_v2  ;;  %v9412_v16 = vpop.f32.mrf.mxu0  ;;  %v19551_v2 = vld [vmem:[#allocation54_spill] sm:$0xff]  ;;  %19553 = vst [vmem:[#allocation20_spill] sm:$0xff] %v13660_v26 }
 0x186   :  { %3159 = vmatmul.mubr.f32.gmra.mxu0 %v19542_v5  ;;  %3289 = vmatmul.mubr.f32.gmra.mxu1 %v19543_v0  ;;  %v19552_v56 = vand.u32 4294901760, %v19551_v2  ;;  %v13689_v0 = vand.u32 4294901760, %v248_v22  ;;  %19569 = vst [vmem:[#allocation27_spill] sm:$0xff] %v13706_v50  ;;  %v18365_v2 = vand.u32 4294901760, %v13692_v51 }
 0x187   :  { %9866 = vmatprep.subr.mxu0 %v19545_v4  ;;  %9905 = vmatprep.subr.mxu1 %v19547_v44  ;;  %v9413_v35 = vpop.f32.mrf.mxu0  ;;  %v13704_v44 = vsub.f32 %v233_v42, %v13677_v8 }
 0x188   :  { %9867 = vmatpush3.msra.mxu0 %v19549_v15  ;;  %9906 = vmatpush3.msra.mxu1 %v19550_v49  ;;  %v9414_v63 = vadd.f32 %v9413_v35, %v9412_v16  ;;  %19564 = vst [vmem:[#allocation35_spill] sm:$0xff] %v13689_v0  ;;  %v19571_v16 = vand.u32 4294901760, %v13259_v34  ;;  %v19573_v34 = vand.u32 4294901760, %v13292_v13  ;;  %v13761_v30 = vsub.f32 %v13692_v51, %v18365_v2 }
 0x189   :  { %9868 = vmatprep.subr.mxu0 %v19552_v56  ;;  %9907 = vmatprep.subr.mxu1 %v19554_v53  ;;  %v13718_v56 = vsub.f32 %v248_v22, %v13689_v0  ;;  %v18364_v13 = vand.u32 4294901760, %v13704_v44  ;;  %v19577_v22 = vld [vmem:[#allocation12_spill] sm:$0xff] }
 0x18a   :  { %3296 = vmatprep.mubr.f32.mxu1 %v19555_v20  ;;  %9869 = vmatpush3.msra.mxu0 %v19557_v25  ;;  %v1581_v32 = vadd.f32 %v9414_v63, %v13564_v31  ;;  %v9415_v7 = vpop.f32.mrf.mxu0  ;;  %v18369_v31 = vand.u32 4294901760, %v13671_v23  ;;  %v230_v20 = vld [vmem:[#allocation5 + $0x358] sm:$0xff]  ;;  %v19578_v63 = vld [vmem:[#allocation68_spill] sm:$0xff] }
 0x18b   :  { %9908 = vmatpush3.msra.mxu1 %v19499_v21  ;;  %9870 = vmatprep.subr.mxu0 %v19559_v62  ;;  %v13683_v21 = vsub.f32 %v234_v54, %v13660_v26  ;;  %v13697_v54 = vand.u32 4294901760, %v232_v18 }
 0x18c   :  { %3300 = vmatmul.mubr.f32.gmra.mxu1 %v19558_v57  ;;  %9909 = vmatprep.subr.mxu1 %v19501_v1  ;;  %v19565_v1 = vld [vmem:[#allocation11_spill] sm:$0xff]  ;;  %v9416_v4 = vpop.f32.mrf.mxu0  ;;  %v13734_v53 = vsub.f32 %v13671_v23, %v18369_v31  ;;  %v19579_v57 = vand.u32 4294901760, %v19578_v63 }
 0x18d   :  { %9871 = vmatpush3.msra.mxu0 %v19561_v27  ;;  %9910 = vmatpush3.msra.mxu1 %v19503_v12  ;;  %19567 = vst [vmem:[#allocation34_spill] sm:$0xff] %v13697_v54  ;;  %v19568_v12 = vand.u32 4294901760, %v13194_v17  ;;  %v9417_v15 = vadd.f32 %v9416_v4, %v9415_v7  ;;  %v18367_v49 = vand.u32 4294901760, %v13683_v21  ;;  %v19572_v17 = vand.u32 4294901760, %v13234_v59 }
 0x18e   :  { %9872 = vmatprep.subr.mxu0 %v19563_v28  ;;  %9911 = vmatprep.subr.mxu1 %v19565_v1  ;;  %v13729_v59 = vand.u32 4294901760, %v231_v47  ;;  %v13756_v7 = vand.u32 4294901760, %v230_v20  ;;  %v229_v28 = vld [vmem:[#allocation5 + $0x350] sm:$0xff]  ;;  %v244_v1 = vld [vmem:[#allocation5 + $0x3c8] sm:$0xff] }
 0x18f   :  { %3307 = vmatprep.mubr.f32.mxu1 %v19566_v48  ;;  %9873 = vmatpush3.msra.mxu0 %v19568_v12  ;;  %v13721_v42 = vadd.f32 %v9417_v15, %v13586_v19  ;;  %v9459_v5 = vpop.f32.mrf.mxu1  ;;  %v19575_v19 = vand.u32 4294901760, %v13243_v45  ;;  %v245_v45 = vld [vmem:[#allocation5 + $0x3d0] sm:$0xff]  ;;  %v18366_v48 = vand.u32 4294901760, %v13718_v56  ;;  %v19583_v12 = vand.u32 4294901760, %v13365_v38  ;;  %v228_v15 = vld [vmem:[#allocation5 + $0x348] sm:$0xff] }
 0x190   :  { %9912 = vmatpush3.msra.mxu1 %v19505_v14  ;;  %9874 = vmatprep.subr.mxu0 %v19571_v16  ;;  %v246_v14 = vld [vmem:[#allocation5 + $0x3d8] sm:$0xff]  ;;  %19574 = vst [vmem:[#allocation17_spill] sm:$0xff] %v13729_v59  ;;  %v9418_v35 = vpop.f32.mrf.mxu0  ;;  %19582 = vst [vmem:[#allocation42_spill] sm:$0xff] %v13756_v7 }
 0x191   :  { %3311 = vmatmul.mubr.f32.gmra.mxu1 %v19570_v6  ;;  %9913 = vmatprep.subr.mxu1 %v19506_v39  ;;  %v13727_v39 = vsub.f32 %v232_v18, %v13697_v54  ;;  %v9460_v25 = vpop.f32.mrf.mxu1  ;;  %v13746_v62 = vand.u32 4294901760, %v246_v14 }
 0x192   :  { %9875 = vmatpush3.msra.mxu0 %v19572_v17  ;;  %9914 = vmatpush3.msra.mxu1 %v19507_v29  ;;  %v13741_v29 = vsub.f32 %v247_v10, %v13706_v50  ;;  %v9419_v18 = vpop.f32.mrf.mxu0  ;;  %v9461_v27 = vadd.f32 %v9460_v25, %v9459_v5  ;;  %v19581_v10 = vand.u32 4294901760, %v13299_v61  ;;  %v19585_v17 = vld [vmem:[#allocation45_spill] sm:$0xff]  ;;  %v19586_v5 = vld [vmem:[#allocation66_spill] sm:$0xff] }
 0x193   :  { %9876 = vmatprep.subr.mxu0 %v19573_v34  ;;  %9915 = vmatprep.subr.mxu1 %v13038_v46  ;;  %19580 = vst [vmem:[#allocation29_spill] sm:$0xff] %v13746_v62  ;;  %v13751_v46 = vsub.f32 %v13683_v21, %v18367_v49  ;;  %v9420_v4 = vadd.f32 %v9419_v18, %v9418_v35  ;;  %v18368_v6 = vand.u32 4294901760, %v13727_v39  ;;  %v19587_v34 = vand.u32 4294901760, %v19586_v5  ;;  %v19589_v25 = vld [vmem:[#allocation50_spill] sm:$0xff] }
 0x194   :  { %9877 = vmatpush3.msra.mxu0 %v19575_v19  ;;  %19576 = vst [vmem:[#allocation32_spill] sm:$0xff] %v13741_v29  ;;  %9916 = vmatpush3.msra.mxu1 %v19577_v22  ;;  %v13772_v16 = vadd.f32 %v9461_v27, %v1581_v32  ;;  %v13777_v35 = vand.u32 4294901760, %v245_v45  ;;  %v18370_v38 = vand.u32 4294901760, %v13741_v29  ;;  %v19590_v22 = vld [vmem:[#allocation37_spill] sm:$0xff]  ;;  %v13793_v18 = vand.u32 4294901760, %v244_v1  ;;  %v243_v49 = vld [vmem:[#allocation5 + $0x3c0] sm:$0xff] }
 0x195   :  { %9878 = vmatprep.subr.mxu0 %v19579_v57  ;;  %9917 = vmatprep.subr.mxu1 %v13067_v40  ;;  %v13768_v40 = vsub.f32 %v231_v47, %v13729_v59  ;;  %v227_v47 = vld [vmem:[#allocation5 + $0x340] sm:$0xff]  ;;  %v13786_v19 = vadd.f32 %v9420_v4, %v13607_v36  ;;  %v9421_v32 = vpop.f32.mrf.mxu0  ;;  %v13791_v57 = vand.u32 4294901760, %v229_v28  ;;  %v13796_v27 = vsub.f32 %v246_v14, %v13746_v62 }
 0x196   :  { %9879 = vmatpush3.msra.mxu0 %v19581_v10  ;;  %9918 = vmatpush3.msra.mxu1 %v13081_v58  ;;  %19588 = vst [vmem:[#allocation48_spill] sm:$0xff] %v13777_v35  ;;  %v13782_v58 = vsub.f32 %v13704_v44, %v18364_v13  ;;  %19592 = vst [vmem:[#allocation49_spill] sm:$0xff] %v13793_v18  ;;  %v9462_v10 = vpop.f32.mrf.mxu1  ;;  %v13801_v36 = vsub.f32 %v230_v20, %v13756_v7  ;;  %v13818_v20 = vand.u32 4294901760, %v227_v47 }
 0x197   :  { %9880 = vmatprep.subr.mxu0 %v19583_v12  ;;  %19584 = vst [vmem:[#allocation16_spill] sm:$0xff] %v13768_v40  ;;  %9919 = vmatprep.subr.mxu1 %v19585_v17  ;;  %19591 = vst [vmem:[#allocation40_spill] sm:$0xff] %v13791_v57  ;;  %v19594_v12 = vld [vmem:[#allocation59_spill] sm:$0xff]  ;;  %v19595_v17 = vld [vmem:[#allocation56_spill] sm:$0xff]  ;;  %v13807_v5 = vsub.f32 %v13718_v56, %v18366_v48  ;;  %v13816_v14 = vsub.f32 %v13727_v39, %v18368_v6 }
 0x198   :  { %9881 = vmatpush3.msra.mxu0 %v19587_v34  ;;  %3477 = vmatprep.mubr.f32.mxu0 %v19589_v25  ;;  %19593 = vst [vmem:[#allocation36_spill] sm:$0xff] %v13796_v27  ;;  %19596 = vst [vmem:[#allocation52_spill] sm:$0xff] %v13801_v36  ;;  %v13809_v34 = vand.u32 4294901760, %v228_v15  ;;  %v9463_v2 = vpop.f32.mrf.mxu1  ;;  %v242_v6 = vld [vmem:[#allocation5 + $0x3b8] sm:$0xff]  ;;  %v13830_v31 = vsub.f32 %v245_v45, %v13777_v35  ;;  %v13839_v63 = vsub.f32 %v244_v1, %v13793_v18 }
 0x199   :  { %9920 = vmatpush3.msra.mxu1 %v19590_v22  ;;  %3479 = vmatmul.mubr.f32.vlgmr.msra.gmra.mxu0 %v19594_v12  ;;  %v9422_v22 = vpop.f32.mrf.mxu0  ;;  %19598 = vst [vmem:[#allocation31_spill] sm:$0xff] %v13818_v20  ;;  %v9464_v4 = vadd.f32 %v9463_v2, %v9462_v10  ;;  %v226_v48 = vld [vmem:[#allocation5 + $0x338] sm:$0xff]  ;;  %v225_v2 = vld [vmem:[#allocation5 + $0x330] sm:$0xff] }
 0x19a   :  { %9921 = vmatprep.subr.mxu1 %v19595_v17  ;;  %19597 = vst [vmem:[#allocation13_spill] sm:$0xff] %v13809_v34  ;;  %9944 = vmatprep.subr.mxu0 %v13652_v37  ;;  %v18371_v17 = vand.u32 4294901760, %v13768_v40  ;;  %v9423_v13 = vadd.f32 %v9422_v22, %v9421_v32  ;;  %19599 = vst [vmem:[#allocation30_spill] sm:$0xff] %v13830_v31  ;;  %v19600_v32 = vld [vmem:[#allocation62_spill] sm:$0xff]  ;;  %v13835_v22 = vsub.f32 %v229_v28, %v13791_v57  ;;  %v19604_v1 = vld [vmem:[#allocation65_spill] sm:$0xff] }
 0x19b   :  { %9922 = vmatpush3.msra.mxu1 %v19509_v55  ;;  %9945 = vmatpush3.msra.mxu0 %v13660_v26  ;;  %v13827_v55 = vsub.f32 %v13741_v29, %v18370_v38  ;;  %19602 = vst [vmem:[#allocation33_spill] sm:$0xff] %v13839_v63  ;;  %v13848_v45 = vsub.f32 %v228_v15, %v13809_v34  ;;  %v9424_v61 = vpop.f32.mrf.mxu0  ;;  %v13866_v15 = vand.u32 4294901760, %v242_v6  ;;  %v13872_v28 = vand.u32 4294901760, %v226_v48 }
 0x19c   :  { %9923 = vmatprep.subr.mxu1 %v19511_v60  ;;  %9946 = vmatprep.subr.mxu0 %v13665_v33  ;;  %19601 = vst [vmem:[#allocation44_spill] sm:$0xff] %v13835_v22  ;;  %v13842_v38 = vadd.f32 %v9423_v13, %v13624_v9  ;;  %v13852_v10 = vadd.f32 %v9464_v4, %v13721_v42  ;;  %v13856_v9 = vand.u32 4294901760, %v243_v49  ;;  %v9465_v42 = vpop.f32.mrf.mxu1  ;;  %v13891_v26 = vand.u32 4294901760, %v225_v2 }
 0x19d   :  { %3484 = vmatprep.mubr.f32.mxu0 %v19600_v32  ;;  %9924 = vmatpush3.msra.mxu1 %v19513_v11  ;;  %19603 = vst [vmem:[#allocation55_spill] sm:$0xff] %v13848_v45  ;;  %v13859_v11 = vsub.f32 %v227_v47, %v13818_v20  ;;  %v13864_v13 = vsub.f32 %v13768_v40, %v18371_v17  ;;  %19607 = vst [vmem:[#allocation51_spill] sm:$0xff] %v13866_v15  ;;  %v9425_v60 = vpop.f32.mrf.mxu0  ;;  %v19609_v17 = vand.u32 4294901760, %v13796_v27  ;;  %v19610_v47 = vld [vmem:[#allocation67_spill] sm:$0xff]  ;;  %v19652_v40 = vld [vmem:[#allocation18_spill] sm:$0xff] }
 0x19e   :  { %9947 = vmatpush3.msra.mxu0 %v13677_v8  ;;  %9925 = vmatprep.subr.mxu1 %v19515_v24  ;;  %19605 = vst [vmem:[#allocation38_spill] sm:$0xff] %v13856_v9  ;;  %19608 = vst [vmem:[#allocation14_spill] sm:$0xff] %v13872_v28  ;;  %v9426_v4 = vadd.f32 %v9425_v60, %v9424_v61  ;;  %v9466_v33 = vpop.f32.mrf.mxu1  ;;  %v224_v61 = vld [vmem:[#allocation5 + $0x328] sm:$0xff]  ;;  %v13897_v60 = vsub.f32 %v243_v49, %v13856_v9  ;;  %v19617_v49 = vand.u32 4294901760, %v13830_v31 }
 0x19f   :  { %3486 = vmatmul.mubr.f32.gmra.mxu0 %v19604_v1  ;;  %19606 = vst [vmem:[#allocation43_spill] sm:$0xff] %v13859_v11  ;;  %9948 = vmatprep.subr.mxu0 %v13689_v0  ;;  %v13880_v8 = vsub.f32 %v13796_v27, %v19609_v17  ;;  %v241_v0 = vld [vmem:[#allocation5 + $0x3b0] sm:$0xff]  ;;  %19612 = vst [vmem:[#allocation53_spill] sm:$0xff] %v13891_v26  ;;  %v9467_v37 = vadd.f32 %v9466_v33, %v9465_v42  ;;  %v240_v17 = vld [vmem:[#allocation5 + $0x3a8] sm:$0xff]  ;;  %v19639_v27 = vand.u32 4294901760, %v13816_v14 }
 0x1a0   :  { %9926 = vmatpush3.msra.mxu1 %v19517_v52  ;;  %9949 = vmatpush3.msra.mxu0 %v13697_v54  ;;  %v19611_v54 = vand.u32 4294901760, %v13801_v36  ;;  %19613 = vst [vmem:[#allocation58_spill] sm:$0xff] %v13897_v60  ;;  %v13901_v52 = vsub.f32 %v242_v6, %v13866_v15  ;;  %v13911_v33 = vand.u32 4294901760, %v241_v0  ;;  %v14037_v14 = vld [vmem:[#allocation5 + $0x388] sm:$0xff] }
 0x1a1   :  { %9927 = vmatprep.subr.mxu1 %v19519_v41  ;;  %9950 = vmatprep.subr.mxu0 %v13706_v50  ;;  %v13919_v6 = vadd.f32 %v9467_v37, %v13786_v19  ;;  %v9468_v42 = vpop.f32.mrf.mxu1  ;;  %v19621_v19 = vand.u32 4294901760, %v13734_v53  ;;  %v223_v50 = vld [vmem:[#allocation5 + $0x320] sm:$0xff] }
 0x1a2   :  { %3491 = vmatprep.mubr.f32.mxu0 %v19610_v47  ;;  %v13889_v41 = vsub.f32 %v13801_v36, %v19611_v54  ;;  %9928 = vmatpush3.msra.mxu1 %v19522_v43  ;;  %19614 = vst [vmem:[#allocation57_spill] sm:$0xff] %v13901_v52  ;;  %v13904_v54 = vadd.f32 %v9426_v4, %v13640_v3  ;;  %19616 = vst [vmem:[#allocation61_spill] sm:$0xff] %v13911_v33  ;;  %v19618_v3 = vld [vmem:[#allocation69_spill] sm:$0xff]  ;;  %v19619_v4 = vand.u32 4294901760, %v13835_v22  ;;  %v239_v53 = vld [vmem:[#allocation5 + $0x3a0] sm:$0xff] }
 0x1a3   :  { %3609 = vmatprep.mubr.f32.mxu1 %v19589_v25  ;;  %9951 = vmatpush3.msra.mxu0 %v13729_v59  ;;  %v13909_v43 = vsub.f32 %v226_v48, %v13872_v28  ;;  %v13916_v25 = vsub.f32 %v13830_v31, %v19617_v49  ;;  %v19620_v49 = vand.u32 4294901760, %v13839_v63  ;;  %v13940_v48 = vsub.f32 %v225_v2, %v13891_v26 }
 0x1a4   :  { %3611 = vmatmul.mubr.f32.vlgmr.msra.gmra.mxu1 %v19594_v12  ;;  %3493 = vmatmul.mubr.f32.gmra.mxu0 %v19618_v3  ;;  %v13928_v24 = vsub.f32 %v13835_v22, %v19619_v4  ;;  %v19623_v4 = vand.u32 4294901760, %v13848_v45  ;;  %v19625_v2 = vand.u32 4294901760, %v13859_v11  ;;  %v13967_v31 = vsub.f32 %v241_v0, %v13911_v33 }
 0x1a5   :  { %19615 = vst [vmem:[#allocation60_spill] sm:$0xff] %v13909_v43  ;;  %9952 = vmatprep.subr.mxu0 %v13746_v62  ;;  %v13933_v37 = vsub.f32 %v13839_v63, %v19620_v49  ;;  %9991 = vmatprep.subr.mxu1 %v19621_v19  ;;  %19622 = vst [vmem:[#allocation64_spill] sm:$0xff] %v13940_v48  ;;  %v13942_v62 = vand.u32 4294901760, %v224_v61  ;;  %v9469_v49 = vpop.f32.mrf.mxu1  ;;  %v19624_v63 = vand.u32 4294901760, %v13751_v46  ;;  %v19630_v46 = vand.u32 4294901760, %v13782_v58  ;;  %v19631_v19 = vld [vmem:[#allocation72_spill] sm:$0xff] }
 0x1a6   :  { %9953 = vmatpush3.msra.mxu0 %v13756_v7  ;;  %v13947_v59 = vsub.f32 %v13848_v45, %v19623_v4  ;;  %v13956_v12 = vsub.f32 %v13859_v11, %v19625_v2  ;;  %v9470_v22 = vadd.f32 %v9469_v49, %v9468_v42  ;;  %v19626_v4 = vand.u32 4294901760, %v13761_v30  ;;  %v19627_v45 = vld [vmem:[#allocation71_spill] sm:$0xff]  ;;  %19628 = vst [vmem:[#allocation70_spill] sm:$0xff] %v13967_v31  ;;  %v238_v42 = vld [vmem:[#allocation5 + $0x398] sm:$0xff]  ;;  %v221_v30 = vld [vmem:[#allocation5 + $0x310] sm:$0xff] }
 0x1a7   :  { %9992 = vmatpush3.msra.mxu1 %v19624_v63  ;;  %9954 = vmatprep.subr.mxu0 %v13777_v35  ;;  %v13963_v63 = vand.u32 4294901760, %v240_v17  ;;  %v222_v35 = vld [vmem:[#allocation5 + $0x318] sm:$0xff]  ;;  %v13973_v49 = vand.u32 4294901760, %v223_v50  ;;  %v13982_v0 = vsub.f32 %v224_v61, %v13942_v62  ;;  %v13985_v7 = vand.u32 4294901760, %v239_v53 }
 0x1a8   :  { %9993 = vmatprep.subr.mxu1 %v19626_v4  ;;  %3498 = vmatprep.mubr.f32.mxu0 %v19627_v45  ;;  %v13976_v2 = vadd.f32 %v9470_v22, %v13842_v38  ;;  %v9471_v4 = vpop.f32.mrf.mxu1  ;;  %v50_v11 = vld [vmem:[#allocation2 + $0x38] sm:$0xff]  ;;  %v19634_v58 = vand.u32 4294901760, %v13897_v60  ;;  %v19635_v61 = vand.u32 4294901760, %v13901_v52  ;;  %v14011_v22 = vld [vmem:[#allocation5 + $0x390] sm:$0xff] }
 0x1a9   :  { %3616 = vmatprep.mubr.f32.mxu1 %v19600_v32  ;;  %9955 = vmatpush3.msra.mxu0 %v13791_v57  ;;  %19629 = vst [vmem:[#allocation63_spill] sm:$0xff] %v13973_v49  ;;  %19632 = vst [vmem:[#allocation73_spill] sm:$0xff] %v13982_v0  ;;  %v14001_v32 = vand.u32 4294901760, %v222_v35  ;;  %v49_v57 = vld [vmem:[#allocation2 + $0x30] sm:$0xff] }
 0x1aa   :  { %9994 = vmatpush3.msra.mxu1 %v19630_v46  ;;  %3500 = vmatmul.mubr.f32.gmra.mxu0 %v19631_v19  ;;  %19633 = vst [vmem:[#allocation74_spill] sm:$0xff] %v13985_v7  ;;  %v13993_v38 = vsub.f32 %v13897_v60, %v19634_v58  ;;  %v13999_v46 = vsub.f32 %v13901_v52, %v19635_v61  ;;  %v9472_v36 = vpop.f32.mrf.mxu1  ;;  %v19644_v60 = vand.u32 4294901760, %v13827_v55 }
 0x1ab   :  { %3618 = vmatmul.mubr.f32.gmra.mxu1 %v19604_v1  ;;  %9956 = vmatprep.subr.mxu0 %v13793_v18  ;;  %19636 = vst [vmem:[#allocation46_spill] sm:$0xff] %v14001_v32  ;;  %v19637_v1 = vand.u32 4294901760, %v13807_v5  ;;  %v19638_v18 = vand.u32 4294901760, %v13909_v43  ;;  %v14015_v61 = vsub.f32 %v240_v17, %v13963_v63  ;;  %v9473_v52 = vadd.f32 %v9472_v36, %v9471_v4  ;;  %v19645_v17 = vld [vmem:[#allocation75_spill] sm:$0xff] }
 0x1ac   :  { %9957 = vmatpush3.msra.mxu0 %v13809_v34  ;;  %v14021_v5 = vsub.f32 %v223_v50, %v13973_v49  ;;  %v14027_v34 = vand.u32 4294901760, %v50_v11  ;;  %3505 = vmatprep.mubr.f32.mxu0 %v19645_v17  ;;  %v19646_v36 = vand.u32 4294901760, %v13940_v48  ;;  %v220_v50 = vld [vmem:[#allocation5 + $0x308] sm:$0xff]  ;;  %v14040_v4 = vsub.f32 %v239_v53, %v13985_v7 }
 0x1ad   :  { %9995 = vmatprep.subr.mxu1 %v19637_v1  ;;  %v14009_v58 = vsub.f32 %v13909_v43, %v19638_v18  ;;  %9958 = vmatprep.subr.mxu0 %v13856_v9  ;;  %v14023_v1 = vand.u32 4294901760, %v238_v42  ;;  %v14025_v18 = vand.u32 4294901760, %v221_v30  ;;  %v14042_v9 = vand.u32 4294901760, %v49_v57 }
 0x1ae   :  { %9996 = vmatpush3.msra.mxu1 %v19639_v27  ;;  %19640 = vst [vmem:[#allocation39_spill] sm:$0xff] %v14021_v5  ;;  %19643 = vst [vmem:[#allocation25_spill] sm:$0xff] %v14027_v34  ;;  %v14035_v27 = vsub.f32 %v13940_v48, %v19646_v36  ;;  %v14045_v43 = vadd.f32 %v9473_v52, %v13904_v54  ;;  %3623 = vmatprep.mubr.f32.mxu1 %v19610_v47  ;;  %v14052_v36 = vand.u32 4294901760, %v14011_v22  ;;  %v66_v48 = vld [vmem:[#allocation2 + $0xb8] sm:$0xff]  ;;  %v219_v47 = vld [vmem:[#allocation5 + $0x300] sm:$0xff] }
 0x1af   :  { %19641 = vst [vmem:[#allocation28_spill] sm:$0xff] %v14023_v1  ;;  %19642 = vst [vmem:[#allocation21_spill] sm:$0xff] %v14025_v18  ;;  %9997 = vmatprep.subr.mxu1 %v19644_v60  ;;  %9959 = vmatpush3.msra.mxu0 %v13818_v20  ;;  %v19651_v53 = vand.u32 4294901760, %v13864_v13  ;;  %v14059_v52 = vsub.f32 %v222_v35, %v14001_v32  ;;  %v19653_v54 = vand.u32 4294901760, %v13967_v31  ;;  %v14068_v20 = vld [vmem:[#allocation5 + $0x380] sm:$0xff]  ;;  %v14076_v35 = vand.u32 4294901760, %v14037_v14  ;;  %v9506_v29 = vpop.f32.mrf.mxu0 }
 0x1b0   :  { %19647 = vst [vmem:[#allocation22_spill] sm:$0xff] %v14040_v4  ;;  %19648 = vst [vmem:[#allocation19_spill] sm:$0xff] %v14042_v9  ;;  %3507 = vmatmul.mubr.f32.gmra.mxu0 %v19652_v40  ;;  %3625 = vmatmul.mubr.f32.gmra.mxu1 %v19618_v3  ;;  %v14073_v13 = vsub.f32 %v221_v30, %v14025_v18  ;;  %v19655_v60 = vand.u32 4294901760, %v13880_v8  ;;  %v14089_v30 = vsub.f32 %v49_v57, %v14042_v9 }
 0x1b1   :  { %19649 = vst [vmem:[#allocation23_spill] sm:$0xff] %v14045_v43  ;;  %19650 = vst [vmem:[#allocation54_spill] sm:$0xff] %v14052_v36  ;;  %9998 = vmatpush3.msra.mxu1 %v19651_v53  ;;  %v14065_v55 = vsub.f32 %v13967_v31, %v19653_v54  ;;  %9960 = vmatprep.subr.mxu0 %v13866_v15  ;;  %v14078_v53 = vand.u32 4294901760, %v220_v50  ;;  %v14081_v54 = vsub.f32 %v50_v11, %v14027_v34  ;;  %v65_v43 = vld [vmem:[#allocation2 + $0xb0] sm:$0xff] }
 0x1b2   :  { %19654 = vst [vmem:[#allocation24_spill] sm:$0xff] %v14076_v35  ;;  %9999 = vmatprep.subr.mxu1 %v19655_v60  ;;  %9961 = vmatpush3.msra.mxu0 %v13872_v28  ;;  %19656 = vst [vmem:[#allocation47_spill] sm:$0xff] %v14089_v30  ;;  %v14092_v31 = vsub.f32 %v238_v42, %v14023_v1  ;;  %v19657_v11 = vand.u32 4294901760, %v13889_v41  ;;  %v19658_v8 = vand.u32 4294901760, %v13982_v0  ;;  %v14103_v3 = vand.u32 4294901760, %v14068_v20 }
 0x1b3   :  { %9962 = vmatprep.subr.mxu0 %v13911_v33  ;;  %v14106_v15 = vand.u32 4294901760, %v66_v48  ;;  %v19661_v42 = vand.u32 4294901760, %v13916_v25  ;;  %3630 = vmatprep.mubr.f32.mxu1 %v19627_v45  ;;  %v19664_v57 = vand.u32 4294901760, %v13928_v24  ;;  %v14126_v45 = vsub.f32 %v14011_v22, %v14052_v36 }
 0x1b4   :  { %10000 = vmatpush3.msra.mxu1 %v19657_v11  ;;  %v14100_v60 = vsub.f32 %v13982_v0, %v19658_v8  ;;  %19659 = vst [vmem:[#allocation11_spill] sm:$0xff] %v14103_v3  ;;  %v19662_v11 = vand.u32 4294901760, %v14015_v61  ;;  %v14117_v8 = vand.u32 4294901760, %v219_v47  ;;  %v9507_v0 = vpop.f32.mrf.mxu0  ;;  %9963 = vmatpush3.msra.mxu0 %v13891_v26  ;;  %v14133_v28 = vsub.f32 %v220_v50, %v14078_v53 }
 0x1b5   :  { %19660 = vst [vmem:[#allocation12_spill] sm:$0xff] %v14106_v15  ;;  %10001 = vmatprep.subr.mxu1 %v19661_v42  ;;  %v14128_v42 = vand.u32 4294901760, %v65_v43  ;;  %v9508_v41 = vadd.f32 %v9507_v0, %v9506_v29  ;;  %3632 = vmatmul.mubr.f32.gmra.mxu1 %v19631_v19  ;;  %v19667_v24 = vand.u32 4294901760, %v14040_v4  ;;  %v19668_v26 = vand.u32 4294901760, %v13933_v37 }
 0x1b6   :  { %v14115_v33 = vsub.f32 %v14015_v61, %v19662_v11  ;;  %19663 = vst [vmem:[#allocation68_spill] sm:$0xff] %v14117_v8  ;;  %10002 = vmatpush3.msra.mxu1 %v19664_v57  ;;  %v82_v11 = vld [vmem:[#allocation2 + $0x138] sm:$0xff]  ;;  %9964 = vmatprep.subr.mxu0 %v13963_v63  ;;  %19666 = vst [vmem:[#allocation66_spill] sm:$0xff] %v14133_v28  ;;  %v19669_v19 = vand.u32 4294901760, %v14021_v5  ;;  %v14152_v50 = vsub.f32 %v66_v48, %v14106_v15  ;;  %v9509_v25 = vpop.f32.mrf.mxu0 }
 0x1b7   :  { %19665 = vst [vmem:[#allocation45_spill] sm:$0xff] %v14128_v42  ;;  %v14138_v57 = vsub.f32 %v14040_v4, %v19667_v24  ;;  %10003 = vmatprep.subr.mxu1 %v19668_v26  ;;  %9965 = vmatpush3.msra.mxu0 %v13942_v62  ;;  %v14155_v24 = vadd.f32 %v9508_v41, %v13772_v16  ;;  %v19670_v22 = vand.u32 4294901760, %v13947_v59  ;;  %v14169_v48 = vand.u32 4294901760, %v82_v11  ;;  %v81_v16 = vld [vmem:[#allocation2 + $0x130] sm:$0xff] }
 0x1b8   :  { %v14149_v0 = vsub.f32 %v14021_v5, %v19669_v19  ;;  %9966 = vmatprep.subr.mxu0 %v13985_v7  ;;  %v4003_v26 = vand.u32 4294901760, %v14115_v33  ;;  %v14162_v37 = vsub.f32 %v219_v47, %v14117_v8  ;;  %v19672_v19 = vand.u32 4294901760, %v14059_v52  ;;  %3637 = vmatprep.mubr.f32.mxu1 %v19645_v17  ;;  %v9510_v7 = vpop.f32.mrf.mxu0 }
 0x1b9   :  { %10004 = vmatpush3.msra.mxu1 %v19670_v22  ;;  %19673 = vst [vmem:[#allocation37_spill] sm:$0xff] %v14169_v48  ;;  %v19674_v41 = vand.u32 4294901760, %v13993_v38  ;;  %v19675_v59 = vand.u32 4294901760, %v14081_v54  ;;  %v14181_v22 = vsub.f32 %v65_v43, %v14128_v42  ;;  %9967 = vmatpush3.msra.mxu0 %v13973_v49  ;;  %v19677_v38 = vand.u32 4294901760, %v13956_v12 }
 0x1ba   :  { %19671 = vst [vmem:[#allocation50_spill] sm:$0xff] %v14162_v37  ;;  %v14167_v29 = vsub.f32 %v14059_v52, %v19672_v19  ;;  %v14185_v19 = vsub.f32 %v14037_v14, %v14076_v35  ;;  %v4010_v17 = vand.u32 4294901760, %v14138_v57  ;;  %v19679_v43 = vand.u32 4294901760, %v14092_v31  ;;  %3639 = vmatmul.mubr.f32.gmra.mxu1 %v19652_v40  ;;  %9968 = vmatprep.subr.mxu0 %v14023_v1 }
 0x1bb   :  { %10005 = vmatprep.subr.mxu1 %v19674_v41  ;;  %v14177_v33 = vsub.f32 %v14081_v54, %v19675_v59  ;;  %v19678_v41 = vand.u32 4294901760, %v14089_v30  ;;  %v9511_v14 = vadd.f32 %v9510_v7, %v9509_v25  ;;  %v3898_v12 = vand.u32 4294901760, %v14149_v0  ;;  %9969 = vmatpush3.msra.mxu0 %v14001_v32  ;;  %v9512_v32 = vpop.f32.mrf.mxu0 }
 0x1bc   :  { %19676 = vst [vmem:[#allocation59_spill] sm:$0xff] %v14185_v19  ;;  %10006 = vmatpush3.msra.mxu1 %v19677_v38  ;;  %v14199_v47 = vsub.f32 %v14092_v31, %v19679_v43  ;;  %v14207_v57 = vsub.f32 %v14068_v20, %v14103_v3  ;;  %v19682_v49 = vand.u32 4294901760, %v13999_v46  ;;  %v3905_v7 = vand.u32 4294901760, %v14167_v29  ;;  %v9553_v20 = vpop.f32.mrf.mxu1  ;;  %9970 = vmatprep.subr.mxu0 %v14052_v36  ;;  %v97_v38 = vld [vmem:[#allocation2 + $0x1b0] sm:$0xff] }
 0x1bd   :  { %v14194_v59 = vsub.f32 %v14089_v30, %v19678_v41  ;;  %v14209_v41 = vand.u32 4294901760, %v81_v16  ;;  %v98_v30 = vld [vmem:[#allocation2 + $0x1b8] sm:$0xff]  ;;  %v14217_v25 = vsub.f32 %v82_v11, %v14169_v48  ;;  %v14220_v0 = vadd.f32 %v9511_v14, %v13852_v10  ;;  %9971 = vmatpush3.msra.mxu0 %v14025_v18  ;;  %4041 = vmatprep.mubr.f32.mxu1 %v14027_v34  ;;  %v19717_v34 = vld [vmem:[#allocation55_spill] sm:$0xff] }
 0x1be   :  { %19680 = vst [vmem:[#allocation56_spill] sm:$0xff] %v14207_v57  ;;  %10007 = vmatprep.subr.mxu1 %v19682_v49  ;;  %v19684_v43 = vand.u32 4294901760, %v14009_v58  ;;  %v3744_v49 = vand.u32 4294901760, %v14177_v33  ;;  %v19685_v46 = vand.u32 4294901760, %v14126_v45  ;;  %v19686_v10 = vand.u32 4294901760, %v14065_v55  ;;  %9972 = vmatprep.subr.mxu0 %v14076_v35 }
 0x1bf   :  { %19681 = vst [vmem:[#allocation62_spill] sm:$0xff] %v14209_v41  ;;  %19683 = vst [vmem:[#allocation65_spill] sm:$0xff] %v14217_v25  ;;  %v3750_v58 = vand.u32 4294901760, %v14194_v59  ;;  %v4017_v14 = vand.u32 4294901760, %v14199_v47  ;;  %v19688_v40 = vand.u32 4294901760, %v14035_v27  ;;  %v19689_v11 = vand.u32 4294901760, %v14152_v50  ;;  %v9513_v47 = vpop.f32.mrf.mxu0  ;;  %9973 = vmatpush3.msra.mxu0 %v14078_v53 }
 0x1c0   :  { %10008 = vmatpush3.msra.mxu1 %v19684_v43  ;;  %v4023_v29 = vsub.f32 %v14126_v45, %v19685_v46  ;;  %v14237_v43 = vand.u32 4294901760, %v98_v30  ;;  %v9554_v46 = vpop.f32.mrf.mxu1  ;;  %v14247_v59 = vsub.f32 %v81_v16, %v14209_v41  ;;  %v19690_v33 = vand.u32 4294901760, %v14073_v13  ;;  %9974 = vmatprep.subr.mxu0 %v14103_v3 }
 0x1c1   :  { %10009 = vmatprep.subr.mxu1 %v19686_v10  ;;  %v3758_v55 = vsub.f32 %v14152_v50, %v19689_v11  ;;  %v9555_v18 = vadd.f32 %v9554_v46, %v9553_v20  ;;  %v14254_v35 = vand.u32 4294901760, %v97_v38  ;;  %v9514_v36 = vadd.f32 %v9513_v47, %v9512_v32  ;;  %v114_v10 = vld [vmem:[#allocation2 + $0x238] sm:$0xff]  ;;  %9975 = vmatpush3.msra.mxu0 %v14117_v8 }
 0x1c2   :  { %19687 = vst [vmem:[#allocation67_spill] sm:$0xff] %v14237_v43  ;;  %10010 = vmatpush3.msra.mxu1 %v19688_v40  ;;  %v3911_v27 = vsub.f32 %v14073_v13, %v19690_v33  ;;  %v19692_v11 = vand.u32 4294901760, %v14100_v60  ;;  %v19693_v16 = vand.u32 4294901760, %v14181_v22  ;;  %v19694_v20 = vand.u32 4294901760, %v14185_v19  ;;  %3745 = vmatprep.mubr.f32.mxu0 %v3744_v49  ;;  %v9556_v8 = vpop.f32.mrf.mxu1 }
 0x1c3   :  { %10011 = vmatprep.subr.mxu1 %v4003_v26  ;;  %19691 = vst [vmem:[#allocation69_spill] sm:$0xff] %v14254_v35  ;;  %v14267_v40 = vadd.f32 %v9555_v18, %v14155_v24  ;;  %v4024_v32 = vand.u32 4294901760, %v4023_v29  ;;  %v19695_v60 = vand.u32 4294901760, %v14133_v28  ;;  %v3759_v33 = vand.u32 4294901760, %v3758_v55  ;;  %v113_v29 = vld [vmem:[#allocation2 + $0x230] sm:$0xff]  ;;  %3751 = vmatmul.mubr.f32.vlgmr.msra.gmra.mxu0 %v3750_v58 }
 0x1c4   :  { %10012 = vmatpush3.msra.mxu1 %v19692_v11  ;;  %v3764_v26 = vsub.f32 %v14181_v22, %v19693_v16  ;;  %v4030_v46 = vsub.f32 %v14185_v19, %v19694_v20  ;;  %v14274_v11 = vsub.f32 %v98_v30, %v14237_v43  ;;  %v14277_v16 = vadd.f32 %v9514_v36, %v13919_v6  ;;  %v9515_v20 = vpop.f32.mrf.mxu0 }
 0x1c5   :  { %10013 = vmatprep.subr.mxu1 %v4010_v17  ;;  %v3918_v47 = vsub.f32 %v14133_v28, %v19695_v60  ;;  %v19696_v18 = vand.u32 4294901760, %v14207_v57  ;;  %v3912_v60 = vand.u32 4294901760, %v3911_v27  ;;  %v19697_v30 = vand.u32 4294901760, %v14217_v25  ;;  %10038 = vmatprep.subr.mxu0 %v13671_v23  ;;  %v9557_v27 = vpop.f32.mrf.mxu1 }
 0x1c6   :  { %10014 = vmatpush3.msra.mxu1 %v3898_v12  ;;  %v14287_v36 = vsub.f32 %v97_v38, %v14254_v35  ;;  %v14289_v12 = vand.u32 4294901760, %v114_v10  ;;  %v9516_v49 = vpop.f32.mrf.mxu0  ;;  %v3765_v55 = vand.u32 4294901760, %v3764_v26  ;;  %v19699_v17 = vand.u32 4294901760, %v14162_v37  ;;  %10039 = vmatpush3.msra.mxu0 %v13683_v21 }
 0x1c7   :  { %v4037_v24 = vsub.f32 %v14207_v57, %v19696_v18  ;;  %10015 = vmatprep.subr.mxu1 %v4017_v14  ;;  %v3773_v6 = vsub.f32 %v14217_v25, %v19697_v30  ;;  %v4031_v18 = vand.u32 4294901760, %v4030_v46  ;;  %v9517_v14 = vadd.f32 %v9516_v49, %v9515_v20  ;;  %10040 = vmatprep.subr.mxu0 %v13692_v51  ;;  %v9559_v49 = vpop.f32.mrf.mxu1 }
 0x1c8   :  { %19698 = vst [vmem:[#allocation71_spill] sm:$0xff] %v14289_v12  ;;  %10016 = vmatpush3.msra.mxu1 %v3905_v7  ;;  %v3925_v58 = vsub.f32 %v14162_v37, %v19699_v17  ;;  %v3919_v30 = vand.u32 4294901760, %v3918_v47  ;;  %v18464_v38 = vand.u32 4294901760, %v14274_v11  ;;  %v14297_v25 = vand.u32 4294901760, %v113_v29  ;;  %3760 = vmatprep.mubr.f32.mxu0 %v3759_v33  ;;  %v9518_v33 = vpop.f32.mrf.mxu0 }
 0x1c9   :  { %10017 = vmatprep.subr.mxu1 %v4024_v32  ;;  %v9558_v3 = vadd.f32 %v9557_v27, %v9556_v8  ;;  %v4038_v7 = vand.u32 4294901760, %v4037_v24  ;;  %v19701_v26 = vand.u32 4294901760, %v14247_v59  ;;  %v2066_v20 = vadd.f32 %v9517_v14, %v13976_v2  ;;  %10041 = vmatpush3.msra.mxu0 %v13704_v44 }
 0x1ca   :  { %19700 = vst [vmem:[#allocation72_spill] sm:$0xff] %v14297_v25  ;;  %10018 = vmatpush3.msra.mxu1 %v3912_v60  ;;  %v3774_v32 = vand.u32 4294901760, %v3773_v6  ;;  %v18462_v47 = vand.u32 4294901760, %v14287_v36  ;;  %v14307_v17 = vsub.f32 %v114_v10, %v14289_v12  ;;  %3766 = vmatmul.mubr.f32.gmra.mxu0 %v3765_v55  ;;  %v3926_v24 = vand.u32 4294901760, %v3925_v58  ;;  %v9519_v10 = vpop.f32.mrf.mxu0  ;;  %v9560_v6 = vpop.f32.mrf.mxu1  ;;  %v19704_v55 = vld [vmem:[#allocation32_spill] sm:$0xff] }
 0x1cb   :  { %v3779_v46 = vsub.f32 %v14247_v59, %v19701_v26  ;;  %v14310_v8 = vadd.f32 %v9558_v3, %v14220_v0  ;;  %10019 = vmatprep.subr.mxu1 %v4031_v18  ;;  %10042 = vmatprep.subr.mxu0 %v13718_v56  ;;  %v3788_v2 = vsub.f32 %v14274_v11, %v18464_v38  ;;  %v19714_v38 = vld [vmem:[#allocation26_spill] sm:$0xff] }
 0x1cc   :  { %19702 = vst [vmem:[#allocation75_spill] sm:$0xff] %v14307_v17  ;;  %10020 = vmatpush3.msra.mxu1 %v3919_v30  ;;  %v14317_v60 = vsub.f32 %v113_v29, %v14297_v25  ;;  %10043 = vmatpush3.msra.mxu0 %v13727_v39  ;;  %v9520_v0 = vadd.f32 %v9519_v10, %v9518_v33  ;;  %v18463_v58 = vand.u32 4294901760, %v14307_v17  ;;  %v19705_v29 = vld [vmem:[#allocation23_spill] sm:$0xff]  ;;  %v19706_v30 = vld [vmem:[#allocation16_spill] sm:$0xff] }
 0x1cd   :  { %10021 = vmatprep.subr.mxu1 %v4038_v7  ;;  %v3780_v3 = vand.u32 4294901760, %v3779_v46  ;;  %10044 = vmatprep.subr.mxu0 %v19704_v55  ;;  %v3794_v18 = vsub.f32 %v14287_v36, %v18462_v47  ;;  %v9561_v14 = vadd.f32 %v9560_v6, %v9559_v49  ;;  %v3789_v7 = vand.u32 4294901760, %v3788_v2  ;;  %v19707_v33 = vld [vmem:[#allocation36_spill] sm:$0xff]  ;;  %v19708_v49 = vld [vmem:[#allocation41_spill] sm:$0xff] }
 0x1ce   :  { %19703 = vst [vmem:[#allocation18_spill] sm:$0xff] %v14317_v60  ;;  %3775 = vmatprep.mubr.f32.mxu0 %v3774_v32  ;;  %10022 = vmatpush3.msra.mxu1 %v3926_v24  ;;  %v2075_v27 = vadd.f32 %v9520_v0, %v19705_v29  ;;  %v18469_v26 = vand.u32 4294901760, %v14317_v60  ;;  %v9562_v32 = vpop.f32.mrf.mxu1  ;;  %v19709_v24 = vld [vmem:[#allocation52_spill] sm:$0xff]  ;;  %v3803_v0 = vsub.f32 %v14307_v17, %v18463_v58  ;;  %v19711_v29 = vld [vmem:[#allocation30_spill] sm:$0xff] }
 0x1cf   :  { %10045 = vmatpush3.msra.mxu0 %v19706_v30  ;;  %4043 = vmatmul.mubr.f32.vlgmr.msra.gmra.mxu1 %v14042_v9  ;;  %v14331_v46 = vadd.f32 %v9561_v14, %v14277_v16  ;;  %v3795_v10 = vand.u32 4294901760, %v3794_v18  ;;  %v19710_v2 = vld [vmem:[#allocation20_spill] sm:$0xff]  ;;  %v19712_v14 = vld [vmem:[#allocation15_spill] sm:$0xff] }
 0x1d0   :  { %3781 = vmatmul.mubr.f32.gmra.mxu0 %v3780_v3  ;;  %10046 = vmatprep.subr.mxu0 %v19707_v33  ;;  %v9563_v6 = vpop.f32.mrf.mxu1  ;;  %v3809_v3 = vsub.f32 %v14317_v60, %v18469_v26  ;;  %v19713_v18 = vld [vmem:[#allocation44_spill] sm:$0xff]  ;;  %v3804_v9 = vand.u32 4294901760, %v3803_v0  ;;  %v19718_v60 = vld [vmem:[#allocation34_spill] sm:$0xff]  ;;  %v19721_v0 = vld [vmem:[#allocation43_spill] sm:$0xff] }
 0x1d1   :  { %10085 = vmatprep.subr.mxu1 %v19708_v49  ;;  %10047 = vmatpush3.msra.mxu0 %v19709_v24  ;;  %v9564_v16 = vadd.f32 %v9563_v6, %v9562_v32  ;;  %v19715_v32 = vld [vmem:[#allocation33_spill] sm:$0xff]  ;;  %v19716_v6 = vld [vmem:[#allocation35_spill] sm:$0xff] }
 0x1d2   :  { %10086 = vmatpush3.msra.mxu1 %v19710_v2  ;;  %10048 = vmatprep.subr.mxu0 %v19711_v29  ;;  %v9565_v58 = vpop.f32.mrf.mxu1  ;;  %v3810_v26 = vand.u32 4294901760, %v3809_v3  ;;  %v19723_v3 = vld [vmem:[#allocation57_spill] sm:$0xff] }
 0x1d3   :  { %10087 = vmatprep.subr.mxu1 %v19712_v14  ;;  %3790 = vmatprep.mubr.f32.mxu0 %v3789_v7  ;;  %v14347_v47 = vadd.f32 %v9564_v16, %v2066_v20  ;;  %v19719_v20 = vld [vmem:[#allocation58_spill] sm:$0xff]  ;;  %v19720_v16 = vld [vmem:[#allocation27_spill] sm:$0xff] }
 0x1d4   :  { %4048 = vmatprep.mubr.f32.mxu1 %v14106_v15  ;;  %10049 = vmatpush3.msra.mxu0 %v19713_v18  ;;  %v9566_v7 = vpop.f32.mrf.mxu1 }
 0x1d5   :  { %10088 = vmatpush3.msra.mxu1 %v19714_v38  ;;  %3796 = vmatmul.mubr.f32.gmra.mxu0 %v3795_v10  ;;  %v9567_v15 = vadd.f32 %v9566_v7, %v9565_v58  ;;  %v19724_v58 = vld [vmem:[#allocation29_spill] sm:$0xff]  ;;  %v19725_v7 = vld [vmem:[#allocation60_spill] sm:$0xff] }
 0x1d6   :  { %4050 = vmatmul.mubr.f32.gmra.mxu1 %v14128_v42  ;;  %10050 = vmatprep.subr.mxu0 %v19715_v32  ;;  %v19722_v42 = vld [vmem:[#allocation17_spill] sm:$0xff] }
 0x1d7   :  { %10089 = vmatprep.subr.mxu1 %v19716_v6  ;;  %10051 = vmatpush3.msra.mxu0 %v19717_v34  ;;  %v14357_v10 = vadd.f32 %v9567_v15, %v2075_v27  ;;  %v19728_v15 = vld [vmem:[#allocation48_spill] sm:$0xff] }
 0x1d8   :  { %10090 = vmatpush3.msra.mxu1 %v19718_v60  ;;  %10052 = vmatprep.subr.mxu0 %v19719_v20 }
 0x1d9   :  { %10091 = vmatprep.subr.mxu1 %v19720_v16  ;;  %3805 = vmatprep.mubr.f32.mxu0 %v3804_v9  ;;  %v9600_v17 = vpop.f32.mrf.mxu0  ;;  %v19726_v16 = vld [vmem:[#allocation42_spill] sm:$0xff] }
 0x1da   :  { %4055 = vmatprep.mubr.f32.mxu1 %v14169_v48  ;;  %10053 = vmatpush3.msra.mxu0 %v19721_v0  ;;  %v19727_v9 = vld [vmem:[#allocation70_spill] sm:$0xff]  ;;  %v19729_v48 = vld [vmem:[#allocation64_spill] sm:$0xff] }
 0x1db   :  { %10092 = vmatpush3.msra.mxu1 %v19722_v42  ;;  %3811 = vmatmul.mubr.f32.gmra.mxu0 %v3810_v26  ;;  %v9601_v27 = vpop.f32.mrf.mxu0  ;;  %v19730_v26 = vld [vmem:[#allocation40_spill] sm:$0xff] }
 0x1dc   :  { %4057 = vmatmul.mubr.f32.gmra.mxu1 %v14209_v41  ;;  %10054 = vmatprep.subr.mxu0 %v19723_v3  ;;  %v9602_v41 = vadd.f32 %v9601_v27, %v9600_v17  ;;  %v19735_v27 = vld [vmem:[#allocation31_spill] sm:$0xff] }
 0x1dd   :  { %10093 = vmatprep.subr.mxu1 %v19724_v58  ;;  %10055 = vmatpush3.msra.mxu0 %v19725_v7  ;;  %v19731_v7 = vld [vmem:[#allocation49_spill] sm:$0xff] }
 0x1de   :  { %10094 = vmatpush3.msra.mxu1 %v19726_v16  ;;  %10056 = vmatprep.subr.mxu0 %v19727_v9  ;;  %v19732_v58 = vld [vmem:[#allocation73_spill] sm:$0xff]  ;;  %v2395_v9 = vadd.f32 %v9602_v41, %v14267_v40  ;;  %v9603_v16 = vpop.f32.mrf.mxu0  ;;  %v19736_v41 = vld [vmem:[#allocation51_spill] sm:$0xff] }
 0x1df   :  { %10095 = vmatprep.subr.mxu1 %v19728_v15  ;;  %4062 = vmatprep.mubr.f32.mxu1 %v14237_v43  ;;  %v19733_v15 = vld [vmem:[#allocation13_spill] sm:$0xff]  ;;  %v19734_v43 = vld [vmem:[#allocation38_spill] sm:$0xff] }
 0x1e0   :  { %10057 = vmatpush3.msra.mxu0 %v19729_v48  ;;  %10096 = vmatpush3.msra.mxu1 %v19730_v26  ;;  %v9604_v17 = vpop.f32.mrf.mxu0 }
 0x1e1   :  { %4064 = vmatmul.mubr.f32.gmra.mxu1 %v14254_v35  ;;  %10058 = vmatprep.subr.mxu0 %v14015_v61  ;;  %v9605_v35 = vadd.f32 %v9604_v17, %v9603_v16  ;;  %v19739_v17 = vld [vmem:[#allocation53_spill] sm:$0xff] }
 0x1e2   :  { %10097 = vmatprep.subr.mxu1 %v19731_v7  ;;  %10059 = vmatpush3.msra.mxu0 %v19732_v58 }
 0x1e3   :  { %10098 = vmatpush3.msra.mxu1 %v19733_v15  ;;  %10060 = vmatprep.subr.mxu0 %v14040_v4  ;;  %v2402_v40 = vadd.f32 %v9605_v35, %v14310_v8  ;;  %v9647_v4 = vpop.f32.mrf.mxu1 }
 0x1e4   :  { %10099 = vmatprep.subr.mxu1 %v19734_v43  ;;  %4069 = vmatprep.mubr.f32.mxu1 %v14289_v12  ;;  %v19737_v43 = vld [vmem:[#allocation14_spill] sm:$0xff]  ;;  %v9606_v12 = vpop.f32.mrf.mxu0 }
 0x1e5   :  { %10061 = vmatpush3.msra.mxu0 %v14021_v5  ;;  %10100 = vmatpush3.msra.mxu1 %v19735_v27  ;;  %v19738_v5 = vld [vmem:[#allocation61_spill] sm:$0xff]  ;;  %v9648_v16 = vpop.f32.mrf.mxu1 }
 0x1e6   :  { %4071 = vmatmul.mubr.f32.gmra.mxu1 %v14297_v25  ;;  %10062 = vmatprep.subr.mxu0 %v14092_v31  ;;  %v9607_v25 = vpop.f32.mrf.mxu0 }
 0x1e7   :  { %10101 = vmatprep.subr.mxu1 %v19736_v41  ;;  %10063 = vmatpush3.msra.mxu0 %v14059_v52  ;;  %v9649_v41 = vadd.f32 %v9648_v16, %v9647_v4  ;;  %v9608_v35 = vadd.f32 %v9607_v25, %v9606_v12  ;;  %v19741_v4 = vld [vmem:[#allocation63_spill] sm:$0xff]  ;;  %v19743_v12 = vand.u32 4294901760, %v13671_v23  ;;  %v19749_v23 = vand.u32 4294901760, %v13704_v44 }
 0x1e8   :  { %10102 = vmatpush3.msra.mxu1 %v19737_v43  ;;  %10064 = vmatprep.subr.mxu0 %v14126_v45 }
 0x1e9   :  { %10103 = vmatprep.subr.mxu1 %v19738_v5  ;;  %10065 = vmatpush3.msra.mxu0 %v14073_v13  ;;  %v14398_v8 = vadd.f32 %v9649_v41, %v2395_v9  ;;  %v19740_v5 = vld [vmem:[#allocation74_spill] sm:$0xff] }
 0x1ea   :  { %10104 = vmatpush3.msra.mxu1 %v19739_v17  ;;  %10066 = vmatprep.subr.mxu0 %v14185_v19  ;;  %v2409_v17 = vadd.f32 %v9608_v35, %v14331_v46  ;;  %v9609_v19 = vpop.f32.mrf.mxu0  ;;  %v19744_v9 = vld [vmem:[#allocation46_spill] sm:$0xff]  ;;  %v19745_v46 = vand.u32 4294901760, %v13683_v21  ;;  %v19750_v21 = vld [vmem:[#allocation24_spill] sm:$0xff] }
 0x1eb   :  { %10105 = vmatprep.subr.mxu1 %v13963_v63  ;;  %10067 = vmatpush3.msra.mxu0 %v14133_v28  ;;  %v9650_v16 = vpop.f32.mrf.mxu1  ;;  %v19742_v28 = vld [vmem:[#allocation47_spill] sm:$0xff]  ;;  %v19746_v35 = vld [vmem:[#allocation54_spill] sm:$0xff] }
 0x1ec   :  { %10106 = vmatpush3.msra.mxu1 %v13942_v62  ;;  %10068 = vmatprep.subr.mxu0 %v14207_v57  ;;  %v9610_v25 = vpop.f32.mrf.mxu0  ;;  %v19748_v57 = vld [vmem:[#allocation21_spill] sm:$0xff] }
 0x1ed   :  { %10107 = vmatprep.subr.mxu1 %v19740_v5  ;;  %10069 = vmatpush3.msra.mxu0 %v14162_v37  ;;  %v9611_v41 = vadd.f32 %v9610_v25, %v9609_v19  ;;  %v9651_v37 = vpop.f32.mrf.mxu1 }
 0x1ee   :  { %4206 = vmatprep.mubr.f32.mxu0 %v14081_v54  ;;  %10108 = vmatpush3.msra.mxu1 %v19741_v4  ;;  %v9652_v5 = vadd.f32 %v9651_v37, %v9650_v16  ;;  %v19747_v4 = vand.u32 4294901760, %v13692_v51  ;;  %v19751_v51 = vand.u32 4294901760, %v13718_v56  ;;  %v19753_v16 = vld [vmem:[#allocation11_spill] sm:$0xff]  ;;  %v19757_v56 = vand.u32 4294901760, %v14081_v54 }
 0x1ef   :  { %4209 = vmatmul.mubr.f32.vlgmr.msra.gmra.mxu0 %v19742_v28  ;;  %10109 = vmatprep.subr.mxu1 %v14023_v1  ;;  %v2416_v1 = vadd.f32 %v9611_v41, %v14347_v47  ;;  %v19752_v47 = vand.u32 4294901760, %v13727_v39  ;;  %v19758_v39 = vand.u32 4294901760, %v19706_v30  ;;  %v19761_v54 = vand.u32 4294901760, %v19709_v24 }
 0x1f0   :  { %10132 = vmatprep.subr.mxu0 %v19743_v12  ;;  %10110 = vmatpush3.msra.mxu1 %v19744_v9  ;;  %v14420_v19 = vadd.f32 %v9652_v5, %v2402_v40  ;;  %v9612_v25 = vpop.f32.mrf.mxu0  ;;  %v19754_v40 = vand.u32 4294901760, %v19704_v55  ;;  %v19755_v12 = vld [vmem:[#allocation65_spill] sm:$0xff]  ;;  %v19762_v30 = vand.u32 4294901760, %v19711_v29  ;;  %v19766_v29 = vand.u32 4294901760, %v19715_v32 }
 0x1f1   :  { %10133 = vmatpush3.msra.mxu0 %v19745_v46  ;;  %10111 = vmatprep.subr.mxu1 %v19746_v35  ;;  %v9653_v37 = vpop.f32.mrf.mxu1  ;;  %v19756_v46 = vld [vmem:[#allocation68_spill] sm:$0xff]  ;;  %v19771_v32 = vand.u32 4294901760, %v19755_v12 }
 0x1f2   :  { %10134 = vmatprep.subr.mxu0 %v19747_v4  ;;  %4215 = vmatprep.mubr.f32.mxu0 %v14152_v50  ;;  %v9613_v4 = vpop.f32.mrf.mxu0 }
 0x1f3   :  { %10112 = vmatpush3.msra.mxu1 %v19748_v57  ;;  %10135 = vmatpush3.msra.mxu0 %v19749_v23  ;;  %v9614_v44 = vadd.f32 %v9613_v4, %v9612_v25  ;;  %v9654_v5 = vpop.f32.mrf.mxu1  ;;  %v19770_v4 = vld [vmem:[#allocation75_spill] sm:$0xff] }
 0x1f4   :  { %4218 = vmatmul.mubr.f32.gmra.mxu0 %v14181_v22  ;;  %10113 = vmatprep.subr.mxu1 %v19750_v21  ;;  %v9655_v41 = vadd.f32 %v9654_v5, %v9653_v37  ;;  %v19760_v37 = vand.u32 4294901760, %v19707_v33  ;;  %v19764_v33 = vand.u32 4294901760, %v19713_v18  ;;  %v19775_v5 = vand.u32 4294901760, %v19723_v3 }
 0x1f5   :  { %10136 = vmatprep.subr.mxu0 %v19751_v51  ;;  %10114 = vmatpush3.msra.mxu1 %v14078_v53  ;;  %v2423_v23 = vadd.f32 %v9614_v44, %v14357_v10  ;;  %v19759_v51 = vand.u32 4294901760, %v19742_v28  ;;  %v281_v44 = vld [vmem:[#allocation5 + $0x4f0] sm:$0xff]  ;;  %v19786_v3 = vand.u32 4294901760, %v14274_v11 }
 0x1f6   :  { %10137 = vmatpush3.msra.mxu0 %v19752_v47  ;;  %10115 = vmatprep.subr.mxu1 %v19753_v16  ;;  %v14441_v25 = vadd.f32 %v9655_v41, %v2409_v17  ;;  %v9656_v55 = vpop.f32.mrf.mxu1  ;;  %v19763_v17 = vand.u32 4294901760, %v14152_v50  ;;  %v19767_v50 = vand.u32 4294901760, %v19717_v34  ;;  %v282_v34 = vld [vmem:[#allocation5 + $0x4f8] sm:$0xff] }
 0x1f7   :  { %10138 = vmatprep.subr.mxu0 %v19754_v40  ;;  %4224 = vmatprep.mubr.f32.mxu0 %v19755_v12  ;;  %v266_v47 = vld [vmem:[#allocation5 + $0x478] sm:$0xff]  ;;  %v19777_v12 = vld [vmem:[#allocation60_spill] sm:$0xff] }
 0x1f8   :  { %10116 = vmatpush3.msra.mxu1 %v19756_v46  ;;  %4349 = vmatprep.mubr.f32.mxu1 %v19757_v56  ;;  %v9657_v10 = vpop.f32.mrf.mxu1  ;;  %v19776_v40 = vld [vmem:[#allocation29_spill] sm:$0xff]  ;;  %v19778_v41 = vand.u32 4294901760, %v19777_v12  ;;  %v14491_v56 = vand.u32 4294901760, %v266_v47 }
 0x1f9   :  { %10139 = vmatpush3.msra.mxu0 %v19758_v39  ;;  %4353 = vmatmul.mubr.f32.vlgmr.msra.gmra.mxu1 %v19759_v51  ;;  %v9658_v28 = vadd.f32 %v9657_v10, %v9656_v55  ;;  %v19782_v39 = vld [vmem:[#allocation42_spill] sm:$0xff]  ;;  %v19785_v55 = vld [vmem:[#allocation48_spill] sm:$0xff]  ;;  %v264_v10 = vld [vmem:[#allocation5 + $0x468] sm:$0xff] }
 0x1fa   :  { %4227 = vmatmul.mubr.f32.gmra.mxu0 %v14247_v59  ;;  %10140 = vmatprep.subr.mxu0 %v19760_v37  ;;  %19780 = vst [vmem:[#allocation23_spill] sm:$0xff] %v14491_v56  ;;  %v19783_v51 = vld [vmem:[#allocation70_spill] sm:$0xff]  ;;  %v265_v37 = vld [vmem:[#allocation5 + $0x470] sm:$0xff] }
 0x1fb   :  { %10179 = vmatprep.subr.mxu1 %v19708_v49  ;;  %10141 = vmatpush3.msra.mxu0 %v19761_v54  ;;  %v14458_v49 = vadd.f32 %v9658_v28, %v2416_v1  ;;  %v19768_v1 = vand.u32 4294901760, %v19719_v20  ;;  %v19774_v20 = vand.u32 4294901760, %v14247_v59  ;;  %v19784_v59 = vand.u32 4294901760, %v19783_v51  ;;  %v280_v54 = vld [vmem:[#allocation5 + $0x4e8] sm:$0xff] }
 0x1fc   :  { %10180 = vmatpush3.msra.mxu1 %v19710_v2  ;;  %10142 = vmatprep.subr.mxu0 %v19762_v30  ;;  %v9659_v24 = vpop.f32.mrf.mxu1  ;;  %v19765_v2 = vand.u32 4294901760, %v14181_v22  ;;  %v19787_v28 = vand.u32 4294901760, %v19729_v48  ;;  %v19790_v48 = vand.u32 4294901760, %v19732_v58 }
 0x1fd   :  { %10181 = vmatprep.subr.mxu1 %v19712_v14  ;;  %4233 = vmatprep.mubr.f32.mxu0 %v14274_v11 }
 0x1fe   :  { %4360 = vmatprep.mubr.f32.mxu1 %v19763_v17  ;;  %10143 = vmatpush3.msra.mxu0 %v19764_v33  ;;  %v9660_v14 = vpop.f32.mrf.mxu1  ;;  %v19788_v33 = vand.u32 4294901760, %v14287_v36 }
 0x1ff   :  { %10182 = vmatpush3.msra.mxu1 %v19714_v38  ;;  %4236 = vmatmul.mubr.f32.gmra.mxu0 %v14287_v36  ;;  %v9661_v18 = vadd.f32 %v9660_v14, %v9659_v24  ;;  %v19769_v38 = vld [vmem:[#allocation27_spill] sm:$0xff]  ;;  %v19789_v24 = vand.u32 4294901760, %v14015_v61  ;;  %v14522_v36 = vand.u32 4294901760, %v280_v54  ;;  %v14524_v61 = vand.u32 4294901760, %v264_v10 }
 0x200   :  { %4364 = vmatmul.mubr.f32.gmra.mxu1 %v19765_v2  ;;  %10144 = vmatprep.subr.mxu0 %v19766_v29  ;;  %v14509_v2 = vsub.f32 %v266_v47, %v14491_v56  ;;  %v263_v47 = vld [vmem:[#allocation5 + $0x460] sm:$0xff] }
 0x201   :  { %10183 = vmatprep.subr.mxu1 %v19716_v6  ;;  %10145 = vmatpush3.msra.mxu0 %v19767_v50  ;;  %v14474_v22 = vadd.f32 %v9661_v18, %v2423_v23  ;;  %v19772_v6 = vand.u32 4294901760, %v19721_v0  ;;  %v14489_v0 = vand.u32 4294901760, %v282_v34  ;;  %v14493_v23 = vand.u32 4294901760, %v281_v44  ;;  %19792 = vst [vmem:[#allocation41_spill] sm:$0xff] %v14522_v36  ;;  %19793 = vst [vmem:[#allocation52_spill] sm:$0xff] %v14524_v61  ;;  %v19794_v18 = vld [vmem:[#allocation22_spill] sm:$0xff] }
 0x202   :  { %10184 = vmatpush3.msra.mxu1 %v19718_v60  ;;  %10146 = vmatprep.subr.mxu0 %v19768_v1  ;;  %v19773_v60 = vld [vmem:[#allocation18_spill] sm:$0xff]  ;;  %v19795_v1 = vand.u32 4294901760, %v19794_v18  ;;  %v14550_v12 = vsub.f32 %v280_v54, %v14522_v36  ;;  %v19807_v54 = vld [vmem:[#allocation61_spill] sm:$0xff] }
 0x203   :  { %10185 = vmatprep.subr.mxu1 %v19769_v38  ;;  %4242 = vmatprep.mubr.f32.mxu0 %v19770_v4  ;;  %19779 = vst [vmem:[#allocation32_spill] sm:$0xff] %v14489_v0  ;;  %19781 = vst [vmem:[#allocation16_spill] sm:$0xff] %v14493_v23  ;;  %v14512_v11 = vsub.f32 %v282_v34, %v14489_v0  ;;  %v14515_v29 = vsub.f32 %v281_v44, %v14493_v23  ;;  %v19796_v38 = vld [vmem:[#allocation38_spill] sm:$0xff] }
 0x204   :  { %4371 = vmatprep.mubr.f32.mxu1 %v19771_v32  ;;  %10147 = vmatpush3.msra.mxu0 %v19772_v6  ;;  %v19798_v32 = vld [vmem:[#allocation39_spill] sm:$0xff]  ;;  %v279_v34 = vld [vmem:[#allocation5 + $0x4e0] sm:$0xff] }
 0x205   :  { %10186 = vmatpush3.msra.mxu1 %v19722_v42  ;;  %4245 = vmatmul.mubr.f32.gmra.mxu0 %v19773_v60  ;;  %v9694_v42 = vpop.f32.mrf.mxu0  ;;  %v19799_v6 = vand.u32 4294901760, %v19798_v32  ;;  %v18500_v44 = vand.u32 4294901760, %v14515_v29  ;;  %v14561_v51 = vand.u32 4294901760, %v279_v34 }
 0x206   :  { %4375 = vmatmul.mubr.f32.gmra.mxu1 %v19774_v20  ;;  %10148 = vmatprep.subr.mxu0 %v19775_v5  ;;  %v19800_v5 = vand.u32 4294901760, %v19773_v60 }
 0x207   :  { %10187 = vmatprep.subr.mxu1 %v19776_v40  ;;  %10149 = vmatpush3.msra.mxu0 %v19778_v41  ;;  %v9695_v30 = vpop.f32.mrf.mxu0  ;;  %v19802_v41 = vld [vmem:[#allocation51_spill] sm:$0xff]  ;;  %19805 = vst [vmem:[#allocation20_spill] sm:$0xff] %v14561_v51 }
 0x208   :  { %10188 = vmatpush3.msra.mxu1 %v19782_v39  ;;  %10150 = vmatprep.subr.mxu0 %v19784_v59  ;;  %v9696_v17 = vadd.f32 %v9695_v30, %v9694_v42  ;;  %v19803_v42 = vand.u32 4294901760, %v14059_v52  ;;  %v14563_v59 = vand.u32 4294901760, %v263_v47  ;;  %v19808_v52 = vand.u32 4294901760, %v14073_v13  ;;  %v19810_v13 = vld [vmem:[#allocation59_spill] sm:$0xff] }
 0x209   :  { %10189 = vmatprep.subr.mxu1 %v19785_v55  ;;  %4382 = vmatprep.mubr.f32.mxu1 %v19786_v3  ;;  %v278_v55 = vld [vmem:[#allocation5 + $0x4d8] sm:$0xff] }
 0x20a   :  { %10151 = vmatpush3.msra.mxu0 %v19787_v28  ;;  %10190 = vmatpush3.msra.mxu1 %v19730_v26  ;;  %v14520_v26 = vand.u32 4294901760, %v265_v37  ;;  %v2667_v14 = vadd.f32 %v9696_v17, %v14398_v8  ;;  %v9697_v50 = vpop.f32.mrf.mxu0  ;;  %v18502_v8 = vand.u32 4294901760, %v14512_v11  ;;  %19806 = vst [vmem:[#allocation30_spill] sm:$0xff] %v14563_v59  ;;  %v262_v3 = vld [vmem:[#allocation5 + $0x458] sm:$0xff]  ;;  %v19811_v17 = vand.u32 4294901760, %v19810_v13 }
 0x20b   :  { %4386 = vmatmul.mubr.f32.gmra.mxu1 %v19788_v33  ;;  %10152 = vmatprep.subr.mxu0 %v19789_v24  ;;  %v19809_v28 = vld [vmem:[#allocation53_spill] sm:$0xff]  ;;  %v277_v33 = vld [vmem:[#allocation5 + $0x4d0] sm:$0xff]  ;;  %v14594_v32 = vand.u32 4294901760, %v262_v3 }
 0x20c   :  { %10191 = vmatprep.subr.mxu1 %v19731_v7  ;;  %10153 = vmatpush3.msra.mxu0 %v19790_v48  ;;  %19791 = vst [vmem:[#allocation36_spill] sm:$0xff] %v14520_v26  ;;  %v19797_v7 = vand.u32 4294901760, %v19770_v4  ;;  %v9698_v58 = vpop.f32.mrf.mxu0  ;;  %v19801_v4 = vand.u32 4294901760, %v14092_v31  ;;  %v14544_v40 = vsub.f32 %v265_v37, %v14520_v26  ;;  %v19804_v31 = vand.u32 4294901760, %v14126_v45 }
 0x20d   :  { %10192 = vmatpush3.msra.mxu1 %v19733_v15  ;;  %10154 = vmatprep.subr.mxu0 %v19795_v1  ;;  %v18501_v15 = vand.u32 4294901760, %v14509_v2  ;;  %v9699_v20 = vadd.f32 %v9698_v58, %v9697_v50  ;;  %v18497_v48 = vand.u32 4294901760, %v14550_v12  ;;  %v14592_v58 = vand.u32 4294901760, %v278_v55  ;;  %19815 = vst [vmem:[#allocation44_spill] sm:$0xff] %v14594_v32 }
 0x20e   :  { %10193 = vmatprep.subr.mxu1 %v19796_v38  ;;  %4393 = vmatprep.mubr.f32.mxu1 %v19797_v7  ;;  %v18499_v24 = vand.u32 4294901760, %v14544_v40  ;;  %v19812_v38 = vld [vmem:[#allocation66_spill] sm:$0xff] }
 0x20f   :  { %10155 = vmatpush3.msra.mxu0 %v19799_v6  ;;  %10194 = vmatpush3.msra.mxu1 %v19735_v27  ;;  %v14547_v27 = vsub.f32 %v264_v10, %v14524_v61  ;;  %v14556_v60 = vadd.f32 %v9699_v20, %v14420_v19  ;;  %v14571_v19 = vsub.f32 %v14512_v11, %v18502_v8  ;;  %v261_v10 = vld [vmem:[#allocation5 + $0x450] sm:$0xff]  ;;  %v19813_v7 = vand.u32 4294901760, %v19812_v38  ;;  %v275_v38 = vld [vmem:[#allocation5 + $0x4c0] sm:$0xff]  ;;  %v274_v8 = vld [vmem:[#allocation5 + $0x4b8] sm:$0xff] }
 0x210   :  { %4397 = vmatmul.mubr.f32.gmra.mxu1 %v19800_v5  ;;  %10156 = vmatprep.subr.mxu0 %v19801_v4  ;;  %v9741_v39 = vpop.f32.mrf.mxu1  ;;  %v9700_v37 = vpop.f32.mrf.mxu0  ;;  %v14576_v45 = vsub.f32 %v14509_v2, %v18501_v15  ;;  %19814 = vst [vmem:[#allocation15_spill] sm:$0xff] %v14592_v58  ;;  %v19816_v20 = vld [vmem:[#allocation56_spill] sm:$0xff]  ;;  %v14600_v4 = vsub.f32 %v263_v47, %v14563_v59  ;;  %v14614_v47 = vand.u32 4294901760, %v277_v33 }
 0x211   :  { %10195 = vmatprep.subr.mxu1 %v19802_v41  ;;  %10157 = vmatpush3.msra.mxu0 %v19803_v42  ;;  %v18498_v50 = vand.u32 4294901760, %v14547_v27  ;;  %v19817_v5 = vand.u32 4294901760, %v19816_v20  ;;  %v14602_v41 = vand.u32 4294901760, %v261_v10  ;;  %v276_v42 = vld [vmem:[#allocation5 + $0x4c8] sm:$0xff] }
 0x212   :  { %10196 = vmatpush3.msra.mxu1 %v19737_v43  ;;  %10158 = vmatprep.subr.mxu0 %v19804_v31  ;;  %v14581_v43 = vsub.f32 %v14515_v29, %v18500_v44  ;;  %v9742_v30 = vpop.f32.mrf.mxu1  ;;  %v9701_v18 = vpop.f32.mrf.mxu0  ;;  %19818 = vst [vmem:[#allocation26_spill] sm:$0xff] %v14600_v4  ;;  %19823 = vst [vmem:[#allocation35_spill] sm:$0xff] %v14614_v47  ;;  %v19826_v20 = vld [vmem:[#allocation19_spill] sm:$0xff] }
 0x213   :  { %10197 = vmatprep.subr.mxu1 %v19807_v54  ;;  %10159 = vmatpush3.msra.mxu0 %v19808_v52  ;;  %v9743_v1 = vadd.f32 %v9742_v30, %v9741_v39  ;;  %v9702_v6 = vadd.f32 %v9701_v18, %v9700_v37  ;;  %19819 = vst [vmem:[#allocation33_spill] sm:$0xff] %v14602_v41  ;;  %v19820_v54 = vld [vmem:[#allocation74_spill] sm:$0xff] }
 0x214   :  { %10198 = vmatpush3.msra.mxu1 %v19809_v28  ;;  %10160 = vmatprep.subr.mxu0 %v19811_v17  ;;  %v14605_v39 = vsub.f32 %v279_v34, %v14561_v51  ;;  %v19821_v37 = vld [vmem:[#allocation50_spill] sm:$0xff]  ;;  %v19824_v17 = vld [vmem:[#allocation25_spill] sm:$0xff]  ;;  %v19825_v34 = vld [vmem:[#allocation63_spill] sm:$0xff]  ;;  %v14625_v18 = vsub.f32 %v14544_v40, %v18499_v24 }
 0x215   :  { %10199 = vmatprep.subr.mxu1 %v13963_v63  ;;  %10161 = vmatpush3.msra.mxu0 %v19813_v7  ;;  %v260_v63 = vld [vmem:[#allocation5 + $0x448] sm:$0xff]  ;;  %v14607_v31 = vadd.f32 %v9743_v1, %v2667_v14  ;;  %v19822_v52 = vand.u32 4294901760, %v19821_v37  ;;  %v14617_v28 = vadd.f32 %v9702_v6, %v14441_v25  ;;  %v14630_v1 = vsub.f32 %v14550_v12, %v18497_v48  ;;  %v259_v7 = vld [vmem:[#allocation5 + $0x440] sm:$0xff]  ;;  %v19836_v14 = vld [vmem:[#allocation12_spill] sm:$0xff] }
 0x216   :  { %10200 = vmatpush3.msra.mxu1 %v13942_v62  ;;  %10162 = vmatprep.subr.mxu0 %v19817_v5  ;;  %v9703_v13 = vpop.f32.mrf.mxu0  ;;  %v14635_v25 = vsub.f32 %v14547_v27, %v18498_v50  ;;  %v9744_v6 = vpop.f32.mrf.mxu1  ;;  %v19827_v5 = vld [vmem:[#allocation28_spill] sm:$0xff]  ;;  %v14642_v37 = vand.u32 4294901760, %v276_v42  ;;  %v14652_v50 = vsub.f32 %v261_v10, %v14602_v41  ;;  %v14660_v15 = vand.u32 4294901760, %v259_v7 }
 0x217   :  { %10201 = vmatprep.subr.mxu1 %v19820_v54  ;;  %10163 = vmatpush3.msra.mxu0 %v19822_v52  ;;  %v14640_v54 = vsub.f32 %v262_v3, %v14594_v32  ;;  %v14644_v52 = vand.u32 4294901760, %v260_v63  ;;  %v273_v62 = vld [vmem:[#allocation5 + $0x4b0] sm:$0xff] }
 0x218   :  { %4563 = vmatprep.mubr.f32.mxu0 %v19824_v17  ;;  %10202 = vmatpush3.msra.mxu1 %v19825_v34  ;;  %19829 = vst [vmem:[#allocation34_spill] sm:$0xff] %v14642_v37  ;;  %v14647_v34 = vsub.f32 %v278_v55, %v14592_v58  ;;  %v9704_v48 = vpop.f32.mrf.mxu0  ;;  %19832 = vst [vmem:[#allocation17_spill] sm:$0xff] %v14652_v50  ;;  %v9745_v44 = vpop.f32.mrf.mxu1  ;;  %v14658_v55 = vand.u32 4294901760, %v275_v38  ;;  %v257_v3 = vld [vmem:[#allocation5 + $0x430] sm:$0xff] }
 0x219   :  { %4565 = vmatmul.mubr.f32.vlgmr.msra.gmra.mxu0 %v19826_v20  ;;  %10203 = vmatprep.subr.mxu1 %v19827_v5  ;;  %19828 = vst [vmem:[#allocation55_spill] sm:$0xff] %v14640_v54  ;;  %19830 = vst [vmem:[#allocation58_spill] sm:$0xff] %v14644_v52  ;;  %v18503_v5 = vand.u32 4294901760, %v14605_v39  ;;  %v9705_v24 = vadd.f32 %v9704_v48, %v9703_v13  ;;  %v9746_v10 = vadd.f32 %v9745_v44, %v9744_v6  ;;  %v258_v6 = vld [vmem:[#allocation5 + $0x438] sm:$0xff] }
 0x21a   :  { %19831 = vst [vmem:[#allocation43_spill] sm:$0xff] %v14647_v34  ;;  %10226 = vmatprep.subr.mxu0 %v14489_v0  ;;  %10204 = vmatpush3.msra.mxu1 %v19744_v9  ;;  %19833 = vst [vmem:[#allocation57_spill] sm:$0xff] %v14658_v55  ;;  %v14663_v9 = vsub.f32 %v277_v33, %v14614_v47  ;;  %v14676_v33 = vsub.f32 %v260_v63, %v14644_v52  ;;  %v19840_v63 = vand.u32 4294901760, %v14600_v4  ;;  %v272_v0 = vld [vmem:[#allocation5 + $0x4a8] sm:$0xff] }
 0x21b   :  { %10227 = vmatpush3.msra.mxu0 %v14491_v56  ;;  %10205 = vmatprep.subr.mxu1 %v19746_v35  ;;  %19834 = vst [vmem:[#allocation64_spill] sm:$0xff] %v14660_v15  ;;  %v14671_v35 = vadd.f32 %v9705_v24, %v14458_v49  ;;  %v14680_v48 = vsub.f32 %v276_v42, %v14642_v37  ;;  %v19839_v24 = vld [vmem:[#allocation45_spill] sm:$0xff]  ;;  %v14697_v42 = vand.u32 4294901760, %v274_v8 }
 0x21c   :  { %19835 = vst [vmem:[#allocation40_spill] sm:$0xff] %v14663_v9  ;;  %10228 = vmatprep.subr.mxu0 %v14493_v23  ;;  %4570 = vmatprep.mubr.f32.mxu0 %v19836_v14  ;;  %19837 = vst [vmem:[#allocation49_spill] sm:$0xff] %v14676_v33  ;;  %v14683_v30 = vadd.f32 %v9746_v10, %v14556_v60  ;;  %v9706_v49 = vpop.f32.mrf.mxu0  ;;  %v14695_v13 = vsub.f32 %v14600_v4, %v19840_v63  ;;  %v9747_v10 = vpop.f32.mrf.mxu1  ;;  %v14712_v60 = vand.u32 4294901760, %v258_v6  ;;  %v67_v4 = vld [vmem:[#allocation2 + $0xc0] sm:$0xff] }
 0x21d   :  { %10206 = vmatpush3.msra.mxu1 %v19748_v57  ;;  %10229 = vmatpush3.msra.mxu0 %v14520_v26  ;;  %19838 = vst [vmem:[#allocation73_spill] sm:$0xff] %v14680_v48  ;;  %v14690_v57 = vsub.f32 %v14605_v39, %v18503_v5  ;;  %19841 = vst [vmem:[#allocation13_spill] sm:$0xff] %v14697_v42  ;;  %v14708_v26 = vsub.f32 %v275_v38, %v14658_v55  ;;  %v19847_v5 = vld [vmem:[#allocation37_spill] sm:$0xff]  ;;  %v19848_v38 = vand.u32 4294901760, %v14647_v34 }
 0x21e   :  { %4572 = vmatmul.mubr.f32.gmra.mxu0 %v19839_v24  ;;  %10207 = vmatprep.subr.mxu1 %v19750_v21  ;;  %v14703_v21 = vsub.f32 %v259_v7, %v14660_v15  ;;  %v9707_v63 = vpop.f32.mrf.mxu0  ;;  %19844 = vst [vmem:[#allocation47_spill] sm:$0xff] %v14712_v60  ;;  %v9748_v23 = vpop.f32.mrf.mxu1 }
 0x21f   :  { %10230 = vmatprep.subr.mxu0 %v14522_v36  ;;  %10208 = vmatpush3.msra.mxu1 %v14078_v53  ;;  %19843 = vst [vmem:[#allocation14_spill] sm:$0xff] %v14708_v26  ;;  %v14714_v36 = vand.u32 4294901760, %v273_v62  ;;  %v14716_v53 = vand.u32 4294901760, %v257_v3  ;;  %v9708_v7 = vadd.f32 %v9707_v63, %v9706_v49  ;;  %v14723_v44 = vsub.f32 %v14647_v34, %v19848_v38  ;;  %v19853_v49 = vld [vmem:[#allocation62_spill] sm:$0xff] }
 0x220   :  { %19842 = vst [vmem:[#allocation31_spill] sm:$0xff] %v14703_v21  ;;  %10231 = vmatpush3.msra.mxu0 %v14524_v61  ;;  %10209 = vmatprep.subr.mxu1 %v19753_v16  ;;  %v9749_v56 = vadd.f32 %v9748_v23, %v9747_v10  ;;  %v19849_v63 = vand.u32 4294901760, %v14640_v54  ;;  %v14736_v38 = vsub.f32 %v274_v8, %v14697_v42  ;;  %v19857_v8 = vand.u32 4294901760, %v14571_v19 }
 0x221   :  { %19845 = vst [vmem:[#allocation46_spill] sm:$0xff] %v14714_v36  ;;  %19846 = vst [vmem:[#allocation54_spill] sm:$0xff] %v14716_v53  ;;  %10232 = vmatprep.subr.mxu0 %v14561_v51  ;;  %4577 = vmatprep.mubr.f32.mxu0 %v19847_v5  ;;  %v14739_v61 = vadd.f32 %v9708_v7, %v14474_v22  ;;  %v14764_v16 = vsub.f32 %v257_v3, %v14716_v53  ;;  %v19859_v3 = vand.u32 4294901760, %v14676_v33 }
 0x222   :  { %10210 = vmatpush3.msra.mxu1 %v19756_v46  ;;  %4695 = vmatprep.mubr.f32.mxu1 %v19824_v17  ;;  %v14733_v51 = vsub.f32 %v14640_v54, %v19849_v63  ;;  %19850 = vst [vmem:[#allocation21_spill] sm:$0xff] %v14736_v38  ;;  %v19851_v46 = vand.u32 4294901760, %v14663_v9  ;;  %v19852_v17 = vand.u32 4294901760, %v14652_v50  ;;  %v256_v63 = vld [vmem:[#allocation5 + $0x428] sm:$0xff]  ;;  %v14755_v22 = vadd.f32 %v9749_v56, %v14617_v28  ;;  %v9750_v7 = vpop.f32.mrf.mxu1  ;;  %v271_v56 = vld [vmem:[#allocation5 + $0x4a0] sm:$0xff] }
 0x223   :  { %10233 = vmatpush3.msra.mxu0 %v14563_v59  ;;  %4697 = vmatmul.mubr.f32.vlgmr.msra.gmra.mxu1 %v19826_v20  ;;  %19855 = vst [vmem:[#allocation11_spill] sm:$0xff] %v14764_v16  ;;  %v14773_v28 = vand.u32 4294901760, %v272_v0  ;;  %v19858_v20 = vand.u32 4294901760, %v14680_v48  ;;  %v19860_v19 = vand.u32 4294901760, %v14576_v45  ;;  %v14815_v59 = vand.u32 4294901760, %v271_v56 }
 0x224   :  { %v14746_v23 = vsub.f32 %v14663_v9, %v19851_v46  ;;  %v14751_v10 = vsub.f32 %v14652_v50, %v19852_v17  ;;  %4579 = vmatmul.mubr.f32.gmra.mxu0 %v19853_v49  ;;  %10234 = vmatprep.subr.mxu0 %v14592_v58  ;;  %v14761_v46 = vsub.f32 %v258_v6, %v14712_v60  ;;  %v19862_v50 = vand.u32 4294901760, %v14581_v43  ;;  %v270_v43 = vld [vmem:[#allocation5 + $0x498] sm:$0xff] }
 0x225   :  { %v14767_v17 = vsub.f32 %v273_v62, %v14714_v36  ;;  %10273 = vmatprep.subr.mxu1 %v19857_v8  ;;  %10235 = vmatpush3.msra.mxu0 %v14594_v32  ;;  %v14778_v6 = vsub.f32 %v14680_v48, %v19858_v20  ;;  %v14783_v58 = vsub.f32 %v14676_v33, %v19859_v3  ;;  %v9751_v62 = vpop.f32.mrf.mxu1  ;;  %v14788_v8 = vand.u32 4294901760, %v256_v63  ;;  %v255_v32 = vld [vmem:[#allocation5 + $0x420] sm:$0xff]  ;;  %v19863_v3 = vld [vmem:[#allocation67_spill] sm:$0xff] }
 0x226   :  { %19854 = vst [vmem:[#allocation24_spill] sm:$0xff] %v14761_v46  ;;  %10274 = vmatpush3.msra.mxu1 %v19860_v19  ;;  %10236 = vmatprep.subr.mxu0 %v14614_v47  ;;  %v9752_v48 = vadd.f32 %v9751_v62, %v9750_v7  ;;  %v19864_v47 = vand.u32 4294901760, %v14708_v26  ;;  %v254_v7 = vld [vmem:[#allocation5 + $0x418] sm:$0xff]  ;;  %v52_v33 = vld [vmem:[#allocation2 + $0x48] sm:$0xff]  ;;  %v19865_v20 = vand.u32 4294901760, %v14625_v18  ;;  %19867 = vst [vmem:[#allocation27_spill] sm:$0xff] %v14815_v59 }
 0x227   :  { %19856 = vst [vmem:[#allocation65_spill] sm:$0xff] %v14767_v17  ;;  %19861 = vst [vmem:[#allocation68_spill] sm:$0xff] %v14788_v8  ;;  %10275 = vmatprep.subr.mxu1 %v19862_v50  ;;  %4584 = vmatprep.mubr.f32.mxu0 %v19863_v3  ;;  %v9753_v19 = vpop.f32.mrf.mxu1  ;;  %v14820_v50 = vsub.f32 %v272_v0, %v14773_v28  ;;  %v253_v18 = vld [vmem:[#allocation5 + $0x410] sm:$0xff]  ;;  %v19887_v54 = vand.u32 4294901760, %v14695_v13  ;;  %v19893_v34 = vand.u32 4294901760, %v14723_v44 }
 0x228   :  { %v14801_v9 = vsub.f32 %v14708_v26, %v19864_v47  ;;  %4702 = vmatprep.mubr.f32.mxu1 %v19836_v14  ;;  %10237 = vmatpush3.msra.mxu0 %v14602_v41  ;;  %v14809_v45 = vadd.f32 %v9752_v48, %v14671_v35  ;;  %v19866_v47 = vld [vmem:[#allocation69_spill] sm:$0xff]  ;;  %v14817_v41 = vand.u32 4294901760, %v255_v32  ;;  %v14825_v48 = vsub.f32 %v256_v63, %v14788_v8 }
 0x229   :  { %10276 = vmatpush3.msra.mxu1 %v19865_v20  ;;  %4586 = vmatmul.mubr.f32.gmra.mxu0 %v19866_v47  ;;  %19869 = vst [vmem:[#allocation18_spill] sm:$0xff] %v14820_v50  ;;  %v19871_v35 = vand.u32 4294901760, %v14703_v21  ;;  %v19872_v14 = vand.u32 4294901760, %v14736_v38  ;;  %v9754_v0 = vpop.f32.mrf.mxu1  ;;  %v14844_v26 = vand.u32 4294901760, %v52_v33  ;;  %v19879_v63 = vand.u32 4294901760, %v14767_v17 }
 0x22a   :  { %19868 = vst [vmem:[#allocation75_spill] sm:$0xff] %v14817_v41  ;;  %4704 = vmatmul.mubr.f32.gmra.mxu1 %v19839_v24  ;;  %10238 = vmatprep.subr.mxu0 %v14642_v37  ;;  %19870 = vst [vmem:[#allocation29_spill] sm:$0xff] %v14825_v48  ;;  %v19873_v24 = vand.u32 4294901760, %v14630_v1  ;;  %v14842_v37 = vand.u32 4294901760, %v254_v7  ;;  %v19878_v1 = vand.u32 4294901760, %v14761_v46  ;;  %v19897_v44 = vand.u32 4294901760, %v14825_v48 }
 0x22b   :  { %v14831_v20 = vsub.f32 %v14703_v21, %v19871_v35  ;;  %v14836_v62 = vsub.f32 %v14736_v38, %v19872_v14  ;;  %10239 = vmatpush3.msra.mxu0 %v14644_v52  ;;  %19875 = vst [vmem:[#allocation42_spill] sm:$0xff] %v14844_v26  ;;  %v9755_v35 = vadd.f32 %v9754_v0, %v9753_v19  ;;  %v19876_v21 = vand.u32 4294901760, %v14635_v25  ;;  %v269_v52 = vld [vmem:[#allocation5 + $0x490] sm:$0xff] }
 0x22c   :  { %10277 = vmatprep.subr.mxu1 %v19873_v24  ;;  %19874 = vst [vmem:[#allocation60_spill] sm:$0xff] %v14842_v37  ;;  %10240 = vmatprep.subr.mxu0 %v14658_v55  ;;  %v14849_v14 = vand.u32 4294901760, %v270_v43  ;;  %v14854_v24 = vsub.f32 %v14761_v46, %v19878_v1  ;;  %v14859_v38 = vsub.f32 %v14767_v17, %v19879_v63  ;;  %v19880_v19 = vand.u32 4294901760, %v14764_v16  ;;  %v19882_v55 = vld [vmem:[#allocation71_spill] sm:$0xff] }
 0x22d   :  { %10278 = vmatpush3.msra.mxu1 %v19876_v21  ;;  %v51_v21 = vld [vmem:[#allocation2 + $0x40] sm:$0xff]  ;;  %v19881_v0 = vand.u32 4294901760, %v14690_v57  ;;  %4591 = vmatprep.mubr.f32.mxu0 %v19882_v55  ;;  %v14870_v1 = vsub.f32 %v255_v32, %v14817_v41  ;;  %v14872_v46 = vld [vmem:[#allocation5 + $0x488] sm:$0xff]  ;;  %v14876_v63 = vsub.f32 %v271_v56, %v14815_v59  ;;  %v14879_v17 = vadd.f32 %v9755_v35, %v14739_v61  ;;  %v19888_v56 = vld [vmem:[#allocation72_spill] sm:$0xff] }
 0x22e   :  { %19877 = vst [vmem:[#allocation70_spill] sm:$0xff] %v14849_v14  ;;  %v14864_v25 = vsub.f32 %v14764_v16, %v19880_v19  ;;  %4709 = vmatprep.mubr.f32.mxu1 %v19847_v5  ;;  %10241 = vmatpush3.msra.mxu0 %v14660_v15  ;;  %v14885_v32 = vand.u32 4294901760, %v253_v18  ;;  %v14892_v61 = vsub.f32 %v254_v7, %v14842_v37  ;;  %v14894_v5 = vand.u32 4294901760, %v269_v52  ;;  %v68_v19 = vld [vmem:[#allocation2 + $0xc8] sm:$0xff]  ;;  %v14909_v15 = vld [vmem:[#allocation5 + $0x480] sm:$0xff] }
 0x22f   :  { %10279 = vmatprep.subr.mxu1 %v19881_v0  ;;  %19883 = vst [vmem:[#allocation48_spill] sm:$0xff] %v14870_v1  ;;  %19884 = vst [vmem:[#allocation22_spill] sm:$0xff] %v14876_v63  ;;  %v252_v0 = vld [vmem:[#allocation5 + $0x408] sm:$0xff]  ;;  %4593 = vmatmul.mubr.f32.gmra.mxu0 %v19888_v56  ;;  %v14897_v35 = vsub.f32 %v52_v33, %v14844_v26  ;;  %v14899_v57 = vand.u32 4294901760, %v51_v21  ;;  %v14907_v7 = vand.u32 4294901760, %v14872_v46  ;;  %v251_v33 = vld [vmem:[#allocation5 + $0x400] sm:$0xff] }
 0x230   :  { %19885 = vst [vmem:[#allocation38_spill] sm:$0xff] %v14879_v17  ;;  %19886 = vst [vmem:[#allocation39_spill] sm:$0xff] %v14885_v32  ;;  %10280 = vmatpush3.msra.mxu1 %v19887_v54  ;;  %10242 = vmatprep.subr.mxu0 %v14697_v42  ;;  %v14919_v13 = vand.u32 4294901760, %v252_v0  ;;  %v14923_v54 = vsub.f32 %v270_v43, %v14849_v14  ;;  %v9788_v17 = vpop.f32.mrf.mxu0  ;;  %v19895_v26 = vand.u32 4294901760, %v14733_v51  ;;  %v19899_v43 = vand.u32 4294901760, %v14746_v23 }
 0x231   :  { %19889 = vst [vmem:[#allocation51_spill] sm:$0xff] %v14894_v5  ;;  %19890 = vst [vmem:[#allocation61_spill] sm:$0xff] %v14897_v35  ;;  %4711 = vmatmul.mubr.f32.gmra.mxu1 %v19853_v49  ;;  %10281 = vmatprep.subr.mxu1 %v19893_v34  ;;  %v19894_v49 = vand.u32 4294901760, %v14820_v50  ;;  %v14929_v34 = vsub.f32 %v253_v18, %v14885_v32  ;;  %v14945_v51 = vand.u32 4294901760, %v251_v33  ;;  %v19902_v16 = vand.u32 4294901760, %v14751_v10 }
 0x232   :  { %19891 = vst [vmem:[#allocation53_spill] sm:$0xff] %v14899_v57  ;;  %19892 = vst [vmem:[#allocation59_spill] sm:$0xff] %v14907_v7  ;;  %10243 = vmatpush3.msra.mxu0 %v14712_v60  ;;  %10282 = vmatpush3.msra.mxu1 %v19895_v26  ;;  %v14937_v60 = vand.u32 4294901760, %v68_v19  ;;  %v14943_v26 = vand.u32 4294901760, %v14909_v15  ;;  %v14964_v18 = vsub.f32 %v252_v0, %v14919_v13  ;;  %v19906_v23 = vand.u32 4294901760, %v14778_v6 }
 0x233   :  { %v14917_v42 = vsub.f32 %v14820_v50, %v19894_v49  ;;  %10244 = vmatprep.subr.mxu0 %v14714_v36  ;;  %19896 = vst [vmem:[#allocation66_spill] sm:$0xff] %v14929_v34  ;;  %v14934_v49 = vsub.f32 %v14825_v48, %v19897_v44  ;;  %10283 = vmatprep.subr.mxu1 %v19899_v43  ;;  %19900 = vst [vmem:[#allocation74_spill] sm:$0xff] %v14945_v51  ;;  %v9789_v44 = vpop.f32.mrf.mxu0  ;;  %v14958_v43 = vand.u32 4294901760, %v67_v4  ;;  %v84_v48 = vld [vmem:[#allocation2 + $0x148] sm:$0xff] }
 0x234   :  { %19898 = vst [vmem:[#allocation56_spill] sm:$0xff] %v14937_v60  ;;  %4716 = vmatprep.mubr.f32.mxu1 %v19863_v3  ;;  %v14949_v36 = vsub.f32 %v51_v21, %v14899_v57  ;;  %10245 = vmatpush3.msra.mxu0 %v14716_v53  ;;  %v14956_v3 = vsub.f32 %v269_v52, %v14894_v5  ;;  %19904 = vst [vmem:[#allocation63_spill] sm:$0xff] %v14964_v18  ;;  %v19908_v52 = vand.u32 4294901760, %v14783_v58 }
 0x235   :  { %10284 = vmatpush3.msra.mxu1 %v19902_v16  ;;  %19903 = vst [vmem:[#allocation25_spill] sm:$0xff] %v14958_v43  ;;  %v9790_v50 = vadd.f32 %v9789_v44, %v9788_v17  ;;  %10246 = vmatprep.subr.mxu0 %v14773_v28  ;;  %v19905_v16 = vand.u32 4294901760, %v14876_v63  ;;  %v14982_v0 = vsub.f32 %v68_v19, %v14937_v60  ;;  %v9791_v21 = vpop.f32.mrf.mxu0  ;;  %v14999_v17 = vand.u32 4294901760, %v84_v48 }
 0x236   :  { %19901 = vst [vmem:[#allocation50_spill] sm:$0xff] %v14949_v36  ;;  %4718 = vmatmul.mubr.f32.gmra.mxu1 %v19866_v47  ;;  %10285 = vmatprep.subr.mxu1 %v19906_v23  ;;  %v19907_v47 = vand.u32 4294901760, %v14870_v1  ;;  %v14991_v6 = vsub.f32 %v251_v33, %v14945_v51  ;;  %v19910_v23 = vand.u32 4294901760, %v14897_v35  ;;  %v19913_v58 = vand.u32 4294901760, %v14892_v61 }
 0x237   :  { %v14969_v10 = vsub.f32 %v14876_v63, %v19905_v16  ;;  %10247 = vmatpush3.msra.mxu0 %v14788_v8  ;;  %v14985_v16 = vadd.f32 %v9790_v50, %v14607_v31  ;;  %10286 = vmatpush3.msra.mxu1 %v19908_v52  ;;  %19911 = vst [vmem:[#allocation28_spill] sm:$0xff] %v14999_v17  ;;  %v83_v31 = vld [vmem:[#allocation2 + $0x140] sm:$0xff]  ;;  %v19912_v50 = vand.u32 4294901760, %v14801_v9  ;;  %v19915_v9 = vand.u32 4294901760, %v14831_v20 }
 0x238   :  { %v14979_v44 = vsub.f32 %v14870_v1, %v19907_v47  ;;  %10248 = vmatprep.subr.mxu0 %v14815_v59  ;;  %19909 = vst [vmem:[#allocation19_spill] sm:$0xff] %v14991_v6  ;;  %v14996_v47 = vsub.f32 %v14897_v35, %v19910_v23  ;;  %4723 = vmatprep.mubr.f32.mxu1 %v19882_v55  ;;  %v9792_v35 = vpop.f32.mrf.mxu0 }
 0x239   :  { %10287 = vmatprep.subr.mxu1 %v19912_v50  ;;  %v15007_v33 = vsub.f32 %v14892_v61, %v19913_v58  ;;  %v15011_v23 = vsub.f32 %v67_v4, %v14958_v43  ;;  %v15015_v19 = vsub.f32 %v14872_v46, %v14907_v7  ;;  %10249 = vmatpush3.msra.mxu0 %v14817_v41  ;;  %v5096_v55 = vand.u32 4294901760, %v14969_v10 }
 0x23a   :  { %10288 = vmatpush3.msra.mxu1 %v19915_v9  ;;  %v19916_v50 = vand.u32 4294901760, %v14923_v54  ;;  %v9793_v52 = vadd.f32 %v9792_v35, %v9791_v21  ;;  %10250 = vmatprep.subr.mxu0 %v14849_v14  ;;  %v4984_v46 = vand.u32 4294901760, %v14979_v44  ;;  %v15033_v20 = vsub.f32 %v14909_v15, %v14943_v26  ;;  %v100_v9 = vld [vmem:[#allocation2 + $0x1c8] sm:$0xff]  ;;  %v9835_v41 = vpop.f32.mrf.mxu1  ;;  %v9794_v14 = vpop.f32.mrf.mxu0 }
 0x23b   :  { %19914 = vst [vmem:[#allocation12_spill] sm:$0xff] %v15015_v19  ;;  %4725 = vmatmul.mubr.f32.gmra.mxu1 %v19888_v56  ;;  %v15035_v10 = vand.u32 4294901760, %v83_v31  ;;  %10251 = vmatpush3.msra.mxu0 %v14842_v37  ;;  %v4830_v56 = vand.u32 4294901760, %v14996_v47  ;;  %v19920_v35 = vand.u32 4294901760, %v14949_v36  ;;  %v15045_v44 = vsub.f32 %v84_v48, %v14999_v17  ;;  %v99_v37 = vld [vmem:[#allocation2 + $0x1c0] sm:$0xff] }
 0x23c   :  { %v15024_v58 = vsub.f32 %v14923_v54, %v19916_v50  ;;  %19917 = vst [vmem:[#allocation45_spill] sm:$0xff] %v15033_v20  ;;  %v19919_v50 = vand.u32 4294901760, %v14836_v62  ;;  %v15048_v15 = vadd.f32 %v9793_v52, %v14683_v30  ;;  %v19922_v4 = vand.u32 4294901760, %v14854_v24  ;;  %10252 = vmatprep.subr.mxu0 %v14894_v5 }
 0x23d   :  { %19918 = vst [vmem:[#allocation37_spill] sm:$0xff] %v15035_v10  ;;  %v4835_v21 = vsub.f32 %v14949_v36, %v19920_v35  ;;  %19921 = vst [vmem:[#allocation62_spill] sm:$0xff] %v15045_v44  ;;  %v4991_v62 = vand.u32 4294901760, %v15007_v33  ;;  %v19923_v47 = vand.u32 4294901760, %v14956_v3  ;;  %v19924_v30 = vand.u32 4294901760, %v14859_v38  ;;  %10253 = vmatpush3.msra.mxu0 %v14885_v32  ;;  %v9836_v35 = vpop.f32.mrf.mxu1  ;;  %4831 = vmatprep.mubr.f32.mxu0 %v4830_v56 }
 0x23e   :  { %10289 = vmatprep.subr.mxu1 %v19919_v50  ;;  %v5103_v24 = vand.u32 4294901760, %v15024_v58  ;;  %v19925_v52 = vand.u32 4294901760, %v14929_v34  ;;  %v19927_v48 = vand.u32 4294901760, %v14864_v25  ;;  %10254 = vmatprep.subr.mxu0 %v14907_v7  ;;  %v19928_v38 = vand.u32 4294901760, %v14982_v0 }
 0x23f   :  { %10290 = vmatpush3.msra.mxu1 %v19922_v4  ;;  %v5109_v50 = vsub.f32 %v14956_v3, %v19923_v47  ;;  %v15069_v47 = vand.u32 4294901760, %v100_v9  ;;  %v18590_v58 = vand.u32 4294901760, %v15033_v20  ;;  %v15079_v32 = vsub.f32 %v83_v31, %v15035_v10  ;;  %10255 = vmatpush3.msra.mxu0 %v14919_v13 }
 0x240   :  { %10291 = vmatprep.subr.mxu1 %v19924_v30  ;;  %v15066_v33 = vsub.f32 %v14929_v34, %v19925_v52  ;;  %v4844_v30 = vsub.f32 %v14982_v0, %v19928_v38  ;;  %v9795_v52 = vpop.f32.mrf.mxu0  ;;  %v9837_v5 = vadd.f32 %v9836_v35, %v9835_v41  ;;  %v19929_v4 = vand.u32 4294901760, %v14917_v42  ;;  %10256 = vmatprep.subr.mxu0 %v14943_v26 }
 0x241   :  { %19926 = vst [vmem:[#allocation67_spill] sm:$0xff] %v15069_v47  ;;  %10292 = vmatpush3.msra.mxu1 %v19927_v48  ;;  %v4836_v25 = vand.u32 4294901760, %v4835_v21  ;;  %v15085_v7 = vand.u32 4294901760, %v99_v37  ;;  %v9796_v36 = vadd.f32 %v9795_v52, %v9794_v14  ;;  %v19931_v38 = vand.u32 4294901760, %v14934_v49  ;;  %10257 = vmatpush3.msra.mxu0 %v14945_v51 }
 0x242   :  { %10293 = vmatprep.subr.mxu1 %v19929_v4  ;;  %v19932_v31 = vand.u32 4294901760, %v15011_v23  ;;  %v19933_v42 = vand.u32 4294901760, %v15015_v19  ;;  %v116_v4 = vld [vmem:[#allocation2 + $0x248] sm:$0xff]  ;;  %v15098_v48 = vadd.f32 %v9837_v5, %v14985_v16  ;;  %v5110_v14 = vand.u32 4294901760, %v5109_v50  ;;  %v9838_v50 = vpop.f32.mrf.mxu1  ;;  %10320 = vmatprep.subr.mxu0 %v14512_v11 }
 0x243   :  { %19930 = vst [vmem:[#allocation69_spill] sm:$0xff] %v15085_v7  ;;  %10294 = vmatpush3.msra.mxu1 %v19931_v38  ;;  %v19934_v49 = vand.u32 4294901760, %v14964_v18  ;;  %v15105_v38 = vsub.f32 %v100_v9, %v15069_v47  ;;  %v4845_v21 = vand.u32 4294901760, %v4844_v30  ;;  %v5123_v5 = vsub.f32 %v15033_v20, %v18590_v58  ;;  %4837 = vmatmul.mubr.f32.vlgmr.msra.gmra.mxu0 %v4836_v25 }
 0x244   :  { %v4850_v41 = vsub.f32 %v15011_v23, %v19932_v31  ;;  %v5116_v35 = vsub.f32 %v15015_v19, %v19933_v42  ;;  %10295 = vmatprep.subr.mxu1 %v5096_v55  ;;  %v15108_v31 = vadd.f32 %v9796_v36, %v14755_v22  ;;  %v9797_v42 = vpop.f32.mrf.mxu0  ;;  %v115_v55 = vld [vmem:[#allocation2 + $0x240] sm:$0xff]  ;;  %v4998_v9 = vand.u32 4294901760, %v15066_v33  ;;  %v9839_v16 = vpop.f32.mrf.mxu1  ;;  %10321 = vmatpush3.msra.mxu0 %v14509_v2 }
 0x245   :  { %v5004_v52 = vsub.f32 %v14964_v18, %v19934_v49  ;;  %10296 = vmatpush3.msra.mxu1 %v4984_v46  ;;  %v19935_v49 = vand.u32 4294901760, %v15045_v44  ;;  %v15119_v22 = vsub.f32 %v99_v37, %v15085_v7  ;;  %v15121_v46 = vand.u32 4294901760, %v116_v4  ;;  %10322 = vmatprep.subr.mxu0 %v14515_v29 }
 0x246   :  { %10297 = vmatprep.subr.mxu1 %v5103_v24  ;;  %v9798_v56 = vpop.f32.mrf.mxu0  ;;  %v4851_v30 = vand.u32 4294901760, %v4850_v41  ;;  %v5117_v58 = vand.u32 4294901760, %v5116_v35  ;;  %v19937_v25 = vand.u32 4294901760, %v14991_v6  ;;  %v18597_v37 = vand.u32 4294901760, %v15105_v38  ;;  %4846 = vmatprep.mubr.f32.mxu0 %v4845_v21 }
 0x247   :  { %v4859_v36 = vsub.f32 %v15045_v44, %v19935_v49  ;;  %19936 = vst [vmem:[#allocation71_spill] sm:$0xff] %v15121_v46  ;;  %10298 = vmatpush3.msra.mxu1 %v4991_v62  ;;  %v9799_v33 = vadd.f32 %v9798_v56, %v9797_v42  ;;  %v5005_v49 = vand.u32 4294901760, %v5004_v52  ;;  %v15129_v51 = vand.u32 4294901760, %v115_v55  ;;  %10323 = vmatpush3.msra.mxu0 %v14544_v40 }
 0x248   :  { %v5011_v24 = vsub.f32 %v14991_v6, %v19937_v25  ;;  %10299 = vmatprep.subr.mxu1 %v5110_v14  ;;  %v9840_v44 = vadd.f32 %v9839_v16, %v9838_v50  ;;  %v5124_v62 = vand.u32 4294901760, %v5123_v5  ;;  %v19939_v41 = vand.u32 4294901760, %v15079_v32  ;;  %v9800_v21 = vpop.f32.mrf.mxu0  ;;  %4852 = vmatmul.mubr.f32.gmra.mxu0 %v4851_v30  ;;  %v9841_v50 = vpop.f32.mrf.mxu1 }
 0x249   :  { %19938 = vst [vmem:[#allocation72_spill] sm:$0xff] %v15129_v51  ;;  %v3152_v42 = vadd.f32 %v9799_v33, %v14809_v45  ;;  %10300 = vmatpush3.msra.mxu1 %v4998_v9  ;;  %v4860_v14 = vand.u32 4294901760, %v4859_v36  ;;  %v18595_v52 = vand.u32 4294901760, %v15119_v22  ;;  %v15139_v56 = vsub.f32 %v116_v4, %v15121_v46  ;;  %10324 = vmatprep.subr.mxu0 %v14550_v12 }
 0x24a   :  { %v4865_v35 = vsub.f32 %v15079_v32, %v19939_v41  ;;  %v15142_v16 = vadd.f32 %v9840_v44, %v15048_v15  ;;  %10301 = vmatprep.subr.mxu1 %v5117_v58  ;;  %v5012_v5 = vand.u32 4294901760, %v5011_v24  ;;  %v4874_v45 = vsub.f32 %v15105_v38, %v18597_v37  ;;  %v9801_v4 = vpop.f32.mrf.mxu0  ;;  %10325 = vmatpush3.msra.mxu0 %v14547_v27  ;;  %v9842_v36 = vpop.f32.mrf.mxu1  ;;  %v19943_v24 = vld [vmem:[#allocation38_spill] sm:$0xff]  ;;  %v19952_v37 = vld [vmem:[#allocation36_spill] sm:$0xff] }
 0x24b   :  { %19940 = vst [vmem:[#allocation76_spill] sm:$0xff] %v15139_v56  ;;  %10302 = vmatpush3.msra.mxu1 %v5005_v49  ;;  %v15149_v9 = vsub.f32 %v115_v55, %v15129_v51  ;;  %v9802_v15 = vadd.f32 %v9801_v4, %v9800_v21  ;;  %10326 = vmatprep.subr.mxu0 %v14605_v39  ;;  %v18596_v30 = vand.u32 4294901760, %v15139_v56  ;;  %v19942_v55 = vld [vmem:[#allocation42_spill] sm:$0xff]  ;;  %v19945_v21 = vld [vmem:[#allocation43_spill] sm:$0xff] }
 0x24c   :  { %10303 = vmatprep.subr.mxu1 %v5124_v62  ;;  %v4866_v44 = vand.u32 4294901760, %v4865_v35  ;;  %4861 = vmatprep.mubr.f32.mxu0 %v4860_v14  ;;  %v4880_v58 = vsub.f32 %v15119_v22, %v18595_v52  ;;  %v9843_v25 = vadd.f32 %v9842_v36, %v9841_v50  ;;  %v19944_v49 = vld [vmem:[#allocation26_spill] sm:$0xff]  ;;  %v4875_v62 = vand.u32 4294901760, %v4874_v45  ;;  %v9844_v14 = vpop.f32.mrf.mxu1  ;;  %v19946_v50 = vld [vmem:[#allocation32_spill] sm:$0xff]  ;;  %v19948_v45 = vld [vmem:[#allocation23_spill] sm:$0xff] }
 0x24d   :  { %19941 = vst [vmem:[#allocation77_spill] sm:$0xff] %v15149_v9  ;;  %10304 = vmatpush3.msra.mxu1 %v5012_v5  ;;  %5127 = vmatprep.mubr.f32.mxu1 %v19942_v55  ;;  %v3161_v33 = vadd.f32 %v9802_v15, %v19943_v24  ;;  %v18600_v41 = vand.u32 4294901760, %v15149_v9  ;;  %v19947_v5 = vld [vmem:[#allocation55_spill] sm:$0xff]  ;;  %v4889_v15 = vsub.f32 %v15139_v56, %v18596_v30  ;;  %v19949_v24 = vld [vmem:[#allocation40_spill] sm:$0xff]  ;;  %v19955_v55 = vld [vmem:[#allocation49_spill] sm:$0xff] }
 0x24e   :  { %10327 = vmatpush3.msra.mxu0 %v19944_v49  ;;  %5129 = vmatmul.mubr.f32.vlgmr.msra.gmra.mxu1 %v14899_v57  ;;  %v15163_v35 = vadd.f32 %v9843_v25, %v15108_v31  ;;  %v4881_v4 = vand.u32 4294901760, %v4880_v58  ;;  %v9845_v36 = vpop.f32.mrf.mxu1  ;;  %v19950_v25 = vld [vmem:[#allocation16_spill] sm:$0xff]  ;;  %v19951_v58 = vld [vmem:[#allocation17_spill] sm:$0xff] }
 0x24f   :  { %4867 = vmatmul.mubr.f32.gmra.mxu0 %v4866_v44  ;;  %10328 = vmatprep.subr.mxu0 %v19945_v21  ;;  %v9846_v31 = vadd.f32 %v9845_v36, %v9844_v14  ;;  %v4895_v44 = vsub.f32 %v15149_v9, %v18600_v41  ;;  %v4890_v57 = vand.u32 4294901760, %v4889_v15  ;;  %v19953_v14 = vld [vmem:[#allocation73_spill] sm:$0xff]  ;;  %v19956_v9 = vld [vmem:[#allocation52_spill] sm:$0xff]  ;;  %v19959_v15 = vld [vmem:[#allocation31_spill] sm:$0xff] }
 0x250   :  { %10367 = vmatprep.subr.mxu1 %v19946_v50  ;;  %10329 = vmatpush3.msra.mxu0 %v19947_v5  ;;  %v19954_v36 = vld [vmem:[#allocation41_spill] sm:$0xff] }
 0x251   :  { %10368 = vmatpush3.msra.mxu1 %v19948_v45  ;;  %10330 = vmatprep.subr.mxu0 %v19949_v24  ;;  %v15179_v52 = vadd.f32 %v9846_v31, %v3152_v42  ;;  %v9847_v30 = vpop.f32.mrf.mxu1  ;;  %v4896_v41 = vand.u32 4294901760, %v4895_v44  ;;  %v19957_v42 = vld [vmem:[#allocation14_spill] sm:$0xff]  ;;  %v19958_v31 = vld [vmem:[#allocation20_spill] sm:$0xff]  ;;  %v19961_v44 = vld [vmem:[#allocation21_spill] sm:$0xff] }
 0x252   :  { %10369 = vmatprep.subr.mxu1 %v19950_v25  ;;  %4876 = vmatprep.mubr.f32.mxu0 %v4875_v62 }
 0x253   :  { %5134 = vmatprep.mubr.f32.mxu1 %v14937_v60  ;;  %10331 = vmatpush3.msra.mxu0 %v19951_v58  ;;  %v9848_v62 = vpop.f32.mrf.mxu1 }
 0x254   :  { %10370 = vmatpush3.msra.mxu1 %v19952_v37  ;;  %4882 = vmatmul.mubr.f32.gmra.mxu0 %v4881_v4  ;;  %v9849_v60 = vadd.f32 %v9848_v62, %v9847_v30  ;;  %v19962_v30 = vld [vmem:[#allocation15_spill] sm:$0xff]  ;;  %v19963_v62 = vld [vmem:[#allocation24_spill] sm:$0xff] }
 0x255   :  { %5136 = vmatmul.mubr.f32.gmra.mxu1 %v14958_v43  ;;  %10332 = vmatprep.subr.mxu0 %v19953_v14  ;;  %v19960_v43 = vld [vmem:[#allocation30_spill] sm:$0xff] }
 0x256   :  { %10371 = vmatprep.subr.mxu1 %v19954_v36  ;;  %10333 = vmatpush3.msra.mxu0 %v19955_v55  ;;  %v15189_v4 = vadd.f32 %v9849_v60, %v3161_v33  ;;  %v19965_v60 = vld [vmem:[#allocation65_spill] sm:$0xff] }
 0x257   :  { %10372 = vmatpush3.msra.mxu1 %v19956_v9  ;;  %10334 = vmatprep.subr.mxu0 %v19957_v42 }
 0x258   :  { %10373 = vmatprep.subr.mxu1 %v19958_v31  ;;  %4891 = vmatprep.mubr.f32.mxu0 %v4890_v57  ;;  %v19964_v31 = vld [vmem:[#allocation44_spill] sm:$0xff]  ;;  %v19966_v57 = vld [vmem:[#allocation35_spill] sm:$0xff] }
 0x259   :  { %5141 = vmatprep.mubr.f32.mxu1 %v14999_v17  ;;  %10335 = vmatpush3.msra.mxu0 %v19959_v15  ;;  %v9882_v56 = vpop.f32.mrf.mxu0  ;;  %v19967_v17 = vld [vmem:[#allocation11_spill] sm:$0xff] }
 0x25a   :  { %10374 = vmatpush3.msra.mxu1 %v19960_v43  ;;  %4897 = vmatmul.mubr.f32.gmra.mxu0 %v4896_v41  ;;  %v19968_v41 = vld [vmem:[#allocation33_spill] sm:$0xff] }
 0x25b   :  { %5143 = vmatmul.mubr.f32.gmra.mxu1 %v15035_v10  ;;  %10336 = vmatprep.subr.mxu0 %v19961_v44  ;;  %v9883_v33 = vpop.f32.mrf.mxu0  ;;  %v19971_v44 = vld [vmem:[#allocation29_spill] sm:$0xff] }
 0x25c   :  { %10375 = vmatprep.subr.mxu1 %v19962_v30  ;;  %10337 = vmatpush3.msra.mxu0 %v19963_v62  ;;  %v9884_v10 = vadd.f32 %v9883_v33, %v9882_v56  ;;  %v19969_v30 = vld [vmem:[#allocation18_spill] sm:$0xff]  ;;  %v19974_v33 = vld [vmem:[#allocation64_spill] sm:$0xff] }
 0x25d   :  { %10376 = vmatpush3.msra.mxu1 %v19964_v31  ;;  %10338 = vmatprep.subr.mxu0 %v19965_v60  ;;  %v19970_v62 = vld [vmem:[#allocation34_spill] sm:$0xff] }
 0x25e   :  { %10377 = vmatprep.subr.mxu1 %v19966_v57  ;;  %5148 = vmatprep.mubr.f32.mxu1 %v15069_v47  ;;  %v3481_v60 = vadd.f32 %v9884_v10, %v15098_v48  ;;  %v19972_v57 = vld [vmem:[#allocation58_spill] sm:$0xff]  ;;  %v19973_v47 = vld [vmem:[#allocation57_spill] sm:$0xff] }
 0x25f   :  { %10339 = vmatpush3.msra.mxu0 %v19967_v17  ;;  %10378 = vmatpush3.msra.mxu1 %v19968_v41  ;;  %v9885_v31 = vpop.f32.mrf.mxu0  ;;  %v19975_v10 = vld [vmem:[#allocation13_spill] sm:$0xff] }
 0x260   :  { %5150 = vmatmul.mubr.f32.gmra.mxu1 %v15085_v7  ;;  %10340 = vmatprep.subr.mxu0 %v19969_v30 }
 0x261   :  { %10379 = vmatprep.subr.mxu1 %v19970_v62  ;;  %10341 = vmatpush3.msra.mxu0 %v19971_v44  ;;  %v9886_v56 = vpop.f32.mrf.mxu0 }
 0x262   :  { %10380 = vmatpush3.msra.mxu1 %v19972_v57  ;;  %10342 = vmatprep.subr.mxu0 %v14876_v63  ;;  %v9887_v7 = vadd.f32 %v9886_v56, %v9885_v31 }
 0x263   :  { %10381 = vmatprep.subr.mxu1 %v19973_v47  ;;  %5155 = vmatprep.mubr.f32.mxu1 %v15121_v46  ;;  %v19976_v47 = vld [vmem:[#allocation47_spill] sm:$0xff] }
 0x264   :  { %10343 = vmatpush3.msra.mxu0 %v14870_v1  ;;  %10382 = vmatpush3.msra.mxu1 %v19974_v33  ;;  %v3488_v48 = vadd.f32 %v9887_v7, %v15142_v16  ;;  %v9929_v63 = vpop.f32.mrf.mxu1  ;;  %v9888_v46 = vpop.f32.mrf.mxu0  ;;  %v19977_v1 = vld [vmem:[#allocation46_spill] sm:$0xff] }
 0x265   :  { %5157 = vmatmul.mubr.f32.gmra.mxu1 %v15129_v51  ;;  %10344 = vmatprep.subr.mxu0 %v14923_v54 }
 0x266   :  { %10383 = vmatprep.subr.mxu1 %v19975_v10  ;;  %10345 = vmatpush3.msra.mxu0 %v14892_v61  ;;  %v9930_v31 = vpop.f32.mrf.mxu1  ;;  %v9889_v56 = vpop.f32.mrf.mxu0 }
 0x267   :  { %10384 = vmatpush3.msra.mxu1 %v19976_v47  ;;  %10346 = vmatprep.subr.mxu0 %v14956_v3  ;;  %v9931_v51 = vadd.f32 %v9930_v31, %v9929_v63  ;;  %v9890_v7 = vadd.f32 %v9889_v56, %v9888_v46  ;;  %v19979_v63 = vld [vmem:[#allocation75_spill] sm:$0xff]  ;;  %v19981_v46 = vld [vmem:[#allocation70_spill] sm:$0xff] }
 0x268   :  { %10385 = vmatprep.subr.mxu1 %v19977_v1  ;;  %10347 = vmatpush3.msra.mxu0 %v14929_v34  ;;  %v19978_v34 = vld [vmem:[#allocation61_spill] sm:$0xff] }
 0x269   :  { %10386 = vmatpush3.msra.mxu1 %v14716_v53  ;;  %10348 = vmatprep.subr.mxu0 %v15015_v19  ;;  %v15230_v16 = vadd.f32 %v9931_v51, %v3481_v60  ;;  %v3495_v53 = vadd.f32 %v9890_v7, %v15163_v35  ;;  %v19982_v51 = vand.u32 4294901760, %v14512_v11  ;;  %v19983_v60 = vld [vmem:[#allocation60_spill] sm:$0xff]  ;;  %v19984_v35 = vand.u32 4294901760, %v14509_v2  ;;  %v19985_v7 = vld [vmem:[#allocation51_spill] sm:$0xff] }
 0x26a   :  { %10387 = vmatprep.subr.mxu1 %v14773_v28  ;;  %10349 = vmatpush3.msra.mxu0 %v14964_v18  ;;  %v9891_v19 = vpop.f32.mrf.mxu0  ;;  %v19980_v18 = vld [vmem:[#allocation50_spill] sm:$0xff]  ;;  %v19988_v11 = vand.u32 4294901760, %v14544_v40  ;;  %v19989_v2 = vld [vmem:[#allocation59_spill] sm:$0xff] }
 0x26b   :  { %10388 = vmatpush3.msra.mxu1 %v14788_v8  ;;  %10350 = vmatprep.subr.mxu0 %v15033_v20  ;;  %v9932_v31 = vpop.f32.mrf.mxu1  ;;  %v19987_v8 = vld [vmem:[#allocation39_spill] sm:$0xff] }
 0x26c   :  { %10389 = vmatprep.subr.mxu1 %v14815_v59  ;;  %10351 = vmatpush3.msra.mxu0 %v14991_v6  ;;  %v9892_v56 = vpop.f32.mrf.mxu0 }
 0x26d   :  { %5292 = vmatprep.mubr.f32.mxu0 %v19978_v34  ;;  %10390 = vmatpush3.msra.mxu1 %v19979_v63  ;;  %v9893_v59 = vadd.f32 %v9892_v56, %v9891_v19  ;;  %v9933_v6 = vpop.f32.mrf.mxu1  ;;  %v19986_v63 = vand.u32 4294901760, %v14515_v29  ;;  %v19990_v29 = vand.u32 4294901760, %v14550_v12  ;;  %v19995_v12 = vand.u32 4294901760, %v19978_v34 }
 0x26e   :  { %5295 = vmatmul.mubr.f32.vlgmr.msra.gmra.mxu0 %v19980_v18  ;;  %10391 = vmatprep.subr.mxu1 %v19981_v46  ;;  %v9934_v20 = vadd.f32 %v9933_v6, %v9932_v31  ;;  %v19999_v34 = vand.u32 4294901760, %v19947_v5 }
 0x26f   :  { %10414 = vmatprep.subr.mxu0 %v19982_v51  ;;  %10392 = vmatpush3.msra.mxu1 %v19983_v60  ;;  %v3502_v46 = vadd.f32 %v9893_v59, %v15179_v52  ;;  %v19991_v59 = vand.u32 4294901760, %v14547_v27  ;;  %v19992_v52 = vand.u32 4294901760, %v14605_v39  ;;  %v19994_v51 = vld [vmem:[#allocation74_spill] sm:$0xff]  ;;  %v19996_v27 = vand.u32 4294901760, %v19944_v49 }
 0x270   :  { %10415 = vmatpush3.msra.mxu0 %v19984_v35  ;;  %10393 = vmatprep.subr.mxu1 %v19985_v7  ;;  %v15252_v19 = vadd.f32 %v9934_v20, %v3488_v48  ;;  %v9894_v56 = vpop.f32.mrf.mxu0  ;;  %v9935_v6 = vpop.f32.mrf.mxu1  ;;  %v19993_v48 = vld [vmem:[#allocation62_spill] sm:$0xff]  ;;  %v20000_v49 = vand.u32 4294901760, %v19949_v24  ;;  %v20004_v24 = vand.u32 4294901760, %v19953_v14 }
 0x271   :  { %10416 = vmatprep.subr.mxu0 %v19986_v63  ;;  %5301 = vmatprep.mubr.f32.mxu0 %v14982_v0  ;;  %v20009_v14 = vand.u32 4294901760, %v19993_v48 }
 0x272   :  { %10394 = vmatpush3.msra.mxu1 %v19987_v8  ;;  %10417 = vmatpush3.msra.mxu0 %v19988_v11  ;;  %v9895_v63 = vpop.f32.mrf.mxu0  ;;  %v9936_v20 = vpop.f32.mrf.mxu1  ;;  %v19997_v11 = vand.u32 4294901760, %v19980_v18 }
 0x273   :  { %5304 = vmatmul.mubr.f32.gmra.mxu0 %v15011_v23  ;;  %10395 = vmatprep.subr.mxu1 %v19989_v2  ;;  %v9896_v40 = vadd.f32 %v9895_v63, %v9894_v56  ;;  %v9937_v31 = vadd.f32 %v9936_v20, %v9935_v6  ;;  %v19998_v6 = vand.u32 4294901760, %v19945_v21  ;;  %v20002_v21 = vand.u32 4294901760, %v19951_v58  ;;  %v298_v63 = vld [vmem:[#allocation5 + $0x578] sm:$0xff] }
 0x274   :  { %10418 = vmatprep.subr.mxu0 %v19990_v29  ;;  %10396 = vmatpush3.msra.mxu1 %v14919_v13  ;;  %v20008_v29 = vld [vmem:[#allocation76_spill] sm:$0xff] }
 0x275   :  { %10419 = vmatpush3.msra.mxu0 %v19991_v59  ;;  %10397 = vmatprep.subr.mxu1 %v14943_v26  ;;  %v3509_v35 = vadd.f32 %v9896_v40, %v15189_v4  ;;  %v15273_v56 = vadd.f32 %v9937_v31, %v3495_v53  ;;  %v9938_v39 = vpop.f32.mrf.mxu1  ;;  %v20001_v53 = vand.u32 4294901760, %v14982_v0  ;;  %v20005_v0 = vand.u32 4294901760, %v19955_v55  ;;  %v314_v55 = vld [vmem:[#allocation5 + $0x5f8] sm:$0xff]  ;;  %v313_v59 = vld [vmem:[#allocation5 + $0x5f0] sm:$0xff] }
 0x276   :  { %10420 = vmatprep.subr.mxu0 %v19992_v52  ;;  %5310 = vmatprep.mubr.f32.mxu0 %v19993_v48  ;;  %v20013_v40 = vld [vmem:[#allocation21_spill] sm:$0xff]  ;;  %v20015_v52 = vld [vmem:[#allocation15_spill] sm:$0xff]  ;;  %v20016_v48 = vld [vmem:[#allocation24_spill] sm:$0xff] }
 0x277   :  { %10398 = vmatpush3.msra.mxu1 %v19994_v51  ;;  %5435 = vmatprep.mubr.f32.mxu1 %v19995_v12  ;;  %v9939_v4 = vpop.f32.mrf.mxu1  ;;  %v20014_v20 = vand.u32 4294901760, %v20013_v40  ;;  %v20017_v31 = vand.u32 4294901760, %v20016_v48  ;;  %v15323_v12 = vand.u32 4294901760, %v298_v63 }
 0x278   :  { %10421 = vmatpush3.msra.mxu0 %v19996_v27  ;;  %5439 = vmatmul.mubr.f32.vlgmr.msra.gmra.mxu1 %v19997_v11  ;;  %v9940_v18 = vadd.f32 %v9939_v4, %v9938_v39  ;;  %v20021_v27 = vld [vmem:[#allocation44_spill] sm:$0xff]  ;;  %v20022_v11 = vld [vmem:[#allocation65_spill] sm:$0xff]  ;;  %v20024_v39 = vld [vmem:[#allocation35_spill] sm:$0xff] }
 0x279   :  { %5313 = vmatmul.mubr.f32.gmra.mxu0 %v15079_v32  ;;  %10422 = vmatprep.subr.mxu0 %v19998_v6  ;;  %20019 = vst [vmem:[#allocation26_spill] sm:$0xff] %v15323_v12  ;;  %v20025_v6 = vand.u32 4294901760, %v15105_v38  ;;  %v312_v4 = vld [vmem:[#allocation5 + $0x5e8] sm:$0xff] }
 0x27a   :  { %10461 = vmatprep.subr.mxu1 %v19946_v50  ;;  %10423 = vmatpush3.msra.mxu0 %v19999_v34  ;;  %v15290_v50 = vadd.f32 %v9940_v18, %v3502_v46  ;;  %v9941_v5 = vpop.f32.mrf.mxu1  ;;  %v20006_v46 = vand.u32 4294901760, %v19957_v42  ;;  %v20012_v42 = vand.u32 4294901760, %v15079_v32  ;;  %v20023_v32 = vand.u32 4294901760, %v20022_v11  ;;  %v297_v34 = vld [vmem:[#allocation5 + $0x570] sm:$0xff] }
 0x27b   :  { %10462 = vmatpush3.msra.mxu1 %v19948_v45  ;;  %10424 = vmatprep.subr.mxu0 %v20000_v49  ;;  %v20003_v45 = vand.u32 4294901760, %v15011_v23  ;;  %v296_v49 = vld [vmem:[#allocation5 + $0x568] sm:$0xff] }
 0x27c   :  { %10463 = vmatprep.subr.mxu1 %v19950_v25  ;;  %5319 = vmatprep.mubr.f32.mxu0 %v15105_v38  ;;  %v9942_v25 = vpop.f32.mrf.mxu1 }
 0x27d   :  { %5446 = vmatprep.mubr.f32.mxu1 %v20001_v53  ;;  %10425 = vmatpush3.msra.mxu0 %v20002_v21  ;;  %v9943_v58 = vadd.f32 %v9942_v25, %v9941_v5  ;;  %v20026_v53 = vand.u32 4294901760, %v19967_v17  ;;  %v20027_v5 = vand.u32 4294901760, %v15119_v22  ;;  %v20029_v17 = vand.u32 4294901760, %v19971_v44 }
 0x27e   :  { %10464 = vmatpush3.msra.mxu1 %v19952_v37  ;;  %5322 = vmatmul.mubr.f32.gmra.mxu0 %v15119_v22  ;;  %v20007_v37 = vld [vmem:[#allocation20_spill] sm:$0xff]  ;;  %v15354_v22 = vand.u32 4294901760, %v312_v4 }
 0x27f   :  { %5450 = vmatmul.mubr.f32.gmra.mxu1 %v20003_v45  ;;  %10426 = vmatprep.subr.mxu0 %v20004_v24  ;;  %v15306_v23 = vadd.f32 %v9943_v58, %v3509_v35  ;;  %v15325_v35 = vand.u32 4294901760, %v313_v59  ;;  %v20028_v45 = vand.u32 4294901760, %v19969_v30  ;;  %v15341_v24 = vsub.f32 %v298_v63, %v15323_v12  ;;  %v311_v63 = vld [vmem:[#allocation5 + $0x5e0] sm:$0xff] }
 0x280   :  { %10465 = vmatprep.subr.mxu1 %v19954_v36  ;;  %10427 = vmatpush3.msra.mxu0 %v20005_v0  ;;  %v20010_v36 = vand.u32 4294901760, %v19959_v15  ;;  %v15321_v15 = vand.u32 4294901760, %v314_v55  ;;  %20031 = vst [vmem:[#allocation55_spill] sm:$0xff] %v15354_v22  ;;  %v15356_v30 = vand.u32 4294901760, %v296_v49  ;;  %v15382_v48 = vsub.f32 %v312_v4, %v15354_v22  ;;  %v20047_v4 = vld [vmem:[#allocation54_spill] sm:$0xff] }
 0x281   :  { %10466 = vmatpush3.msra.mxu1 %v19956_v9  ;;  %10428 = vmatprep.subr.mxu0 %v20006_v46  ;;  %v20011_v9 = vld [vmem:[#allocation77_spill] sm:$0xff]  ;;  %20020 = vst [vmem:[#allocation43_spill] sm:$0xff] %v15325_v35  ;;  %v15347_v25 = vsub.f32 %v313_v59, %v15325_v35  ;;  %v20033_v46 = vld [vmem:[#allocation22_spill] sm:$0xff] }
 0x282   :  { %10467 = vmatprep.subr.mxu1 %v20007_v37  ;;  %5328 = vmatprep.mubr.f32.mxu0 %v20008_v29  ;;  %20018 = vst [vmem:[#allocation38_spill] sm:$0xff] %v15321_v15  ;;  %v15344_v38 = vsub.f32 %v314_v55, %v15321_v15  ;;  %20032 = vst [vmem:[#allocation23_spill] sm:$0xff] %v15356_v30  ;;  %v20034_v37 = vand.u32 4294901760, %v20033_v46  ;;  %v295_v59 = vld [vmem:[#allocation5 + $0x560] sm:$0xff]  ;;  %v20050_v46 = vld [vmem:[#allocation63_spill] sm:$0xff] }
 0x283   :  { %5457 = vmatprep.mubr.f32.mxu1 %v20009_v14  ;;  %10429 = vmatpush3.msra.mxu0 %v20010_v36  ;;  %v20035_v14 = vld [vmem:[#allocation57_spill] sm:$0xff]  ;;  %v20037_v36 = vld [vmem:[#allocation48_spill] sm:$0xff]  ;;  %v15395_v11 = vand.u32 4294901760, %v295_v59 }
 0x284   :  { %10468 = vmatpush3.msra.mxu1 %v19960_v43  ;;  %5331 = vmatmul.mubr.f32.gmra.mxu0 %v20011_v9  ;;  %v9976_v43 = vpop.f32.mrf.mxu0  ;;  %v20038_v55 = vand.u32 4294901760, %v20037_v36  ;;  %v20054_v36 = vld [vmem:[#allocation68_spill] sm:$0xff] }
 0x285   :  { %5461 = vmatmul.mubr.f32.gmra.mxu1 %v20012_v42  ;;  %10430 = vmatprep.subr.mxu0 %v20014_v20  ;;  %v18634_v42 = vand.u32 4294901760, %v15347_v25  ;;  %v20039_v20 = vand.u32 4294901760, %v20011_v9  ;;  %20044 = vst [vmem:[#allocation16_spill] sm:$0xff] %v15395_v11 }
 0x286   :  { %10469 = vmatprep.subr.mxu1 %v20015_v52  ;;  %10431 = vmatpush3.msra.mxu0 %v20017_v31  ;;  %v9977_v18 = vpop.f32.mrf.mxu0  ;;  %v20041_v31 = vand.u32 4294901760, %v14892_v61  ;;  %v20045_v61 = vld [vmem:[#allocation66_spill] sm:$0xff] }
 0x287   :  { %10470 = vmatpush3.msra.mxu1 %v20021_v27  ;;  %10432 = vmatprep.subr.mxu0 %v20023_v32  ;;  %v9978_v21 = vadd.f32 %v9977_v18, %v9976_v43  ;;  %v15393_v27 = vand.u32 4294901760, %v311_v63  ;;  %v310_v32 = vld [vmem:[#allocation5 + $0x5d8] sm:$0xff] }
 0x288   :  { %10471 = vmatprep.subr.mxu1 %v20024_v39  ;;  %5468 = vmatprep.mubr.f32.mxu1 %v20025_v6  ;;  %v294_v39 = vld [vmem:[#allocation5 + $0x558] sm:$0xff] }
 0x289   :  { %10433 = vmatpush3.msra.mxu0 %v20026_v53  ;;  %10472 = vmatpush3.msra.mxu1 %v19968_v41  ;;  %v15352_v41 = vand.u32 4294901760, %v297_v34  ;;  %v3753_v0 = vadd.f32 %v9978_v21, %v15230_v16  ;;  %v18636_v16 = vand.u32 4294901760, %v15344_v38  ;;  %20043 = vst [vmem:[#allocation40_spill] sm:$0xff] %v15393_v27  ;;  %v309_v53 = vld [vmem:[#allocation5 + $0x5d0] sm:$0xff] }
 0x28a   :  { %5472 = vmatmul.mubr.f32.gmra.mxu1 %v20027_v5  ;;  %10434 = vmatprep.subr.mxu0 %v20028_v45  ;;  %v9979_v58 = vpop.f32.mrf.mxu0  ;;  %v18631_v5 = vand.u32 4294901760, %v15382_v48 }
 0x28b   :  { %10473 = vmatprep.subr.mxu1 %v19970_v62  ;;  %10435 = vmatpush3.msra.mxu0 %v20029_v17  ;;  %20030 = vst [vmem:[#allocation32_spill] sm:$0xff] %v15352_v41  ;;  %v20036_v62 = vand.u32 4294901760, %v20008_v29  ;;  %v20040_v29 = vand.u32 4294901760, %v14923_v54  ;;  %v15376_v52 = vsub.f32 %v297_v34, %v15352_v41  ;;  %v20042_v54 = vand.u32 4294901760, %v14956_v3  ;;  %v293_v34 = vld [vmem:[#allocation5 + $0x550] sm:$0xff] }
 0x28c   :  { %10474 = vmatpush3.msra.mxu1 %v19972_v57  ;;  %10436 = vmatprep.subr.mxu0 %v20034_v37  ;;  %v9980_v44 = vpop.f32.mrf.mxu0  ;;  %v18635_v57 = vand.u32 4294901760, %v15341_v24  ;;  %v20051_v37 = vand.u32 4294901760, %v20050_v46  ;;  %v15462_v46 = vsub.f32 %v15382_v48, %v18631_v5 }
 0x28d   :  { %10475 = vmatprep.subr.mxu1 %v20035_v14  ;;  %5479 = vmatprep.mubr.f32.mxu1 %v20036_v62  ;;  %v9981_v40 = vadd.f32 %v9980_v44, %v9979_v58  ;;  %v18633_v21 = vand.u32 4294901760, %v15376_v52  ;;  %v15424_v14 = vand.u32 4294901760, %v310_v32  ;;  %v15426_v62 = vand.u32 4294901760, %v294_v39 }
 0x28e   :  { %10437 = vmatpush3.msra.mxu0 %v20038_v55  ;;  %10476 = vmatpush3.msra.mxu1 %v19974_v33  ;;  %v15379_v33 = vsub.f32 %v296_v49, %v15356_v30  ;;  %v15408_v3 = vsub.f32 %v15341_v24, %v18635_v57  ;;  %v20048_v49 = vld [vmem:[#allocation12_spill] sm:$0xff]  ;;  %v20055_v55 = vld [vmem:[#allocation45_spill] sm:$0xff] }
 0x28f   :  { %5483 = vmatmul.mubr.f32.gmra.mxu1 %v20039_v20  ;;  %10438 = vmatprep.subr.mxu0 %v20040_v29  ;;  %v15388_v9 = vadd.f32 %v9981_v40, %v15252_v19  ;;  %v10023_v43 = vpop.f32.mrf.mxu1  ;;  %v15403_v19 = vsub.f32 %v15344_v38, %v18636_v16  ;;  %v20049_v18 = vand.u32 4294901760, %v20048_v49  ;;  %20052 = vst [vmem:[#allocation17_spill] sm:$0xff] %v15424_v14  ;;  %20053 = vst [vmem:[#allocation36_spill] sm:$0xff] %v15426_v62  ;;  %v306_v16 = vld [vmem:[#allocation5 + $0x5b8] sm:$0xff] }
 0x290   :  { %10477 = vmatprep.subr.mxu1 %v19975_v10  ;;  %10439 = vmatpush3.msra.mxu0 %v20041_v31  ;;  %v9982_v6 = vpop.f32.mrf.mxu0  ;;  %v20046_v10 = vand.u32 4294901760, %v20045_v61  ;;  %v18632_v45 = vand.u32 4294901760, %v15379_v33  ;;  %v20056_v40 = vand.u32 4294901760, %v20055_v55  ;;  %v15432_v20 = vsub.f32 %v295_v59, %v15395_v11  ;;  %v308_v31 = vld [vmem:[#allocation5 + $0x5c8] sm:$0xff]  ;;  %v20065_v55 = vld [vmem:[#allocation53_spill] sm:$0xff] }
 0x291   :  { %10478 = vmatpush3.msra.mxu1 %v19976_v47  ;;  %10440 = vmatprep.subr.mxu0 %v20042_v54  ;;  %v15413_v47 = vsub.f32 %v15347_v25, %v18634_v42  ;;  %v15434_v29 = vand.u32 4294901760, %v293_v34  ;;  %v20059_v61 = vld [vmem:[#allocation27_spill] sm:$0xff]  ;;  %v15446_v59 = vand.u32 4294901760, %v309_v53 }
 0x292   :  { %10479 = vmatprep.subr.mxu1 %v19977_v1  ;;  %10441 = vmatpush3.msra.mxu0 %v20046_v10  ;;  %v10024_v1 = vpop.f32.mrf.mxu1  ;;  %v9983_v17 = vpop.f32.mrf.mxu0  ;;  %20057 = vst [vmem:[#allocation73_spill] sm:$0xff] %v15432_v20 }
 0x293   :  { %10480 = vmatpush3.msra.mxu1 %v20047_v4  ;;  %10442 = vmatprep.subr.mxu0 %v20049_v18  ;;  %v10025_v58 = vadd.f32 %v10024_v1, %v10023_v43  ;;  %v9984_v44 = vadd.f32 %v9983_v17, %v9982_v6  ;;  %20058 = vst [vmem:[#allocation41_spill] sm:$0xff] %v15434_v29  ;;  %v20060_v6 = vld [vmem:[#allocation19_spill] sm:$0xff]  ;;  %20062 = vst [vmem:[#allocation49_spill] sm:$0xff] %v15446_v59  ;;  %v20063_v17 = vld [vmem:[#allocation42_spill] sm:$0xff] }
 0x294   :  { %10481 = vmatprep.subr.mxu1 %v14773_v28  ;;  %10443 = vmatpush3.msra.mxu0 %v20051_v37  ;;  %v292_v28 = vld [vmem:[#allocation5 + $0x548] sm:$0xff]  ;;  %v15437_v43 = vsub.f32 %v311_v63, %v15393_v27  ;;  %v20061_v10 = vand.u32 4294901760, %v20060_v6  ;;  %v307_v37 = vld [vmem:[#allocation5 + $0x5c0] sm:$0xff]  ;;  %v15474_v6 = vand.u32 4294901760, %v308_v31  ;;  %v305_v1 = vld [vmem:[#allocation5 + $0x5b0] sm:$0xff] }
 0x295   :  { %10482 = vmatpush3.msra.mxu1 %v20054_v36  ;;  %10444 = vmatprep.subr.mxu0 %v20056_v40  ;;  %v15439_v54 = vadd.f32 %v10025_v58, %v3753_v0  ;;  %v15449_v49 = vadd.f32 %v9984_v44, %v15273_v56  ;;  %v9985_v18 = vpop.f32.mrf.mxu0  ;;  %v20064_v63 = vld [vmem:[#allocation75_spill] sm:$0xff]  ;;  %v15457_v58 = vsub.f32 %v15376_v52, %v18633_v21  ;;  %v291_v44 = vld [vmem:[#allocation5 + $0x540] sm:$0xff]  ;;  %v20075_v0 = vld [vmem:[#allocation56_spill] sm:$0xff] }
 0x296   :  { %10483 = vmatprep.subr.mxu1 %v20059_v61  ;;  %10445 = vmatpush3.msra.mxu0 %v20061_v10  ;;  %v15467_v56 = vsub.f32 %v15379_v33, %v18632_v45  ;;  %v10026_v36 = vpop.f32.mrf.mxu1  ;;  %v20066_v40 = vld [vmem:[#allocation70_spill] sm:$0xff]  ;;  %v15472_v61 = vsub.f32 %v294_v39, %v15426_v62  ;;  %20068 = vst [vmem:[#allocation14_spill] sm:$0xff] %v15474_v6  ;;  %v15476_v10 = vand.u32 4294901760, %v292_v28  ;;  %v15492_v57 = vand.u32 4294901760, %v291_v44  ;;  %v289_v39 = vld [vmem:[#allocation5 + $0x530] sm:$0xff] }
 0x297   :  { %5649 = vmatprep.mubr.f32.mxu0 %v20063_v17  ;;  %10484 = vmatpush3.msra.mxu1 %v20064_v63  ;;  %v15479_v63 = vsub.f32 %v310_v32, %v15424_v14  ;;  %v9986_v5 = vpop.f32.mrf.mxu0  ;;  %v15484_v45 = vsub.f32 %v293_v34, %v15434_v29  ;;  %v15490_v32 = vand.u32 4294901760, %v307_v37 }
 0x298   :  { %5651 = vmatmul.mubr.f32.vlgmr.msra.gmra.mxu0 %v20065_v55  ;;  %10485 = vmatprep.subr.mxu1 %v20066_v40  ;;  %20067 = vst [vmem:[#allocation52_spill] sm:$0xff] %v15472_v61  ;;  %20069 = vst [vmem:[#allocation31_spill] sm:$0xff] %v15476_v10  ;;  %v18637_v40 = vand.u32 4294901760, %v15437_v43  ;;  %v9987_v21 = vadd.f32 %v9986_v5, %v9985_v18  ;;  %v10027_v42 = vpop.f32.mrf.mxu1  ;;  %v15512_v5 = vsub.f32 %v308_v31, %v15474_v6 }
 0x299   :  { %20070 = vst [vmem:[#allocation30_spill] sm:$0xff] %v15479_v63  ;;  %10508 = vmatprep.subr.mxu0 %v15321_v15  ;;  %10486 = vmatpush3.msra.mxu1 %v19983_v60  ;;  %20071 = vst [vmem:[#allocation11_spill] sm:$0xff] %v15484_v45  ;;  %v15495_v60 = vsub.f32 %v309_v53, %v15446_v59  ;;  %v10028_v34 = vadd.f32 %v10027_v42, %v10026_v36  ;;  %v290_v36 = vld [vmem:[#allocation5 + $0x538] sm:$0xff]  ;;  %v15529_v31 = vand.u32 4294901760, %v306_v16  ;;  %v304_v15 = vld [vmem:[#allocation5 + $0x5a8] sm:$0xff] }
 0x29a   :  { %10509 = vmatpush3.msra.mxu0 %v15323_v12  ;;  %10487 = vmatprep.subr.mxu1 %v19985_v7  ;;  %20072 = vst [vmem:[#allocation33_spill] sm:$0xff] %v15490_v32  ;;  %20073 = vst [vmem:[#allocation18_spill] sm:$0xff] %v15492_v57  ;;  %v15503_v7 = vadd.f32 %v9987_v21, %v15290_v50  ;;  %v15508_v53 = vsub.f32 %v292_v28, %v15476_v10  ;;  %v20078_v21 = vld [vmem:[#allocation25_spill] sm:$0xff]  ;;  %v20079_v28 = vand.u32 4294901760, %v15432_v20 }
 0x29b   :  { %20074 = vst [vmem:[#allocation34_spill] sm:$0xff] %v15495_v60  ;;  %10510 = vmatprep.subr.mxu0 %v15325_v35  ;;  %5656 = vmatprep.mubr.f32.mxu0 %v20075_v0  ;;  %20077 = vst [vmem:[#allocation58_spill] sm:$0xff] %v15512_v5  ;;  %v15515_v4 = vadd.f32 %v10028_v34, %v15388_v9  ;;  %v9988_v50 = vpop.f32.mrf.mxu0  ;;  %v15544_v9 = vand.u32 4294901760, %v290_v36 }
 0x29c   :  { %10488 = vmatpush3.msra.mxu1 %v19987_v8  ;;  %10511 = vmatpush3.msra.mxu0 %v15352_v41  ;;  %20076 = vst [vmem:[#allocation29_spill] sm:$0xff] %v15508_v53  ;;  %v15522_v8 = vsub.f32 %v15437_v43, %v18637_v40  ;;  %v15527_v18 = vsub.f32 %v15432_v20, %v20079_v28  ;;  %20080 = vst [vmem:[#allocation64_spill] sm:$0xff] %v15529_v31  ;;  %v10029_v34 = vpop.f32.mrf.mxu1  ;;  %v20086_v40 = vld [vmem:[#allocation28_spill] sm:$0xff] }
 0x29d   :  { %5658 = vmatmul.mubr.f32.gmra.mxu0 %v20078_v21  ;;  %10489 = vmatprep.subr.mxu1 %v19989_v2  ;;  %v15535_v2 = vsub.f32 %v291_v44, %v15492_v57  ;;  %v15540_v41 = vsub.f32 %v307_v37, %v15490_v32  ;;  %v9989_v28 = vpop.f32.mrf.mxu0  ;;  %20083 = vst [vmem:[#allocation46_spill] sm:$0xff] %v15544_v9  ;;  %v20087_v37 = vand.u32 4294901760, %v15479_v63  ;;  %v69_v20 = vld [vmem:[#allocation2 + $0xd0] sm:$0xff] }
 0x29e   :  { %10512 = vmatprep.subr.mxu0 %v15354_v22  ;;  %10490 = vmatpush3.msra.mxu1 %v14919_v13  ;;  %v15546_v22 = vand.u32 4294901760, %v305_v1  ;;  %v15548_v13 = vand.u32 4294901760, %v289_v39  ;;  %v9990_v44 = vadd.f32 %v9989_v28, %v9988_v50  ;;  %v10030_v35 = vpop.f32.mrf.mxu1  ;;  %v20088_v28 = vand.u32 4294901760, %v15472_v61  ;;  %v20092_v50 = vld [vmem:[#allocation37_spill] sm:$0xff] }
 0x29f   :  { %20081 = vst [vmem:[#allocation13_spill] sm:$0xff] %v15535_v2  ;;  %20082 = vst [vmem:[#allocation47_spill] sm:$0xff] %v15540_v41  ;;  %10513 = vmatpush3.msra.mxu0 %v15356_v30  ;;  %10491 = vmatprep.subr.mxu1 %v14943_v26  ;;  %v15555_v42 = vsub.f32 %v15479_v63, %v20087_v37  ;;  %v10031_v12 = vadd.f32 %v10030_v35, %v10029_v34 }
 0x2a0   :  { %20084 = vst [vmem:[#allocation61_spill] sm:$0xff] %v15546_v22  ;;  %20085 = vst [vmem:[#allocation50_spill] sm:$0xff] %v15548_v13  ;;  %10514 = vmatprep.subr.mxu0 %v15393_v27  ;;  %5663 = vmatprep.mubr.f32.mxu0 %v20086_v40  ;;  %v15565_v27 = vsub.f32 %v15472_v61, %v20088_v28  ;;  %v15568_v37 = vsub.f32 %v306_v16, %v15529_v31  ;;  %v288_v28 = vld [vmem:[#allocation5 + $0x528] sm:$0xff]  ;;  %v20096_v16 = vand.u32 4294901760, %v15403_v19 }
 0x2a1   :  { %10492 = vmatpush3.msra.mxu1 %v19994_v51  ;;  %5781 = vmatprep.mubr.f32.mxu1 %v20063_v17  ;;  %v15571_v30 = vadd.f32 %v9990_v44, %v15306_v23  ;;  %v20090_v51 = vand.u32 4294901760, %v15495_v60  ;;  %v20091_v17 = vand.u32 4294901760, %v15484_v45  ;;  %v15587_v23 = vadd.f32 %v10031_v12, %v15449_v49  ;;  %v10032_v44 = vpop.f32.mrf.mxu1  ;;  %v303_v12 = vld [vmem:[#allocation5 + $0x5a0] sm:$0xff] }
 0x2a2   :  { %20089 = vst [vmem:[#allocation60_spill] sm:$0xff] %v15568_v37  ;;  %10515 = vmatpush3.msra.mxu0 %v15395_v11  ;;  %5783 = vmatmul.mubr.f32.vlgmr.msra.gmra.mxu1 %v20065_v55  ;;  %v15596_v26 = vsub.f32 %v289_v39, %v15548_v13  ;;  %v15605_v49 = vand.u32 4294901760, %v304_v15  ;;  %v20097_v55 = vand.u32 4294901760, %v15512_v5  ;;  %v20098_v39 = vand.u32 4294901760, %v15508_v53 }
 0x2a3   :  { %v15578_v35 = vsub.f32 %v15495_v60, %v20090_v51  ;;  %v15583_v34 = vsub.f32 %v15484_v45, %v20091_v17  ;;  %5665 = vmatmul.mubr.f32.gmra.mxu0 %v20092_v50  ;;  %10516 = vmatprep.subr.mxu0 %v15424_v14  ;;  %v15593_v51 = vsub.f32 %v290_v36, %v15544_v9  ;;  %v20099_v19 = vand.u32 4294901760, %v15408_v3 }
 0x2a4   :  { %20094 = vst [vmem:[#allocation39_spill] sm:$0xff] %v15596_v26  ;;  %v15599_v17 = vsub.f32 %v305_v1, %v15546_v22  ;;  %10555 = vmatprep.subr.mxu1 %v20096_v16  ;;  %10517 = vmatpush3.msra.mxu0 %v15426_v62  ;;  %v15610_v36 = vsub.f32 %v15512_v5, %v20097_v55  ;;  %v10033_v1 = vpop.f32.mrf.mxu1  ;;  %v15620_v16 = vand.u32 4294901760, %v288_v28  ;;  %v287_v62 = vld [vmem:[#allocation5 + $0x520] sm:$0xff]  ;;  %v20101_v45 = vand.u32 4294901760, %v15413_v47  ;;  %v302_v47 = vld [vmem:[#allocation5 + $0x598] sm:$0xff] }
 0x2a5   :  { %20093 = vst [vmem:[#allocation51_spill] sm:$0xff] %v15593_v51  ;;  %v15615_v14 = vsub.f32 %v15508_v53, %v20098_v39  ;;  %10556 = vmatpush3.msra.mxu1 %v20099_v19  ;;  %10518 = vmatprep.subr.mxu0 %v15446_v59  ;;  %v10034_v5 = vadd.f32 %v10033_v1, %v10032_v44  ;;  %v20102_v39 = vld [vmem:[#allocation67_spill] sm:$0xff]  ;;  %v20103_v59 = vand.u32 4294901760, %v15540_v41  ;;  %v286_v44 = vld [vmem:[#allocation5 + $0x518] sm:$0xff]  ;;  %v20104_v55 = vand.u32 4294901760, %v15457_v58  ;;  %v285_v58 = vld [vmem:[#allocation5 + $0x510] sm:$0xff] }
 0x2a6   :  { %20095 = vst [vmem:[#allocation59_spill] sm:$0xff] %v15599_v17  ;;  %20100 = vst [vmem:[#allocation62_spill] sm:$0xff] %v15620_v16  ;;  %10557 = vmatprep.subr.mxu1 %v20101_v45  ;;  %5670 = vmatprep.mubr.f32.mxu0 %v20102_v39  ;;  %v54_v53 = vld [vmem:[#allocation2 + $0x58] sm:$0xff]  ;;  %v10035_v19 = vpop.f32.mrf.mxu1  ;;  %v15647_v11 = vand.u32 4294901760, %v303_v12  ;;  %v15652_v45 = vsub.f32 %v304_v15, %v15605_v49  ;;  %v20126_v61 = vand.u32 4294901760, %v15527_v18  ;;  %v20132_v63 = vand.u32 4294901760, %v15555_v42 }
 0x2a7   :  { %v15633_v60 = vsub.f32 %v15540_v41, %v20103_v59  ;;  %5788 = vmatprep.mubr.f32.mxu1 %v20075_v0  ;;  %10519 = vmatpush3.msra.mxu0 %v15434_v29  ;;  %v15641_v3 = vadd.f32 %v10034_v5, %v15503_v7  ;;  %v20105_v59 = vld [vmem:[#allocation69_spill] sm:$0xff]  ;;  %v15649_v29 = vand.u32 4294901760, %v287_v62  ;;  %v15657_v5 = vsub.f32 %v288_v28, %v15620_v16 }
 0x2a8   :  { %10558 = vmatpush3.msra.mxu1 %v20104_v55  ;;  %5672 = vmatmul.mubr.f32.gmra.mxu0 %v20105_v59  ;;  %20106 = vst [vmem:[#allocation74_spill] sm:$0xff] %v15647_v11  ;;  %20108 = vst [vmem:[#allocation76_spill] sm:$0xff] %v15652_v45  ;;  %v20110_v7 = vand.u32 4294901760, %v15535_v2  ;;  %v20111_v0 = vand.u32 4294901760, %v15568_v37  ;;  %v10036_v15 = vpop.f32.mrf.mxu1  ;;  %v15676_v41 = vand.u32 4294901760, %v54_v53  ;;  %v20118_v28 = vand.u32 4294901760, %v15599_v17 }
 0x2a9   :  { %20107 = vst [vmem:[#allocation20_spill] sm:$0xff] %v15649_v29  ;;  %5790 = vmatmul.mubr.f32.gmra.mxu1 %v20078_v21  ;;  %10520 = vmatprep.subr.mxu0 %v15474_v6  ;;  %20109 = vst [vmem:[#allocation77_spill] sm:$0xff] %v15657_v5  ;;  %v20112_v21 = vand.u32 4294901760, %v15462_v46  ;;  %v15674_v6 = vand.u32 4294901760, %v286_v44  ;;  %v20117_v46 = vand.u32 4294901760, %v15593_v51  ;;  %v20136_v42 = vand.u32 4294901760, %v15657_v5 }
 0x2aa   :  { %v15663_v55 = vsub.f32 %v15535_v2, %v20110_v7  ;;  %v15668_v1 = vsub.f32 %v15568_v37, %v20111_v0  ;;  %10521 = vmatpush3.msra.mxu0 %v15476_v10  ;;  %20114 = vst [vmem:[#allocation15_spill] sm:$0xff] %v15676_v41  ;;  %v10037_v7 = vadd.f32 %v10036_v15, %v10035_v19  ;;  %v20115_v2 = vand.u32 4294901760, %v15467_v56  ;;  %v301_v10 = vld [vmem:[#allocation5 + $0x590] sm:$0xff] }
 0x2ab   :  { %10559 = vmatprep.subr.mxu1 %v20112_v21  ;;  %20113 = vst [vmem:[#allocation21_spill] sm:$0xff] %v15674_v6  ;;  %10522 = vmatprep.subr.mxu0 %v15490_v32  ;;  %v15681_v0 = vand.u32 4294901760, %v302_v47  ;;  %v15686_v21 = vsub.f32 %v15593_v51, %v20117_v46  ;;  %v15691_v37 = vsub.f32 %v15599_v17, %v20118_v28  ;;  %v20119_v19 = vand.u32 4294901760, %v15596_v26  ;;  %v20121_v32 = vld [vmem:[#allocation71_spill] sm:$0xff] }
 0x2ac   :  { %10560 = vmatpush3.msra.mxu1 %v20115_v2  ;;  %v53_v2 = vld [vmem:[#allocation2 + $0x50] sm:$0xff]  ;;  %v20120_v15 = vand.u32 4294901760, %v15522_v8  ;;  %5677 = vmatprep.mubr.f32.mxu0 %v20121_v32  ;;  %v15702_v46 = vsub.f32 %v287_v62, %v15649_v29  ;;  %v15704_v51 = vld [vmem:[#allocation5 + $0x588] sm:$0xff]  ;;  %v15708_v28 = vsub.f32 %v303_v12, %v15647_v11  ;;  %v15711_v17 = vadd.f32 %v10037_v7, %v15571_v30 }
 0x2ad   :  { %20116 = vst [vmem:[#allocation24_spill] sm:$0xff] %v15681_v0  ;;  %v15696_v56 = vsub.f32 %v15596_v26, %v20119_v19  ;;  %5795 = vmatprep.mubr.f32.mxu1 %v20086_v40  ;;  %10523 = vmatpush3.msra.mxu0 %v15492_v57  ;;  %v15717_v62 = vand.u32 4294901760, %v285_v58  ;;  %v20127_v12 = vld [vmem:[#allocation72_spill] sm:$0xff]  ;;  %v15724_v30 = vsub.f32 %v286_v44, %v15674_v6  ;;  %v15726_v40 = vand.u32 4294901760, %v301_v10  ;;  %v70_v19 = vld [vmem:[#allocation2 + $0xd8] sm:$0xff]  ;;  %v15741_v57 = vld [vmem:[#allocation5 + $0x580] sm:$0xff] }
 0x2ae   :  { %10561 = vmatprep.subr.mxu1 %v20120_v15  ;;  %20122 = vst [vmem:[#allocation44_spill] sm:$0xff] %v15702_v46  ;;  %20123 = vst [vmem:[#allocation65_spill] sm:$0xff] %v15708_v28  ;;  %v284_v15 = vld [vmem:[#allocation5 + $0x508] sm:$0xff]  ;;  %5679 = vmatmul.mubr.f32.gmra.mxu0 %v20127_v12  ;;  %v15729_v7 = vsub.f32 %v54_v53, %v15676_v41  ;;  %v15731_v8 = vand.u32 4294901760, %v53_v2  ;;  %v15739_v44 = vand.u32 4294901760, %v15704_v51  ;;  %v283_v53 = vld [vmem:[#allocation5 + $0x500] sm:$0xff] }
 0x2af   :  { %20124 = vst [vmem:[#allocation35_spill] sm:$0xff] %v15711_v17  ;;  %20125 = vst [vmem:[#allocation22_spill] sm:$0xff] %v15717_v62  ;;  %10562 = vmatpush3.msra.mxu1 %v20126_v61  ;;  %10524 = vmatprep.subr.mxu0 %v15529_v31  ;;  %v15751_v18 = vand.u32 4294901760, %v284_v15  ;;  %v15755_v61 = vsub.f32 %v302_v47, %v15681_v0  ;;  %v10070_v17 = vpop.f32.mrf.mxu0  ;;  %v20134_v41 = vand.u32 4294901760, %v15565_v27  ;;  %v20138_v47 = vand.u32 4294901760, %v15578_v35 }
 0x2b0   :  { %20128 = vst [vmem:[#allocation57_spill] sm:$0xff] %v15726_v40  ;;  %20129 = vst [vmem:[#allocation48_spill] sm:$0xff] %v15729_v7  ;;  %5797 = vmatmul.mubr.f32.gmra.mxu1 %v20092_v50  ;;  %10563 = vmatprep.subr.mxu1 %v20132_v63  ;;  %v20133_v50 = vand.u32 4294901760, %v15652_v45  ;;  %v15761_v63 = vsub.f32 %v285_v58, %v15717_v62  ;;  %v15777_v27 = vand.u32 4294901760, %v283_v53  ;;  %v20141_v26 = vand.u32 4294901760, %v15583_v34 }
 0x2b1   :  { %20130 = vst [vmem:[#allocation66_spill] sm:$0xff] %v15731_v8  ;;  %20131 = vst [vmem:[#allocation54_spill] sm:$0xff] %v15739_v44  ;;  %10525 = vmatpush3.msra.mxu0 %v15544_v9  ;;  %10564 = vmatpush3.msra.mxu1 %v20134_v41  ;;  %v15769_v9 = vand.u32 4294901760, %v70_v19  ;;  %v15775_v41 = vand.u32 4294901760, %v15741_v57  ;;  %v15796_v58 = vsub.f32 %v284_v15, %v15751_v18  ;;  %v20145_v35 = vand.u32 4294901760, %v15610_v36 }
 0x2b2   :  { %v15749_v31 = vsub.f32 %v15652_v45, %v20133_v50  ;;  %10526 = vmatprep.subr.mxu0 %v15546_v22  ;;  %20135 = vst [vmem:[#allocation12_spill] sm:$0xff] %v15761_v63  ;;  %v15766_v50 = vsub.f32 %v15657_v5, %v20136_v42  ;;  %10565 = vmatprep.subr.mxu1 %v20138_v47  ;;  %20139 = vst [vmem:[#allocation68_spill] sm:$0xff] %v15777_v27  ;;  %v10071_v42 = vpop.f32.mrf.mxu0  ;;  %v15790_v47 = vand.u32 4294901760, %v69_v20  ;;  %v86_v5 = vld [vmem:[#allocation2 + $0x158] sm:$0xff] }
 0x2b3   :  { %20137 = vst [vmem:[#allocation63_spill] sm:$0xff] %v15769_v9  ;;  %5802 = vmatprep.mubr.f32.mxu1 %v20102_v39  ;;  %v15781_v22 = vsub.f32 %v53_v2, %v15731_v8  ;;  %10527 = vmatpush3.msra.mxu0 %v15548_v13  ;;  %v15788_v39 = vsub.f32 %v301_v10, %v15726_v40  ;;  %20143 = vst [vmem:[#allocation19_spill] sm:$0xff] %v15796_v58  ;;  %v20147_v10 = vand.u32 4294901760, %v15615_v14 }
 0x2b4   :  { %10566 = vmatpush3.msra.mxu1 %v20141_v26  ;;  %20142 = vst [vmem:[#allocation27_spill] sm:$0xff] %v15790_v47  ;;  %v10072_v45 = vadd.f32 %v10071_v42, %v10070_v17  ;;  %10528 = vmatprep.subr.mxu0 %v15605_v49  ;;  %v20144_v26 = vand.u32 4294901760, %v15708_v28  ;;  %v15814_v15 = vsub.f32 %v70_v19, %v15769_v9  ;;  %v10073_v2 = vpop.f32.mrf.mxu0  ;;  %v15831_v17 = vand.u32 4294901760, %v86_v5 }
 0x2b5   :  { %20140 = vst [vmem:[#allocation45_spill] sm:$0xff] %v15781_v22  ;;  %5804 = vmatmul.mubr.f32.gmra.mxu1 %v20105_v59  ;;  %10567 = vmatprep.subr.mxu1 %v20145_v35  ;;  %v20146_v59 = vand.u32 4294901760, %v15702_v46  ;;  %v15823_v36 = vsub.f32 %v283_v53, %v15777_v27  ;;  %v20149_v35 = vand.u32 4294901760, %v15729_v7  ;;  %v20152_v14 = vand.u32 4294901760, %v15724_v30 }
 0x2b6   :  { %v15801_v34 = vsub.f32 %v15708_v28, %v20144_v26  ;;  %10529 = vmatpush3.msra.mxu0 %v15620_v16  ;;  %v15817_v26 = vadd.f32 %v10072_v45, %v15439_v54  ;;  %10568 = vmatpush3.msra.mxu1 %v20147_v10  ;;  %20150 = vst [vmem:[#allocation75_spill] sm:$0xff] %v15831_v17  ;;  %v85_v54 = vld [vmem:[#allocation2 + $0x150] sm:$0xff]  ;;  %v20151_v45 = vand.u32 4294901760, %v15633_v60  ;;  %v20154_v60 = vand.u32 4294901760, %v15663_v55 }
 0x2b7   :  { %v15811_v42 = vsub.f32 %v15702_v46, %v20146_v59  ;;  %10530 = vmatprep.subr.mxu0 %v15647_v11  ;;  %20148 = vst [vmem:[#allocation42_spill] sm:$0xff] %v15823_v36  ;;  %v15828_v59 = vsub.f32 %v15729_v7, %v20149_v35  ;;  %5809 = vmatprep.mubr.f32.mxu1 %v20121_v32  ;;  %v10074_v7 = vpop.f32.mrf.mxu0 }
 0x2b8   :  { %10569 = vmatprep.subr.mxu1 %v20151_v45  ;;  %v15839_v53 = vsub.f32 %v15724_v30, %v20152_v14  ;;  %v15843_v35 = vsub.f32 %v69_v20, %v15790_v47  ;;  %v15847_v19 = vsub.f32 %v15704_v51, %v15739_v44  ;;  %10531 = vmatpush3.msra.mxu0 %v15649_v29  ;;  %v6182_v32 = vand.u32 4294901760, %v15801_v34 }
 0x2b9   :  { %10570 = vmatpush3.msra.mxu1 %v20154_v60  ;;  %v20155_v45 = vand.u32 4294901760, %v15755_v61  ;;  %v10075_v10 = vadd.f32 %v10074_v7, %v10073_v2  ;;  %10532 = vmatprep.subr.mxu0 %v15681_v0  ;;  %v6070_v51 = vand.u32 4294901760, %v15811_v42  ;;  %v15865_v55 = vsub.f32 %v15741_v57, %v15775_v41  ;;  %v102_v60 = vld [vmem:[#allocation2 + $0x1d8] sm:$0xff]  ;;  %v10117_v29 = vpop.f32.mrf.mxu1 }
 0x2ba   :  { %20153 = vst [vmem:[#allocation53_spill] sm:$0xff] %v15847_v19  ;;  %5811 = vmatmul.mubr.f32.gmra.mxu1 %v20127_v12  ;;  %v15867_v34 = vand.u32 4294901760, %v85_v54  ;;  %10533 = vmatpush3.msra.mxu0 %v15674_v6  ;;  %v5916_v12 = vand.u32 4294901760, %v15828_v59  ;;  %v20159_v7 = vand.u32 4294901760, %v15781_v22  ;;  %v15877_v42 = vsub.f32 %v86_v5, %v15831_v17  ;;  %v101_v6 = vld [vmem:[#allocation2 + $0x1d0] sm:$0xff]  ;;  %v10076_v0 = vpop.f32.mrf.mxu0 }
 0x2bb   :  { %v15856_v14 = vsub.f32 %v15755_v61, %v20155_v45  ;;  %20156 = vst [vmem:[#allocation70_spill] sm:$0xff] %v15865_v55  ;;  %v20158_v45 = vand.u32 4294901760, %v15668_v1  ;;  %v15880_v57 = vadd.f32 %v10075_v10, %v15515_v4  ;;  %v20161_v20 = vand.u32 4294901760, %v15686_v21  ;;  %10534 = vmatprep.subr.mxu0 %v15726_v40 }
 0x2bc   :  { %20157 = vst [vmem:[#allocation56_spill] sm:$0xff] %v15867_v34  ;;  %v5921_v2 = vsub.f32 %v15781_v22, %v20159_v7  ;;  %20160 = vst [vmem:[#allocation25_spill] sm:$0xff] %v15877_v42  ;;  %v6077_v1 = vand.u32 4294901760, %v15839_v53  ;;  %v20162_v59 = vand.u32 4294901760, %v15788_v39  ;;  %v20163_v4 = vand.u32 4294901760, %v15691_v37  ;;  %10535 = vmatpush3.msra.mxu0 %v15717_v62  ;;  %v10118_v7 = vpop.f32.mrf.mxu1  ;;  %5917 = vmatprep.mubr.f32.mxu0 %v5916_v12 }
 0x2bd   :  { %10571 = vmatprep.subr.mxu1 %v20158_v45  ;;  %v6189_v21 = vand.u32 4294901760, %v15856_v14  ;;  %v20164_v10 = vand.u32 4294901760, %v15761_v63  ;;  %v20166_v5 = vand.u32 4294901760, %v15696_v56  ;;  %10536 = vmatprep.subr.mxu0 %v15739_v44  ;;  %v20167_v37 = vand.u32 4294901760, %v15814_v15 }
 0x2be   :  { %10572 = vmatpush3.msra.mxu1 %v20161_v20  ;;  %v6195_v45 = vsub.f32 %v15788_v39, %v20162_v59  ;;  %v15901_v59 = vand.u32 4294901760, %v102_v60  ;;  %v18724_v14 = vand.u32 4294901760, %v15865_v55  ;;  %v15911_v62 = vsub.f32 %v85_v54, %v15867_v34  ;;  %10537 = vmatpush3.msra.mxu0 %v15751_v18 }
 0x2bf   :  { %10573 = vmatprep.subr.mxu1 %v20163_v4  ;;  %v15898_v53 = vsub.f32 %v15761_v63, %v20164_v10  ;;  %v5930_v4 = vsub.f32 %v15814_v15, %v20167_v37  ;;  %v10077_v10 = vpop.f32.mrf.mxu0  ;;  %v10119_v40 = vadd.f32 %v10118_v7, %v10117_v29  ;;  %v20168_v20 = vand.u32 4294901760, %v15749_v31  ;;  %10538 = vmatprep.subr.mxu0 %v15775_v41 }
 0x2c0   :  { %20165 = vst [vmem:[#allocation28_spill] sm:$0xff] %v15901_v59  ;;  %10574 = vmatpush3.msra.mxu1 %v20166_v5  ;;  %v5922_v56 = vand.u32 4294901760, %v5921_v2  ;;  %v15917_v44 = vand.u32 4294901760, %v101_v6  ;;  %v10078_v22 = vadd.f32 %v10077_v10, %v10076_v0  ;;  %v20170_v37 = vand.u32 4294901760, %v15766_v50  ;;  %10539 = vmatpush3.msra.mxu0 %v15777_v27 }
 0x2c1   :  { %10575 = vmatprep.subr.mxu1 %v20168_v20  ;;  %v20171_v54 = vand.u32 4294901760, %v15843_v35  ;;  %v20172_v31 = vand.u32 4294901760, %v15847_v19  ;;  %v118_v20 = vld [vmem:[#allocation2 + $0x258] sm:$0xff]  ;;  %v15930_v5 = vadd.f32 %v10119_v40, %v15817_v26  ;;  %v6196_v0 = vand.u32 4294901760, %v6195_v45  ;;  %v10120_v45 = vpop.f32.mrf.mxu1  ;;  %10602 = vmatprep.subr.mxu0 %v15344_v38 }
 0x2c2   :  { %20169 = vst [vmem:[#allocation37_spill] sm:$0xff] %v15917_v44  ;;  %10576 = vmatpush3.msra.mxu1 %v20170_v37  ;;  %v20173_v50 = vand.u32 4294901760, %v15796_v58  ;;  %v15937_v37 = vsub.f32 %v102_v60, %v15901_v59  ;;  %v5931_v2 = vand.u32 4294901760, %v5930_v4  ;;  %v6209_v40 = vsub.f32 %v15865_v55, %v18724_v14  ;;  %5923 = vmatmul.mubr.f32.vlgmr.msra.gmra.mxu0 %v5922_v56 }
 0x2c3   :  { %v5936_v29 = vsub.f32 %v15843_v35, %v20171_v54  ;;  %v6202_v7 = vsub.f32 %v15847_v19, %v20172_v31  ;;  %10577 = vmatprep.subr.mxu1 %v6182_v32  ;;  %v15940_v54 = vadd.f32 %v10078_v22, %v15587_v23  ;;  %v10079_v31 = vpop.f32.mrf.mxu0  ;;  %v117_v32 = vld [vmem:[#allocation2 + $0x250] sm:$0xff]  ;;  %v6084_v60 = vand.u32 4294901760, %v15898_v53  ;;  %v10121_v26 = vpop.f32.mrf.mxu1  ;;  %10603 = vmatpush3.msra.mxu0 %v15341_v24 }
 0x2c4   :  { %v6090_v10 = vsub.f32 %v15796_v58, %v20173_v50  ;;  %10578 = vmatpush3.msra.mxu1 %v6070_v51  ;;  %v20174_v50 = vand.u32 4294901760, %v15877_v42  ;;  %v15951_v23 = vsub.f32 %v101_v6, %v15917_v44  ;;  %v15953_v51 = vand.u32 4294901760, %v118_v20  ;;  %10604 = vmatprep.subr.mxu0 %v15347_v25 }
 0x2c5   :  { %10579 = vmatprep.subr.mxu1 %v6189_v21  ;;  %v10080_v12 = vpop.f32.mrf.mxu0  ;;  %v5937_v4 = vand.u32 4294901760, %v5936_v29  ;;  %v6203_v14 = vand.u32 4294901760, %v6202_v7  ;;  %v20176_v56 = vand.u32 4294901760, %v15823_v36  ;;  %v18731_v6 = vand.u32 4294901760, %v15937_v37  ;;  %5932 = vmatprep.mubr.f32.mxu0 %v5931_v2 }
 0x2c6   :  { %v5945_v22 = vsub.f32 %v15877_v42, %v20174_v50  ;;  %20175 = vst [vmem:[#allocation67_spill] sm:$0xff] %v15953_v51  ;;  %10580 = vmatpush3.msra.mxu1 %v6077_v1  ;;  %v10081_v53 = vadd.f32 %v10080_v12, %v10079_v31  ;;  %v6091_v50 = vand.u32 4294901760, %v6090_v10  ;;  %v15961_v27 = vand.u32 4294901760, %v117_v32  ;;  %10605 = vmatpush3.msra.mxu0 %v15376_v52 }
 0x2c7   :  { %v6097_v21 = vsub.f32 %v15823_v36, %v20176_v56  ;;  %10581 = vmatprep.subr.mxu1 %v6196_v0  ;;  %v10122_v42 = vadd.f32 %v10121_v26, %v10120_v45  ;;  %v6210_v1 = vand.u32 4294901760, %v6209_v40  ;;  %v20178_v29 = vand.u32 4294901760, %v15911_v62  ;;  %v10082_v2 = vpop.f32.mrf.mxu0  ;;  %5938 = vmatmul.mubr.f32.gmra.mxu0 %v5937_v4  ;;  %v10123_v45 = vpop.f32.mrf.mxu1 }
 0x2c8   :  { %20177 = vst [vmem:[#allocation69_spill] sm:$0xff] %v15961_v27  ;;  %v4238_v31 = vadd.f32 %v10081_v53, %v15641_v3  ;;  %10582 = vmatpush3.msra.mxu1 %v6084_v60  ;;  %v5946_v0 = vand.u32 4294901760, %v5945_v22  ;;  %v18729_v10 = vand.u32 4294901760, %v15951_v23  ;;  %v15971_v12 = vsub.f32 %v118_v20, %v15953_v51  ;;  %10606 = vmatprep.subr.mxu0 %v15382_v48 }
 0x2c9   :  { %v5951_v7 = vsub.f32 %v15911_v62, %v20178_v29  ;;  %v15974_v26 = vadd.f32 %v10122_v42, %v15880_v57  ;;  %10583 = vmatprep.subr.mxu1 %v6203_v14  ;;  %v6098_v40 = vand.u32 4294901760, %v6097_v21  ;;  %v5960_v3 = vsub.f32 %v15937_v37, %v18731_v6  ;;  %v10083_v20 = vpop.f32.mrf.mxu0  ;;  %10607 = vmatpush3.msra.mxu0 %v15379_v33  ;;  %v10124_v22 = vpop.f32.mrf.mxu1  ;;  %v20182_v21 = vld [vmem:[#allocation35_spill] sm:$0xff]  ;;  %v20191_v6 = vld [vmem:[#allocation32_spill] sm:$0xff] }
 0x2ca   :  { %20179 = vst [vmem:[#allocation71_spill] sm:$0xff] %v15971_v12  ;;  %10584 = vmatpush3.msra.mxu1 %v6091_v50  ;;  %v15981_v60 = vsub.f32 %v117_v32, %v15961_v27  ;;  %v10084_v57 = vadd.f32 %v10083_v20, %v10082_v2  ;;  %10608 = vmatprep.subr.mxu0 %v15437_v43  ;;  %v18730_v4 = vand.u32 4294901760, %v15971_v12  ;;  %v20181_v32 = vld [vmem:[#allocation15_spill] sm:$0xff]  ;;  %v20183_v50 = vld [vmem:[#allocation73_spill] sm:$0xff]  ;;  %v20184_v2 = vld [vmem:[#allocation30_spill] sm:$0xff] }
 0x2cb   :  { %10585 = vmatprep.subr.mxu1 %v6210_v1  ;;  %v5952_v42 = vand.u32 4294901760, %v5951_v7  ;;  %5947 = vmatprep.mubr.f32.mxu0 %v5946_v0  ;;  %v5966_v14 = vsub.f32 %v15951_v23, %v18729_v10  ;;  %v10125_v56 = vadd.f32 %v10124_v22, %v10123_v45  ;;  %v5961_v1 = vand.u32 4294901760, %v5960_v3  ;;  %v10126_v0 = vpop.f32.mrf.mxu1  ;;  %v20185_v45 = vld [vmem:[#allocation38_spill] sm:$0xff] }
 0x2cc   :  { %20180 = vst [vmem:[#allocation72_spill] sm:$0xff] %v15981_v60  ;;  %10586 = vmatpush3.msra.mxu1 %v6098_v40  ;;  %6213 = vmatprep.mubr.f32.mxu1 %v20181_v32  ;;  %v4247_v53 = vadd.f32 %v10084_v57, %v20182_v21  ;;  %v18734_v29 = vand.u32 4294901760, %v15981_v60  ;;  %v20186_v40 = vld [vmem:[#allocation52_spill] sm:$0xff]  ;;  %v5975_v57 = vsub.f32 %v15971_v12, %v18730_v4  ;;  %v20187_v3 = vld [vmem:[#allocation26_spill] sm:$0xff]  ;;  %v20194_v32 = vld [vmem:[#allocation29_spill] sm:$0xff] }
 0x2cd   :  { %10609 = vmatpush3.msra.mxu0 %v20183_v50  ;;  %6215 = vmatmul.mubr.f32.vlgmr.msra.gmra.mxu1 %v15731_v8  ;;  %v15995_v7 = vadd.f32 %v10125_v56, %v15940_v54  ;;  %v5967_v20 = vand.u32 4294901760, %v5966_v14  ;;  %v10127_v22 = vpop.f32.mrf.mxu1  ;;  %v20188_v21 = vld [vmem:[#allocation34_spill] sm:$0xff]  ;;  %v20189_v56 = vld [vmem:[#allocation43_spill] sm:$0xff] }
 0x2ce   :  { %5953 = vmatmul.mubr.f32.gmra.mxu0 %v5952_v42  ;;  %10610 = vmatprep.subr.mxu0 %v20184_v2  ;;  %v10128_v54 = vadd.f32 %v10127_v22, %v10126_v0  ;;  %v5981_v42 = vsub.f32 %v15981_v60, %v18734_v29  ;;  %v20190_v14 = vld [vmem:[#allocation11_spill] sm:$0xff]  ;;  %v5976_v8 = vand.u32 4294901760, %v5975_v57  ;;  %v20192_v0 = vld [vmem:[#allocation58_spill] sm:$0xff]  ;;  %v20198_v57 = vld [vmem:[#allocation13_spill] sm:$0xff] }
 0x2cf   :  { %10649 = vmatprep.subr.mxu1 %v20185_v45  ;;  %10611 = vmatpush3.msra.mxu0 %v20186_v40  ;;  %v20193_v22 = vld [vmem:[#allocation55_spill] sm:$0xff] }
 0x2d0   :  { %10650 = vmatpush3.msra.mxu1 %v20187_v3  ;;  %10612 = vmatprep.subr.mxu0 %v20188_v21  ;;  %v16011_v10 = vadd.f32 %v10128_v54, %v4238_v31  ;;  %v10129_v4 = vpop.f32.mrf.mxu1  ;;  %v5982_v29 = vand.u32 4294901760, %v5981_v42  ;;  %v20195_v60 = vld [vmem:[#allocation23_spill] sm:$0xff]  ;;  %v20197_v54 = vld [vmem:[#allocation40_spill] sm:$0xff] }
 0x2d1   :  { %10651 = vmatprep.subr.mxu1 %v20189_v56  ;;  %5962 = vmatprep.mubr.f32.mxu0 %v5961_v1  ;;  %v20196_v31 = vld [vmem:[#allocation47_spill] sm:$0xff]  ;;  %v20200_v42 = vld [vmem:[#allocation60_spill] sm:$0xff] }
 0x2d2   :  { %6220 = vmatprep.mubr.f32.mxu1 %v15769_v9  ;;  %10613 = vmatpush3.msra.mxu0 %v20190_v14  ;;  %v10130_v1 = vpop.f32.mrf.mxu1 }
 0x2d3   :  { %10652 = vmatpush3.msra.mxu1 %v20191_v6  ;;  %5968 = vmatmul.mubr.f32.gmra.mxu0 %v5967_v20  ;;  %v10131_v9 = vadd.f32 %v10130_v1, %v10129_v4  ;;  %v20201_v4 = vld [vmem:[#allocation17_spill] sm:$0xff]  ;;  %v20202_v1 = vld [vmem:[#allocation51_spill] sm:$0xff] }
 0x2d4   :  { %6222 = vmatmul.mubr.f32.gmra.mxu1 %v15790_v47  ;;  %10614 = vmatprep.subr.mxu0 %v20192_v0  ;;  %v20199_v47 = vld [vmem:[#allocation16_spill] sm:$0xff] }
 0x2d5   :  { %10653 = vmatprep.subr.mxu1 %v20193_v22  ;;  %10615 = vmatpush3.msra.mxu0 %v20194_v32  ;;  %v16021_v20 = vadd.f32 %v10131_v9, %v4247_v53  ;;  %v20204_v9 = vld [vmem:[#allocation59_spill] sm:$0xff] }
 0x2d6   :  { %10654 = vmatpush3.msra.mxu1 %v20195_v60  ;;  %10616 = vmatprep.subr.mxu0 %v20196_v31 }
 0x2d7   :  { %10655 = vmatprep.subr.mxu1 %v20197_v54  ;;  %5977 = vmatprep.mubr.f32.mxu0 %v5976_v8  ;;  %v20203_v54 = vld [vmem:[#allocation36_spill] sm:$0xff]  ;;  %v20205_v8 = vld [vmem:[#allocation49_spill] sm:$0xff] }
 0x2d8   :  { %6227 = vmatprep.mubr.f32.mxu1 %v15831_v17  ;;  %10617 = vmatpush3.msra.mxu0 %v20198_v57  ;;  %v20206_v17 = vld [vmem:[#allocation39_spill] sm:$0xff] }
 0x2d9   :  { %10656 = vmatpush3.msra.mxu1 %v20199_v47  ;;  %5983 = vmatmul.mubr.f32.gmra.mxu0 %v5982_v29  ;;  %v10164_v12 = vpop.f32.mrf.mxu0  ;;  %v20207_v29 = vld [vmem:[#allocation41_spill] sm:$0xff] }
 0x2da   :  { %6229 = vmatmul.mubr.f32.gmra.mxu1 %v15867_v34  ;;  %10618 = vmatprep.subr.mxu0 %v20200_v42  ;;  %v20210_v42 = vld [vmem:[#allocation77_spill] sm:$0xff] }
 0x2db   :  { %10657 = vmatprep.subr.mxu1 %v20201_v4  ;;  %10619 = vmatpush3.msra.mxu0 %v20202_v1  ;;  %v10165_v53 = vpop.f32.mrf.mxu0  ;;  %v20208_v4 = vld [vmem:[#allocation76_spill] sm:$0xff]  ;;  %v20209_v1 = vld [vmem:[#allocation14_spill] sm:$0xff] }
 0x2dc   :  { %10658 = vmatpush3.msra.mxu1 %v20203_v54  ;;  %10620 = vmatprep.subr.mxu0 %v20204_v9  ;;  %v10166_v34 = vadd.f32 %v10165_v53, %v10164_v12  ;;  %v20213_v53 = vld [vmem:[#allocation18_spill] sm:$0xff] }
 0x2dd   :  { %10659 = vmatprep.subr.mxu1 %v20205_v8  ;;  %6234 = vmatprep.mubr.f32.mxu1 %v15901_v59  ;;  %v20211_v8 = vld [vmem:[#allocation31_spill] sm:$0xff]  ;;  %v20212_v59 = vld [vmem:[#allocation33_spill] sm:$0xff] }
 0x2de   :  { %10621 = vmatpush3.msra.mxu0 %v20206_v17  ;;  %10660 = vmatpush3.msra.mxu1 %v20207_v29  ;;  %v4567_v9 = vadd.f32 %v10166_v34, %v15930_v5  ;;  %v10167_v54 = vpop.f32.mrf.mxu0  ;;  %v20214_v34 = vld [vmem:[#allocation64_spill] sm:$0xff] }
 0x2df   :  { %6236 = vmatmul.mubr.f32.gmra.mxu1 %v15917_v44  ;;  %10622 = vmatprep.subr.mxu0 %v20208_v4 }
 0x2e0   :  { %10661 = vmatprep.subr.mxu1 %v20209_v1  ;;  %10623 = vmatpush3.msra.mxu0 %v20210_v42  ;;  %v10168_v12 = vpop.f32.mrf.mxu0 }
 0x2e1   :  { %10662 = vmatpush3.msra.mxu1 %v20211_v8  ;;  %10624 = vmatprep.subr.mxu0 %v15708_v28  ;;  %v10169_v44 = vadd.f32 %v10168_v12, %v10167_v54 }
 0x2e2   :  { %10663 = vmatprep.subr.mxu1 %v20212_v59  ;;  %6241 = vmatprep.mubr.f32.mxu1 %v15953_v51  ;;  %v20215_v59 = vld [vmem:[#allocation46_spill] sm:$0xff] }
 0x2e3   :  { %10625 = vmatpush3.msra.mxu0 %v15702_v46  ;;  %10664 = vmatpush3.msra.mxu1 %v20213_v53  ;;  %v4574_v5 = vadd.f32 %v10169_v44, %v15974_v26  ;;  %v10211_v28 = vpop.f32.mrf.mxu1  ;;  %v20216_v46 = vld [vmem:[#allocation61_spill] sm:$0xff] }
 0x2e4   :  { %6243 = vmatmul.mubr.f32.gmra.mxu1 %v15961_v27  ;;  %10626 = vmatprep.subr.mxu0 %v15755_v61  ;;  %v10170_v51 = vpop.f32.mrf.mxu0 }
 0x2e5   :  { %10665 = vmatprep.subr.mxu1 %v20214_v34  ;;  %10627 = vmatpush3.msra.mxu0 %v15724_v30  ;;  %v10212_v54 = vpop.f32.mrf.mxu1 }
 0x2e6   :  { %10666 = vmatpush3.msra.mxu1 %v20215_v59  ;;  %10628 = vmatprep.subr.mxu0 %v15788_v39  ;;  %v10171_v12 = vpop.f32.mrf.mxu0  ;;  %v10213_v27 = vadd.f32 %v10212_v54, %v10211_v28  ;;  %v20218_v28 = vld [vmem:[#allocation20_spill] sm:$0xff] }
 0x2e7   :  { %10667 = vmatprep.subr.mxu1 %v20216_v46  ;;  %10629 = vmatpush3.msra.mxu0 %v15761_v63  ;;  %v10172_v44 = vadd.f32 %v10171_v12, %v10170_v51  ;;  %v20217_v63 = vld [vmem:[#allocation48_spill] sm:$0xff] }
 0x2e8   :  { %10668 = vmatpush3.msra.mxu1 %v15548_v13  ;;  %10630 = vmatprep.subr.mxu0 %v15847_v19  ;;  %v16062_v26 = vadd.f32 %v10213_v27, %v4567_v9  ;;  %v20220_v51 = vld [vmem:[#allocation24_spill] sm:$0xff]  ;;  %v20221_v27 = vand.u32 4294901760, %v15344_v38  ;;  %v20222_v9 = vld [vmem:[#allocation21_spill] sm:$0xff]  ;;  %v20227_v38 = vand.u32 4294901760, %v15376_v52 }
 0x2e9   :  { %10669 = vmatprep.subr.mxu1 %v15605_v49  ;;  %10631 = vmatpush3.msra.mxu0 %v15796_v58  ;;  %v4581_v13 = vadd.f32 %v10172_v44, %v15995_v7  ;;  %v10173_v19 = vpop.f32.mrf.mxu0  ;;  %v20219_v58 = vld [vmem:[#allocation45_spill] sm:$0xff]  ;;  %v20223_v7 = vand.u32 4294901760, %v15341_v24  ;;  %v20228_v24 = vld [vmem:[#allocation54_spill] sm:$0xff] }
 0x2ea   :  { %10670 = vmatpush3.msra.mxu1 %v15620_v16  ;;  %10632 = vmatprep.subr.mxu0 %v15865_v55  ;;  %v10214_v54 = vpop.f32.mrf.mxu1  ;;  %v20224_v44 = vld [vmem:[#allocation57_spill] sm:$0xff]  ;;  %v20226_v16 = vld [vmem:[#allocation22_spill] sm:$0xff] }
 0x2eb   :  { %10671 = vmatprep.subr.mxu1 %v15647_v11  ;;  %10633 = vmatpush3.msra.mxu0 %v15823_v36  ;;  %v10174_v12 = vpop.f32.mrf.mxu0 }
 0x2ec   :  { %6378 = vmatprep.mubr.f32.mxu0 %v20217_v63  ;;  %10672 = vmatpush3.msra.mxu1 %v20218_v28  ;;  %v10175_v11 = vadd.f32 %v10174_v12, %v10173_v19  ;;  %v10215_v36 = vpop.f32.mrf.mxu1  ;;  %v20225_v28 = vand.u32 4294901760, %v15347_v25  ;;  %v20229_v25 = vand.u32 4294901760, %v15382_v48  ;;  %v20234_v48 = vand.u32 4294901760, %v20217_v63 }
 0x2ed   :  { %6381 = vmatmul.mubr.f32.vlgmr.msra.gmra.mxu0 %v20219_v58  ;;  %10673 = vmatprep.subr.mxu1 %v20220_v51  ;;  %v10216_v55 = vadd.f32 %v10215_v36, %v10214_v54  ;;  %v20238_v63 = vand.u32 4294901760, %v20186_v40 }
 0x2ee   :  { %10696 = vmatprep.subr.mxu0 %v20221_v27  ;;  %10674 = vmatpush3.msra.mxu1 %v20222_v9  ;;  %v4588_v51 = vadd.f32 %v10175_v11, %v16011_v10  ;;  %v20230_v11 = vand.u32 4294901760, %v15379_v33  ;;  %v20231_v10 = vand.u32 4294901760, %v15437_v43  ;;  %v20233_v27 = vld [vmem:[#allocation68_spill] sm:$0xff]  ;;  %v20235_v33 = vand.u32 4294901760, %v20183_v50 }
 0x2ef   :  { %10697 = vmatpush3.msra.mxu0 %v20223_v7  ;;  %10675 = vmatprep.subr.mxu1 %v20224_v44  ;;  %v16084_v19 = vadd.f32 %v10216_v55, %v4574_v5  ;;  %v10176_v12 = vpop.f32.mrf.mxu0  ;;  %v20232_v5 = vld [vmem:[#allocation25_spill] sm:$0xff]  ;;  %v20239_v50 = vand.u32 4294901760, %v20188_v21  ;;  %v20243_v21 = vand.u32 4294901760, %v20192_v0 }
 0x2f0   :  { %10698 = vmatprep.subr.mxu0 %v20225_v28  ;;  %6387 = vmatprep.mubr.f32.mxu0 %v15814_v15  ;;  %v20248_v0 = vand.u32 4294901760, %v20232_v5 }
 0x2f1   :  { %10676 = vmatpush3.msra.mxu1 %v20226_v16  ;;  %10699 = vmatpush3.msra.mxu0 %v20227_v38  ;;  %v10217_v36 = vpop.f32.mrf.mxu1  ;;  %v10177_v28 = vpop.f32.mrf.mxu0  ;;  %v20236_v38 = vand.u32 4294901760, %v20219_v58 }
 0x2f2   :  { %6390 = vmatmul.mubr.f32.gmra.mxu0 %v15843_v35  ;;  %10677 = vmatprep.subr.mxu1 %v20228_v24  ;;  %v10178_v52 = vadd.f32 %v10177_v28, %v10176_v12  ;;  %v330_v28 = vld [vmem:[#allocation5 + $0x678] sm:$0xff] }
 0x2f3   :  { %10700 = vmatprep.subr.mxu0 %v20229_v25  ;;  %10678 = vmatpush3.msra.mxu1 %v15751_v18  ;;  %v10218_v55 = vpop.f32.mrf.mxu1  ;;  %v20247_v25 = vld [vmem:[#allocation71_spill] sm:$0xff] }
 0x2f4   :  { %10701 = vmatpush3.msra.mxu0 %v20230_v11  ;;  %10679 = vmatprep.subr.mxu1 %v15775_v41  ;;  %v10219_v54 = vadd.f32 %v10218_v55, %v10217_v36  ;;  %v4595_v7 = vadd.f32 %v10178_v52, %v16021_v20  ;;  %v20237_v36 = vand.u32 4294901760, %v20184_v2  ;;  %v20241_v2 = vand.u32 4294901760, %v20190_v14  ;;  %v345_v11 = vld [vmem:[#allocation5 + $0x6f0] sm:$0xff] }
 0x2f5   :  { %10702 = vmatprep.subr.mxu0 %v20231_v10  ;;  %6396 = vmatprep.mubr.f32.mxu0 %v20232_v5  ;;  %v20252_v52 = vld [vmem:[#allocation60_spill] sm:$0xff]  ;;  %v20254_v10 = vld [vmem:[#allocation17_spill] sm:$0xff]  ;;  %v20255_v5 = vld [vmem:[#allocation51_spill] sm:$0xff] }
 0x2f6   :  { %10680 = vmatpush3.msra.mxu1 %v20233_v27  ;;  %6521 = vmatprep.mubr.f32.mxu1 %v20234_v48  ;;  %v16105_v12 = vadd.f32 %v10219_v54, %v4581_v13  ;;  %v10220_v43 = vpop.f32.mrf.mxu1  ;;  %v20240_v13 = vand.u32 4294901760, %v15814_v15  ;;  %v20244_v15 = vand.u32 4294901760, %v20194_v32  ;;  %v346_v32 = vld [vmem:[#allocation5 + $0x6f8] sm:$0xff]  ;;  %v20253_v55 = vand.u32 4294901760, %v20252_v52 }
 0x2f7   :  { %10703 = vmatpush3.msra.mxu0 %v20235_v33  ;;  %6525 = vmatmul.mubr.f32.vlgmr.msra.gmra.mxu1 %v20236_v38  ;;  %v20256_v54 = vand.u32 4294901760, %v20255_v5  ;;  %v16155_v48 = vand.u32 4294901760, %v330_v28  ;;  %v20260_v33 = vld [vmem:[#allocation36_spill] sm:$0xff]  ;;  %v20261_v38 = vld [vmem:[#allocation59_spill] sm:$0xff] }
 0x2f8   :  { %6399 = vmatmul.mubr.f32.gmra.mxu0 %v15911_v62  ;;  %10704 = vmatprep.subr.mxu0 %v20237_v36  ;;  %v10221_v20 = vpop.f32.mrf.mxu1  ;;  %v20264_v36 = vand.u32 4294901760, %v15937_v37 }
 0x2f9   :  { %10743 = vmatprep.subr.mxu1 %v20185_v45  ;;  %10705 = vmatpush3.msra.mxu0 %v20238_v63  ;;  %v10222_v58 = vadd.f32 %v10221_v20, %v10220_v43  ;;  %20258 = vst [vmem:[#allocation73_spill] sm:$0xff] %v16155_v48  ;;  %v20263_v43 = vld [vmem:[#allocation49_spill] sm:$0xff]  ;;  %v329_v63 = vld [vmem:[#allocation5 + $0x670] sm:$0xff]  ;;  %v344_v20 = vld [vmem:[#allocation5 + $0x6e8] sm:$0xff] }
 0x2fa   :  { %10744 = vmatpush3.msra.mxu1 %v20187_v3  ;;  %10706 = vmatprep.subr.mxu0 %v20239_v50  ;;  %v20242_v3 = vand.u32 4294901760, %v15843_v35  ;;  %v328_v50 = vld [vmem:[#allocation5 + $0x668] sm:$0xff] }
 0x2fb   :  { %10745 = vmatprep.subr.mxu1 %v20189_v56  ;;  %6405 = vmatprep.mubr.f32.mxu0 %v15937_v37  ;;  %v16122_v45 = vadd.f32 %v10222_v58, %v4588_v51  ;;  %v10223_v40 = vpop.f32.mrf.mxu1  ;;  %v20245_v51 = vand.u32 4294901760, %v20196_v31  ;;  %v20251_v31 = vand.u32 4294901760, %v15911_v62  ;;  %v20262_v62 = vand.u32 4294901760, %v20261_v38 }
 0x2fc   :  { %6532 = vmatprep.mubr.f32.mxu1 %v20240_v13  ;;  %10707 = vmatpush3.msra.mxu0 %v20241_v2  ;;  %v20265_v13 = vand.u32 4294901760, %v20206_v17  ;;  %v20268_v17 = vand.u32 4294901760, %v20210_v42 }
 0x2fd   :  { %10746 = vmatpush3.msra.mxu1 %v20191_v6  ;;  %6408 = vmatmul.mubr.f32.gmra.mxu0 %v15951_v23  ;;  %v10224_v56 = vpop.f32.mrf.mxu1  ;;  %v20246_v6 = vld [vmem:[#allocation40_spill] sm:$0xff] }
 0x2fe   :  { %6536 = vmatmul.mubr.f32.gmra.mxu1 %v20242_v3  ;;  %10708 = vmatprep.subr.mxu0 %v20243_v21  ;;  %v10225_v14 = vadd.f32 %v10224_v56, %v10223_v40  ;;  %v20266_v40 = vand.u32 4294901760, %v15951_v23  ;;  %v20267_v3 = vand.u32 4294901760, %v20208_v4  ;;  %v16173_v21 = vsub.f32 %v330_v28, %v16155_v48  ;;  %v343_v28 = vld [vmem:[#allocation5 + $0x6e0] sm:$0xff] }
 0x2ff   :  { %10747 = vmatprep.subr.mxu1 %v20193_v22  ;;  %10709 = vmatpush3.msra.mxu0 %v20244_v15  ;;  %v20249_v22 = vand.u32 4294901760, %v20198_v57  ;;  %v16153_v57 = vand.u32 4294901760, %v346_v32  ;;  %v16186_v23 = vand.u32 4294901760, %v344_v20  ;;  %v16188_v4 = vand.u32 4294901760, %v328_v50 }
 0x300   :  { %10748 = vmatpush3.msra.mxu1 %v20195_v60  ;;  %10710 = vmatprep.subr.mxu0 %v20245_v51  ;;  %v16138_v35 = vadd.f32 %v10225_v14, %v4595_v7  ;;  %v20250_v60 = vld [vmem:[#allocation72_spill] sm:$0xff]  ;;  %v16157_v7 = vand.u32 4294901760, %v345_v11  ;;  %v20272_v51 = vld [vmem:[#allocation65_spill] sm:$0xff] }
 0x301   :  { %10749 = vmatprep.subr.mxu1 %v20246_v6  ;;  %6414 = vmatprep.mubr.f32.mxu0 %v20247_v25  ;;  %20257 = vst [vmem:[#allocation35_spill] sm:$0xff] %v16153_v57  ;;  %v16176_v37 = vsub.f32 %v346_v32, %v16153_v57  ;;  %20270 = vst [vmem:[#allocation52_spill] sm:$0xff] %v16186_v23  ;;  %v20273_v6 = vand.u32 4294901760, %v20272_v51  ;;  %v16214_v5 = vsub.f32 %v344_v20, %v16186_v23  ;;  %v20286_v20 = vld [vmem:[#allocation50_spill] sm:$0xff]  ;;  %v20289_v51 = vld [vmem:[#allocation19_spill] sm:$0xff] }
 0x302   :  { %6543 = vmatprep.mubr.f32.mxu1 %v20248_v0  ;;  %10711 = vmatpush3.msra.mxu0 %v20249_v22  ;;  %20259 = vst [vmem:[#allocation30_spill] sm:$0xff] %v16157_v7  ;;  %v16179_v56 = vsub.f32 %v345_v11, %v16157_v7  ;;  %20271 = vst [vmem:[#allocation26_spill] sm:$0xff] %v16188_v4  ;;  %v20274_v0 = vld [vmem:[#allocation33_spill] sm:$0xff]  ;;  %v20276_v22 = vld [vmem:[#allocation44_spill] sm:$0xff] }
 0x303   :  { %10750 = vmatpush3.msra.mxu1 %v20199_v47  ;;  %6417 = vmatmul.mubr.f32.gmra.mxu0 %v20250_v60  ;;  %v10258_v47 = vpop.f32.mrf.mxu0  ;;  %v20277_v32 = vand.u32 4294901760, %v20276_v22  ;;  %v327_v11 = vld [vmem:[#allocation5 + $0x660] sm:$0xff] }
 0x304   :  { %6547 = vmatmul.mubr.f32.gmra.mxu1 %v20251_v31  ;;  %10712 = vmatprep.subr.mxu0 %v20253_v55  ;;  %v18768_v31 = vand.u32 4294901760, %v16179_v56  ;;  %v20278_v55 = vand.u32 4294901760, %v20250_v60  ;;  %v16227_v38 = vand.u32 4294901760, %v327_v11  ;;  %v20293_v22 = vld [vmem:[#allocation62_spill] sm:$0xff] }
 0x305   :  { %10751 = vmatprep.subr.mxu1 %v20254_v10  ;;  %10713 = vmatpush3.msra.mxu0 %v20256_v54  ;;  %v10259_v58 = vpop.f32.mrf.mxu0  ;;  %v20280_v54 = vand.u32 4294901760, %v15724_v30  ;;  %v20284_v30 = vld [vmem:[#allocation12_spill] sm:$0xff] }
 0x306   :  { %10752 = vmatpush3.msra.mxu1 %v20260_v33  ;;  %10714 = vmatprep.subr.mxu0 %v20262_v62  ;;  %v10260_v2 = vadd.f32 %v10259_v58, %v10258_v47  ;;  %v16225_v33 = vand.u32 4294901760, %v343_v28  ;;  %20283 = vst [vmem:[#allocation43_spill] sm:$0xff] %v16227_v38  ;;  %v342_v62 = vld [vmem:[#allocation5 + $0x6d8] sm:$0xff] }
 0x307   :  { %10753 = vmatprep.subr.mxu1 %v20263_v43  ;;  %6554 = vmatprep.mubr.f32.mxu1 %v20264_v36  ;;  %v326_v43 = vld [vmem:[#allocation5 + $0x658] sm:$0xff] }
 0x308   :  { %10715 = vmatpush3.msra.mxu0 %v20265_v13  ;;  %10754 = vmatpush3.msra.mxu1 %v20207_v29  ;;  %v16184_v29 = vand.u32 4294901760, %v329_v63  ;;  %v4839_v15 = vadd.f32 %v10260_v2, %v16062_v26  ;;  %v10261_v14 = vpop.f32.mrf.mxu0  ;;  %v18770_v26 = vand.u32 4294901760, %v16176_v37  ;;  %20282 = vst [vmem:[#allocation34_spill] sm:$0xff] %v16225_v33  ;;  %v341_v13 = vld [vmem:[#allocation5 + $0x6d0] sm:$0xff] }
 0x309   :  { %6558 = vmatmul.mubr.f32.gmra.mxu1 %v20266_v40  ;;  %10716 = vmatprep.subr.mxu0 %v20267_v3  ;;  %v18765_v40 = vand.u32 4294901760, %v16214_v5 }
 0x30a   :  { %10755 = vmatprep.subr.mxu1 %v20209_v1  ;;  %10717 = vmatpush3.msra.mxu0 %v20268_v17  ;;  %20269 = vst [vmem:[#allocation38_spill] sm:$0xff] %v16184_v29  ;;  %v20275_v1 = vand.u32 4294901760, %v20247_v25  ;;  %v10262_v42 = vpop.f32.mrf.mxu0  ;;  %v20279_v25 = vand.u32 4294901760, %v15755_v61  ;;  %v16208_v10 = vsub.f32 %v329_v63, %v16184_v29  ;;  %v20281_v61 = vand.u32 4294901760, %v15788_v39  ;;  %v325_v63 = vld [vmem:[#allocation5 + $0x650] sm:$0xff] }
 0x30b   :  { %10756 = vmatpush3.msra.mxu1 %v20211_v8  ;;  %10718 = vmatprep.subr.mxu0 %v20273_v6  ;;  %v18769_v8 = vand.u32 4294901760, %v16173_v21  ;;  %v10263_v52 = vadd.f32 %v10262_v42, %v10261_v14  ;;  %v20290_v6 = vand.u32 4294901760, %v20289_v51  ;;  %v16294_v51 = vsub.f32 %v16214_v5, %v18765_v40 }
 0x30c   :  { %10757 = vmatprep.subr.mxu1 %v20274_v0  ;;  %6565 = vmatprep.mubr.f32.mxu1 %v20275_v1  ;;  %v18767_v2 = vand.u32 4294901760, %v16208_v10  ;;  %v16256_v0 = vand.u32 4294901760, %v342_v62  ;;  %v16258_v1 = vand.u32 4294901760, %v326_v43 }
 0x30d   :  { %10719 = vmatpush3.msra.mxu0 %v20277_v32  ;;  %10758 = vmatpush3.msra.mxu1 %v20213_v53  ;;  %v16211_v53 = vsub.f32 %v328_v50, %v16188_v4  ;;  %v16220_v60 = vadd.f32 %v10263_v52, %v16084_v19  ;;  %v16235_v19 = vsub.f32 %v16176_v37, %v18770_v26  ;;  %v20287_v50 = vld [vmem:[#allocation53_spill] sm:$0xff]  ;;  %v20294_v32 = vld [vmem:[#allocation70_spill] sm:$0xff] }
 0x30e   :  { %6569 = vmatmul.mubr.f32.gmra.mxu1 %v20278_v55  ;;  %10720 = vmatprep.subr.mxu0 %v20279_v25  ;;  %v10305_v47 = vpop.f32.mrf.mxu1  ;;  %v16240_v39 = vsub.f32 %v16173_v21, %v18769_v8  ;;  %v20288_v58 = vand.u32 4294901760, %v20287_v50  ;;  %20291 = vst [vmem:[#allocation11_spill] sm:$0xff] %v16256_v0  ;;  %20292 = vst [vmem:[#allocation32_spill] sm:$0xff] %v16258_v1  ;;  %v20295_v52 = vand.u32 4294901760, %v20294_v32  ;;  %v16266_v25 = vand.u32 4294901760, %v325_v63  ;;  %v20304_v32 = vld [vmem:[#allocation66_spill] sm:$0xff] }
 0x30f   :  { %10759 = vmatprep.subr.mxu1 %v20214_v34  ;;  %10721 = vmatpush3.msra.mxu0 %v20280_v54  ;;  %v10264_v36 = vpop.f32.mrf.mxu0  ;;  %v20285_v34 = vand.u32 4294901760, %v20284_v30  ;;  %v18766_v3 = vand.u32 4294901760, %v16211_v53  ;;  %v16264_v55 = vsub.f32 %v327_v11, %v16227_v38  ;;  %v340_v54 = vld [vmem:[#allocation5 + $0x6c8] sm:$0xff]  ;;  %v20298_v30 = vld [vmem:[#allocation74_spill] sm:$0xff]  ;;  %v16278_v11 = vand.u32 4294901760, %v341_v13  ;;  %v338_v26 = vld [vmem:[#allocation5 + $0x6b8] sm:$0xff] }
 0x310   :  { %10760 = vmatpush3.msra.mxu1 %v20215_v59  ;;  %10722 = vmatprep.subr.mxu0 %v20281_v61  ;;  %v16245_v59 = vsub.f32 %v16179_v56, %v18768_v31  ;;  %20297 = vst [vmem:[#allocation55_spill] sm:$0xff] %v16266_v25 }
 0x311   :  { %10761 = vmatprep.subr.mxu1 %v20216_v46  ;;  %10723 = vmatpush3.msra.mxu0 %v20285_v34  ;;  %v10306_v46 = vpop.f32.mrf.mxu1  ;;  %v10265_v17 = vpop.f32.mrf.mxu0  ;;  %20296 = vst [vmem:[#allocation58_spill] sm:$0xff] %v16264_v55  ;;  %20301 = vst [vmem:[#allocation29_spill] sm:$0xff] %v16278_v11 }
 0x312   :  { %10762 = vmatpush3.msra.mxu1 %v20286_v20  ;;  %10724 = vmatprep.subr.mxu0 %v20288_v58  ;;  %v10307_v14 = vadd.f32 %v10306_v46, %v10305_v47  ;;  %v10266_v42 = vadd.f32 %v10265_v17, %v10264_v36  ;;  %v16269_v47 = vsub.f32 %v343_v28, %v16225_v33  ;;  %v20299_v36 = vld [vmem:[#allocation42_spill] sm:$0xff]  ;;  %v20302_v17 = vld [vmem:[#allocation15_spill] sm:$0xff]  ;;  %v20303_v28 = vld [vmem:[#allocation20_spill] sm:$0xff] }
 0x313   :  { %10763 = vmatprep.subr.mxu1 %v15605_v49  ;;  %10725 = vmatpush3.msra.mxu0 %v20290_v6  ;;  %v324_v49 = vld [vmem:[#allocation5 + $0x648] sm:$0xff]  ;;  %v20300_v34 = vand.u32 4294901760, %v20299_v36  ;;  %v339_v6 = vld [vmem:[#allocation5 + $0x6c0] sm:$0xff]  ;;  %v16306_v36 = vand.u32 4294901760, %v340_v54  ;;  %v337_v46 = vld [vmem:[#allocation5 + $0x6b0] sm:$0xff] }
 0x314   :  { %10764 = vmatpush3.msra.mxu1 %v20293_v22  ;;  %10726 = vmatprep.subr.mxu0 %v20295_v52  ;;  %v16271_v61 = vadd.f32 %v10307_v14, %v4839_v15  ;;  %v16281_v50 = vadd.f32 %v10266_v42, %v16105_v12  ;;  %v10267_v58 = vpop.f32.mrf.mxu0  ;;  %v16289_v14 = vsub.f32 %v16208_v10, %v18767_v2  ;;  %v323_v42 = vld [vmem:[#allocation5 + $0x640] sm:$0xff]  ;;  %v20305_v52 = vld [vmem:[#allocation24_spill] sm:$0xff]  ;;  %v20314_v15 = vld [vmem:[#allocation63_spill] sm:$0xff] }
 0x315   :  { %10765 = vmatprep.subr.mxu1 %v20298_v30  ;;  %10727 = vmatpush3.msra.mxu0 %v20300_v34  ;;  %v16299_v12 = vsub.f32 %v16211_v53, %v18766_v3  ;;  %v10308_v22 = vpop.f32.mrf.mxu1  ;;  %v16304_v30 = vsub.f32 %v326_v43, %v16258_v1  ;;  %20307 = vst [vmem:[#allocation47_spill] sm:$0xff] %v16306_v36  ;;  %v16308_v34 = vand.u32 4294901760, %v324_v49  ;;  %v16324_v8 = vand.u32 4294901760, %v323_v42  ;;  %v321_v43 = vld [vmem:[#allocation5 + $0x630] sm:$0xff] }
 0x316   :  { %6735 = vmatprep.mubr.f32.mxu0 %v20302_v17  ;;  %10766 = vmatpush3.msra.mxu1 %v20303_v28  ;;  %v16311_v28 = vsub.f32 %v342_v62, %v16256_v0  ;;  %v10268_v40 = vpop.f32.mrf.mxu0  ;;  %v16316_v3 = vsub.f32 %v325_v63, %v16266_v25  ;;  %v16322_v62 = vand.u32 4294901760, %v339_v6 }
 0x317   :  { %6737 = vmatmul.mubr.f32.vlgmr.msra.gmra.mxu0 %v20304_v32  ;;  %10767 = vmatprep.subr.mxu1 %v20305_v52  ;;  %20306 = vst [vmem:[#allocation23_spill] sm:$0xff] %v16304_v30  ;;  %20308 = vst [vmem:[#allocation13_spill] sm:$0xff] %v16308_v34  ;;  %v18771_v52 = vand.u32 4294901760, %v16269_v47  ;;  %v10269_v2 = vadd.f32 %v10268_v40, %v10267_v58  ;;  %v10309_v31 = vpop.f32.mrf.mxu1  ;;  %v16344_v40 = vsub.f32 %v340_v54, %v16306_v36 }
 0x318   :  { %20309 = vst [vmem:[#allocation16_spill] sm:$0xff] %v16311_v28  ;;  %10790 = vmatprep.subr.mxu0 %v16153_v57  ;;  %10768 = vmatpush3.msra.mxu1 %v20222_v9  ;;  %20310 = vst [vmem:[#allocation39_spill] sm:$0xff] %v16316_v3  ;;  %v16327_v9 = vsub.f32 %v341_v13, %v16278_v11  ;;  %v10310_v63 = vadd.f32 %v10309_v31, %v10308_v22  ;;  %v322_v22 = vld [vmem:[#allocation5 + $0x638] sm:$0xff]  ;;  %v16361_v54 = vand.u32 4294901760, %v338_v26  ;;  %v336_v57 = vld [vmem:[#allocation5 + $0x6a8] sm:$0xff] }
 0x319   :  { %10791 = vmatpush3.msra.mxu0 %v16155_v48  ;;  %10769 = vmatprep.subr.mxu1 %v20224_v44  ;;  %20311 = vst [vmem:[#allocation41_spill] sm:$0xff] %v16322_v62  ;;  %20312 = vst [vmem:[#allocation76_spill] sm:$0xff] %v16324_v8  ;;  %v16335_v44 = vadd.f32 %v10269_v2, %v16122_v45  ;;  %v16340_v13 = vsub.f32 %v324_v49, %v16308_v34  ;;  %v20317_v2 = vld [vmem:[#allocation27_spill] sm:$0xff]  ;;  %v20318_v49 = vand.u32 4294901760, %v16264_v55 }
 0x31a   :  { %20313 = vst [vmem:[#allocation14_spill] sm:$0xff] %v16327_v9  ;;  %10792 = vmatprep.subr.mxu0 %v16157_v7  ;;  %6742 = vmatprep.mubr.f32.mxu0 %v20314_v15  ;;  %20316 = vst [vmem:[#allocation31_spill] sm:$0xff] %v16344_v40  ;;  %v16347_v20 = vadd.f32 %v10310_v63, %v16220_v60  ;;  %v10270_v45 = vpop.f32.mrf.mxu0  ;;  %v16376_v60 = vand.u32 4294901760, %v322_v22 }
 0x31b   :  { %10770 = vmatpush3.msra.mxu1 %v20226_v16  ;;  %10793 = vmatpush3.msra.mxu0 %v16184_v29  ;;  %20315 = vst [vmem:[#allocation77_spill] sm:$0xff] %v16340_v13  ;;  %v16354_v16 = vsub.f32 %v16269_v47, %v18771_v52  ;;  %v16359_v58 = vsub.f32 %v16264_v55, %v20318_v49  ;;  %20319 = vst [vmem:[#allocation18_spill] sm:$0xff] %v16361_v54  ;;  %v10311_v63 = vpop.f32.mrf.mxu1  ;;  %v20325_v52 = vld [vmem:[#allocation75_spill] sm:$0xff]  ;;  %v71_v55 = vld [vmem:[#allocation2 + $0xe0] sm:$0xff] }
 0x31c   :  { %6744 = vmatmul.mubr.f32.gmra.mxu0 %v20317_v2  ;;  %10771 = vmatprep.subr.mxu1 %v20228_v24  ;;  %v16367_v24 = vsub.f32 %v323_v42, %v16324_v8  ;;  %v16372_v29 = vsub.f32 %v339_v6, %v16322_v62  ;;  %v10271_v49 = vpop.f32.mrf.mxu0  ;;  %20322 = vst [vmem:[#allocation61_spill] sm:$0xff] %v16376_v60  ;;  %v20326_v6 = vand.u32 4294901760, %v16311_v28 }
 0x31d   :  { %10794 = vmatprep.subr.mxu0 %v16186_v23  ;;  %10772 = vmatpush3.msra.mxu1 %v15751_v18  ;;  %v16378_v23 = vand.u32 4294901760, %v337_v46  ;;  %v16380_v18 = vand.u32 4294901760, %v321_v43  ;;  %v10272_v42 = vadd.f32 %v10271_v49, %v10270_v45  ;;  %v10312_v7 = vpop.f32.mrf.mxu1  ;;  %v20327_v49 = vand.u32 4294901760, %v16304_v30  ;;  %v20331_v45 = vld [vmem:[#allocation56_spill] sm:$0xff] }
 0x31e   :  { %20320 = vst [vmem:[#allocation64_spill] sm:$0xff] %v16367_v24  ;;  %20321 = vst [vmem:[#allocation46_spill] sm:$0xff] %v16372_v29  ;;  %10795 = vmatpush3.msra.mxu0 %v16188_v4  ;;  %10773 = vmatprep.subr.mxu1 %v15775_v41  ;;  %v16387_v31 = vsub.f32 %v16311_v28, %v20326_v6  ;;  %v10313_v48 = vadd.f32 %v10312_v7, %v10311_v63 }
 0x31f   :  { %20323 = vst [vmem:[#allocation48_spill] sm:$0xff] %v16378_v23  ;;  %20324 = vst [vmem:[#allocation45_spill] sm:$0xff] %v16380_v18  ;;  %10796 = vmatprep.subr.mxu0 %v16225_v33  ;;  %6749 = vmatprep.mubr.f32.mxu0 %v20325_v52  ;;  %v16397_v33 = vsub.f32 %v16304_v30, %v20327_v49  ;;  %v16400_v6 = vsub.f32 %v338_v26, %v16361_v54  ;;  %v320_v49 = vld [vmem:[#allocation5 + $0x628] sm:$0xff]  ;;  %v20335_v26 = vand.u32 4294901760, %v16235_v19 }
 0x320   :  { %10774 = vmatpush3.msra.mxu1 %v20233_v27  ;;  %6867 = vmatprep.mubr.f32.mxu1 %v20302_v17  ;;  %v16403_v4 = vadd.f32 %v10272_v42, %v16138_v35  ;;  %v20329_v27 = vand.u32 4294901760, %v16327_v9  ;;  %v20330_v17 = vand.u32 4294901760, %v16316_v3  ;;  %v16419_v35 = vadd.f32 %v10313_v48, %v16281_v50  ;;  %v10314_v42 = vpop.f32.mrf.mxu1  ;;  %v335_v48 = vld [vmem:[#allocation5 + $0x6a0] sm:$0xff] }
 0x321   :  { %20328 = vst [vmem:[#allocation21_spill] sm:$0xff] %v16400_v6  ;;  %10797 = vmatpush3.msra.mxu0 %v16227_v38  ;;  %6869 = vmatmul.mubr.f32.vlgmr.msra.gmra.mxu1 %v20304_v32  ;;  %v16428_v41 = vsub.f32 %v321_v43, %v16380_v18  ;;  %v16437_v50 = vand.u32 4294901760, %v336_v57  ;;  %v20336_v32 = vand.u32 4294901760, %v16344_v40  ;;  %v20337_v43 = vand.u32 4294901760, %v16340_v13 }
 0x322   :  { %v16410_v7 = vsub.f32 %v16327_v9, %v20329_v27  ;;  %v16415_v63 = vsub.f32 %v16316_v3, %v20330_v17  ;;  %6751 = vmatmul.mubr.f32.gmra.mxu0 %v20331_v45  ;;  %10798 = vmatprep.subr.mxu0 %v16256_v0  ;;  %v16425_v27 = vsub.f32 %v322_v22, %v16376_v60  ;;  %v20338_v19 = vand.u32 4294901760, %v16240_v39 }
 0x323   :  { %20333 = vst [vmem:[#allocation22_spill] sm:$0xff] %v16428_v41  ;;  %v16431_v17 = vsub.f32 %v337_v46, %v16378_v23  ;;  %10837 = vmatprep.subr.mxu1 %v20335_v26  ;;  %10799 = vmatpush3.msra.mxu0 %v16258_v1  ;;  %v16442_v22 = vsub.f32 %v16344_v40, %v20336_v32  ;;  %v10315_v46 = vpop.f32.mrf.mxu1  ;;  %v16452_v26 = vand.u32 4294901760, %v320_v49  ;;  %v319_v1 = vld [vmem:[#allocation5 + $0x620] sm:$0xff]  ;;  %v20340_v3 = vand.u32 4294901760, %v16245_v59  ;;  %v334_v59 = vld [vmem:[#allocation5 + $0x698] sm:$0xff] }
 0x324   :  { %20332 = vst [vmem:[#allocation57_spill] sm:$0xff] %v16425_v27  ;;  %v16447_v0 = vsub.f32 %v16340_v13, %v20337_v43  ;;  %10838 = vmatpush3.msra.mxu1 %v20338_v19  ;;  %10800 = vmatprep.subr.mxu0 %v16278_v11  ;;  %v10316_v40 = vadd.f32 %v10315_v46, %v10314_v42  ;;  %v20341_v43 = vld [vmem:[#allocation28_spill] sm:$0xff]  ;;  %v20342_v11 = vand.u32 4294901760, %v16372_v29  ;;  %v318_v42 = vld [vmem:[#allocation5 + $0x618] sm:$0xff]  ;;  %v56_v13 = vld [vmem:[#allocation2 + $0x68] sm:$0xff]  ;;  %v20343_v32 = vand.u32 4294901760, %v16289_v14 }
 0x325   :  { %20334 = vst [vmem:[#allocation54_spill] sm:$0xff] %v16431_v17  ;;  %20339 = vst [vmem:[#allocation25_spill] sm:$0xff] %v16452_v26  ;;  %10839 = vmatprep.subr.mxu1 %v20340_v3  ;;  %6756 = vmatprep.mubr.f32.mxu0 %v20341_v43  ;;  %v10317_v19 = vpop.f32.mrf.mxu1  ;;  %v16479_v38 = vand.u32 4294901760, %v335_v48  ;;  %v16484_v3 = vsub.f32 %v336_v57, %v16437_v50  ;;  %v317_v14 = vld [vmem:[#allocation5 + $0x610] sm:$0xff]  ;;  %v20365_v30 = vand.u32 4294901760, %v16359_v58  ;;  %v20371_v28 = vand.u32 4294901760, %v16387_v31 }
 0x326   :  { %v16465_v9 = vsub.f32 %v16372_v29, %v20342_v11  ;;  %6874 = vmatprep.mubr.f32.mxu1 %v20314_v15  ;;  %10801 = vmatpush3.msra.mxu0 %v16266_v25  ;;  %v16473_v39 = vadd.f32 %v10316_v40, %v16335_v44  ;;  %v20344_v11 = vld [vmem:[#allocation37_spill] sm:$0xff]  ;;  %v16481_v25 = vand.u32 4294901760, %v319_v1  ;;  %v16489_v40 = vsub.f32 %v320_v49, %v16452_v26 }
 0x327   :  { %10840 = vmatpush3.msra.mxu1 %v20343_v32  ;;  %6758 = vmatmul.mubr.f32.gmra.mxu0 %v20344_v11  ;;  %20345 = vst [vmem:[#allocation68_spill] sm:$0xff] %v16479_v38  ;;  %20347 = vst [vmem:[#allocation71_spill] sm:$0xff] %v16484_v3  ;;  %v20349_v44 = vand.u32 4294901760, %v16367_v24  ;;  %v20350_v15 = vand.u32 4294901760, %v16400_v6  ;;  %v10318_v57 = vpop.f32.mrf.mxu1  ;;  %v16508_v29 = vand.u32 4294901760, %v56_v13  ;;  %v20357_v49 = vand.u32 4294901760, %v16431_v17 }
 0x328   :  { %20346 = vst [vmem:[#allocation40_spill] sm:$0xff] %v16481_v25  ;;  %6876 = vmatmul.mubr.f32.gmra.mxu1 %v20317_v2  ;;  %10802 = vmatprep.subr.mxu0 %v16306_v36  ;;  %20348 = vst [vmem:[#allocation72_spill] sm:$0xff] %v16489_v40  ;;  %v20351_v2 = vand.u32 4294901760, %v16294_v51  ;;  %v16506_v36 = vand.u32 4294901760, %v318_v42  ;;  %v20356_v51 = vand.u32 4294901760, %v16425_v27  ;;  %v20375_v31 = vand.u32 4294901760, %v16489_v40 }
 0x329   :  { %v16495_v32 = vsub.f32 %v16367_v24, %v20349_v44  ;;  %v16500_v46 = vsub.f32 %v16400_v6, %v20350_v15  ;;  %10803 = vmatpush3.msra.mxu0 %v16308_v34  ;;  %20353 = vst [vmem:[#allocation17_spill] sm:$0xff] %v16508_v29  ;;  %v10319_v44 = vadd.f32 %v10318_v57, %v10317_v19  ;;  %v20354_v24 = vand.u32 4294901760, %v16299_v12  ;;  %v333_v34 = vld [vmem:[#allocation5 + $0x690] sm:$0xff] }
 0x32a   :  { %10841 = vmatprep.subr.mxu1 %v20351_v2  ;;  %20352 = vst [vmem:[#allocation60_spill] sm:$0xff] %v16506_v36  ;;  %10804 = vmatprep.subr.mxu0 %v16322_v62  ;;  %v16513_v15 = vand.u32 4294901760, %v334_v59  ;;  %v16518_v2 = vsub.f32 %v16425_v27, %v20356_v51  ;;  %v16523_v6 = vsub.f32 %v16431_v17, %v20357_v49  ;;  %v20358_v19 = vand.u32 4294901760, %v16428_v41  ;;  %v20360_v62 = vld [vmem:[#allocation67_spill] sm:$0xff] }
 0x32b   :  { %10842 = vmatpush3.msra.mxu1 %v20354_v24  ;;  %v55_v24 = vld [vmem:[#allocation2 + $0x60] sm:$0xff]  ;;  %v20359_v57 = vand.u32 4294901760, %v16354_v16  ;;  %6763 = vmatprep.mubr.f32.mxu0 %v20360_v62  ;;  %v16534_v51 = vsub.f32 %v319_v1, %v16481_v25  ;;  %v16536_v27 = vld [vmem:[#allocation5 + $0x688] sm:$0xff]  ;;  %v16540_v49 = vsub.f32 %v335_v48, %v16479_v38  ;;  %v16543_v17 = vadd.f32 %v10319_v44, %v16403_v4  ;;  %v20366_v48 = vld [vmem:[#allocation69_spill] sm:$0xff] }
 0x32c   :  { %20355 = vst [vmem:[#allocation51_spill] sm:$0xff] %v16513_v15  ;;  %v16528_v12 = vsub.f32 %v16428_v41, %v20358_v19  ;;  %6881 = vmatprep.mubr.f32.mxu1 %v20325_v52  ;;  %10805 = vmatpush3.msra.mxu0 %v16324_v8  ;;  %v16549_v1 = vand.u32 4294901760, %v317_v14  ;;  %v16556_v4 = vsub.f32 %v318_v42, %v16506_v36  ;;  %v16558_v52 = vand.u32 4294901760, %v333_v34  ;;  %v72_v19 = vld [vmem:[#allocation2 + $0xe8] sm:$0xff]  ;;  %v16573_v8 = vld [vmem:[#allocation5 + $0x680] sm:$0xff] }
 0x32d   :  { %10843 = vmatprep.subr.mxu1 %v20359_v57  ;;  %20361 = vst [vmem:[#allocation36_spill] sm:$0xff] %v16534_v51  ;;  %20362 = vst [vmem:[#allocation59_spill] sm:$0xff] %v16540_v49  ;;  %v316_v57 = vld [vmem:[#allocation5 + $0x608] sm:$0xff]  ;;  %6765 = vmatmul.mubr.f32.gmra.mxu0 %v20366_v48  ;;  %v16561_v44 = vsub.f32 %v56_v13, %v16508_v29  ;;  %v16563_v16 = vand.u32 4294901760, %v55_v24  ;;  %v16571_v42 = vand.u32 4294901760, %v16536_v27  ;;  %v315_v13 = vld [vmem:[#allocation5 + $0x600] sm:$0xff] }
 0x32e   :  { %20363 = vst [vmem:[#allocation49_spill] sm:$0xff] %v16543_v17  ;;  %20364 = vst [vmem:[#allocation65_spill] sm:$0xff] %v16549_v1  ;;  %10844 = vmatpush3.msra.mxu1 %v20365_v30  ;;  %10806 = vmatprep.subr.mxu0 %v16361_v54  ;;  %v16583_v58 = vand.u32 4294901760, %v316_v57  ;;  %v16587_v30 = vsub.f32 %v334_v59, %v16513_v15  ;;  %v10352_v17 = vpop.f32.mrf.mxu0  ;;  %v20373_v29 = vand.u32 4294901760, %v16397_v33  ;;  %v20377_v59 = vand.u32 4294901760, %v16410_v7 }
 0x32f   :  { %20367 = vst [vmem:[#allocation33_spill] sm:$0xff] %v16558_v52  ;;  %20368 = vst [vmem:[#allocation44_spill] sm:$0xff] %v16561_v44  ;;  %6883 = vmatmul.mubr.f32.gmra.mxu1 %v20331_v45  ;;  %10845 = vmatprep.subr.mxu1 %v20371_v28  ;;  %v20372_v45 = vand.u32 4294901760, %v16484_v3  ;;  %v16593_v28 = vsub.f32 %v317_v14, %v16549_v1  ;;  %v16609_v33 = vand.u32 4294901760, %v315_v13  ;;  %v20380_v41 = vand.u32 4294901760, %v16415_v63 }
 0x330   :  { %20369 = vst [vmem:[#allocation12_spill] sm:$0xff] %v16563_v16  ;;  %20370 = vst [vmem:[#allocation50_spill] sm:$0xff] %v16571_v42  ;;  %10807 = vmatpush3.msra.mxu0 %v16376_v60  ;;  %10846 = vmatpush3.msra.mxu1 %v20373_v29  ;;  %v16601_v60 = vand.u32 4294901760, %v72_v19  ;;  %v16607_v29 = vand.u32 4294901760, %v16573_v8  ;;  %v16628_v14 = vsub.f32 %v316_v57, %v16583_v58  ;;  %v20384_v7 = vand.u32 4294901760, %v16442_v22 }
 0x331   :  { %v16581_v54 = vsub.f32 %v16484_v3, %v20372_v45  ;;  %10808 = vmatprep.subr.mxu0 %v16378_v23  ;;  %20374 = vst [vmem:[#allocation53_spill] sm:$0xff] %v16593_v28  ;;  %v16598_v45 = vsub.f32 %v16489_v40, %v20375_v31  ;;  %10847 = vmatprep.subr.mxu1 %v20377_v59  ;;  %20378 = vst [vmem:[#allocation62_spill] sm:$0xff] %v16609_v33  ;;  %v10353_v31 = vpop.f32.mrf.mxu0  ;;  %v16622_v59 = vand.u32 4294901760, %v71_v55  ;;  %v88_v40 = vld [vmem:[#allocation2 + $0x168] sm:$0xff] }
 0x332   :  { %20376 = vst [vmem:[#allocation19_spill] sm:$0xff] %v16601_v60  ;;  %6888 = vmatprep.mubr.f32.mxu1 %v20341_v43  ;;  %v16613_v23 = vsub.f32 %v55_v24, %v16563_v16  ;;  %10809 = vmatpush3.msra.mxu0 %v16380_v18  ;;  %v16620_v43 = vsub.f32 %v333_v34, %v16558_v52  ;;  %20382 = vst [vmem:[#allocation42_spill] sm:$0xff] %v16628_v14  ;;  %v20386_v34 = vand.u32 4294901760, %v16447_v0 }
 0x333   :  { %10848 = vmatpush3.msra.mxu1 %v20380_v41  ;;  %20381 = vst [vmem:[#allocation74_spill] sm:$0xff] %v16622_v59  ;;  %v10354_v3 = vadd.f32 %v10353_v31, %v10352_v17  ;;  %10810 = vmatprep.subr.mxu0 %v16437_v50  ;;  %v20383_v41 = vand.u32 4294901760, %v16540_v49  ;;  %v16646_v57 = vsub.f32 %v72_v19, %v16601_v60  ;;  %v10355_v24 = vpop.f32.mrf.mxu0  ;;  %v16663_v17 = vand.u32 4294901760, %v88_v40 }
 0x334   :  { %20379 = vst [vmem:[#allocation70_spill] sm:$0xff] %v16613_v23  ;;  %6890 = vmatmul.mubr.f32.gmra.mxu1 %v20344_v11  ;;  %10849 = vmatprep.subr.mxu1 %v20384_v7  ;;  %v20385_v11 = vand.u32 4294901760, %v16534_v51  ;;  %v16655_v22 = vsub.f32 %v315_v13, %v16609_v33  ;;  %v20388_v7 = vand.u32 4294901760, %v16561_v44  ;;  %v20391_v0 = vand.u32 4294901760, %v16556_v4 }
 0x335   :  { %v16633_v63 = vsub.f32 %v16540_v49, %v20383_v41  ;;  %10811 = vmatpush3.msra.mxu0 %v16452_v26  ;;  %v16649_v41 = vadd.f32 %v10354_v3, %v16271_v61  ;;  %10850 = vmatpush3.msra.mxu1 %v20386_v34  ;;  %20389 = vst [vmem:[#allocation20_spill] sm:$0xff] %v16663_v17  ;;  %v87_v61 = vld [vmem:[#allocation2 + $0x160] sm:$0xff]  ;;  %v20390_v3 = vand.u32 4294901760, %v16465_v9  ;;  %v20393_v9 = vand.u32 4294901760, %v16495_v32 }
 0x336   :  { %v16643_v31 = vsub.f32 %v16534_v51, %v20385_v11  ;;  %10812 = vmatprep.subr.mxu0 %v16479_v38  ;;  %20387 = vst [vmem:[#allocation15_spill] sm:$0xff] %v16655_v22  ;;  %v16660_v11 = vsub.f32 %v16561_v44, %v20388_v7  ;;  %6895 = vmatprep.mubr.f32.mxu1 %v20360_v62  ;;  %v10356_v44 = vpop.f32.mrf.mxu0 }
 0x337   :  { %10851 = vmatprep.subr.mxu1 %v20390_v3  ;;  %v16671_v13 = vsub.f32 %v16556_v4, %v20391_v0  ;;  %v16675_v7 = vsub.f32 %v71_v55, %v16622_v59  ;;  %v16679_v19 = vsub.f32 %v16536_v27, %v16571_v42  ;;  %10813 = vmatpush3.msra.mxu0 %v16481_v25  ;;  %v7268_v62 = vand.u32 4294901760, %v16633_v63 }
 0x338   :  { %10852 = vmatpush3.msra.mxu1 %v20393_v9  ;;  %v20394_v3 = vand.u32 4294901760, %v16587_v30  ;;  %v10357_v34 = vadd.f32 %v10356_v44, %v10355_v24  ;;  %10814 = vmatprep.subr.mxu0 %v16513_v15  ;;  %v7156_v27 = vand.u32 4294901760, %v16643_v31  ;;  %v16697_v32 = vsub.f32 %v16573_v8, %v16607_v29  ;;  %v104_v9 = vld [vmem:[#allocation2 + $0x1e8] sm:$0xff]  ;;  %v10399_v25 = vpop.f32.mrf.mxu1 }
 0x339   :  { %20392 = vst [vmem:[#allocation66_spill] sm:$0xff] %v16679_v19  ;;  %6897 = vmatmul.mubr.f32.gmra.mxu1 %v20366_v48  ;;  %v16699_v63 = vand.u32 4294901760, %v87_v61  ;;  %10815 = vmatpush3.msra.mxu0 %v16506_v36  ;;  %v7002_v48 = vand.u32 4294901760, %v16660_v11  ;;  %v20398_v44 = vand.u32 4294901760, %v16613_v23  ;;  %v16709_v31 = vsub.f32 %v88_v40, %v16663_v17  ;;  %v103_v36 = vld [vmem:[#allocation2 + $0x1e0] sm:$0xff]  ;;  %v10358_v15 = vpop.f32.mrf.mxu0 }
 0x33a   :  { %v16688_v0 = vsub.f32 %v16587_v30, %v20394_v3  ;;  %20395 = vst [vmem:[#allocation24_spill] sm:$0xff] %v16697_v32  ;;  %v20397_v3 = vand.u32 4294901760, %v16500_v46  ;;  %v16712_v8 = vadd.f32 %v10357_v34, %v16347_v20  ;;  %v20400_v55 = vand.u32 4294901760, %v16518_v2  ;;  %10816 = vmatprep.subr.mxu0 %v16558_v52 }
 0x33b   :  { %20396 = vst [vmem:[#allocation63_spill] sm:$0xff] %v16699_v63  ;;  %v7007_v24 = vsub.f32 %v16613_v23, %v20398_v44  ;;  %20399 = vst [vmem:[#allocation27_spill] sm:$0xff] %v16709_v31  ;;  %v7163_v46 = vand.u32 4294901760, %v16671_v13  ;;  %v20401_v11 = vand.u32 4294901760, %v16620_v43  ;;  %v20402_v20 = vand.u32 4294901760, %v16523_v6  ;;  %10817 = vmatpush3.msra.mxu0 %v16549_v1  ;;  %v10400_v44 = vpop.f32.mrf.mxu1  ;;  %7003 = vmatprep.mubr.f32.mxu0 %v7002_v48 }
 0x33c   :  { %10853 = vmatprep.subr.mxu1 %v20397_v3  ;;  %v7275_v2 = vand.u32 4294901760, %v16688_v0  ;;  %v20403_v34 = vand.u32 4294901760, %v16593_v28  ;;  %v20405_v40 = vand.u32 4294901760, %v16528_v12  ;;  %10818 = vmatprep.subr.mxu0 %v16571_v42  ;;  %v20406_v6 = vand.u32 4294901760, %v16646_v57 }
 0x33d   :  { %10854 = vmatpush3.msra.mxu1 %v20400_v55  ;;  %v7281_v3 = vsub.f32 %v16620_v43, %v20401_v11  ;;  %v16733_v11 = vand.u32 4294901760, %v104_v9  ;;  %v18858_v0 = vand.u32 4294901760, %v16697_v32  ;;  %v16743_v1 = vsub.f32 %v87_v61, %v16699_v63  ;;  %10819 = vmatpush3.msra.mxu0 %v16583_v58 }
 0x33e   :  { %10855 = vmatprep.subr.mxu1 %v20402_v20  ;;  %v16730_v13 = vsub.f32 %v16593_v28, %v20403_v34  ;;  %v7016_v20 = vsub.f32 %v16646_v57, %v20406_v6  ;;  %v10359_v34 = vpop.f32.mrf.mxu0  ;;  %v10401_v52 = vadd.f32 %v10400_v44, %v10399_v25  ;;  %v20407_v55 = vand.u32 4294901760, %v16581_v54  ;;  %10820 = vmatprep.subr.mxu0 %v16607_v29 }
 0x33f   :  { %20404 = vst [vmem:[#allocation75_spill] sm:$0xff] %v16733_v11  ;;  %10856 = vmatpush3.msra.mxu1 %v20405_v40  ;;  %v7008_v12 = vand.u32 4294901760, %v7007_v24  ;;  %v16749_v42 = vand.u32 4294901760, %v103_v36  ;;  %v10360_v23 = vadd.f32 %v10359_v34, %v10358_v15  ;;  %v20409_v6 = vand.u32 4294901760, %v16598_v45  ;;  %10821 = vmatpush3.msra.mxu0 %v16609_v33 }
 0x340   :  { %10857 = vmatprep.subr.mxu1 %v20407_v55  ;;  %v20410_v61 = vand.u32 4294901760, %v16675_v7  ;;  %v20411_v54 = vand.u32 4294901760, %v16679_v19  ;;  %v120_v55 = vld [vmem:[#allocation2 + $0x268] sm:$0xff]  ;;  %v16762_v40 = vadd.f32 %v10401_v52, %v16649_v41  ;;  %v7282_v15 = vand.u32 4294901760, %v7281_v3  ;;  %v10402_v3 = vpop.f32.mrf.mxu1  ;;  %10884 = vmatprep.subr.mxu0 %v16176_v37 }
 0x341   :  { %20408 = vst [vmem:[#allocation56_spill] sm:$0xff] %v16749_v42  ;;  %10858 = vmatpush3.msra.mxu1 %v20409_v6  ;;  %v20412_v45 = vand.u32 4294901760, %v16628_v14  ;;  %v16769_v6 = vsub.f32 %v104_v9, %v16733_v11  ;;  %v7017_v24 = vand.u32 4294901760, %v7016_v20  ;;  %v7295_v52 = vsub.f32 %v16697_v32, %v18858_v0  ;;  %7009 = vmatmul.mubr.f32.vlgmr.msra.gmra.mxu0 %v7008_v12 }
 0x342   :  { %v7022_v25 = vsub.f32 %v16675_v7, %v20410_v61  ;;  %v7288_v44 = vsub.f32 %v16679_v19, %v20411_v54  ;;  %10859 = vmatprep.subr.mxu1 %v7268_v62  ;;  %v16772_v61 = vadd.f32 %v10360_v23, %v16419_v35  ;;  %v10361_v54 = vpop.f32.mrf.mxu0  ;;  %v119_v62 = vld [vmem:[#allocation2 + $0x260] sm:$0xff]  ;;  %v7170_v9 = vand.u32 4294901760, %v16730_v13  ;;  %v10403_v41 = vpop.f32.mrf.mxu1  ;;  %10885 = vmatpush3.msra.mxu0 %v16173_v21 }
 0x343   :  { %v7176_v34 = vsub.f32 %v16628_v14, %v20412_v45  ;;  %10860 = vmatpush3.msra.mxu1 %v7156_v27  ;;  %v20413_v45 = vand.u32 4294901760, %v16709_v31  ;;  %v16783_v35 = vsub.f32 %v103_v36, %v16749_v42  ;;  %v16785_v27 = vand.u32 4294901760, %v120_v55  ;;  %10886 = vmatprep.subr.mxu0 %v16179_v56 }
 0x344   :  { %10861 = vmatprep.subr.mxu1 %v7275_v2  ;;  %v10362_v48 = vpop.f32.mrf.mxu0  ;;  %v7023_v20 = vand.u32 4294901760, %v7022_v25  ;;  %v7289_v0 = vand.u32 4294901760, %v7288_v44  ;;  %v20415_v12 = vand.u32 4294901760, %v16655_v22  ;;  %v18865_v36 = vand.u32 4294901760, %v16769_v6  ;;  %7018 = vmatprep.mubr.f32.mxu0 %v7017_v24 }
 0x345   :  { %v7031_v23 = vsub.f32 %v16709_v31, %v20413_v45  ;;  %20414 = vst [vmem:[#allocation28_spill] sm:$0xff] %v16785_v27  ;;  %10862 = vmatpush3.msra.mxu1 %v7163_v46  ;;  %v10363_v13 = vadd.f32 %v10362_v48, %v10361_v54  ;;  %v7177_v45 = vand.u32 4294901760, %v7176_v34  ;;  %v16793_v33 = vand.u32 4294901760, %v119_v62  ;;  %10887 = vmatpush3.msra.mxu0 %v16208_v10 }
 0x346   :  { %v7183_v2 = vsub.f32 %v16655_v22, %v20415_v12  ;;  %10863 = vmatprep.subr.mxu1 %v7282_v15  ;;  %v10404_v31 = vadd.f32 %v10403_v41, %v10402_v3  ;;  %v7296_v46 = vand.u32 4294901760, %v7295_v52  ;;  %v20417_v25 = vand.u32 4294901760, %v16743_v1  ;;  %v10364_v24 = vpop.f32.mrf.mxu0  ;;  %7024 = vmatmul.mubr.f32.gmra.mxu0 %v7023_v20  ;;  %v10405_v3 = vpop.f32.mrf.mxu1 }
 0x347   :  { %20416 = vst [vmem:[#allocation37_spill] sm:$0xff] %v16793_v33  ;;  %v5324_v54 = vadd.f32 %v10363_v13, %v16473_v39  ;;  %10864 = vmatpush3.msra.mxu1 %v7170_v9  ;;  %v7032_v15 = vand.u32 4294901760, %v7031_v23  ;;  %v18863_v34 = vand.u32 4294901760, %v16783_v35  ;;  %v16803_v48 = vsub.f32 %v120_v55, %v16785_v27  ;;  %10888 = vmatprep.subr.mxu0 %v16214_v5 }
 0x348   :  { %v7037_v44 = vsub.f32 %v16743_v1, %v20417_v25  ;;  %v16806_v41 = vadd.f32 %v10404_v31, %v16712_v8  ;;  %10865 = vmatprep.subr.mxu1 %v7289_v0  ;;  %v7184_v52 = vand.u32 4294901760, %v7183_v2  ;;  %v7046_v39 = vsub.f32 %v16769_v6, %v18865_v36  ;;  %v10365_v55 = vpop.f32.mrf.mxu0  ;;  %10889 = vmatpush3.msra.mxu0 %v16211_v53  ;;  %v10406_v23 = vpop.f32.mrf.mxu1  ;;  %v20421_v2 = vld [vmem:[#allocation49_spill] sm:$0xff]  ;;  %v20430_v36 = vld [vmem:[#allocation38_spill] sm:$0xff] }
 0x349   :  { %20418 = vst [vmem:[#allocation67_spill] sm:$0xff] %v16803_v48  ;;  %10866 = vmatpush3.msra.mxu1 %v7177_v45  ;;  %v16813_v9 = vsub.f32 %v119_v62, %v16793_v33  ;;  %v10366_v8 = vadd.f32 %v10365_v55, %v10364_v24  ;;  %10890 = vmatprep.subr.mxu0 %v16269_v47  ;;  %v18864_v20 = vand.u32 4294901760, %v16803_v48  ;;  %v20420_v62 = vld [vmem:[#allocation17_spill] sm:$0xff]  ;;  %v20422_v45 = vld [vmem:[#allocation58_spill] sm:$0xff]  ;;  %v20423_v24 = vld [vmem:[#allocation16_spill] sm:$0xff] }
 0x34a   :  { %10867 = vmatprep.subr.mxu1 %v7296_v46  ;;  %v7038_v31 = vand.u32 4294901760, %v7037_v44  ;;  %7033 = vmatprep.mubr.f32.mxu0 %v7032_v15  ;;  %v7052_v0 = vsub.f32 %v16783_v35, %v18863_v34  ;;  %v10407_v12 = vadd.f32 %v10406_v23, %v10405_v3  ;;  %v7047_v46 = vand.u32 4294901760, %v7046_v39  ;;  %v10408_v15 = vpop.f32.mrf.mxu1  ;;  %v20424_v3 = vld [vmem:[#allocation35_spill] sm:$0xff]  ;;  %v20426_v39 = vld [vmem:[#allocation73_spill] sm:$0xff] }
 0x34b   :  { %20419 = vst [vmem:[#allocation69_spill] sm:$0xff] %v16813_v9  ;;  %10868 = vmatpush3.msra.mxu1 %v7184_v52  ;;  %7299 = vmatprep.mubr.f32.mxu1 %v20420_v62  ;;  %v5333_v13 = vadd.f32 %v10366_v8, %v20421_v2  ;;  %v18868_v25 = vand.u32 4294901760, %v16813_v9  ;;  %v20425_v52 = vld [vmem:[#allocation23_spill] sm:$0xff]  ;;  %v7061_v8 = vsub.f32 %v16803_v48, %v18864_v20  ;;  %v20427_v2 = vld [vmem:[#allocation14_spill] sm:$0xff]  ;;  %v20433_v62 = vld [vmem:[#allocation77_spill] sm:$0xff] }
 0x34c   :  { %10891 = vmatpush3.msra.mxu0 %v20422_v45  ;;  %7301 = vmatmul.mubr.f32.vlgmr.msra.gmra.mxu1 %v16563_v16  ;;  %v16827_v44 = vadd.f32 %v10407_v12, %v16772_v61  ;;  %v7053_v55 = vand.u32 4294901760, %v7052_v0  ;;  %v10409_v23 = vpop.f32.mrf.mxu1  ;;  %v20428_v12 = vld [vmem:[#allocation30_spill] sm:$0xff]  ;;  %v20429_v0 = vld [vmem:[#allocation39_spill] sm:$0xff] }
 0x34d   :  { %7039 = vmatmul.mubr.f32.gmra.mxu0 %v7038_v31  ;;  %10892 = vmatprep.subr.mxu0 %v20423_v24  ;;  %v10410_v61 = vadd.f32 %v10409_v23, %v10408_v15  ;;  %v7067_v31 = vsub.f32 %v16813_v9, %v18868_v25  ;;  %v7062_v16 = vand.u32 4294901760, %v7061_v8  ;;  %v20431_v15 = vld [vmem:[#allocation31_spill] sm:$0xff]  ;;  %v20432_v23 = vld [vmem:[#allocation52_spill] sm:$0xff]  ;;  %v20434_v9 = vld [vmem:[#allocation26_spill] sm:$0xff] }
 0x34e   :  { %10931 = vmatprep.subr.mxu1 %v20424_v3  ;;  %10893 = vmatpush3.msra.mxu0 %v20425_v52  ;;  %v20437_v8 = vld [vmem:[#allocation64_spill] sm:$0xff] }
 0x34f   :  { %10932 = vmatpush3.msra.mxu1 %v20426_v39  ;;  %10894 = vmatprep.subr.mxu0 %v20427_v2  ;;  %v16843_v34 = vadd.f32 %v10410_v61, %v5324_v54  ;;  %v10411_v20 = vpop.f32.mrf.mxu1  ;;  %v7068_v25 = vand.u32 4294901760, %v7067_v31  ;;  %v20435_v54 = vld [vmem:[#allocation46_spill] sm:$0xff]  ;;  %v20439_v31 = vld [vmem:[#allocation21_spill] sm:$0xff] }
 0x350   :  { %10933 = vmatprep.subr.mxu1 %v20428_v12  ;;  %7048 = vmatprep.mubr.f32.mxu0 %v7047_v46  ;;  %v20436_v61 = vld [vmem:[#allocation34_spill] sm:$0xff] }
 0x351   :  { %7306 = vmatprep.mubr.f32.mxu1 %v16601_v60  ;;  %10895 = vmatpush3.msra.mxu0 %v20429_v0  ;;  %v10412_v46 = vpop.f32.mrf.mxu1 }
 0x352   :  { %10934 = vmatpush3.msra.mxu1 %v20430_v36  ;;  %7054 = vmatmul.mubr.f32.gmra.mxu0 %v7053_v55  ;;  %v10413_v60 = vadd.f32 %v10412_v46, %v10411_v20  ;;  %v20440_v20 = vld [vmem:[#allocation11_spill] sm:$0xff]  ;;  %v20441_v46 = vld [vmem:[#allocation57_spill] sm:$0xff] }
 0x353   :  { %7308 = vmatmul.mubr.f32.gmra.mxu1 %v16622_v59  ;;  %10896 = vmatprep.subr.mxu0 %v20431_v15  ;;  %v20438_v59 = vld [vmem:[#allocation43_spill] sm:$0xff] }
 0x354   :  { %10935 = vmatprep.subr.mxu1 %v20432_v23  ;;  %10897 = vmatpush3.msra.mxu0 %v20433_v62  ;;  %v16853_v55 = vadd.f32 %v10413_v60, %v5333_v13  ;;  %v20443_v60 = vld [vmem:[#allocation54_spill] sm:$0xff] }
 0x355   :  { %10936 = vmatpush3.msra.mxu1 %v20434_v9  ;;  %10898 = vmatprep.subr.mxu0 %v20435_v54 }
 0x356   :  { %10937 = vmatprep.subr.mxu1 %v20436_v61  ;;  %7063 = vmatprep.mubr.f32.mxu0 %v7062_v16  ;;  %v20442_v61 = vld [vmem:[#allocation32_spill] sm:$0xff]  ;;  %v20444_v16 = vld [vmem:[#allocation29_spill] sm:$0xff] }
 0x357   :  { %7313 = vmatprep.mubr.f32.mxu1 %v16663_v17  ;;  %10899 = vmatpush3.msra.mxu0 %v20437_v8  ;;  %v20445_v17 = vld [vmem:[#allocation22_spill] sm:$0xff] }
 0x358   :  { %10938 = vmatpush3.msra.mxu1 %v20438_v59  ;;  %7069 = vmatmul.mubr.f32.gmra.mxu0 %v7068_v25  ;;  %v10446_v48 = vpop.f32.mrf.mxu0  ;;  %v20446_v25 = vld [vmem:[#allocation55_spill] sm:$0xff] }
 0x359   :  { %7315 = vmatmul.mubr.f32.gmra.mxu1 %v16699_v63  ;;  %10900 = vmatprep.subr.mxu0 %v20439_v31  ;;  %v20449_v31 = vld [vmem:[#allocation72_spill] sm:$0xff] }
 0x35a   :  { %10939 = vmatprep.subr.mxu1 %v20440_v20  ;;  %10901 = vmatpush3.msra.mxu0 %v20441_v46  ;;  %v10447_v13 = vpop.f32.mrf.mxu0  ;;  %v20447_v20 = vld [vmem:[#allocation71_spill] sm:$0xff] }
 0x35b   :  { %10940 = vmatpush3.msra.mxu1 %v20442_v61  ;;  %10902 = vmatprep.subr.mxu0 %v20443_v60  ;;  %v10448_v63 = vadd.f32 %v10447_v13, %v10446_v48  ;;  %v20448_v46 = vld [vmem:[#allocation47_spill] sm:$0xff]  ;;  %v20452_v13 = vld [vmem:[#allocation76_spill] sm:$0xff] }
 0x35c   :  { %10941 = vmatprep.subr.mxu1 %v20444_v16  ;;  %7320 = vmatprep.mubr.f32.mxu1 %v16733_v11  ;;  %v20450_v16 = vld [vmem:[#allocation13_spill] sm:$0xff] }
 0x35d   :  { %10903 = vmatpush3.msra.mxu0 %v20445_v17  ;;  %10942 = vmatpush3.msra.mxu1 %v20446_v25  ;;  %v5653_v60 = vadd.f32 %v10448_v63, %v16762_v40  ;;  %v10449_v61 = vpop.f32.mrf.mxu0  ;;  %v20451_v11 = vld [vmem:[#allocation41_spill] sm:$0xff]  ;;  %v20453_v63 = vld [vmem:[#allocation18_spill] sm:$0xff] }
 0x35e   :  { %7322 = vmatmul.mubr.f32.gmra.mxu1 %v16749_v42  ;;  %10904 = vmatprep.subr.mxu0 %v20447_v20 }
 0x35f   :  { %10943 = vmatprep.subr.mxu1 %v20448_v46  ;;  %10905 = vmatpush3.msra.mxu0 %v20449_v31  ;;  %v10450_v48 = vpop.f32.mrf.mxu0 }
 0x360   :  { %10944 = vmatpush3.msra.mxu1 %v20450_v16  ;;  %10906 = vmatprep.subr.mxu0 %v16540_v49  ;;  %v10451_v42 = vadd.f32 %v10450_v48, %v10449_v61 }
 0x361   :  { %10945 = vmatprep.subr.mxu1 %v20451_v11  ;;  %7327 = vmatprep.mubr.f32.mxu1 %v16785_v27  ;;  %v20454_v11 = vld [vmem:[#allocation61_spill] sm:$0xff] }
 0x362   :  { %10907 = vmatpush3.msra.mxu0 %v16534_v51  ;;  %10946 = vmatpush3.msra.mxu1 %v20452_v13  ;;  %v5660_v40 = vadd.f32 %v10451_v42, %v16806_v41  ;;  %v10493_v49 = vpop.f32.mrf.mxu1  ;;  %v20455_v51 = vld [vmem:[#allocation48_spill] sm:$0xff] }
 0x363   :  { %7329 = vmatmul.mubr.f32.gmra.mxu1 %v16793_v33  ;;  %10908 = vmatprep.subr.mxu0 %v16587_v30  ;;  %v10452_v27 = vpop.f32.mrf.mxu0 }
 0x364   :  { %10947 = vmatprep.subr.mxu1 %v20453_v63  ;;  %10909 = vmatpush3.msra.mxu0 %v16556_v4  ;;  %v10494_v61 = vpop.f32.mrf.mxu1 }
 0x365   :  { %10948 = vmatpush3.msra.mxu1 %v20454_v11  ;;  %10910 = vmatprep.subr.mxu0 %v16620_v43  ;;  %v10453_v48 = vpop.f32.mrf.mxu0  ;;  %v10495_v33 = vadd.f32 %v10494_v61, %v10493_v49  ;;  %v20457_v49 = vld [vmem:[#allocation40_spill] sm:$0xff] }
 0x366   :  { %10949 = vmatprep.subr.mxu1 %v20455_v51  ;;  %10911 = vmatpush3.msra.mxu0 %v16593_v28  ;;  %v10454_v42 = vadd.f32 %v10453_v48, %v10452_v27  ;;  %v20456_v28 = vld [vmem:[#allocation44_spill] sm:$0xff]  ;;  %v20459_v27 = vld [vmem:[#allocation51_spill] sm:$0xff] }
 0x367   :  { %10950 = vmatpush3.msra.mxu1 %v16380_v18  ;;  %10912 = vmatprep.subr.mxu0 %v16679_v19  ;;  %v16894_v41 = vadd.f32 %v10495_v33, %v5653_v60  ;;  %v20460_v33 = vand.u32 4294901760, %v16176_v37  ;;  %v20461_v60 = vld [vmem:[#allocation60_spill] sm:$0xff]  ;;  %v20466_v37 = vand.u32 4294901760, %v16208_v10 }
 0x368   :  { %10951 = vmatprep.subr.mxu1 %v16437_v50  ;;  %10913 = vmatpush3.msra.mxu0 %v16628_v14  ;;  %v5667_v18 = vadd.f32 %v10454_v42, %v16827_v44  ;;  %v10455_v19 = vpop.f32.mrf.mxu0  ;;  %v20458_v14 = vld [vmem:[#allocation70_spill] sm:$0xff]  ;;  %v20462_v44 = vand.u32 4294901760, %v16173_v21  ;;  %v20463_v42 = vld [vmem:[#allocation33_spill] sm:$0xff] }
 0x369   :  { %10952 = vmatpush3.msra.mxu1 %v16452_v26  ;;  %10914 = vmatprep.subr.mxu0 %v16697_v32  ;;  %v10496_v61 = vpop.f32.mrf.mxu1  ;;  %v20465_v26 = vld [vmem:[#allocation65_spill] sm:$0xff]  ;;  %v20467_v21 = vld [vmem:[#allocation50_spill] sm:$0xff] }
 0x36a   :  { %10953 = vmatprep.subr.mxu1 %v16479_v38  ;;  %10915 = vmatpush3.msra.mxu0 %v16655_v22  ;;  %v10456_v48 = vpop.f32.mrf.mxu0 }
 0x36b   :  { %7464 = vmatprep.mubr.f32.mxu0 %v20456_v28  ;;  %10954 = vmatpush3.msra.mxu1 %v20457_v49  ;;  %v10457_v38 = vadd.f32 %v10456_v48, %v10455_v19  ;;  %v10497_v22 = vpop.f32.mrf.mxu1  ;;  %v20464_v49 = vand.u32 4294901760, %v16179_v56  ;;  %v20468_v56 = vand.u32 4294901760, %v16214_v5  ;;  %v20473_v5 = vand.u32 4294901760, %v20456_v28 }
 0x36c   :  { %7467 = vmatmul.mubr.f32.vlgmr.msra.gmra.mxu0 %v20458_v14  ;;  %10955 = vmatprep.subr.mxu1 %v20459_v27  ;;  %v10498_v32 = vadd.f32 %v10497_v22, %v10496_v61  ;;  %v20477_v28 = vand.u32 4294901760, %v20425_v52 }
 0x36d   :  { %10978 = vmatprep.subr.mxu0 %v20460_v33  ;;  %10956 = vmatpush3.msra.mxu1 %v20461_v60  ;;  %v5674_v27 = vadd.f32 %v10457_v38, %v16843_v34  ;;  %v20469_v38 = vand.u32 4294901760, %v16211_v53  ;;  %v20470_v34 = vand.u32 4294901760, %v16269_v47  ;;  %v20472_v33 = vld [vmem:[#allocation62_spill] sm:$0xff]  ;;  %v20474_v53 = vand.u32 4294901760, %v20422_v45 }
 0x36e   :  { %10979 = vmatpush3.msra.mxu0 %v20462_v44  ;;  %10957 = vmatprep.subr.mxu1 %v20463_v42  ;;  %v16916_v19 = vadd.f32 %v10498_v32, %v5660_v40  ;;  %v10458_v48 = vpop.f32.mrf.mxu0  ;;  %v20471_v40 = vld [vmem:[#allocation27_spill] sm:$0xff]  ;;  %v20478_v45 = vand.u32 4294901760, %v20427_v2  ;;  %v20482_v2 = vand.u32 4294901760, %v20431_v15 }
 0x36f   :  { %10980 = vmatprep.subr.mxu0 %v20464_v49  ;;  %7473 = vmatprep.mubr.f32.mxu0 %v16646_v57  ;;  %v20487_v15 = vand.u32 4294901760, %v20471_v40 }
 0x370   :  { %10958 = vmatpush3.msra.mxu1 %v20465_v26  ;;  %10981 = vmatpush3.msra.mxu0 %v20466_v37  ;;  %v10499_v22 = vpop.f32.mrf.mxu1  ;;  %v10459_v49 = vpop.f32.mrf.mxu0  ;;  %v20475_v37 = vand.u32 4294901760, %v20458_v14 }
 0x371   :  { %7476 = vmatmul.mubr.f32.gmra.mxu0 %v16675_v7  ;;  %10959 = vmatprep.subr.mxu1 %v20467_v21  ;;  %v10460_v10 = vadd.f32 %v10459_v49, %v10458_v48  ;;  %v362_v49 = vld [vmem:[#allocation5 + $0x778] sm:$0xff] }
 0x372   :  { %10982 = vmatprep.subr.mxu0 %v20468_v56  ;;  %10960 = vmatpush3.msra.mxu1 %v16583_v58  ;;  %v10500_v32 = vpop.f32.mrf.mxu1  ;;  %v20486_v56 = vld [vmem:[#allocation67_spill] sm:$0xff] }
 0x373   :  { %10983 = vmatpush3.msra.mxu0 %v20469_v38  ;;  %10961 = vmatprep.subr.mxu1 %v16607_v29  ;;  %v10501_v61 = vadd.f32 %v10500_v32, %v10499_v22  ;;  %v5681_v44 = vadd.f32 %v10460_v10, %v16853_v55  ;;  %v20476_v22 = vand.u32 4294901760, %v20423_v24  ;;  %v20480_v24 = vand.u32 4294901760, %v20429_v0  ;;  %v377_v38 = vld [vmem:[#allocation5 + $0x7f0] sm:$0xff]  ;;  %v20491_v10 = vld [vmem:[#allocation21_spill] sm:$0xff] }
 0x374   :  { %10984 = vmatprep.subr.mxu0 %v20470_v34  ;;  %7482 = vmatprep.mubr.f32.mxu0 %v20471_v40  ;;  %v20492_v32 = vand.u32 4294901760, %v20491_v10  ;;  %v20493_v34 = vld [vmem:[#allocation11_spill] sm:$0xff]  ;;  %v20494_v40 = vld [vmem:[#allocation57_spill] sm:$0xff] }
 0x375   :  { %10962 = vmatpush3.msra.mxu1 %v20472_v33  ;;  %7607 = vmatprep.mubr.f32.mxu1 %v20473_v5  ;;  %v16937_v48 = vadd.f32 %v10501_v61, %v5667_v18  ;;  %v10502_v47 = vpop.f32.mrf.mxu1  ;;  %v20479_v18 = vand.u32 4294901760, %v16646_v57  ;;  %v20483_v57 = vand.u32 4294901760, %v20433_v62  ;;  %v378_v62 = vld [vmem:[#allocation5 + $0x7f8] sm:$0xff]  ;;  %v20495_v61 = vand.u32 4294901760, %v20494_v40 }
 0x376   :  { %10985 = vmatpush3.msra.mxu0 %v20474_v53  ;;  %7611 = vmatmul.mubr.f32.vlgmr.msra.gmra.mxu1 %v20475_v37  ;;  %v16987_v5 = vand.u32 4294901760, %v362_v49  ;;  %v20499_v53 = vld [vmem:[#allocation32_spill] sm:$0xff]  ;;  %v20500_v37 = vld [vmem:[#allocation54_spill] sm:$0xff] }
 0x377   :  { %7485 = vmatmul.mubr.f32.gmra.mxu0 %v16743_v1  ;;  %10986 = vmatprep.subr.mxu0 %v20476_v22  ;;  %v10503_v55 = vpop.f32.mrf.mxu1  ;;  %v20503_v22 = vand.u32 4294901760, %v16769_v6 }
 0x378   :  { %11025 = vmatprep.subr.mxu1 %v20424_v3  ;;  %10987 = vmatpush3.msra.mxu0 %v20477_v28  ;;  %v10504_v14 = vadd.f32 %v10503_v55, %v10502_v47  ;;  %20497 = vst [vmem:[#allocation58_spill] sm:$0xff] %v16987_v5  ;;  %v20502_v47 = vld [vmem:[#allocation29_spill] sm:$0xff]  ;;  %v361_v28 = vld [vmem:[#allocation5 + $0x770] sm:$0xff]  ;;  %v376_v55 = vld [vmem:[#allocation5 + $0x7e8] sm:$0xff] }
 0x379   :  { %11026 = vmatpush3.msra.mxu1 %v20426_v39  ;;  %10988 = vmatprep.subr.mxu0 %v20478_v45  ;;  %v20481_v39 = vand.u32 4294901760, %v16675_v7  ;;  %v360_v45 = vld [vmem:[#allocation5 + $0x768] sm:$0xff] }
 0x37a   :  { %11027 = vmatprep.subr.mxu1 %v20428_v12  ;;  %7491 = vmatprep.mubr.f32.mxu0 %v16769_v6  ;;  %v16954_v3 = vadd.f32 %v10504_v14, %v5674_v27  ;;  %v10505_v52 = vpop.f32.mrf.mxu1  ;;  %v20484_v27 = vand.u32 4294901760, %v20435_v54  ;;  %v20490_v54 = vand.u32 4294901760, %v16743_v1  ;;  %v20501_v1 = vand.u32 4294901760, %v20500_v37 }
 0x37b   :  { %7618 = vmatprep.mubr.f32.mxu1 %v20479_v18  ;;  %10989 = vmatpush3.msra.mxu0 %v20480_v24  ;;  %v20504_v18 = vand.u32 4294901760, %v20445_v17  ;;  %v20507_v17 = vand.u32 4294901760, %v20449_v31 }
 0x37c   :  { %11028 = vmatpush3.msra.mxu1 %v20430_v36  ;;  %7494 = vmatmul.mubr.f32.gmra.mxu0 %v16783_v35  ;;  %v10506_v12 = vpop.f32.mrf.mxu1  ;;  %v20485_v36 = vld [vmem:[#allocation34_spill] sm:$0xff] }
 0x37d   :  { %7622 = vmatmul.mubr.f32.gmra.mxu1 %v20481_v39  ;;  %10990 = vmatprep.subr.mxu0 %v20482_v2  ;;  %v10507_v0 = vadd.f32 %v10506_v12, %v10505_v52  ;;  %v20505_v52 = vand.u32 4294901760, %v16783_v35  ;;  %v20506_v39 = vand.u32 4294901760, %v20447_v20  ;;  %v17005_v2 = vsub.f32 %v362_v49, %v16987_v5  ;;  %v375_v49 = vld [vmem:[#allocation5 + $0x7e0] sm:$0xff] }
 0x37e   :  { %11029 = vmatprep.subr.mxu1 %v20432_v23  ;;  %10991 = vmatpush3.msra.mxu0 %v20483_v57  ;;  %v20488_v23 = vand.u32 4294901760, %v20437_v8  ;;  %v16985_v8 = vand.u32 4294901760, %v378_v62  ;;  %v17018_v35 = vand.u32 4294901760, %v376_v55  ;;  %v17020_v20 = vand.u32 4294901760, %v360_v45 }
 0x37f   :  { %11030 = vmatpush3.msra.mxu1 %v20434_v9  ;;  %10992 = vmatprep.subr.mxu0 %v20484_v27  ;;  %v16970_v7 = vadd.f32 %v10507_v0, %v5681_v44  ;;  %v20489_v9 = vld [vmem:[#allocation69_spill] sm:$0xff]  ;;  %v16989_v44 = vand.u32 4294901760, %v377_v38  ;;  %v20511_v27 = vld [vmem:[#allocation59_spill] sm:$0xff] }
 0x380   :  { %11031 = vmatprep.subr.mxu1 %v20485_v36  ;;  %7500 = vmatprep.mubr.f32.mxu0 %v20486_v56  ;;  %20496 = vst [vmem:[#allocation49_spill] sm:$0xff] %v16985_v8  ;;  %v17008_v6 = vsub.f32 %v378_v62, %v16985_v8  ;;  %20509 = vst [vmem:[#allocation23_spill] sm:$0xff] %v17018_v35  ;;  %v20512_v36 = vand.u32 4294901760, %v20511_v27  ;;  %v17046_v40 = vsub.f32 %v376_v55, %v17018_v35  ;;  %v20525_v55 = vld [vmem:[#allocation45_spill] sm:$0xff]  ;;  %v20528_v27 = vld [vmem:[#allocation42_spill] sm:$0xff] }
 0x381   :  { %7629 = vmatprep.mubr.f32.mxu1 %v20487_v15  ;;  %10993 = vmatpush3.msra.mxu0 %v20488_v23  ;;  %20498 = vst [vmem:[#allocation16_spill] sm:$0xff] %v16989_v44  ;;  %v17011_v12 = vsub.f32 %v377_v38, %v16989_v44  ;;  %20510 = vst [vmem:[#allocation73_spill] sm:$0xff] %v17020_v20  ;;  %v20513_v15 = vld [vmem:[#allocation41_spill] sm:$0xff]  ;;  %v20515_v23 = vld [vmem:[#allocation36_spill] sm:$0xff] }
 0x382   :  { %11032 = vmatpush3.msra.mxu1 %v20438_v59  ;;  %7503 = vmatmul.mubr.f32.gmra.mxu0 %v20489_v9  ;;  %v10540_v59 = vpop.f32.mrf.mxu0  ;;  %v20516_v62 = vand.u32 4294901760, %v20515_v23  ;;  %v359_v38 = vld [vmem:[#allocation5 + $0x760] sm:$0xff]  ;;  %v20532_v23 = vld [vmem:[#allocation25_spill] sm:$0xff] }
 0x383   :  { %7633 = vmatmul.mubr.f32.gmra.mxu1 %v20490_v54  ;;  %10994 = vmatprep.subr.mxu0 %v20492_v32  ;;  %v18902_v54 = vand.u32 4294901760, %v17011_v12  ;;  %v20517_v32 = vand.u32 4294901760, %v20489_v9  ;;  %v17059_v37 = vand.u32 4294901760, %v359_v38 }
 0x384   :  { %11033 = vmatprep.subr.mxu1 %v20493_v34  ;;  %10995 = vmatpush3.msra.mxu0 %v20495_v61  ;;  %v10541_v14 = vpop.f32.mrf.mxu0  ;;  %v20519_v61 = vand.u32 4294901760, %v16556_v4  ;;  %v20523_v4 = vld [vmem:[#allocation53_spill] sm:$0xff] }
 0x385   :  { %11034 = vmatpush3.msra.mxu1 %v20499_v53  ;;  %10996 = vmatprep.subr.mxu0 %v20501_v1  ;;  %v10542_v24 = vadd.f32 %v10541_v14, %v10540_v59  ;;  %v17057_v53 = vand.u32 4294901760, %v375_v49  ;;  %20522 = vst [vmem:[#allocation30_spill] sm:$0xff] %v17059_v37  ;;  %v374_v1 = vld [vmem:[#allocation5 + $0x7d8] sm:$0xff] }
 0x386   :  { %11035 = vmatprep.subr.mxu1 %v20502_v47  ;;  %7640 = vmatprep.mubr.f32.mxu1 %v20503_v22  ;;  %v358_v47 = vld [vmem:[#allocation5 + $0x758] sm:$0xff] }
 0x387   :  { %10997 = vmatpush3.msra.mxu0 %v20504_v18  ;;  %11036 = vmatpush3.msra.mxu1 %v20446_v25  ;;  %v17016_v25 = vand.u32 4294901760, %v361_v28  ;;  %v5925_v57 = vadd.f32 %v10542_v24, %v16894_v41  ;;  %v10543_v0 = vpop.f32.mrf.mxu0  ;;  %v18904_v41 = vand.u32 4294901760, %v17008_v6  ;;  %20521 = vst [vmem:[#allocation14_spill] sm:$0xff] %v17057_v53  ;;  %v373_v18 = vld [vmem:[#allocation5 + $0x7d0] sm:$0xff] }
 0x388   :  { %7644 = vmatmul.mubr.f32.gmra.mxu1 %v20505_v52  ;;  %10998 = vmatprep.subr.mxu0 %v20506_v39  ;;  %v18899_v52 = vand.u32 4294901760, %v17046_v40 }
 0x389   :  { %11037 = vmatprep.subr.mxu1 %v20448_v46  ;;  %10999 = vmatpush3.msra.mxu0 %v20507_v17  ;;  %20508 = vst [vmem:[#allocation35_spill] sm:$0xff] %v17016_v25  ;;  %v20514_v46 = vand.u32 4294901760, %v20486_v56  ;;  %v10544_v31 = vpop.f32.mrf.mxu0  ;;  %v20518_v56 = vand.u32 4294901760, %v16587_v30  ;;  %v17040_v34 = vsub.f32 %v361_v28, %v17016_v25  ;;  %v20520_v30 = vand.u32 4294901760, %v16620_v43  ;;  %v357_v28 = vld [vmem:[#allocation5 + $0x750] sm:$0xff] }
 0x38a   :  { %11038 = vmatpush3.msra.mxu1 %v20450_v16  ;;  %11000 = vmatprep.subr.mxu0 %v20512_v36  ;;  %v18903_v16 = vand.u32 4294901760, %v17005_v2  ;;  %v10545_v10 = vadd.f32 %v10544_v31, %v10543_v0  ;;  %v20529_v36 = vand.u32 4294901760, %v20528_v27  ;;  %v17126_v27 = vsub.f32 %v17046_v40, %v18899_v52 }
 0x38b   :  { %11039 = vmatprep.subr.mxu1 %v20513_v15  ;;  %7651 = vmatprep.mubr.f32.mxu1 %v20514_v46  ;;  %v18901_v24 = vand.u32 4294901760, %v17040_v34  ;;  %v17088_v15 = vand.u32 4294901760, %v374_v1  ;;  %v17090_v46 = vand.u32 4294901760, %v358_v47 }
 0x38c   :  { %11001 = vmatpush3.msra.mxu0 %v20516_v62  ;;  %11040 = vmatpush3.msra.mxu1 %v20452_v13  ;;  %v17043_v13 = vsub.f32 %v360_v45, %v17020_v20  ;;  %v17052_v9 = vadd.f32 %v10545_v10, %v16916_v19  ;;  %v17067_v19 = vsub.f32 %v17008_v6, %v18904_v41  ;;  %v20526_v45 = vld [vmem:[#allocation66_spill] sm:$0xff]  ;;  %v20533_v62 = vld [vmem:[#allocation24_spill] sm:$0xff]  ;;  %v370_v41 = vld [vmem:[#allocation5 + $0x7b8] sm:$0xff] }
 0x38d   :  { %7655 = vmatmul.mubr.f32.gmra.mxu1 %v20517_v32  ;;  %11002 = vmatprep.subr.mxu0 %v20518_v56  ;;  %v10587_v59 = vpop.f32.mrf.mxu1  ;;  %v17072_v43 = vsub.f32 %v17005_v2, %v18903_v16  ;;  %v20527_v14 = vand.u32 4294901760, %v20526_v45  ;;  %20530 = vst [vmem:[#allocation39_spill] sm:$0xff] %v17088_v15  ;;  %20531 = vst [vmem:[#allocation38_spill] sm:$0xff] %v17090_v46  ;;  %v20534_v10 = vand.u32 4294901760, %v20533_v62  ;;  %v17098_v56 = vand.u32 4294901760, %v357_v28  ;;  %v20543_v62 = vld [vmem:[#allocation12_spill] sm:$0xff] }
 0x38e   :  { %11041 = vmatprep.subr.mxu1 %v20453_v63  ;;  %11003 = vmatpush3.msra.mxu0 %v20519_v61  ;;  %v10546_v22 = vpop.f32.mrf.mxu0  ;;  %v20524_v63 = vand.u32 4294901760, %v20523_v4  ;;  %v18900_v39 = vand.u32 4294901760, %v17043_v13  ;;  %v17096_v32 = vsub.f32 %v359_v38, %v17059_v37  ;;  %v372_v61 = vld [vmem:[#allocation5 + $0x7c8] sm:$0xff]  ;;  %v20537_v4 = vld [vmem:[#allocation68_spill] sm:$0xff]  ;;  %v17110_v38 = vand.u32 4294901760, %v373_v18 }
 0x38f   :  { %11042 = vmatpush3.msra.mxu1 %v20454_v11  ;;  %11004 = vmatprep.subr.mxu0 %v20520_v30  ;;  %v17077_v11 = vsub.f32 %v17011_v12, %v18902_v54  ;;  %20536 = vst [vmem:[#allocation52_spill] sm:$0xff] %v17098_v56 }
 0x390   :  { %11043 = vmatprep.subr.mxu1 %v20455_v51  ;;  %11005 = vmatpush3.msra.mxu0 %v20524_v63  ;;  %v10588_v51 = vpop.f32.mrf.mxu1  ;;  %v10547_v17 = vpop.f32.mrf.mxu0  ;;  %20535 = vst [vmem:[#allocation31_spill] sm:$0xff] %v17096_v32  ;;  %20540 = vst [vmem:[#allocation77_spill] sm:$0xff] %v17110_v38 }
 0x391   :  { %11044 = vmatpush3.msra.mxu1 %v20525_v55  ;;  %11006 = vmatprep.subr.mxu0 %v20527_v14  ;;  %v10589_v0 = vadd.f32 %v10588_v51, %v10587_v59  ;;  %v10548_v31 = vadd.f32 %v10547_v17, %v10546_v22  ;;  %v17101_v59 = vsub.f32 %v375_v49, %v17057_v53  ;;  %v20538_v22 = vld [vmem:[#allocation15_spill] sm:$0xff]  ;;  %v20541_v17 = vld [vmem:[#allocation17_spill] sm:$0xff]  ;;  %v20542_v49 = vld [vmem:[#allocation40_spill] sm:$0xff] }
 0x392   :  { %11045 = vmatprep.subr.mxu1 %v16437_v50  ;;  %11007 = vmatpush3.msra.mxu0 %v20529_v36  ;;  %v356_v50 = vld [vmem:[#allocation5 + $0x748] sm:$0xff]  ;;  %v20539_v63 = vand.u32 4294901760, %v20538_v22  ;;  %v371_v36 = vld [vmem:[#allocation5 + $0x7c0] sm:$0xff]  ;;  %v17138_v22 = vand.u32 4294901760, %v372_v61  ;;  %v369_v51 = vld [vmem:[#allocation5 + $0x7b0] sm:$0xff] }
 0x393   :  { %11046 = vmatpush3.msra.mxu1 %v20532_v23  ;;  %11008 = vmatprep.subr.mxu0 %v20534_v10  ;;  %v17103_v30 = vadd.f32 %v10589_v0, %v5925_v57  ;;  %v17113_v45 = vadd.f32 %v10548_v31, %v16937_v48  ;;  %v10549_v14 = vpop.f32.mrf.mxu0  ;;  %v17121_v0 = vsub.f32 %v17040_v34, %v18901_v24  ;;  %v355_v31 = vld [vmem:[#allocation5 + $0x740] sm:$0xff]  ;;  %v20544_v10 = vld [vmem:[#allocation51_spill] sm:$0xff] }
 0x394   :  { %11047 = vmatprep.subr.mxu1 %v20537_v4  ;;  %11009 = vmatpush3.msra.mxu0 %v20539_v63  ;;  %v17131_v48 = vsub.f32 %v17043_v13, %v18900_v39  ;;  %v10590_v23 = vpop.f32.mrf.mxu1  ;;  %v17136_v4 = vsub.f32 %v358_v47, %v17090_v46  ;;  %20546 = vst [vmem:[#allocation46_spill] sm:$0xff] %v17138_v22  ;;  %v17140_v63 = vand.u32 4294901760, %v356_v50  ;;  %v17156_v16 = vand.u32 4294901760, %v355_v31  ;;  %v20553_v57 = vld [vmem:[#allocation19_spill] sm:$0xff]  ;;  %v353_v47 = vld [vmem:[#allocation5 + $0x730] sm:$0xff] }
 0x395   :  { %7821 = vmatprep.mubr.f32.mxu0 %v20541_v17  ;;  %11048 = vmatpush3.msra.mxu1 %v20542_v49  ;;  %v17143_v49 = vsub.f32 %v374_v1, %v17088_v15  ;;  %v10550_v52 = vpop.f32.mrf.mxu0  ;;  %v17148_v39 = vsub.f32 %v357_v28, %v17098_v56  ;;  %v17154_v1 = vand.u32 4294901760, %v371_v36 }
 0x396   :  { %7823 = vmatmul.mubr.f32.vlgmr.msra.gmra.mxu0 %v20543_v62  ;;  %11049 = vmatprep.subr.mxu1 %v20544_v10  ;;  %20545 = vst [vmem:[#allocation26_spill] sm:$0xff] %v17136_v4  ;;  %20547 = vst [vmem:[#allocation64_spill] sm:$0xff] %v17140_v63  ;;  %v18905_v10 = vand.u32 4294901760, %v17101_v59  ;;  %v10551_v24 = vadd.f32 %v10550_v52, %v10549_v14  ;;  %v10591_v54 = vpop.f32.mrf.mxu1  ;;  %v17176_v52 = vsub.f32 %v372_v61, %v17138_v22 }
 0x397   :  { %20548 = vst [vmem:[#allocation43_spill] sm:$0xff] %v17143_v49  ;;  %11072 = vmatprep.subr.mxu0 %v16985_v8  ;;  %11050 = vmatpush3.msra.mxu1 %v20461_v60  ;;  %20549 = vst [vmem:[#allocation22_spill] sm:$0xff] %v17148_v39  ;;  %v17159_v60 = vsub.f32 %v373_v18, %v17110_v38  ;;  %v10592_v28 = vadd.f32 %v10591_v54, %v10590_v23  ;;  %v354_v23 = vld [vmem:[#allocation5 + $0x738] sm:$0xff]  ;;  %v17193_v61 = vand.u32 4294901760, %v370_v41  ;;  %v368_v8 = vld [vmem:[#allocation5 + $0x7a8] sm:$0xff] }
 0x398   :  { %11073 = vmatpush3.msra.mxu0 %v16987_v5  ;;  %11051 = vmatprep.subr.mxu1 %v20463_v42  ;;  %20550 = vst [vmem:[#allocation55_spill] sm:$0xff] %v17154_v1  ;;  %20551 = vst [vmem:[#allocation71_spill] sm:$0xff] %v17156_v16  ;;  %v17167_v42 = vadd.f32 %v10551_v24, %v16954_v3  ;;  %v17172_v18 = vsub.f32 %v356_v50, %v17140_v63  ;;  %v20556_v24 = vld [vmem:[#allocation74_spill] sm:$0xff]  ;;  %v20557_v50 = vand.u32 4294901760, %v17096_v32 }
 0x399   :  { %20552 = vst [vmem:[#allocation47_spill] sm:$0xff] %v17159_v60  ;;  %11074 = vmatprep.subr.mxu0 %v16989_v44  ;;  %7828 = vmatprep.mubr.f32.mxu0 %v20553_v57  ;;  %20555 = vst [vmem:[#allocation13_spill] sm:$0xff] %v17176_v52  ;;  %v17179_v55 = vadd.f32 %v10592_v28, %v17052_v9  ;;  %v10552_v3 = vpop.f32.mrf.mxu0  ;;  %v17208_v9 = vand.u32 4294901760, %v354_v23 }
 0x39a   :  { %11052 = vmatpush3.msra.mxu1 %v20465_v26  ;;  %11075 = vmatpush3.msra.mxu0 %v17016_v25  ;;  %20554 = vst [vmem:[#allocation72_spill] sm:$0xff] %v17172_v18  ;;  %v17186_v26 = vsub.f32 %v17101_v59, %v18905_v10  ;;  %v17191_v14 = vsub.f32 %v17096_v32, %v20557_v50  ;;  %20558 = vst [vmem:[#allocation76_spill] sm:$0xff] %v17193_v61  ;;  %v10593_v28 = vpop.f32.mrf.mxu1  ;;  %v20564_v10 = vld [vmem:[#allocation20_spill] sm:$0xff] }
 0x39b   :  { %7830 = vmatmul.mubr.f32.gmra.mxu0 %v20556_v24  ;;  %11053 = vmatprep.subr.mxu1 %v20467_v21  ;;  %v17199_v21 = vsub.f32 %v355_v31, %v17156_v16  ;;  %v17204_v25 = vsub.f32 %v371_v36, %v17154_v1  ;;  %v10553_v50 = vpop.f32.mrf.mxu0  ;;  %20561 = vst [vmem:[#allocation48_spill] sm:$0xff] %v17208_v9  ;;  %v20565_v36 = vand.u32 4294901760, %v17143_v49  ;;  %v73_v32 = vld [vmem:[#allocation2 + $0xf0] sm:$0xff] }
 0x39c   :  { %11076 = vmatprep.subr.mxu0 %v17018_v35  ;;  %11054 = vmatpush3.msra.mxu1 %v16583_v58  ;;  %v17210_v35 = vand.u32 4294901760, %v369_v51  ;;  %v17212_v58 = vand.u32 4294901760, %v353_v47  ;;  %v10554_v31 = vadd.f32 %v10553_v50, %v10552_v3  ;;  %v10594_v44 = vpop.f32.mrf.mxu1  ;;  %v20566_v50 = vand.u32 4294901760, %v17136_v4  ;;  %v20570_v3 = vld [vmem:[#allocation63_spill] sm:$0xff] }
 0x39d   :  { %20559 = vst [vmem:[#allocation18_spill] sm:$0xff] %v17199_v21  ;;  %20560 = vst [vmem:[#allocation61_spill] sm:$0xff] %v17204_v25  ;;  %11077 = vmatpush3.msra.mxu0 %v17020_v20  ;;  %11055 = vmatprep.subr.mxu1 %v16607_v29  ;;  %v17219_v54 = vsub.f32 %v17143_v49, %v20565_v36  ;;  %v10595_v5 = vadd.f32 %v10594_v44, %v10593_v28 }
 0x39e   :  { %20562 = vst [vmem:[#allocation44_spill] sm:$0xff] %v17210_v35  ;;  %20563 = vst [vmem:[#allocation70_spill] sm:$0xff] %v17212_v58  ;;  %11078 = vmatprep.subr.mxu0 %v17057_v53  ;;  %7835 = vmatprep.mubr.f32.mxu0 %v20564_v10  ;;  %v17229_v53 = vsub.f32 %v17136_v4, %v20566_v50  ;;  %v17232_v36 = vsub.f32 %v370_v41, %v17193_v61  ;;  %v352_v50 = vld [vmem:[#allocation5 + $0x728] sm:$0xff]  ;;  %v20574_v41 = vand.u32 4294901760, %v17067_v19 }
 0x39f   :  { %11056 = vmatpush3.msra.mxu1 %v20472_v33  ;;  %7953 = vmatprep.mubr.f32.mxu1 %v20541_v17  ;;  %v17235_v20 = vadd.f32 %v10554_v31, %v16970_v7  ;;  %v20568_v33 = vand.u32 4294901760, %v17159_v60  ;;  %v20569_v17 = vand.u32 4294901760, %v17148_v39  ;;  %v17251_v7 = vadd.f32 %v10595_v5, %v17113_v45  ;;  %v10596_v31 = vpop.f32.mrf.mxu1  ;;  %v367_v5 = vld [vmem:[#allocation5 + $0x7a0] sm:$0xff] }
 0x3a0   :  { %20567 = vst [vmem:[#allocation60_spill] sm:$0xff] %v17232_v36  ;;  %11079 = vmatpush3.msra.mxu0 %v17059_v37  ;;  %7955 = vmatmul.mubr.f32.vlgmr.msra.gmra.mxu1 %v20543_v62  ;;  %v17260_v29 = vsub.f32 %v353_v47, %v17212_v58  ;;  %v17269_v45 = vand.u32 4294901760, %v368_v8  ;;  %v20575_v62 = vand.u32 4294901760, %v17176_v52  ;;  %v20576_v47 = vand.u32 4294901760, %v17172_v18 }
 0x3a1   :  { %v17242_v44 = vsub.f32 %v17159_v60, %v20568_v33  ;;  %v17247_v28 = vsub.f32 %v17148_v39, %v20569_v17  ;;  %7837 = vmatmul.mubr.f32.gmra.mxu0 %v20570_v3  ;;  %11080 = vmatprep.subr.mxu0 %v17088_v15  ;;  %v17257_v33 = vsub.f32 %v354_v23, %v17208_v9  ;;  %v20577_v19 = vand.u32 4294901760, %v17072_v43 }
 0x3a2   :  { %20572 = vst [vmem:[#allocation65_spill] sm:$0xff] %v17260_v29  ;;  %v17263_v17 = vsub.f32 %v369_v51, %v17210_v35  ;;  %11119 = vmatprep.subr.mxu1 %v20574_v41  ;;  %11081 = vmatpush3.msra.mxu0 %v17090_v46  ;;  %v17274_v23 = vsub.f32 %v17176_v52, %v20575_v62  ;;  %v10597_v51 = vpop.f32.mrf.mxu1  ;;  %v17284_v41 = vand.u32 4294901760, %v352_v50  ;;  %v351_v46 = vld [vmem:[#allocation5 + $0x720] sm:$0xff]  ;;  %v20579_v39 = vand.u32 4294901760, %v17077_v11  ;;  %v366_v11 = vld [vmem:[#allocation5 + $0x798] sm:$0xff] }
 0x3a3   :  { %20571 = vst [vmem:[#allocation33_spill] sm:$0xff] %v17257_v33  ;;  %v17279_v15 = vsub.f32 %v17172_v18, %v20576_v47  ;;  %11120 = vmatpush3.msra.mxu1 %v20577_v19  ;;  %11082 = vmatprep.subr.mxu0 %v17110_v38  ;;  %v10598_v52 = vadd.f32 %v10597_v51, %v10596_v31  ;;  %v20580_v47 = vld [vmem:[#allocation75_spill] sm:$0xff]  ;;  %v20581_v38 = vand.u32 4294901760, %v17204_v25  ;;  %v350_v31 = vld [vmem:[#allocation5 + $0x718] sm:$0xff]  ;;  %v20582_v62 = vand.u32 4294901760, %v17121_v0  ;;  %v349_v0 = vld [vmem:[#allocation5 + $0x710] sm:$0xff] }
 0x3a4   :  { %20573 = vst [vmem:[#allocation50_spill] sm:$0xff] %v17263_v17  ;;  %20578 = vst [vmem:[#allocation27_spill] sm:$0xff] %v17284_v41  ;;  %11121 = vmatprep.subr.mxu1 %v20579_v39  ;;  %7842 = vmatprep.mubr.f32.mxu0 %v20580_v47  ;;  %v58_v18 = vld [vmem:[#allocation2 + $0x78] sm:$0xff]  ;;  %v10599_v19 = vpop.f32.mrf.mxu1  ;;  %v17311_v37 = vand.u32 4294901760, %v367_v5  ;;  %v17316_v39 = vsub.f32 %v368_v8, %v17269_v45  ;;  %v20604_v4 = vand.u32 4294901760, %v17191_v14  ;;  %v20610_v49 = vand.u32 4294901760, %v17219_v54 }
 0x3a5   :  { %v17297_v60 = vsub.f32 %v17204_v25, %v20581_v38  ;;  %7960 = vmatprep.mubr.f32.mxu1 %v20553_v57  ;;  %11083 = vmatpush3.msra.mxu0 %v17098_v56  ;;  %v17305_v43 = vadd.f32 %v10598_v52, %v17167_v42  ;;  %v20583_v38 = vld [vmem:[#allocation56_spill] sm:$0xff]  ;;  %v17313_v56 = vand.u32 4294901760, %v351_v46  ;;  %v17321_v52 = vsub.f32 %v352_v50, %v17284_v41 }
 0x3a6   :  { %11122 = vmatpush3.msra.mxu1 %v20582_v62  ;;  %7844 = vmatmul.mubr.f32.gmra.mxu0 %v20583_v38  ;;  %20584 = vst [vmem:[#allocation62_spill] sm:$0xff] %v17311_v37  ;;  %20586 = vst [vmem:[#allocation67_spill] sm:$0xff] %v17316_v39  ;;  %v20588_v42 = vand.u32 4294901760, %v17199_v21  ;;  %v20589_v57 = vand.u32 4294901760, %v17232_v36  ;;  %v10600_v8 = vpop.f32.mrf.mxu1  ;;  %v17340_v25 = vand.u32 4294901760, %v58_v18  ;;  %v20596_v50 = vand.u32 4294901760, %v17263_v17 }
 0x3a7   :  { %20585 = vst [vmem:[#allocation34_spill] sm:$0xff] %v17313_v56  ;;  %7962 = vmatmul.mubr.f32.gmra.mxu1 %v20556_v24  ;;  %11084 = vmatprep.subr.mxu0 %v17138_v22  ;;  %20587 = vst [vmem:[#allocation69_spill] sm:$0xff] %v17321_v52  ;;  %v20590_v24 = vand.u32 4294901760, %v17126_v27  ;;  %v17338_v22 = vand.u32 4294901760, %v350_v31  ;;  %v20595_v27 = vand.u32 4294901760, %v17257_v33  ;;  %v20614_v54 = vand.u32 4294901760, %v17321_v52 }
 0x3a8   :  { %v17327_v62 = vsub.f32 %v17199_v21, %v20588_v42  ;;  %v17332_v51 = vsub.f32 %v17232_v36, %v20589_v57  ;;  %11085 = vmatpush3.msra.mxu0 %v17140_v63  ;;  %20592 = vst [vmem:[#allocation11_spill] sm:$0xff] %v17340_v25  ;;  %v10601_v42 = vadd.f32 %v10600_v8, %v10599_v19  ;;  %v20593_v21 = vand.u32 4294901760, %v17131_v48  ;;  %v365_v63 = vld [vmem:[#allocation5 + $0x790] sm:$0xff] }
 0x3a9   :  { %11123 = vmatprep.subr.mxu1 %v20590_v24  ;;  %20591 = vst [vmem:[#allocation21_spill] sm:$0xff] %v17338_v22  ;;  %11086 = vmatprep.subr.mxu0 %v17154_v1  ;;  %v17345_v57 = vand.u32 4294901760, %v366_v11  ;;  %v17350_v24 = vsub.f32 %v17257_v33, %v20595_v27  ;;  %v17355_v36 = vsub.f32 %v17263_v17, %v20596_v50  ;;  %v20597_v19 = vand.u32 4294901760, %v17260_v29  ;;  %v20599_v1 = vld [vmem:[#allocation28_spill] sm:$0xff]  ;;  %v17368_v33 = vld [vmem:[#allocation5 + $0x788] sm:$0xff] }
 0x3aa   :  { %11124 = vmatpush3.msra.mxu1 %v20593_v21  ;;  %v57_v21 = vld [vmem:[#allocation2 + $0x70] sm:$0xff]  ;;  %v20598_v8 = vand.u32 4294901760, %v17186_v26  ;;  %7849 = vmatprep.mubr.f32.mxu0 %v20599_v1  ;;  %v17366_v27 = vsub.f32 %v351_v46, %v17313_v56  ;;  %v17372_v50 = vsub.f32 %v367_v5, %v17311_v37  ;;  %v17375_v17 = vadd.f32 %v10601_v42, %v17235_v20  ;;  %v20605_v5 = vld [vmem:[#allocation37_spill] sm:$0xff] }
 0x3ab   :  { %20594 = vst [vmem:[#allocation57_spill] sm:$0xff] %v17345_v57  ;;  %v17360_v48 = vsub.f32 %v17260_v29, %v20597_v19  ;;  %7967 = vmatprep.mubr.f32.mxu1 %v20564_v10  ;;  %11087 = vmatpush3.msra.mxu0 %v17156_v16  ;;  %v17381_v46 = vand.u32 4294901760, %v349_v0  ;;  %v17388_v20 = vsub.f32 %v350_v31, %v17338_v22  ;;  %v17390_v10 = vand.u32 4294901760, %v365_v63  ;;  %v74_v19 = vld [vmem:[#allocation2 + $0xf8] sm:$0xff]  ;;  %v17405_v16 = vld [vmem:[#allocation5 + $0x780] sm:$0xff] }
 0x3ac   :  { %11125 = vmatprep.subr.mxu1 %v20598_v8  ;;  %20600 = vst [vmem:[#allocation32_spill] sm:$0xff] %v17366_v27  ;;  %20601 = vst [vmem:[#allocation54_spill] sm:$0xff] %v17372_v50  ;;  %v348_v8 = vld [vmem:[#allocation5 + $0x708] sm:$0xff]  ;;  %7851 = vmatmul.mubr.f32.gmra.mxu0 %v20605_v5  ;;  %v17393_v42 = vsub.f32 %v58_v18, %v17340_v25  ;;  %v17395_v26 = vand.u32 4294901760, %v57_v21  ;;  %v17403_v31 = vand.u32 4294901760, %v17368_v33  ;;  %v347_v18 = vld [vmem:[#allocation5 + $0x700] sm:$0xff] }
 0x3ad   :  { %20602 = vst [vmem:[#allocation29_spill] sm:$0xff] %v17375_v17  ;;  %20603 = vst [vmem:[#allocation59_spill] sm:$0xff] %v17381_v46  ;;  %11126 = vmatpush3.msra.mxu1 %v20604_v4  ;;  %11088 = vmatprep.subr.mxu0 %v17193_v61  ;;  %v17415_v14 = vand.u32 4294901760, %v348_v8  ;;  %v17419_v4 = vsub.f32 %v366_v11, %v17345_v57  ;;  %v10634_v17 = vpop.f32.mrf.mxu0  ;;  %v20612_v25 = vand.u32 4294901760, %v17229_v53  ;;  %v20616_v11 = vand.u32 4294901760, %v17242_v44 }
 0x3ae   :  { %20606 = vst [vmem:[#allocation41_spill] sm:$0xff] %v17390_v10  ;;  %20607 = vst [vmem:[#allocation36_spill] sm:$0xff] %v17393_v42  ;;  %7969 = vmatmul.mubr.f32.gmra.mxu1 %v20570_v3  ;;  %11127 = vmatprep.subr.mxu1 %v20610_v49  ;;  %v20611_v3 = vand.u32 4294901760, %v17316_v39  ;;  %v17425_v49 = vsub.f32 %v349_v0, %v17381_v46  ;;  %v17441_v53 = vand.u32 4294901760, %v347_v18  ;;  %v20619_v29 = vand.u32 4294901760, %v17247_v28 }
 0x3af   :  { %20608 = vst [vmem:[#allocation53_spill] sm:$0xff] %v17395_v26  ;;  %20609 = vst [vmem:[#allocation45_spill] sm:$0xff] %v17403_v31  ;;  %11089 = vmatpush3.msra.mxu0 %v17208_v9  ;;  %11128 = vmatpush3.msra.mxu1 %v20612_v25  ;;  %v17433_v9 = vand.u32 4294901760, %v74_v19  ;;  %v17439_v25 = vand.u32 4294901760, %v17405_v16  ;;  %v17460_v0 = vsub.f32 %v348_v8, %v17415_v14  ;;  %v20623_v44 = vand.u32 4294901760, %v17274_v23 }
 0x3b0   :  { %v17413_v61 = vsub.f32 %v17316_v39, %v20611_v3  ;;  %11090 = vmatprep.subr.mxu0 %v17210_v35  ;;  %20613 = vst [vmem:[#allocation66_spill] sm:$0xff] %v17425_v49  ;;  %v17430_v3 = vsub.f32 %v17321_v52, %v20614_v54  ;;  %11129 = vmatprep.subr.mxu1 %v20616_v11  ;;  %20617 = vst [vmem:[#allocation25_spill] sm:$0xff] %v17441_v53  ;;  %v10635_v54 = vpop.f32.mrf.mxu0  ;;  %v17454_v11 = vand.u32 4294901760, %v73_v32  ;;  %v90_v52 = vld [vmem:[#allocation2 + $0x178] sm:$0xff] }
 0x3b1   :  { %20615 = vst [vmem:[#allocation42_spill] sm:$0xff] %v17433_v9  ;;  %7974 = vmatprep.mubr.f32.mxu1 %v20580_v47  ;;  %v17445_v35 = vsub.f32 %v57_v21, %v17395_v26  ;;  %11091 = vmatpush3.msra.mxu0 %v17212_v58  ;;  %v17452_v47 = vsub.f32 %v365_v63, %v17390_v10  ;;  %20621 = vst [vmem:[#allocation15_spill] sm:$0xff] %v17460_v0  ;;  %v20625_v63 = vand.u32 4294901760, %v17279_v15 }
 0x3b2   :  { %11130 = vmatpush3.msra.mxu1 %v20619_v29  ;;  %20620 = vst [vmem:[#allocation68_spill] sm:$0xff] %v17454_v11  ;;  %v10636_v39 = vadd.f32 %v10635_v54, %v10634_v17  ;;  %11092 = vmatprep.subr.mxu0 %v17269_v45  ;;  %v20622_v29 = vand.u32 4294901760, %v17372_v50  ;;  %v17478_v8 = vsub.f32 %v74_v19, %v17433_v9  ;;  %v10637_v21 = vpop.f32.mrf.mxu0  ;;  %v17495_v17 = vand.u32 4294901760, %v90_v52 }
 0x3b3   :  { %20618 = vst [vmem:[#allocation24_spill] sm:$0xff] %v17445_v35  ;;  %7976 = vmatmul.mubr.f32.gmra.mxu1 %v20583_v38  ;;  %11131 = vmatprep.subr.mxu1 %v20623_v44  ;;  %v20624_v38 = vand.u32 4294901760, %v17366_v27  ;;  %v17487_v23 = vsub.f32 %v347_v18, %v17441_v53  ;;  %v20627_v44 = vand.u32 4294901760, %v17393_v42  ;;  %v20630_v15 = vand.u32 4294901760, %v17388_v20 }
 0x3b4   :  { %v17465_v28 = vsub.f32 %v17372_v50, %v20622_v29  ;;  %11093 = vmatpush3.msra.mxu0 %v17284_v41  ;;  %v17481_v29 = vadd.f32 %v10636_v39, %v17103_v30  ;;  %11132 = vmatpush3.msra.mxu1 %v20625_v63  ;;  %20628 = vst [vmem:[#allocation40_spill] sm:$0xff] %v17495_v17  ;;  %v89_v30 = vld [vmem:[#allocation2 + $0x170] sm:$0xff]  ;;  %v20629_v39 = vand.u32 4294901760, %v17297_v60  ;;  %v20632_v60 = vand.u32 4294901760, %v17327_v62 }
 0x3b5   :  { %v17475_v54 = vsub.f32 %v17366_v27, %v20624_v38  ;;  %11094 = vmatprep.subr.mxu0 %v17311_v37  ;;  %20626 = vst [vmem:[#allocation17_spill] sm:$0xff] %v17487_v23  ;;  %v17492_v38 = vsub.f32 %v17393_v42, %v20627_v44  ;;  %7981 = vmatprep.mubr.f32.mxu1 %v20599_v1  ;;  %v10638_v42 = vpop.f32.mrf.mxu0 }
 0x3b6   :  { %11133 = vmatprep.subr.mxu1 %v20629_v39  ;;  %v17503_v18 = vsub.f32 %v17388_v20, %v20630_v15  ;;  %v17507_v44 = vsub.f32 %v73_v32, %v17454_v11  ;;  %v17511_v19 = vsub.f32 %v17368_v33, %v17403_v31  ;;  %11095 = vmatpush3.msra.mxu0 %v17313_v56  ;;  %v8354_v1 = vand.u32 4294901760, %v17465_v28 }
 0x3b7   :  { %11134 = vmatpush3.msra.mxu1 %v20632_v60  ;;  %v20633_v39 = vand.u32 4294901760, %v17419_v4  ;;  %v10639_v63 = vadd.f32 %v10638_v42, %v10637_v21  ;;  %11096 = vmatprep.subr.mxu0 %v17345_v57  ;;  %v8242_v33 = vand.u32 4294901760, %v17475_v54  ;;  %v17529_v62 = vsub.f32 %v17405_v16, %v17439_v25  ;;  %v106_v60 = vld [vmem:[#allocation2 + $0x1f8] sm:$0xff]  ;;  %v10681_v56 = vpop.f32.mrf.mxu1 }
 0x3b8   :  { %20631 = vst [vmem:[#allocation12_spill] sm:$0xff] %v17511_v19  ;;  %7983 = vmatmul.mubr.f32.gmra.mxu1 %v20605_v5  ;;  %v17531_v28 = vand.u32 4294901760, %v89_v30  ;;  %11097 = vmatpush3.msra.mxu0 %v17338_v22  ;;  %v8088_v5 = vand.u32 4294901760, %v17492_v38  ;;  %v20637_v42 = vand.u32 4294901760, %v17445_v35  ;;  %v17541_v54 = vsub.f32 %v90_v52, %v17495_v17  ;;  %v105_v22 = vld [vmem:[#allocation2 + $0x1f0] sm:$0xff]  ;;  %v10640_v57 = vpop.f32.mrf.mxu0 }
 0x3b9   :  { %v17520_v15 = vsub.f32 %v17419_v4, %v20633_v39  ;;  %20634 = vst [vmem:[#allocation51_spill] sm:$0xff] %v17529_v62  ;;  %v20636_v39 = vand.u32 4294901760, %v17332_v51  ;;  %v17544_v16 = vadd.f32 %v10639_v63, %v17179_v55  ;;  %v20639_v32 = vand.u32 4294901760, %v17350_v24  ;;  %11098 = vmatprep.subr.mxu0 %v17390_v10 }
 0x3ba   :  { %20635 = vst [vmem:[#allocation19_spill] sm:$0xff] %v17531_v28  ;;  %v8093_v21 = vsub.f32 %v17445_v35, %v20637_v42  ;;  %20638 = vst [vmem:[#allocation74_spill] sm:$0xff] %v17541_v54  ;;  %v8249_v51 = vand.u32 4294901760, %v17503_v18  ;;  %v20640_v38 = vand.u32 4294901760, %v17452_v47  ;;  %v20641_v55 = vand.u32 4294901760, %v17355_v36  ;;  %11099 = vmatpush3.msra.mxu0 %v17381_v46  ;;  %v10682_v42 = vpop.f32.mrf.mxu1  ;;  %8089 = vmatprep.mubr.f32.mxu0 %v8088_v5 }
 0x3bb   :  { %11135 = vmatprep.subr.mxu1 %v20636_v39  ;;  %v8361_v24 = vand.u32 4294901760, %v17520_v15  ;;  %v20642_v63 = vand.u32 4294901760, %v17425_v49  ;;  %v20644_v52 = vand.u32 4294901760, %v17360_v48  ;;  %11100 = vmatprep.subr.mxu0 %v17403_v31  ;;  %v20645_v36 = vand.u32 4294901760, %v17478_v8 }
 0x3bc   :  { %11136 = vmatpush3.msra.mxu1 %v20639_v32  ;;  %v8367_v39 = vsub.f32 %v17452_v47, %v20640_v38  ;;  %v17565_v38 = vand.u32 4294901760, %v106_v60  ;;  %v18992_v15 = vand.u32 4294901760, %v17529_v62  ;;  %v17575_v46 = vsub.f32 %v89_v30, %v17531_v28  ;;  %11101 = vmatpush3.msra.mxu0 %v17415_v14 }
 0x3bd   :  { %11137 = vmatprep.subr.mxu1 %v20641_v55  ;;  %v17562_v18 = vsub.f32 %v17425_v49, %v20642_v63  ;;  %v8102_v55 = vsub.f32 %v17478_v8, %v20645_v36  ;;  %v10641_v63 = vpop.f32.mrf.mxu0  ;;  %v10683_v10 = vadd.f32 %v10682_v42, %v10681_v56  ;;  %v20646_v32 = vand.u32 4294901760, %v17413_v61  ;;  %11102 = vmatprep.subr.mxu0 %v17439_v25 }
 0x3be   :  { %20643 = vst [vmem:[#allocation20_spill] sm:$0xff] %v17565_v38  ;;  %11138 = vmatpush3.msra.mxu1 %v20644_v52  ;;  %v8094_v48 = vand.u32 4294901760, %v8093_v21  ;;  %v17581_v31 = vand.u32 4294901760, %v105_v22  ;;  %v10642_v35 = vadd.f32 %v10641_v63, %v10640_v57  ;;  %v20648_v36 = vand.u32 4294901760, %v17430_v3  ;;  %11103 = vmatpush3.msra.mxu0 %v17441_v53 }
 0x3bf   :  { %11139 = vmatprep.subr.mxu1 %v20646_v32  ;;  %v20649_v30 = vand.u32 4294901760, %v17507_v44  ;;  %v20650_v61 = vand.u32 4294901760, %v17511_v19  ;;  %v122_v32 = vld [vmem:[#allocation2 + $0x278] sm:$0xff]  ;;  %v17594_v52 = vadd.f32 %v10683_v10, %v17481_v29  ;;  %v8368_v57 = vand.u32 4294901760, %v8367_v39  ;;  %v10684_v39 = vpop.f32.mrf.mxu1  ;;  %11166 = vmatprep.subr.mxu0 %v17008_v6 }
 0x3c0   :  { %20647 = vst [vmem:[#allocation63_spill] sm:$0xff] %v17581_v31  ;;  %11140 = vmatpush3.msra.mxu1 %v20648_v36  ;;  %v20651_v3 = vand.u32 4294901760, %v17460_v0  ;;  %v17601_v36 = vsub.f32 %v106_v60, %v17565_v38  ;;  %v8103_v21 = vand.u32 4294901760, %v8102_v55  ;;  %v8381_v10 = vsub.f32 %v17529_v62, %v18992_v15  ;;  %8095 = vmatmul.mubr.f32.vlgmr.msra.gmra.mxu0 %v8094_v48 }
 0x3c1   :  { %v8108_v56 = vsub.f32 %v17507_v44, %v20649_v30  ;;  %v8374_v42 = vsub.f32 %v17511_v19, %v20650_v61  ;;  %11141 = vmatprep.subr.mxu1 %v8354_v1  ;;  %v17604_v30 = vadd.f32 %v10642_v35, %v17251_v7  ;;  %v10643_v61 = vpop.f32.mrf.mxu0  ;;  %v121_v1 = vld [vmem:[#allocation2 + $0x270] sm:$0xff]  ;;  %v8256_v60 = vand.u32 4294901760, %v17562_v18  ;;  %v10685_v29 = vpop.f32.mrf.mxu1  ;;  %11167 = vmatpush3.msra.mxu0 %v17005_v2 }
 0x3c2   :  { %v8262_v63 = vsub.f32 %v17460_v0, %v20651_v3  ;;  %11142 = vmatpush3.msra.mxu1 %v8242_v33  ;;  %v20652_v3 = vand.u32 4294901760, %v17541_v54  ;;  %v17615_v7 = vsub.f32 %v105_v22, %v17581_v31  ;;  %v17617_v33 = vand.u32 4294901760, %v122_v32  ;;  %11168 = vmatprep.subr.mxu0 %v17011_v12 }
 0x3c3   :  { %11143 = vmatprep.subr.mxu1 %v8361_v24  ;;  %v10644_v5 = vpop.f32.mrf.mxu0  ;;  %v8109_v55 = vand.u32 4294901760, %v8108_v56  ;;  %v8375_v15 = vand.u32 4294901760, %v8374_v42  ;;  %v20654_v48 = vand.u32 4294901760, %v17487_v23  ;;  %v18999_v22 = vand.u32 4294901760, %v17601_v36  ;;  %8104 = vmatprep.mubr.f32.mxu0 %v8103_v21 }
 0x3c4   :  { %v8117_v35 = vsub.f32 %v17541_v54, %v20652_v3  ;;  %20653 = vst [vmem:[#allocation75_spill] sm:$0xff] %v17617_v33  ;;  %11144 = vmatpush3.msra.mxu1 %v8249_v51  ;;  %v10645_v18 = vadd.f32 %v10644_v5, %v10643_v61  ;;  %v8263_v3 = vand.u32 4294901760, %v8262_v63  ;;  %v17625_v53 = vand.u32 4294901760, %v121_v1  ;;  %11169 = vmatpush3.msra.mxu0 %v17040_v34 }
 0x3c5   :  { %v8269_v24 = vsub.f32 %v17487_v23, %v20654_v48  ;;  %11145 = vmatprep.subr.mxu1 %v8368_v57  ;;  %v10686_v54 = vadd.f32 %v10685_v29, %v10684_v39  ;;  %v8382_v51 = vand.u32 4294901760, %v8381_v10  ;;  %v20656_v56 = vand.u32 4294901760, %v17575_v46  ;;  %v10646_v21 = vpop.f32.mrf.mxu0  ;;  %8110 = vmatmul.mubr.f32.gmra.mxu0 %v8109_v55  ;;  %v10687_v39 = vpop.f32.mrf.mxu1 }
 0x3c6   :  { %20655 = vst [vmem:[#allocation56_spill] sm:$0xff] %v17625_v53  ;;  %v6410_v61 = vadd.f32 %v10645_v18, %v17305_v43  ;;  %11146 = vmatpush3.msra.mxu1 %v8256_v60  ;;  %v8118_v57 = vand.u32 4294901760, %v8117_v35  ;;  %v18997_v63 = vand.u32 4294901760, %v17615_v7  ;;  %v17635_v5 = vsub.f32 %v122_v32, %v17617_v33  ;;  %11170 = vmatprep.subr.mxu0 %v17046_v40 }
 0x3c7   :  { %v8123_v42 = vsub.f32 %v17575_v46, %v20656_v56  ;;  %v17638_v29 = vadd.f32 %v10686_v54, %v17544_v16  ;;  %11147 = vmatprep.subr.mxu1 %v8375_v15  ;;  %v8270_v10 = vand.u32 4294901760, %v8269_v24  ;;  %v8132_v43 = vsub.f32 %v17601_v36, %v18999_v22  ;;  %v10647_v32 = vpop.f32.mrf.mxu0  ;;  %11171 = vmatpush3.msra.mxu0 %v17043_v13  ;;  %v10688_v35 = vpop.f32.mrf.mxu1  ;;  %v20660_v24 = vld [vmem:[#allocation29_spill] sm:$0xff]  ;;  %v20669_v22 = vld [vmem:[#allocation35_spill] sm:$0xff] }
 0x3c8   :  { %20657 = vst [vmem:[#allocation28_spill] sm:$0xff] %v17635_v5  ;;  %11148 = vmatpush3.msra.mxu1 %v8263_v3  ;;  %v17645_v60 = vsub.f32 %v121_v1, %v17625_v53  ;;  %v10648_v16 = vadd.f32 %v10647_v32, %v10646_v21  ;;  %11172 = vmatprep.subr.mxu0 %v17101_v59  ;;  %v18998_v55 = vand.u32 4294901760, %v17635_v5  ;;  %v20659_v1 = vld [vmem:[#allocation11_spill] sm:$0xff] }
 0x3c9   :  { %11149 = vmatprep.subr.mxu1 %v8382_v51  ;;  %v8124_v54 = vand.u32 4294901760, %v8123_v42  ;;  %8119 = vmatprep.mubr.f32.mxu0 %v8118_v57  ;;  %v8138_v15 = vsub.f32 %v17615_v7, %v18997_v63  ;;  %v10689_v48 = vadd.f32 %v10688_v35, %v10687_v39  ;;  %v20661_v3 = vld [vmem:[#allocation31_spill] sm:$0xff]  ;;  %v8133_v51 = vand.u32 4294901760, %v8132_v43  ;;  %v10690_v57 = vpop.f32.mrf.mxu1  ;;  %v20663_v39 = vld [vmem:[#allocation49_spill] sm:$0xff]  ;;  %v20665_v43 = vld [vmem:[#allocation58_spill] sm:$0xff] }
 0x3ca   :  { %20658 = vst [vmem:[#allocation37_spill] sm:$0xff] %v17645_v60  ;;  %11150 = vmatpush3.msra.mxu1 %v8270_v10  ;;  %8385 = vmatprep.mubr.f32.mxu1 %v20659_v1  ;;  %v6419_v18 = vadd.f32 %v10648_v16, %v20660_v24  ;;  %v19002_v56 = vand.u32 4294901760, %v17645_v60  ;;  %v20662_v21 = vld [vmem:[#allocation43_spill] sm:$0xff]  ;;  %v20664_v10 = vld [vmem:[#allocation26_spill] sm:$0xff]  ;;  %v8147_v16 = vsub.f32 %v17635_v5, %v18998_v55  ;;  %v20672_v1 = vld [vmem:[#allocation72_spill] sm:$0xff] }
 0x3cb   :  { %11173 = vmatpush3.msra.mxu0 %v20661_v3  ;;  %8387 = vmatmul.mubr.f32.vlgmr.msra.gmra.mxu1 %v17395_v26  ;;  %v17659_v42 = vadd.f32 %v10689_v48, %v17604_v30  ;;  %v8139_v32 = vand.u32 4294901760, %v8138_v15  ;;  %v10691_v35 = vpop.f32.mrf.mxu1  ;;  %v20666_v24 = vld [vmem:[#allocation47_spill] sm:$0xff]  ;;  %v20667_v48 = vld [vmem:[#allocation16_spill] sm:$0xff]  ;;  %v20668_v15 = vld [vmem:[#allocation22_spill] sm:$0xff] }
 0x3cc   :  { %8125 = vmatmul.mubr.f32.gmra.mxu0 %v8124_v54  ;;  %11174 = vmatprep.subr.mxu0 %v20662_v21  ;;  %v10692_v30 = vadd.f32 %v10691_v35, %v10690_v57  ;;  %v8153_v54 = vsub.f32 %v17645_v60, %v19002_v56  ;;  %v8148_v26 = vand.u32 4294901760, %v8147_v16  ;;  %v20670_v57 = vld [vmem:[#allocation13_spill] sm:$0xff]  ;;  %v20671_v35 = vld [vmem:[#allocation23_spill] sm:$0xff]  ;;  %v20676_v16 = vld [vmem:[#allocation18_spill] sm:$0xff] }
 0x3cd   :  { %11213 = vmatprep.subr.mxu1 %v20663_v39  ;;  %11175 = vmatpush3.msra.mxu0 %v20664_v10  ;;  %v20673_v60 = vld [vmem:[#allocation73_spill] sm:$0xff] }
 0x3ce   :  { %11214 = vmatpush3.msra.mxu1 %v20665_v43  ;;  %11176 = vmatprep.subr.mxu0 %v20666_v24  ;;  %v17675_v63 = vadd.f32 %v10692_v30, %v6410_v61  ;;  %v10693_v55 = vpop.f32.mrf.mxu1  ;;  %v8154_v56 = vand.u32 4294901760, %v8153_v54  ;;  %v20674_v61 = vld [vmem:[#allocation61_spill] sm:$0xff]  ;;  %v20675_v30 = vld [vmem:[#allocation14_spill] sm:$0xff]  ;;  %v20678_v54 = vld [vmem:[#allocation60_spill] sm:$0xff] }
 0x3cf   :  { %11215 = vmatprep.subr.mxu1 %v20667_v48  ;;  %8134 = vmatprep.mubr.f32.mxu0 %v8133_v51 }
 0x3d0   :  { %8392 = vmatprep.mubr.f32.mxu1 %v17433_v9  ;;  %11177 = vmatpush3.msra.mxu0 %v20668_v15  ;;  %v10694_v51 = vpop.f32.mrf.mxu1 }
 0x3d1   :  { %11216 = vmatpush3.msra.mxu1 %v20669_v22  ;;  %8140 = vmatmul.mubr.f32.gmra.mxu0 %v8139_v32  ;;  %v10695_v9 = vadd.f32 %v10694_v51, %v10693_v55  ;;  %v20679_v55 = vld [vmem:[#allocation39_spill] sm:$0xff]  ;;  %v20680_v51 = vld [vmem:[#allocation33_spill] sm:$0xff] }
 0x3d2   :  { %8394 = vmatmul.mubr.f32.gmra.mxu1 %v17454_v11  ;;  %11178 = vmatprep.subr.mxu0 %v20670_v57  ;;  %v20677_v11 = vld [vmem:[#allocation30_spill] sm:$0xff] }
 0x3d3   :  { %11217 = vmatprep.subr.mxu1 %v20671_v35  ;;  %11179 = vmatpush3.msra.mxu0 %v20672_v1  ;;  %v17685_v32 = vadd.f32 %v10695_v9, %v6419_v18  ;;  %v20682_v9 = vld [vmem:[#allocation50_spill] sm:$0xff] }
 0x3d4   :  { %11218 = vmatpush3.msra.mxu1 %v20673_v60  ;;  %11180 = vmatprep.subr.mxu0 %v20674_v61 }
 0x3d5   :  { %11219 = vmatprep.subr.mxu1 %v20675_v30  ;;  %8149 = vmatprep.mubr.f32.mxu0 %v8148_v26  ;;  %v20681_v30 = vld [vmem:[#allocation38_spill] sm:$0xff]  ;;  %v20683_v26 = vld [vmem:[#allocation77_spill] sm:$0xff] }
 0x3d6   :  { %8399 = vmatprep.mubr.f32.mxu1 %v17495_v17  ;;  %11181 = vmatpush3.msra.mxu0 %v20676_v16  ;;  %v20684_v17 = vld [vmem:[#allocation65_spill] sm:$0xff] }
 0x3d7   :  { %11220 = vmatpush3.msra.mxu1 %v20677_v11  ;;  %8155 = vmatmul.mubr.f32.gmra.mxu0 %v8154_v56  ;;  %v10728_v5 = vpop.f32.mrf.mxu0  ;;  %v20685_v56 = vld [vmem:[#allocation52_spill] sm:$0xff] }
 0x3d8   :  { %8401 = vmatmul.mubr.f32.gmra.mxu1 %v17531_v28  ;;  %11182 = vmatprep.subr.mxu0 %v20678_v54  ;;  %v20688_v54 = vld [vmem:[#allocation69_spill] sm:$0xff] }
 0x3d9   :  { %11221 = vmatprep.subr.mxu1 %v20679_v55  ;;  %11183 = vmatpush3.msra.mxu0 %v20680_v51  ;;  %v10729_v18 = vpop.f32.mrf.mxu0  ;;  %v20686_v55 = vld [vmem:[#allocation67_spill] sm:$0xff]  ;;  %v20687_v51 = vld [vmem:[#allocation46_spill] sm:$0xff] }
 0x3da   :  { %11222 = vmatpush3.msra.mxu1 %v20681_v30  ;;  %11184 = vmatprep.subr.mxu0 %v20682_v9  ;;  %v10730_v28 = vadd.f32 %v10729_v18, %v10728_v5  ;;  %v20691_v18 = vld [vmem:[#allocation71_spill] sm:$0xff] }
 0x3db   :  { %11223 = vmatprep.subr.mxu1 %v20683_v26  ;;  %8406 = vmatprep.mubr.f32.mxu1 %v17565_v38  ;;  %v20689_v26 = vld [vmem:[#allocation64_spill] sm:$0xff]  ;;  %v20690_v38 = vld [vmem:[#allocation55_spill] sm:$0xff] }
 0x3dc   :  { %11185 = vmatpush3.msra.mxu0 %v20684_v17  ;;  %11224 = vmatpush3.msra.mxu1 %v20685_v56  ;;  %v6739_v9 = vadd.f32 %v10730_v28, %v17594_v52  ;;  %v10731_v30 = vpop.f32.mrf.mxu0  ;;  %v20692_v28 = vld [vmem:[#allocation76_spill] sm:$0xff] }
 0x3dd   :  { %8408 = vmatmul.mubr.f32.gmra.mxu1 %v17581_v31  ;;  %11186 = vmatprep.subr.mxu0 %v20686_v55 }
 0x3de   :  { %11225 = vmatprep.subr.mxu1 %v20687_v51  ;;  %11187 = vmatpush3.msra.mxu0 %v20688_v54  ;;  %v10732_v5 = vpop.f32.mrf.mxu0 }
 0x3df   :  { %11226 = vmatpush3.msra.mxu1 %v20689_v26  ;;  %11188 = vmatprep.subr.mxu0 %v17372_v50  ;;  %v10733_v31 = vadd.f32 %v10732_v5, %v10731_v30 }
 0x3e0   :  { %11227 = vmatprep.subr.mxu1 %v20690_v38  ;;  %8413 = vmatprep.mubr.f32.mxu1 %v17617_v33  ;;  %v20693_v38 = vld [vmem:[#allocation48_spill] sm:$0xff] }
 0x3e1   :  { %11189 = vmatpush3.msra.mxu0 %v17366_v27  ;;  %11228 = vmatpush3.msra.mxu1 %v20691_v18  ;;  %v6746_v52 = vadd.f32 %v10733_v31, %v17638_v29  ;;  %v10775_v50 = vpop.f32.mrf.mxu1  ;;  %v20694_v27 = vld [vmem:[#allocation44_spill] sm:$0xff] }
 0x3e2   :  { %8415 = vmatmul.mubr.f32.gmra.mxu1 %v17625_v53  ;;  %11190 = vmatprep.subr.mxu0 %v17419_v4  ;;  %v10734_v33 = vpop.f32.mrf.mxu0 }
 0x3e3   :  { %11229 = vmatprep.subr.mxu1 %v20692_v28  ;;  %11191 = vmatpush3.msra.mxu0 %v17388_v20  ;;  %v10776_v30 = vpop.f32.mrf.mxu1 }
 0x3e4   :  { %11230 = vmatpush3.msra.mxu1 %v20693_v38  ;;  %11192 = vmatprep.subr.mxu0 %v17452_v47  ;;  %v10735_v5 = vpop.f32.mrf.mxu0  ;;  %v10777_v53 = vadd.f32 %v10776_v30, %v10775_v50  ;;  %v20696_v50 = vld [vmem:[#allocation34_spill] sm:$0xff] }
 0x3e5   :  { %11231 = vmatprep.subr.mxu1 %v20694_v27  ;;  %11193 = vmatpush3.msra.mxu0 %v17425_v49  ;;  %v10736_v31 = vadd.f32 %v10735_v5, %v10734_v33  ;;  %v20695_v49 = vld [vmem:[#allocation36_spill] sm:$0xff]  ;;  %v20698_v33 = vld [vmem:[#allocation57_spill] sm:$0xff] }
 0x3e6   :  { %11232 = vmatpush3.msra.mxu1 %v17212_v58  ;;  %11194 = vmatprep.subr.mxu0 %v17511_v19  ;;  %v17726_v29 = vadd.f32 %v10777_v53, %v6739_v9  ;;  %v20699_v53 = vand.u32 4294901760, %v17008_v6  ;;  %v20700_v9 = vld [vmem:[#allocation21_spill] sm:$0xff]  ;;  %v20705_v6 = vand.u32 4294901760, %v17040_v34 }
 0x3e7   :  { %11233 = vmatprep.subr.mxu1 %v17269_v45  ;;  %11195 = vmatpush3.msra.mxu0 %v17460_v0  ;;  %v6753_v58 = vadd.f32 %v10736_v31, %v17659_v42  ;;  %v10737_v19 = vpop.f32.mrf.mxu0  ;;  %v20697_v0 = vld [vmem:[#allocation24_spill] sm:$0xff]  ;;  %v20701_v42 = vand.u32 4294901760, %v17005_v2  ;;  %v20702_v31 = vld [vmem:[#allocation41_spill] sm:$0xff] }
 0x3e8   :  { %11234 = vmatpush3.msra.mxu1 %v17284_v41  ;;  %11196 = vmatprep.subr.mxu0 %v17529_v62  ;;  %v10778_v30 = vpop.f32.mrf.mxu1  ;;  %v20704_v41 = vld [vmem:[#allocation59_spill] sm:$0xff]  ;;  %v20706_v2 = vld [vmem:[#allocation45_spill] sm:$0xff] }
 0x3e9   :  { %11235 = vmatprep.subr.mxu1 %v17311_v37  ;;  %11197 = vmatpush3.msra.mxu0 %v17487_v23  ;;  %v10738_v5 = vpop.f32.mrf.mxu0 }
 0x3ea   :  { %8550 = vmatprep.mubr.f32.mxu0 %v20695_v49  ;;  %11236 = vmatpush3.msra.mxu1 %v20696_v50  ;;  %v10739_v37 = vadd.f32 %v10738_v5, %v10737_v19  ;;  %v10779_v23 = vpop.f32.mrf.mxu1  ;;  %v20703_v50 = vand.u32 4294901760, %v17011_v12  ;;  %v20707_v12 = vand.u32 4294901760, %v17046_v40  ;;  %v20712_v40 = vand.u32 4294901760, %v20695_v49 }
 0x3eb   :  { %8553 = vmatmul.mubr.f32.vlgmr.msra.gmra.mxu0 %v20697_v0  ;;  %11237 = vmatprep.subr.mxu1 %v20698_v33  ;;  %v10780_v62 = vadd.f32 %v10779_v23, %v10778_v30  ;;  %v20716_v49 = vand.u32 4294901760, %v20664_v10 }
 0x3ec   :  { %11260 = vmatprep.subr.mxu0 %v20699_v53  ;;  %11238 = vmatpush3.msra.mxu1 %v20700_v9  ;;  %v6760_v33 = vadd.f32 %v10739_v37, %v17675_v63  ;;  %v20708_v37 = vand.u32 4294901760, %v17043_v13  ;;  %v20709_v63 = vand.u32 4294901760, %v17101_v59  ;;  %v20711_v53 = vld [vmem:[#allocation25_spill] sm:$0xff]  ;;  %v20713_v13 = vand.u32 4294901760, %v20661_v3 }
 0x3ed   :  { %11261 = vmatpush3.msra.mxu0 %v20701_v42  ;;  %11239 = vmatprep.subr.mxu1 %v20702_v31  ;;  %v17748_v19 = vadd.f32 %v10780_v62, %v6746_v52  ;;  %v10740_v5 = vpop.f32.mrf.mxu0  ;;  %v20710_v52 = vld [vmem:[#allocation74_spill] sm:$0xff]  ;;  %v20717_v3 = vand.u32 4294901760, %v20666_v24  ;;  %v20721_v24 = vand.u32 4294901760, %v20670_v57 }
 0x3ee   :  { %11262 = vmatprep.subr.mxu0 %v20703_v50  ;;  %8559 = vmatprep.mubr.f32.mxu0 %v17478_v8  ;;  %v20726_v57 = vand.u32 4294901760, %v20710_v52 }
 0x3ef   :  { %11240 = vmatpush3.msra.mxu1 %v20704_v41  ;;  %11263 = vmatpush3.msra.mxu0 %v20705_v6  ;;  %v10781_v23 = vpop.f32.mrf.mxu1  ;;  %v10741_v50 = vpop.f32.mrf.mxu0  ;;  %v20714_v6 = vand.u32 4294901760, %v20697_v0 }
 0x3f0   :  { %8562 = vmatmul.mubr.f32.gmra.mxu0 %v17507_v44  ;;  %11241 = vmatprep.subr.mxu1 %v20706_v2  ;;  %v10742_v34 = vadd.f32 %v10741_v50, %v10740_v5 }
 0x3f1   :  { %11264 = vmatprep.subr.mxu0 %v20707_v12  ;;  %11242 = vmatpush3.msra.mxu1 %v17415_v14  ;;  %v10782_v62 = vpop.f32.mrf.mxu1  ;;  %v20725_v12 = vld [vmem:[#allocation28_spill] sm:$0xff] }
 0x3f2   :  { %11265 = vmatpush3.msra.mxu0 %v20708_v37  ;;  %11243 = vmatprep.subr.mxu1 %v17439_v25  ;;  %v10783_v30 = vadd.f32 %v10782_v62, %v10781_v23  ;;  %v6767_v42 = vadd.f32 %v10742_v34, %v17685_v32  ;;  %v20715_v23 = vand.u32 4294901760, %v20662_v21  ;;  %v20719_v21 = vand.u32 4294901760, %v20668_v15  ;;  %v20732_v37 = vld [vmem:[#allocation39_spill] sm:$0xff]  ;;  %v20733_v34 = vld [vmem:[#allocation33_spill] sm:$0xff] }
 0x3f3   :  { %11266 = vmatprep.subr.mxu0 %v20709_v63  ;;  %8568 = vmatprep.mubr.f32.mxu0 %v20710_v52  ;;  %v20734_v62 = vand.u32 4294901760, %v20733_v34  ;;  %v20735_v52 = vld [vmem:[#allocation38_spill] sm:$0xff]  ;;  %v20769_v34 = vld [vmem:[#allocation53_spill] sm:$0xff] }
 0x3f4   :  { %11244 = vmatpush3.msra.mxu1 %v20711_v53  ;;  %8693 = vmatprep.mubr.f32.mxu1 %v20712_v40  ;;  %v17769_v5 = vadd.f32 %v10783_v30, %v6753_v58  ;;  %v10784_v59 = vpop.f32.mrf.mxu1  ;;  %v20718_v58 = vand.u32 4294901760, %v17478_v8  ;;  %v20722_v8 = vand.u32 4294901760, %v20672_v1  ;;  %v20728_v1 = vld [vmem:[#allocation37_spill] sm:$0xff]  ;;  %v20739_v40 = vand.u32 4294901760, %v17601_v36 }
 0x3f5   :  { %11267 = vmatpush3.msra.mxu0 %v20713_v13  ;;  %8697 = vmatmul.mubr.f32.vlgmr.msra.gmra.mxu1 %v20714_v6  ;;  %v20741_v6 = vand.u32 4294901760, %v17615_v7 }
 0x3f6   :  { %8571 = vmatmul.mubr.f32.gmra.mxu0 %v17575_v46  ;;  %11268 = vmatprep.subr.mxu0 %v20715_v23  ;;  %v10785_v32 = vpop.f32.mrf.mxu1  ;;  %v20743_v23 = vand.u32 4294901760, %v20688_v54 }
 0x3f7   :  { %11307 = vmatprep.subr.mxu1 %v20663_v39  ;;  %11269 = vmatpush3.msra.mxu0 %v20716_v49  ;;  %v10786_v0 = vadd.f32 %v10785_v32, %v10784_v59  ;;  %v20742_v59 = vand.u32 4294901760, %v20686_v55 }
 0x3f8   :  { %11308 = vmatpush3.msra.mxu1 %v20665_v43  ;;  %11270 = vmatprep.subr.mxu0 %v20717_v3  ;;  %v20720_v43 = vand.u32 4294901760, %v17507_v44  ;;  %v20748_v3 = vld [vmem:[#allocation32_spill] sm:$0xff] }
 0x3f9   :  { %11309 = vmatprep.subr.mxu1 %v20667_v48  ;;  %8577 = vmatprep.mubr.f32.mxu0 %v17601_v36  ;;  %v17786_v39 = vadd.f32 %v10786_v0, %v6760_v33  ;;  %v10787_v10 = vpop.f32.mrf.mxu1  ;;  %v20723_v33 = vand.u32 4294901760, %v20674_v61  ;;  %v20730_v61 = vld [vmem:[#allocation60_spill] sm:$0xff]  ;;  %v20749_v0 = vand.u32 4294901760, %v20748_v3 }
 0x3fa   :  { %8704 = vmatprep.mubr.f32.mxu1 %v20718_v58  ;;  %11271 = vmatpush3.msra.mxu0 %v20719_v21  ;;  %v20731_v50 = vand.u32 4294901760, %v20730_v61 }
 0x3fb   :  { %11310 = vmatpush3.msra.mxu1 %v20669_v22  ;;  %8580 = vmatmul.mubr.f32.gmra.mxu0 %v17615_v7  ;;  %v10788_v48 = vpop.f32.mrf.mxu1  ;;  %v20724_v22 = vld [vmem:[#allocation14_spill] sm:$0xff]  ;;  %v20747_v7 = vand.u32 4294901760, %v20725_v12 }
 0x3fc   :  { %8708 = vmatmul.mubr.f32.gmra.mxu1 %v20720_v43  ;;  %11272 = vmatprep.subr.mxu0 %v20721_v24  ;;  %v10789_v15 = vadd.f32 %v10788_v48, %v10787_v10  ;;  %v20753_v10 = vand.u32 4294901760, %v17452_v47  ;;  %v20754_v43 = vld [vmem:[#allocation66_spill] sm:$0xff] }
 0x3fd   :  { %11311 = vmatprep.subr.mxu1 %v20671_v35  ;;  %11273 = vmatpush3.msra.mxu0 %v20722_v8  ;;  %v20727_v35 = vand.u32 4294901760, %v20676_v16  ;;  %v20736_v16 = vld [vmem:[#allocation50_spill] sm:$0xff]  ;;  %v20755_v24 = vand.u32 4294901760, %v20754_v43 }
 0x3fe   :  { %11312 = vmatpush3.msra.mxu1 %v20673_v60  ;;  %11274 = vmatprep.subr.mxu0 %v20723_v33  ;;  %v17802_v44 = vadd.f32 %v10789_v15, %v6767_v42  ;;  %v20729_v60 = vand.u32 4294901760, %v17575_v46  ;;  %v20737_v30 = vand.u32 4294901760, %v20736_v16  ;;  %v20740_v42 = vand.u32 4294901760, %v20684_v17  ;;  %v20744_v17 = vld [vmem:[#allocation54_spill] sm:$0xff]  ;;  %v20761_v33 = vld [vmem:[#allocation27_spill] sm:$0xff] }
 0x3ff   :  { %11313 = vmatprep.subr.mxu1 %v20724_v22  ;;  %8586 = vmatprep.mubr.f32.mxu0 %v20725_v12  ;;  %v20745_v32 = vand.u32 4294901760, %v20744_v17  ;;  %v20756_v48 = vld [vmem:[#allocation70_spill] sm:$0xff] }
 0x400   :  { %8715 = vmatprep.mubr.f32.mxu1 %v20726_v57  ;;  %11275 = vmatpush3.msra.mxu0 %v20727_v35  ;;  %v20764_v57 = vld [vmem:[#allocation62_spill] sm:$0xff]  ;;  %v20765_v35 = vld [vmem:[#allocation17_spill] sm:$0xff] }
 0x401   :  { %11314 = vmatpush3.msra.mxu1 %v20677_v11  ;;  %8589 = vmatmul.mubr.f32.gmra.mxu0 %v20728_v1  ;;  %v10822_v63 = vpop.f32.mrf.mxu0  ;;  %v20738_v11 = vld [vmem:[#allocation77_spill] sm:$0xff] }
 0x402   :  { %8719 = vmatmul.mubr.f32.gmra.mxu1 %v20729_v60  ;;  %11276 = vmatprep.subr.mxu0 %v20731_v50  ;;  %v20767_v50 = vld [vmem:[#allocation11_spill] sm:$0xff] }
 0x403   :  { %11315 = vmatprep.subr.mxu1 %v20732_v37  ;;  %11277 = vmatpush3.msra.mxu0 %v20734_v62  ;;  %v10823_v46 = vpop.f32.mrf.mxu0  ;;  %v20770_v62 = vld [vmem:[#allocation57_spill] sm:$0xff] }
 0x404   :  { %11316 = vmatpush3.msra.mxu1 %v20735_v52  ;;  %11278 = vmatprep.subr.mxu0 %v20737_v30  ;;  %v10824_v13 = vadd.f32 %v10823_v46, %v10822_v63  ;;  %v20771_v52 = vld [vmem:[#allocation42_spill] sm:$0xff] }
 0x405   :  { %11317 = vmatprep.subr.mxu1 %v20738_v11  ;;  %8726 = vmatprep.mubr.f32.mxu1 %v20739_v40  ;;  %v20772_v40 = vld [vmem:[#allocation68_spill] sm:$0xff] }
 0x406   :  { %11279 = vmatpush3.msra.mxu0 %v20740_v42  ;;  %11318 = vmatpush3.msra.mxu1 %v20685_v56  ;;  %v7011_v36 = vadd.f32 %v10824_v13, %v17726_v29  ;;  %v10825_v49 = vpop.f32.mrf.mxu0  ;;  %v20746_v56 = vld [vmem:[#allocation55_spill] sm:$0xff]  ;;  %v20752_v29 = vand.u32 4294901760, %v17388_v20 }
 0x407   :  { %8730 = vmatmul.mubr.f32.gmra.mxu1 %v20741_v6  ;;  %11280 = vmatprep.subr.mxu0 %v20742_v59  ;;  %v20774_v59 = vld [vmem:[#allocation19_spill] sm:$0xff] }
 0x408   :  { %11319 = vmatprep.subr.mxu1 %v20687_v51  ;;  %11281 = vmatpush3.msra.mxu0 %v20743_v23  ;;  %v10826_v55 = vpop.f32.mrf.mxu0  ;;  %v20750_v51 = vand.u32 4294901760, %v20728_v1  ;;  %v20766_v1 = vand.u32 4294901760, %v20765_v35 }
 0x409   :  { %11320 = vmatpush3.msra.mxu1 %v20689_v26  ;;  %11282 = vmatprep.subr.mxu0 %v20745_v32  ;;  %v10827_v54 = vadd.f32 %v10826_v55, %v10825_v49  ;;  %v20751_v26 = vand.u32 4294901760, %v17419_v4  ;;  %v20776_v49 = vld [vmem:[#allocation63_spill] sm:$0xff] }
 0x40a   :  { %11321 = vmatprep.subr.mxu1 %v20746_v56  ;;  %8737 = vmatprep.mubr.f32.mxu1 %v20747_v7  ;;  %v20778_v7 = vld [vmem:[#allocation56_spill] sm:$0xff] }
 0x40b   :  { %11283 = vmatpush3.msra.mxu0 %v20749_v0  ;;  %11322 = vmatpush3.msra.mxu1 %v20691_v18  ;;  %v7026_v58 = vadd.f32 %v10827_v54, %v17748_v19 }
 0x40c   :  { %8741 = vmatmul.mubr.f32.gmra.mxu1 %v20750_v51  ;;  %11284 = vmatprep.subr.mxu0 %v20751_v26  ;;  %v10869_v21 = vpop.f32.mrf.mxu1 }
 0x40d   :  { %11323 = vmatprep.subr.mxu1 %v20692_v28  ;;  %11285 = vmatpush3.msra.mxu0 %v20752_v29  ;;  %v10828_v18 = vpop.f32.mrf.mxu0  ;;  %v20757_v28 = vld [vmem:[#allocation12_spill] sm:$0xff] }
 0x40e   :  { %11324 = vmatpush3.msra.mxu1 %v20693_v38  ;;  %11286 = vmatprep.subr.mxu0 %v20753_v10  ;;  %v10870_v4 = vpop.f32.mrf.mxu1  ;;  %v20758_v20 = vand.u32 4294901760, %v20757_v28  ;;  %v20759_v38 = vld [vmem:[#allocation15_spill] sm:$0xff] }
 0x40f   :  { %11325 = vmatprep.subr.mxu1 %v20694_v27  ;;  %11287 = vmatpush3.msra.mxu0 %v20755_v24  ;;  %v10829_v8 = vpop.f32.mrf.mxu0  ;;  %v10871_v19 = vadd.f32 %v10870_v4, %v10869_v21  ;;  %v20760_v15 = vand.u32 4294901760, %v20759_v38  ;;  %v20762_v27 = vld [vmem:[#allocation51_spill] sm:$0xff] }
 0x410   :  { %11326 = vmatpush3.msra.mxu1 %v20756_v48  ;;  %11288 = vmatprep.subr.mxu0 %v20758_v20  ;;  %v10830_v47 = vadd.f32 %v10829_v8, %v10828_v18  ;;  %v20763_v22 = vand.u32 4294901760, %v20762_v27 }
 0x411   :  { %11327 = vmatprep.subr.mxu1 %v17269_v45  ;;  %11289 = vmatpush3.msra.mxu0 %v20760_v15  ;;  %v7303_v12 = vadd.f32 %v10871_v19, %v7011_v36  ;;  %v20768_v45 = vld [vmem:[#allocation34_spill] sm:$0xff] }
 0x412   :  { %11328 = vmatpush3.msra.mxu1 %v20761_v33  ;;  %11290 = vmatprep.subr.mxu0 %v20763_v22  ;;  %v7041_v60 = vadd.f32 %v10830_v47, %v17769_v5  ;;  %v10831_v61 = vpop.f32.mrf.mxu0 }
 0x413   :  { %11329 = vmatprep.subr.mxu1 %v20764_v57  ;;  %11291 = vmatpush3.msra.mxu0 %v20766_v1  ;;  %v10872_v37 = vpop.f32.mrf.mxu1 }
 0x414   :  { %8907 = vmatprep.mubr.f32.mxu0 %v20767_v50  ;;  %11330 = vmatpush3.msra.mxu1 %v20768_v45  ;;  %v10832_v63 = vpop.f32.mrf.mxu0 }
 0x415   :  { %8909 = vmatmul.mubr.f32.vlgmr.msra.gmra.mxu0 %v20769_v34  ;;  %11331 = vmatprep.subr.mxu1 %v20770_v62  ;;  %v10833_v16 = vadd.f32 %v10832_v63, %v10831_v61  ;;  %v10873_v30 = vpop.f32.mrf.mxu1 }
 0x416   :  { %11332 = vmatpush3.msra.mxu1 %v20700_v9  ;;  %8914 = vmatprep.mubr.f32.mxu0 %v20771_v52  ;;  %v10874_v5 = vadd.f32 %v10873_v30, %v10872_v37  ;;  %v20773_v9 = vld [vmem:[#allocation40_spill] sm:$0xff] }
 0x417   :  { %11333 = vmatprep.subr.mxu1 %v20702_v31  ;;  %9039 = vmatprep.mubr.f32.mxu1 %v20767_v50  ;;  %v7056_v11 = vadd.f32 %v10833_v16, %v17786_v39 }
 0x418   :  { %11334 = vmatpush3.msra.mxu1 %v20704_v41  ;;  %v7310_v46 = vadd.f32 %v10874_v5, %v7026_v58  ;;  %v10834_v42 = vpop.f32.mrf.mxu0 }
 0x419   :  { %8916 = vmatmul.mubr.f32.gmra.mxu0 %v20772_v40  ;;  %11335 = vmatprep.subr.mxu1 %v20706_v2  ;;  %v10875_v13 = vpop.f32.mrf.mxu1  ;;  %v20775_v2 = vld [vmem:[#allocation20_spill] sm:$0xff] }
 0x41a   :  { %11336 = vmatpush3.msra.mxu1 %v17415_v14  ;;  %8921 = vmatprep.mubr.f32.mxu0 %v20773_v9  ;;  %v10835_v31 = vpop.f32.mrf.mxu0 }
 0x41b   :  { %11337 = vmatprep.subr.mxu1 %v17439_v25  ;;  %v10836_v6 = vadd.f32 %v10835_v31, %v10834_v42  ;;  %v10876_v41 = vpop.f32.mrf.mxu1 }
 0x41c   :  { %11338 = vmatpush3.msra.mxu1 %v20711_v53  ;;  %v10877_v39 = vadd.f32 %v10876_v41, %v10875_v13  ;;  %v20777_v53 = vld [vmem:[#allocation75_spill] sm:$0xff] }
 0x41d   :  { %8923 = vmatmul.mubr.f32.gmra.mxu0 %v20774_v59  ;;  %9041 = vmatmul.mubr.f32.vlgmr.msra.gmra.mxu1 %v20769_v34  ;;  %v7071_v14 = vadd.f32 %v10836_v6, %v17802_v44 }
 0x41e   :  { %8928 = vmatprep.mubr.f32.mxu0 %v20775_v2  ;;  %9046 = vmatprep.mubr.f32.mxu1 %v20771_v52  ;;  %v7317_v23 = vadd.f32 %v10877_v39, %v7041_v60  ;;  %v10878_v36 = vpop.f32.mrf.mxu1 }
 0x420   :  { %v10879_v25 = vpop.f32.mrf.mxu1 }
 0x421   :  { %8930 = vmatmul.mubr.f32.gmra.mxu0 %v20776_v49  ;;  %9048 = vmatmul.mubr.f32.gmra.mxu1 %v20772_v40  ;;  %v10880_v17 = vadd.f32 %v10879_v25, %v10878_v36 }
 0x422   :  { %8935 = vmatprep.mubr.f32.mxu0 %v20777_v53  ;;  %9053 = vmatprep.mubr.f32.mxu1 %v20773_v9 }
 0x423   :  { %v7324_v32 = vadd.f32 %v10880_v17, %v7056_v11  ;;  %v10881_v56 = vpop.f32.mrf.mxu1 }
 0x425   :  { %8937 = vmatmul.mubr.f32.gmra.mxu0 %v20778_v7  ;;  %9055 = vmatmul.mubr.f32.gmra.mxu1 %v20774_v59  ;;  %v10882_v44 = vpop.f32.mrf.mxu1 }
 0x426   :  { %9060 = vmatprep.mubr.f32.mxu1 %v20775_v2  ;;  %v10883_v55 = vadd.f32 %v10882_v44, %v10881_v56 }
 0x428   :  { %v7331_v3 = vadd.f32 %v10883_v55, %v7071_v14 }
 0x429   :  { %9062 = vmatmul.mubr.f32.gmra.mxu1 %v20776_v49 }
 0x42a   :  { %9067 = vmatprep.mubr.f32.mxu1 %v20777_v53 }
 0x42c   :  { %v10916_v0 = vpop.f32.mrf.mxu0 }
 0x42d   :  { %9069 = vmatmul.mubr.f32.gmra.mxu1 %v20778_v7 }
 0x42e   :  { %v10917_v54 = vpop.f32.mrf.mxu0 }
 0x42f   :  { %v10918_v51 = vadd.f32 %v10917_v54, %v10916_v0 }
 0x431   :  { %v7469_v26 = vadd.f32 %v10918_v51, %v7303_v12  ;;  %v10919_v29 = vpop.f32.mrf.mxu0 }
 0x433   :  { %v10920_v58 = vpop.f32.mrf.mxu0 }
 0x434   :  { %v10921_v21 = vadd.f32 %v10920_v58, %v10919_v29 }
 0x436   :  { %v7478_v10 = vadd.f32 %v10921_v21, %v7310_v46  ;;  %v10963_v18 = vpop.f32.mrf.mxu1 }
 0x437   :  { %v10922_v43 = vpop.f32.mrf.mxu0 }
 0x438   :  { %v10964_v24 = vpop.f32.mrf.mxu1 }
 0x439   :  { %v10923_v4 = vpop.f32.mrf.mxu0  ;;  %v10965_v48 = vadd.f32 %v10964_v24, %v10963_v18 }
 0x43a   :  { %v10924_v28 = vadd.f32 %v10923_v4, %v10922_v43 }
 0x43b   :  { %v17901_v20 = vadd.f32 %v10965_v48, %v7469_v26 }
 0x43c   :  { %v7487_v8 = vadd.f32 %v10924_v28, %v7317_v23  ;;  %v10925_v19 = vpop.f32.mrf.mxu0 }
 0x43d   :  { %v10966_v38 = vpop.f32.mrf.mxu1 }
 0x43e   :  { %v10926_v15 = vpop.f32.mrf.mxu0 }
 0x43f   :  { %v10927_v47 = vadd.f32 %v10926_v15, %v10925_v19  ;;  %v10967_v33 = vpop.f32.mrf.mxu1 }
 0x440   :  { %v10968_v27 = vadd.f32 %v10967_v33, %v10966_v38 }
 0x441   :  { %v7496_v22 = vadd.f32 %v10927_v47, %v7324_v32 }
 0x442   :  { %v17903_v12 = vadd.f32 %v10968_v27, %v7478_v10  ;;  %v10928_v57 = vpop.f32.mrf.mxu0 }
 0x443   :  { %v10969_v35 = vpop.f32.mrf.mxu1 }
 0x444   :  { %v10929_v1 = vpop.f32.mrf.mxu0 }
 0x445   :  { %v10930_v60 = vadd.f32 %v10929_v1, %v10928_v57  ;;  %v10970_v61 = vpop.f32.mrf.mxu1 }
 0x446   :  { %v10971_v50 = vadd.f32 %v10970_v61, %v10969_v35 }
 0x447   :  { %v7505_v45 = vadd.f32 %v10930_v60, %v7331_v3 }
 0x448   :  { %v17905_v37 = vadd.f32 %v10971_v50, %v7487_v8  ;;  %v10972_v34 = vpop.f32.mrf.mxu1 }
 0x44a   :  { %v10973_v62 = vpop.f32.mrf.mxu1 }
 0x44b   :  { %v10974_v63 = vadd.f32 %v10973_v62, %v10972_v34 }
 0x44d   :  { %v17907_v52 = vadd.f32 %v10974_v63, %v7496_v22  ;;  %v10975_v16 = vpop.f32.mrf.mxu1 }
 0x44f   :  { %v10976_v30 = vpop.f32.mrf.mxu1 }
 0x450   :  { %v10977_v5 = vadd.f32 %v10976_v30, %v10975_v16 }
 0x452   :  { %v17909_v11 = vadd.f32 %v10977_v5, %v7505_v45 }
 0x454   :  { %20779 = vst [vmem:[#allocation29_spill] sm:$0xff] %v17909_v11 }
 0x456   :  { %v11010_v40 = vpop.f32.mrf.mxu0 }
 0x458   :  { %v11011_v46 = vpop.f32.mrf.mxu0 }
 0x459   :  { %v11012_v16 = vadd.f32 %v11011_v46, %v11010_v40 }
 0x45b   :  { %v11013_v42 = vpop.f32.mrf.mxu0 }
 0x45d   :  { %v11014_v13 = vpop.f32.mrf.mxu0 }
 0x45e   :  { %v11015_v5 = vadd.f32 %v11014_v13, %v11013_v42 }
 0x460   :  { %v11057_v9 = vpop.f32.mrf.mxu1 }
 0x461   :  { %v11016_v6 = vpop.f32.mrf.mxu0 }
 0x462   :  { %v11058_v31 = vpop.f32.mrf.mxu1 }
 0x463   :  { %v11017_v59 = vpop.f32.mrf.mxu0  ;;  %v11059_v30 = vadd.f32 %v11058_v31, %v11057_v9 }
 0x466   :  { %v17911_v2 = vpop.f32.mrf.mxu0 }
 0x467   :  { %v11060_v41 = vpop.f32.mrf.mxu1 }
 0x468   :  { %v17915_v23 = vpop.f32.mrf.mxu0 }
 0x469   :  { %v11061_v39 = vpop.f32.mrf.mxu1 }
 0x46c   :  { %v17917_v49 = vpop.f32.mrf.mxu0 }
 0x46e   :  { %v17913_v14 = vpop.f32.mrf.mxu1  ;;  %v17921_v53 = vpop.f32.mrf.mxu0 }
 0x470   :  { %v11064_v36 = vpop.f32.mrf.mxu1 }
 0x471   :  { %v11065_v13 = vadd.f32 %v11064_v36, %v17913_v14 }
 0x473   :  { %v17919_v25 = vpop.f32.mrf.mxu1 }
 0x475   :  { %v17923_v17 = vpop.f32.mrf.mxu1 }
 0x476   :  { %v11068_v14 = vadd.f32 %v17923_v17, %v17919_v25 }
 0x478   :  { %v17925_v56 = vpop.f32.mrf.mxu1 }
 0x47a   :  { %v17927_v44 = vpop.f32.mrf.mxu1 }
 0x47b   :  { %20780 = vst [vmem:[#allocation31_spill] sm:$0xff] %v17927_v44 }
 0x480   :  { %v11104_v32 = vpop.f32.mrf.mxu0 }
 0x482   :  { %v11105_v7 = vpop.f32.mrf.mxu0 }
 0x485   :  { %v11107_v55 = vpop.f32.mrf.mxu0 }
 0x487   :  { %v11108_v0 = vpop.f32.mrf.mxu0 }
 0x48b   :  { %v11151_v3 = vpop.f32.mrf.mxu1 }
 0x48c   :  { %v11110_v51 = vpop.f32.mrf.mxu0 }
 0x48d   :  { %v11152_v54 = vpop.f32.mrf.mxu1 }
 0x48e   :  { %v11111_v29 = vpop.f32.mrf.mxu0 }
 0x491   :  { %v17929_v21 = vpop.f32.mrf.mxu0 }
 0x492   :  { %v11154_v26 = vpop.f32.mrf.mxu1 }
 0x493   :  { %v17933_v18 = vpop.f32.mrf.mxu0 }
 0x494   :  { %v11155_v58 = vpop.f32.mrf.mxu1 }
 0x495   :  { %v11156_v31 = vadd.f32 %v11155_v58, %v11154_v26 }
 0x497   :  { %v17935_v24 = vpop.f32.mrf.mxu0 }
 0x498   :  { %v17931_v10 = vpop.f32.mrf.mxu1  ;;  %20781 = vst [vmem:[#allocation43_spill] sm:$0xff] %v17935_v24  ;;  %v11106_v24 = vadd.f32 %v11105_v7, %v11104_v32 }
 0x499   :  { %v17939_v48 = vpop.f32.mrf.mxu0 }
 0x49a   :  { %v11158_v43 = vpop.f32.mrf.mxu1  ;;  %20783 = vst [vmem:[#allocation26_spill] sm:$0xff] %v17939_v48  ;;  %v7825_v48 = vadd.f32 %v11012_v16, %v17901_v20  ;;  %v11021_v20 = vadd.f32 %v17915_v23, %v17911_v2 }
 0x49b   :  { %v11159_v23 = vadd.f32 %v11158_v43, %v17931_v10 }
 0x49c   :  { %v7846_v2 = vadd.f32 %v11021_v20, %v17907_v52  ;;  %v20792_v52 = vld [vmem:[#allocation31_spill] sm:$0xff] }
 0x49d   :  { %v17937_v4 = vpop.f32.mrf.mxu1  ;;  %v11071_v10 = vadd.f32 %v20792_v52, %v17925_v56 }
 0x49e   :  { %20782 = vst [vmem:[#allocation49_spill] sm:$0xff] %v17937_v4  ;;  %v11018_v4 = vadd.f32 %v11017_v59, %v11016_v6  ;;  %v11112_v6 = vadd.f32 %v11111_v29, %v11110_v51  ;;  %v11024_v51 = vadd.f32 %v17921_v53, %v17917_v49 }
 0x49f   :  { %v17941_v28 = vpop.f32.mrf.mxu1 }
 0x4a0   :  { %20784 = vst [vmem:[#allocation58_spill] sm:$0xff] %v17941_v28  ;;  %v11153_v28 = vadd.f32 %v11152_v54, %v11151_v3  ;;  %v7839_v32 = vadd.f32 %v11018_v4, %v17905_v37 }
 0x4a2   :  { %v17943_v19 = vpop.f32.mrf.mxu1  ;;  %v7971_v54 = vadd.f32 %v11065_v13, %v7839_v32 }
 0x4a3   :  { %20785 = vst [vmem:[#allocation47_spill] sm:$0xff] %v17943_v19 }
 0x4a4   :  { %v17945_v15 = vpop.f32.mrf.mxu1  ;;  %v8127_v29 = vadd.f32 %v11112_v6, %v7971_v54 }
 0x4a5   :  { %20786 = vst [vmem:[#allocation16_spill] sm:$0xff] %v17945_v15  ;;  %v20793_v43 = vld [vmem:[#allocation49_spill] sm:$0xff] }
 0x4a6   :  { %v8403_v53 = vadd.f32 %v11159_v23, %v8127_v29 }
 0x4ab   :  { %v11198_v8 = vpop.f32.mrf.mxu0 }
 0x4ad   :  { %v11199_v38 = vpop.f32.mrf.mxu0 }
 0x4ae   :  { %v11200_v42 = vadd.f32 %v11199_v38, %v11198_v8 }
 0x4b0   :  { %v11201_v47 = vpop.f32.mrf.mxu0 }
 0x4b2   :  { %v11202_v27 = vpop.f32.mrf.mxu0 }
 0x4b3   :  { %v11203_v59 = vadd.f32 %v11202_v27, %v11201_v47  ;;  %v7978_v47 = vadd.f32 %v11068_v14, %v7846_v2 }
 0x4b5   :  { %v11245_v33 = vpop.f32.mrf.mxu1 }
 0x4b6   :  { %v11204_v57 = vpop.f32.mrf.mxu0 }
 0x4b7   :  { %v11246_v22 = vpop.f32.mrf.mxu1 }
 0x4b8   :  { %v11205_v1 = vpop.f32.mrf.mxu0 }
 0x4b9   :  { %v11206_v25 = vadd.f32 %v11205_v1, %v11204_v57  ;;  %v20797_v1 = vld [vmem:[#allocation43_spill] sm:$0xff] }
 0x4bb   :  { %v17947_v61 = vpop.f32.mrf.mxu0 }
 0x4bc   :  { %v11248_v35 = vpop.f32.mrf.mxu1  ;;  %20787 = vst [vmem:[#allocation22_spill] sm:$0xff] %v17947_v61  ;;  %v11062_v61 = vadd.f32 %v11061_v39, %v11060_v41  ;;  %v11247_v39 = vadd.f32 %v11246_v22, %v11245_v33  ;;  %v20794_v33 = vld [vmem:[#allocation58_spill] sm:$0xff] }
 0x4bd   :  { %v17951_v45 = vpop.f32.mrf.mxu0  ;;  %v11162_v27 = vadd.f32 %v20794_v33, %v20793_v43 }
 0x4be   :  { %v11249_v60 = vpop.f32.mrf.mxu1  ;;  %20789 = vst [vmem:[#allocation13_spill] sm:$0xff] %v17951_v45  ;;  %v7832_v45 = vadd.f32 %v11015_v5, %v17903_v12 }
 0x4c0   :  { %v7964_v9 = vadd.f32 %v11062_v61, %v7832_v45  ;;  %v20796_v61 = vld [vmem:[#allocation29_spill] sm:$0xff] }
 0x4c1   :  { %v17953_v62 = vpop.f32.mrf.mxu0 }
 0x4c2   :  { %v17949_v50 = vpop.f32.mrf.mxu1  ;;  %20790 = vst [vmem:[#allocation23_spill] sm:$0xff] %v17953_v62  ;;  %v11109_v62 = vadd.f32 %v11108_v0, %v11107_v55 }
 0x4c3   :  { %20788 = vst [vmem:[#allocation35_spill] sm:$0xff] %v17949_v50  ;;  %v17957_v15 = vpop.f32.mrf.mxu0  ;;  %v7957_v50 = vadd.f32 %v11059_v30, %v7825_v48 }
 0x4c4   :  { %v11252_v34 = vpop.f32.mrf.mxu1  ;;  %20791 = vst [vmem:[#allocation72_spill] sm:$0xff] %v17957_v15  ;;  %v8112_v12 = vadd.f32 %v11109_v62, %v7964_v9  ;;  %v20799_v62 = vld [vmem:[#allocation22_spill] sm:$0xff] }
 0x4c5   :  { %v8097_v46 = vadd.f32 %v11106_v24, %v7957_v50  ;;  %v11250_v24 = vadd.f32 %v11249_v60, %v11248_v35  ;;  %v7853_v50 = vadd.f32 %v11024_v51, %v20796_v61  ;;  %v20800_v16 = vld [vmem:[#allocation13_spill] sm:$0xff] }
 0x4c6   :  { %v8396_v36 = vadd.f32 %v11156_v31, %v8112_v12  ;;  %v11209_v30 = vadd.f32 %v20800_v16, %v20799_v62 }
 0x4c7   :  { %v17955_v63 = vpop.f32.mrf.mxu1  ;;  %v8389_v41 = vadd.f32 %v11153_v28, %v8097_v46  ;;  %v7985_v13 = vadd.f32 %v11071_v10, %v7853_v50 }
 0x4c8   :  { %v8564_v4 = vadd.f32 %v11203_v59, %v8396_v36 }
 0x4c9   :  { %v17959_v19 = vpop.f32.mrf.mxu1  ;;  %v8555_v3 = vadd.f32 %v11200_v42, %v8389_v41  ;;  %v20801_v41 = vld [vmem:[#allocation47_spill] sm:$0xff] }
 0x4ca   :  { %v8710_v35 = vadd.f32 %v11250_v24, %v8564_v4  ;;  %v20795_v60 = vld [vmem:[#allocation35_spill] sm:$0xff]  ;;  %v11256_v6 = vadd.f32 %v17959_v19, %v17955_v63 }
 0x4cb   :  { %v8699_v37 = vadd.f32 %v11247_v39, %v8555_v3  ;;  %v20802_v39 = vld [vmem:[#allocation16_spill] sm:$0xff]  ;;  %v20803_v54 = vld [vmem:[#allocation23_spill] sm:$0xff] }
 0x4cc   :  { %v17963_v44 = vpop.f32.mrf.mxu1  ;;  %v11165_v32 = vadd.f32 %v20802_v39, %v20801_v41  ;;  %v20804_v14 = vld [vmem:[#allocation72_spill] sm:$0xff] }
 0x4cd   :  { %v11212_v36 = vadd.f32 %v20804_v14, %v20803_v54 }
 0x4ce   :  { %v17969_v7 = vpop.f32.mrf.mxu1 }
 0x4cf   :  { %v11259_v29 = vadd.f32 %v17969_v7, %v17963_v44 }
 0x4d5   :  { %v11292_v11 = vpop.f32.mrf.mxu0 }
 0x4d7   :  { %v11293_v40 = vpop.f32.mrf.mxu0 }
 0x4d8   :  { %v11294_v0 = vadd.f32 %v11293_v40, %v11292_v11  ;;  %v11115_v11 = vadd.f32 %v17933_v18, %v17929_v21  ;;  %v11253_v21 = vadd.f32 %v11252_v34, %v20795_v60  ;;  %v8573_v40 = vadd.f32 %v11206_v25, %v8403_v53 }
 0x4d9   :  { %v11295_v15 = vpop.f32.mrf.mxu0 }
 0x4da   :  { %v8911_v17 = vadd.f32 %v11294_v0, %v8699_v37  ;;  %v8142_v57 = vadd.f32 %v11115_v11, %v7978_v47  ;;  %v8721_v12 = vadd.f32 %v11253_v21, %v8573_v40 }
 0x4db   :  { %v11296_v55 = vpop.f32.mrf.mxu0 }
 0x4dc   :  { %v11297_v8 = vadd.f32 %v11296_v55, %v11295_v15  ;;  %v20798_v15 = vld [vmem:[#allocation26_spill] sm:$0xff]  ;;  %v8410_v31 = vadd.f32 %v11162_v27, %v8142_v57 }
 0x4dd   :  { %v11298_v26 = vpop.f32.mrf.mxu0  ;;  %v11339_v58 = vpop.f32.mrf.mxu1  ;;  %v11118_v45 = vadd.f32 %v20798_v15, %v20797_v1 }
 0x4de   :  { %v8918_v46 = vadd.f32 %v11297_v8, %v8710_v35  ;;  %v8582_v3 = vadd.f32 %v11209_v30, %v8410_v31 }
 0x4df   :  { %v11299_v48 = vpop.f32.mrf.mxu0  ;;  %v11340_v28 = vpop.f32.mrf.mxu1  ;;  %v8157_v55 = vadd.f32 %v11118_v45, %v7985_v13 }
 0x4e0   :  { %v11341_v38 = vadd.f32 %v11340_v28, %v11339_v58  ;;  %v11300_v42 = vadd.f32 %v11299_v48, %v11298_v26  ;;  %v8732_v51 = vadd.f32 %v11256_v6, %v8582_v3 }
 0x4e1   :  { %v11301_v22 = vpop.f32.mrf.mxu0  ;;  %v11342_v49 = vpop.f32.mrf.mxu1  ;;  %v8417_v24 = vadd.f32 %v11165_v32, %v8157_v55 }
 0x4e2   :  { %v9043_v18 = vadd.f32 %v11341_v38, %v8911_v17  ;;  %v8925_v26 = vadd.f32 %v11300_v42, %v8721_v12 }
 0x4e3   :  { %v11302_v56 = vpop.f32.mrf.mxu0  ;;  %v11343_v5 = vpop.f32.mrf.mxu1  ;;  %v8591_v63 = vadd.f32 %v11212_v36, %v8417_v24 }
 0x4e4   :  { %9074 = vst [vmem:[#allocation7] sm:$0xff] %v9043_v18  ;;  %v11344_v9 = vadd.f32 %v11343_v5, %v11342_v49  ;;  %v11303_v58 = vadd.f32 %v11302_v56, %v11301_v22 }
 0x4e5   :  { %v11304_v34 = vpop.f32.mrf.mxu0  ;;  %v11345_v20 = vpop.f32.mrf.mxu1  ;;  %v8743_v17 = vadd.f32 %v11259_v29, %v8591_v63 }
 0x4e6   :  { %v9050_v59 = vadd.f32 %v11344_v9, %v8918_v46  ;;  %v8932_v4 = vadd.f32 %v11303_v58, %v8732_v51 }
 0x4e7   :  { %v11346_v0 = vpop.f32.mrf.mxu1  ;;  %v11305_v23 = vpop.f32.mrf.mxu0 }
 0x4e8   :  { %9075 = vst [vmem:[#allocation7 + $0x8] sm:$0xff] %v9050_v59  ;;  %v11347_v2 = vadd.f32 %v11346_v0, %v11345_v20  ;;  %v11306_v48 = vadd.f32 %v11305_v23, %v11304_v34 }
 0x4e9   :  { %v11348_v37 = vpop.f32.mrf.mxu1 }
 0x4ea   :  { %v9057_v11 = vadd.f32 %v11347_v2, %v8925_v26  ;;  %v8939_v47 = vadd.f32 %v11306_v48, %v8743_v17 }
 0x4eb   :  { %v11349_v19 = vpop.f32.mrf.mxu1 }
 0x4ec   :  { %9076 = vst [vmem:[#allocation7 + $0x10] sm:$0xff] %v9057_v11  ;;  %v11350_v28 = vadd.f32 %v11349_v19, %v11348_v37 }
 0x4ed   :  { %v11351_v25 = vpop.f32.mrf.mxu1 }
 0x4ee   :  { %v9064_v8 = vadd.f32 %v11350_v28, %v8932_v4 }
 0x4ef   :  { %v11352_v38 = vpop.f32.mrf.mxu1 }
 0x4f0   :  { %9077 = vst [vmem:[#allocation7 + $0x18] sm:$0xff] %v9064_v8  ;;  %v11353_v52 = vadd.f32 %v11352_v38, %v11351_v25 }
 0x4f2   :  { %v9071_v10 = vadd.f32 %v11353_v52, %v8939_v47 }
 0x4f4   :  { %9078 = vst [vmem:[#allocation7 + $0x20] sm:$0xff] %v9071_v10 }
 0x4f5   :  { %11411 = shalt.err (!%p11408_p0)
}
 0x4f6   :  { %9090 = dma.vmem_to_hbm [thread:$0]  %s9085_s25, 640, %s18006_s3, [#allocation4], %s11428_s16, %s11428_s16, %s11430_s22  }
 0x4f7   :  { %11424 = dma.done.wait [#allocation4], 640  }
 0x4f8   :  { %11425 = vsyncadd [#allocation4], 4294966656 }
 0x4f9   :  { %9094 = vsyncpa [#allocation3], 1 }
 0x4fa   :  { %9095 = vsyncpa [#allocation6], 1 }
 0x4fb   :  { %9096 = vsyncpa [#allocation4], 1 }

</bundles_post_ra>
